<compile_context>
chip_gen: v6e
topology: v6e:2x2x1
jax: 0.10.0
libtpu: 0.0.40
codegen_flags: <defaults>
</compile_context>

<pallas_src>
import math

import numpy as np
import jax
import jax.numpy as jnp
from jax import lax
from jax.experimental import pallas as pl
from jax.experimental.pallas import tpu as pltpu


# -----------------------------------------------------------------------------
# In-kernel helpers (pure jnp on register values; all maps are (rows, channels))
# -----------------------------------------------------------------------------
def _shift_down(x, k):
    """y[n] = x[n - k] for n >= k, else 0  (k > 0, along the sublane/row axis)."""
    return jnp.concatenate(
        [jnp.zeros((k,) + x.shape[1:], x.dtype), x[: x.shape[0] - k]], axis=0)


def _shift_up(x, k):
    """y[n] = x[n + k] for n < rows - k, else 0."""
    return jnp.concatenate(
        [x[k:], jnp.zeros((k,) + x.shape[1:], x.dtype)], axis=0)


def _dw3x3_stride2(quads, w, Wo, mask_l):
    """Depthwise 3x3 / stride-2 / pad-1 fold from the 4 parity quadrants of the input.

    quads = [Q00, Q01, Q10, Q11] with Qpq[a*Wo + b] = in[2a+p, 2b+q], each (Ho*Wo, C).
    w = (9, C) depthwise weights (row kh*3+kw).  mask_l = (Ho*Wo, 1) "output col >= 1".
    Returns the (Ho*Wo, C) f32 fold, output rows in row-major (i, j) order.
    """
    q00, q01, q10, q11 = quads
    acc = q00 * w[4:5]                                              # ( 0,  0)
    acc = acc + q01 * w[5:6]                                        # ( 0, +1)
    acc = acc + q10 * w[7:8]                                        # (+1,  0)
    acc = acc + q11 * w[8:9]                                        # (+1, +1)
    acc = acc + _shift_down(q10, Wo) * w[1:2]                       # (-1,  0)
    acc = acc + _shift_down(q11, Wo) * w[2:3]                       # (-1, +1)
    acc = acc + jnp.where(mask_l, _shift_down(q01, 1), 0) * w[3:4]  # ( 0, -1)
    acc = acc + jnp.where(mask_l, _shift_down(q11, 1), 0) * w[6:7]  # (+1, -1)
    acc = acc + jnp.where(mask_l, _shift_down(q11, Wo + 1), 0) * w[0:1]  # (-1, -1)
    return acc


def _dw3x3_stride1(h, w, W, mask_l, mask_r):
    """Depthwise 3x3 / stride-1 / pad-1 on a flattened (H*W, C) map (row-major)."""
    acc = h * w[4:5]
    acc = acc + jnp.where(mask_l, _shift_down(h, 1), 0) * w[3:4]
    acc = acc + jnp.where(mask_r, _shift_up(h, 1), 0) * w[5:6]
    acc = acc + _shift_down(h, W) * w[1:2]
    acc = acc + _shift_up(h, W) * w[7:8]
    acc = acc + jnp.where(mask_l, _shift_down(h, W + 1), 0) * w[0:1]
    acc = acc + jnp.where(mask_r, _shift_down(h, W - 1), 0) * w[2:3]
    acc = acc + jnp.where(mask_l, _shift_up(h, W - 1), 0) * w[6:7]
    acc = acc + jnp.where(mask_r, _shift_up(h, W + 1), 0) * w[8:9]
    return acc


# -----------------------------------------------------------------------------
# Fused kernel: whole AnalogResNetAttention2 forward for one batch element
# -----------------------------------------------------------------------------
def _make_fused_kernel(H):
    W = H
    Ho, Wo = H // 2, W // 2            # 8, 8   attention / scala1 output map
    P1 = Ho * Wo                       # 64
    Ho2, Wo2 = Ho // 2, Wo // 2        # 4, 4   scala2 output map
    P2 = Ho2 * Wo2                     # 16

    def kernel(x2q_ref,
               a_dw1, a_pw1, a_s1, a_b1, a_dw2, a_pw2, a_s2, a_b2, a_sa, a_ba,
               uq_ref,
               c_dw1, c_pw1, c_s1, c_b1, c_dw2, c_pw2, c_s2, c_b2,
               perm_ref,
               d_dw1, d_pw1, d_s1, d_b1, d_dw2, d_pw2, d_s2, d_b2,
               fcw_ref, fcb_ref,
               out_ref, feat_ref,
               fea_scr):
        f32, bf16 = jnp.float32, jnp.bfloat16

        # column-wrap masks, hoisted once per map size and shared by all taps
        col1 = lax.broadcasted_iota(jnp.int32, (P1, 1), 0) % Wo
        ml1, mr1 = col1 >= 1, col1 <= Wo - 2
        col2 = lax.broadcasted_iota(jnp.int32, (P2, 1), 0) % Wo2
        ml2, mr2 = col2 >= 1, col2 <= Wo2 - 2

        # ---------- attention: AnalogSepConv(C -> C), input 16x16 (quadrant order) ---
        quads = [x2q_ref[i * P1:(i + 1) * P1, :] for i in range(4)]   # bf16
        acc = _dw3x3_stride2(quads, a_dw1[...], Wo, ml1)
        h = jnp.dot(acc.astype(bf16), a_pw1[...], preferred_element_type=f32)
        h = jnp.maximum(h * a_s1[...] + a_b1[...], 0.0)
        acc = _dw3x3_stride1(h, a_dw2[...], Wo, ml1, mr1)
        y = jnp.dot(acc.astype(bf16), a_pw2[...], preferred_element_type=f32)
        y = jnp.maximum(y * a_s2[...] + a_b2[...], 0.0)
        # attention tail (module level): BatchNorm -> ReLU
        y = jnp.maximum(y * a_sa[...] + a_ba[...], 0.0)
        yb = y.astype(bf16)

        # bilinear 2x upsample (rows pre-ordered in quadrant order) -> sigmoid ->
        # gate * x2; processed one 64-row quadrant at a time to bound vreg pressure.
        for i in range(4):
            up = jnp.dot(uq_ref[i * P1:(i + 1) * P1, :], yb,
                         preferred_element_type=f32)                  # (P1, C)
            gate = pl.reciprocal(1.0 + jnp.exp(-up), approx=True)     # sigmoid (EUP)
            fea_scr[i * P1:(i + 1) * P1, :] = (
                x2q_ref[i * P1:(i + 1) * P1, :].astype(f32) * gate)

        # ---------- scala[0]: AnalogSepConv(C -> 2C), input 16x16 fea (quad order) ---
        quads = [fea_scr[i * P1:(i + 1) * P1, :] for i in range(4)]
        acc = _dw3x3_stride2(quads, c_dw1[...], Wo, ml1)
        h = jnp.dot(acc.astype(bf16), c_pw1[...], preferred_element_type=f32)
        h = jnp.maximum(h * c_s1[...] + c_b1[...], 0.0)
        acc = _dw3x3_stride1(h, c_dw2[...], Wo, ml1, mr1)
        # fold the row-major -> quadrant-order row permutation of the 8x8 map into the
        # MXU path (exact: 0/1 matrix applied to the already-bf16-rounded activations)
        accq = jnp.dot(perm_ref[...], acc.astype(bf16), preferred_element_type=f32)
        s1 = jnp.dot(accq.astype(bf16), c_pw2[...], preferred_element_type=f32)
        s1 = jnp.maximum(s1 * c_s2[...] + c_b2[...], 0.0)             # (P1, 2C)

        # ---------- scala[1]: AnalogSepConv(2C -> 4C), input 8x8 (quad order) --------
        quads = [s1[i * P2:(i + 1) * P2, :] for i in range(4)]
        acc = _dw3x3_stride2(quads, d_dw1[...], Wo2, ml2)
        h = jnp.dot(acc.astype(bf16), d_pw1[...], preferred_element_type=f32)
        h = jnp.maximum(h * d_s1[...] + d_b1[...], 0.0)
        acc = _dw3x3_stride1(h, d_dw2[...], Wo2, ml2, mr2)
        s2 = jnp.dot(acc.astype(bf16), d_pw2[...], preferred_element_type=f32)
        s2 = jnp.maximum(s2 * d_s2[...] + d_b2[...], 0.0)             # (P2, 4C)

        # ---------- head: AvgPool2d(4,4) over the 4x4 map (== mean) + AnalogLinear ---
        feat = jnp.mean(s2, axis=0, keepdims=True)                    # (1, 4C)
        feat_ref[...] = feat.astype(feat_ref.dtype)
        logits = jnp.dot(feat.astype(bf16), fcw_ref[...],
                         preferred_element_type=f32) + fcb_ref[...]
        out_ref[...] = logits.astype(out_ref.dtype)

    return kernel


# -----------------------------------------------------------------------------
# Wrapper glue (plain JAX / numpy: layout plumbing + constant matrices only)
# -----------------------------------------------------------------------------
def _bilinear_up2_matrix(n):
    """(2n, n) interpolation matrix for nn.Upsample(scale_factor=2, mode='bilinear',
    align_corners=False).  Weights (0.25/0.75) are exact in bf16."""
    U = np.zeros((2 * n, n), np.float32)
    for i in range(2 * n):
        src = max((i + 0.5) / 2.0 - 0.5, 0.0)
        i0 = min(int(np.floor(src)), n - 1)
        frac = src - i0
        i1 = min(i0 + 1, n - 1)
        U[i, i0] += 1.0 - frac
        U[i, i1] += frac
    return U


def _quad_perm(H, W):
    """Row-major indices of an HxW map listed in parity-quadrant order
    (p, q, a, b) -> (2a+p)*W + (2b+q)."""
    idx = []
    for p in range(2):
        for q in range(2):
            for a in range(H // 2):
                for b in range(W // 2):
                    idx.append((2 * a + p) * W + (2 * b + q))
    return np.asarray(idx, np.int32)


def _rep_spec(shape):
    r = len(shape)
    return pl.BlockSpec(shape, lambda n, _r=r: (0,) * _r)


def analog_resnet_attention2_forward(params, x2_nchw, num_classes=100):
    N, C, H, W = x2_nchw.shape
    assert H == 16 and W == 16, "AvgPool2d(4,4)/fc(512) require a 16x16 stage-2 map"

    x2 = jnp.transpose(x2_nchw, (0, 2, 3, 1))                        # NCHW -> NHWC
    # parity-quadrant row order: block(p,q) holds x2[:, 2a+p, 2b+q, :] row-major (a,b)
    x2q = (x2.reshape(N, H // 2, 2, W // 2, 2, C)
             .transpose(0, 2, 4, 1, 3, 5)
             .reshape(N, H * W, C)
             .astype(jnp.bfloat16))

    # constant matrices: quadrant-ordered bilinear upsample + 8x8 row permutation
    up = np.kron(_bilinear_up2_matrix(H // 2), _bilinear_up2_matrix(W // 2))
    uq = jnp.asarray(up[_quad_perm(H, W), :], jnp.bfloat16)          # (H*W, P1)
    perm8 = _quad_perm(H // 2, W // 2)
    p64 = np.zeros((perm8.size, perm8.size), np.float32)
    p64[np.arange(perm8.size), perm8] = 1.0
    p64 = jnp.asarray(p64, jnp.bfloat16)                             # (P1, P1)

    a, c, d = params["att"], params["scala1"], params["scala2"]
    nc_pad = params["fc_w"].shape[1]
    C4 = d["pw2"].shape[1]

    rep_args = (
        a["dw1"], a["pw1"], a["bn1_s"], a["bn1_b"],
        a["dw2"], a["pw2"], a["bn2_s"], a["bn2_b"],
        a["bna_s"], a["bna_b"], uq,
        c["dw1"], c["pw1"], c["bn1_s"], c["bn1_b"],
        c["dw2"], c["pw2"], c["bn2_s"], c["bn2_b"], p64,
        d["dw1"], d["pw1"], d["bn1_s"], d["bn1_b"],
        d["dw2"], d["pw2"], d["bn2_s"], d["bn2_b"],
        params["fc_w"], params["fc_b"])

    in_specs = ([pl.BlockSpec((None, H * W, C), lambda n: (n, 0, 0))]
                + [_rep_spec(t.shape) for t in rep_args])

    out3, feat3 = pl.pallas_call(
        _make_fused_kernel(H),
        grid=(N,),
        in_specs=in_specs,
        out_specs=(pl.BlockSpec((None, 1, nc_pad), lambda n: (n, 0, 0)),
                   pl.BlockSpec((None, 1, C4), lambda n: (n, 0, 0))),
        out_shape=(jax.ShapeDtypeStruct((N, 1, nc_pad), jnp.float32),
                   jax.ShapeDtypeStruct((N, 1, C4), jnp.float32)),
        scratch_shapes=[pltpu.VMEM((H * W, C), jnp.float32)],        # fea (quad order)
        compiler_params=pltpu.CompilerParams(dimension_semantics=("parallel",)),
    )(x2q, *rep_args)

    out = out3[:, 0, :num_classes]        # un-pad the lane-padded fc output
    feature_out = feat3[:, 0, :]
    return out, feature_out


# -----------------------------------------------------------------------------
# Parameters (BasicBlock expansion = 1  ->  channel_in = 128)
# -----------------------------------------------------------------------------
_BN_EPS = 1e-5


def _bn_fold(ch):
    # eval-mode fold with module-init stats (gamma=1, beta=0, mean=0, var=1).
    scale = jnp.full((1, ch), 1.0 / math.sqrt(1.0 + _BN_EPS), jnp.float32)
    bias = jnp.zeros((1, ch), jnp.float32)
    return scale, bias


def _sepconv_params(key, cin, cout):
    k = jax.random.split(key, 4)
    dw1 = jax.random.normal(k[0], (9, cin), jnp.float32) * math.sqrt(2.0 / 9.0)
    pw1 = (jax.random.normal(k[1], (cin, cin), jnp.float32)
           * math.sqrt(2.0 / cin)).astype(jnp.bfloat16)
    dw2 = jax.random.normal(k[2], (9, cin), jnp.float32) * math.sqrt(2.0 / 9.0)
    pw2 = (jax.random.normal(k[3], (cin, cout), jnp.float32)
           * math.sqrt(2.0 / cin)).astype(jnp.bfloat16)
    s1, b1 = _bn_fold(cin)
    s2, b2 = _bn_fold(cout)
    return dict(dw1=dw1, pw1=pw1, bn1_s=s1, bn1_b=b1,
                dw2=dw2, pw2=pw2, bn2_s=s2, bn2_b=b2)


def make_params(key, num_classes=100, channels=128):
    ks = jax.random.split(key, 5)
    att = _sepconv_params(ks[0], channels, channels)
    att["bna_s"], att["bna_b"] = _bn_fold(channels)
    scala1 = _sepconv_params(ks[1], channels, channels * 2)
    scala2 = _sepconv_params(ks[2], channels * 2, channels * 4)
    in_f = channels * 4
    bound = 1.0 / math.sqrt(in_f)
    nc_pad = ((num_classes + 127) // 128) * 128     # lane-dense fc output
    w = jax.random.uniform(ks[3], (in_f, num_classes), jnp.float32, -bound, bound)
    b = jax.random.uniform(ks[4], (1, num_classes), jnp.float32, -bound, bound)
    fc_w = jnp.zeros((in_f, nc_pad), jnp.float32).at[:, :num_classes].set(w)
    fc_b = jnp.zeros((1, nc_pad), jnp.float32).at[:, :num_classes].set(b)
    return dict(att=att, scala1=scala1, scala2=scala2,
                fc_w=fc_w.astype(jnp.bfloat16), fc_b=fc_b)


# -----------------------------------------------------------------------------
if __name__ == "__main__":
    key = jax.random.PRNGKey(0)
    pkey, xkey = jax.random.split(key)

    # block.expansion = 1 (BasicBlock): channel_in = 128; 16x16 stage-2 map; batch 2.
    num_classes = 100
    params = make_params(pkey, num_classes=num_classes, channels=128)
    x2 = jax.random.normal(xkey, (2, 128, 16, 16), jnp.float32)

    fwd = jax.jit(analog_resnet_attention2_forward)
    out, feature_out = fwd(params, x2)
    jax.block_until_ready((out, feature_out))

    assert out.shape == (2, num_classes)
    assert feature_out.shape == (2, 512)
    assert bool(jnp.all(jnp.isfinite(out)))
    assert bool(jnp.all(jnp.isfinite(feature_out)))

    print("KERNEL_OK")
</pallas_src>

<mosaic_0001>
module attributes {stable_mosaic.version = 11 : i64} {
  func.func @kernel(%arg0: i32, %arg1: memref<1x256x128xbf16, #tpu.memory_space<vmem>>, %arg2: memref<9x128xf32, #tpu.memory_space<vmem>>, %arg3: memref<128x128xbf16, #tpu.memory_space<vmem>>, %arg4: memref<1x128xf32, #tpu.memory_space<vmem>>, %arg5: memref<1x128xf32, #tpu.memory_space<vmem>>, %arg6: memref<9x128xf32, #tpu.memory_space<vmem>>, %arg7: memref<128x128xbf16, #tpu.memory_space<vmem>>, %arg8: memref<1x128xf32, #tpu.memory_space<vmem>>, %arg9: memref<1x128xf32, #tpu.memory_space<vmem>>, %arg10: memref<1x128xf32, #tpu.memory_space<vmem>>, %arg11: memref<1x128xf32, #tpu.memory_space<vmem>>, %arg12: memref<256x64xbf16, #tpu.memory_space<vmem>>, %arg13: memref<9x128xf32, #tpu.memory_space<vmem>>, %arg14: memref<128x128xbf16, #tpu.memory_space<vmem>>, %arg15: memref<1x128xf32, #tpu.memory_space<vmem>>, %arg16: memref<1x128xf32, #tpu.memory_space<vmem>>, %arg17: memref<9x128xf32, #tpu.memory_space<vmem>>, %arg18: memref<128x256xbf16, #tpu.memory_space<vmem>>, %arg19: memref<1x256xf32, #tpu.memory_space<vmem>>, %arg20: memref<1x256xf32, #tpu.memory_space<vmem>>, %arg21: memref<64x64xbf16, #tpu.memory_space<vmem>>, %arg22: memref<9x256xf32, #tpu.memory_space<vmem>>, %arg23: memref<256x256xbf16, #tpu.memory_space<vmem>>, %arg24: memref<1x256xf32, #tpu.memory_space<vmem>>, %arg25: memref<1x256xf32, #tpu.memory_space<vmem>>, %arg26: memref<9x256xf32, #tpu.memory_space<vmem>>, %arg27: memref<256x512xbf16, #tpu.memory_space<vmem>>, %arg28: memref<1x512xf32, #tpu.memory_space<vmem>>, %arg29: memref<1x512xf32, #tpu.memory_space<vmem>>, %arg30: memref<512x128xbf16, #tpu.memory_space<vmem>>, %arg31: memref<1x128xf32, #tpu.memory_space<vmem>>, %arg32: memref<1x1x128xf32, #tpu.memory_space<vmem>>, %arg33: memref<1x1x512xf32, #tpu.memory_space<vmem>>, %arg34: memref<256x128xf32, #tpu.memory_space<vmem>>) attributes {dimension_semantics = [#tpu.dimension_semantics<parallel>], iteration_bounds = array<i64: 2>, scalar_prefetch = 0 : i64, scratch_operands = 1 : i64, tpu.core_type = #tpu.core_type<tc>, window_params = [{transform_indices = @transform_0, window_bounds = array<i64: 1, 256, 128>}, {pipeline_mode = #tpu.pipeline_mode<synchronous>, transform_indices = @transform_1, window_bounds = array<i64: 9, 128>}, {pipeline_mode = #tpu.pipeline_mode<synchronous>, transform_indices = @transform_2, window_bounds = array<i64: 128, 128>}, {pipeline_mode = #tpu.pipeline_mode<synchronous>, transform_indices = @transform_3, window_bounds = array<i64: 1, 128>}, {pipeline_mode = #tpu.pipeline_mode<synchronous>, transform_indices = @transform_4, window_bounds = array<i64: 1, 128>}, {pipeline_mode = #tpu.pipeline_mode<synchronous>, transform_indices = @transform_5, window_bounds = array<i64: 9, 128>}, {pipeline_mode = #tpu.pipeline_mode<synchronous>, transform_indices = @transform_6, window_bounds = array<i64: 128, 128>}, {pipeline_mode = #tpu.pipeline_mode<synchronous>, transform_indices = @transform_7, window_bounds = array<i64: 1, 128>}, {pipeline_mode = #tpu.pipeline_mode<synchronous>, transform_indices = @transform_8, window_bounds = array<i64: 1, 128>}, {pipeline_mode = #tpu.pipeline_mode<synchronous>, transform_indices = @transform_9, window_bounds = array<i64: 1, 128>}, {pipeline_mode = #tpu.pipeline_mode<synchronous>, transform_indices = @transform_10, window_bounds = array<i64: 1, 128>}, {pipeline_mode = #tpu.pipeline_mode<synchronous>, transform_indices = @transform_11, window_bounds = array<i64: 256, 64>}, {pipeline_mode = #tpu.pipeline_mode<synchronous>, transform_indices = @transform_12, window_bounds = array<i64: 9, 128>}, {pipeline_mode = #tpu.pipeline_mode<synchronous>, transform_indices = @transform_13, window_bounds = array<i64: 128, 128>}, {pipeline_mode = #tpu.pipeline_mode<synchronous>, transform_indices = @transform_14, window_bounds = array<i64: 1, 128>}, {pipeline_mode = #tpu.pipeline_mode<synchronous>, transform_indices = @transform_15, window_bounds = array<i64: 1, 128>}, {pipeline_mode = #tpu.pipeline_mode<synchronous>, transform_indices = @transform_16, window_bounds = array<i64: 9, 128>}, {pipeline_mode = #tpu.pipeline_mode<synchronous>, transform_indices = @transform_17, window_bounds = array<i64: 128, 256>}, {pipeline_mode = #tpu.pipeline_mode<synchronous>, transform_indices = @transform_18, window_bounds = array<i64: 1, 256>}, {pipeline_mode = #tpu.pipeline_mode<synchronous>, transform_indices = @transform_19, window_bounds = array<i64: 1, 256>}, {pipeline_mode = #tpu.pipeline_mode<synchronous>, transform_indices = @transform_20, window_bounds = array<i64: 64, 64>}, {pipeline_mode = #tpu.pipeline_mode<synchronous>, transform_indices = @transform_21, window_bounds = array<i64: 9, 256>}, {pipeline_mode = #tpu.pipeline_mode<synchronous>, transform_indices = @transform_22, window_bounds = array<i64: 256, 256>}, {pipeline_mode = #tpu.pipeline_mode<synchronous>, transform_indices = @transform_23, window_bounds = array<i64: 1, 256>}, {pipeline_mode = #tpu.pipeline_mode<synchronous>, transform_indices = @transform_24, window_bounds = array<i64: 1, 256>}, {pipeline_mode = #tpu.pipeline_mode<synchronous>, transform_indices = @transform_25, window_bounds = array<i64: 9, 256>}, {pipeline_mode = #tpu.pipeline_mode<synchronous>, transform_indices = @transform_26, window_bounds = array<i64: 256, 512>}, {pipeline_mode = #tpu.pipeline_mode<synchronous>, transform_indices = @transform_27, window_bounds = array<i64: 1, 512>}, {pipeline_mode = #tpu.pipeline_mode<synchronous>, transform_indices = @transform_28, window_bounds = array<i64: 1, 512>}, {pipeline_mode = #tpu.pipeline_mode<synchronous>, transform_indices = @transform_29, window_bounds = array<i64: 512, 128>}, {pipeline_mode = #tpu.pipeline_mode<synchronous>, transform_indices = @transform_30, window_bounds = array<i64: 1, 128>}, {transform_indices = @transform_31, window_bounds = array<i64: 1, 1, 128>}, {transform_indices = @transform_32, window_bounds = array<i64: 1, 1, 512>}]} {
    %0 = tpu.iota {dimensions = array<i32: 0>} : vector<64x1xi32>
    %c8_i32 = arith.constant 8 : i32
    %c0_i32 = arith.constant 0 : i32
    %1 = arith.cmpi eq, %c8_i32, %c0_i32 : i32
    %c1_i32 = arith.constant 1 : i32
    %2 = arith.select %1, %c1_i32, %c8_i32 : i32
    %3 = vector.broadcast %2 : i32 to vector<64x1xi32>
    %4 = arith.remsi %0, %3 : vector<64x1xi32>
    %c0_i32_0 = arith.constant 0 : i32
    %5 = vector.broadcast %c0_i32_0 : i32 to vector<64x1xi32>
    %6 = arith.cmpi ne, %4, %5 : vector<64x1xi32>
    %c0_i32_1 = arith.constant 0 : i32
    %7 = vector.broadcast %c0_i32_1 : i32 to vector<64x1xi32>
    %8 = arith.cmpi slt, %4, %7 : vector<64x1xi32>
    %c0_i32_2 = arith.constant 0 : i32
    %9 = arith.cmpi slt, %2, %c0_i32_2 : i32
    %10 = vector.broadcast %9 : i1 to vector<64x1xi1>
    %11 = vector.broadcast %10 : vector<64x1xi1> to vector<64x1xi1>
    %12 = arith.xori %8, %11 : vector<64x1xi1>
    %13 = arith.andi %12, %6 : vector<64x1xi1>
    %14 = vector.broadcast %2 : i32 to vector<64x1xi32>
    %15 = arith.addi %4, %14 : vector<64x1xi32>
    %16 = arith.select %13, %15, %4 : vector<64x1xi1>, vector<64x1xi32>
    %c1_i32_3 = arith.constant 1 : i32
    %17 = vector.broadcast %c1_i32_3 : i32 to vector<64x1xi32>
    %18 = arith.cmpi sge, %16, %17 : vector<64x1xi32>
    %c6_i32 = arith.constant 6 : i32
    %19 = vector.broadcast %c6_i32 : i32 to vector<64x1xi32>
    %20 = arith.cmpi sle, %16, %19 : vector<64x1xi32>
    %21 = tpu.iota {dimensions = array<i32: 0>} : vector<16x1xi32>
    %c4_i32 = arith.constant 4 : i32
    %c0_i32_4 = arith.constant 0 : i32
    %22 = arith.cmpi eq, %c4_i32, %c0_i32_4 : i32
    %c1_i32_5 = arith.constant 1 : i32
    %23 = arith.select %22, %c1_i32_5, %c4_i32 : i32
    %24 = vector.broadcast %23 : i32 to vector<16x1xi32>
    %25 = arith.remsi %21, %24 : vector<16x1xi32>
    %c0_i32_6 = arith.constant 0 : i32
    %26 = vector.broadcast %c0_i32_6 : i32 to vector<16x1xi32>
    %27 = arith.cmpi ne, %25, %26 : vector<16x1xi32>
    %c0_i32_7 = arith.constant 0 : i32
    %28 = vector.broadcast %c0_i32_7 : i32 to vector<16x1xi32>
    %29 = arith.cmpi slt, %25, %28 : vector<16x1xi32>
    %c0_i32_8 = arith.constant 0 : i32
    %30 = arith.cmpi slt, %23, %c0_i32_8 : i32
    %31 = vector.broadcast %30 : i1 to vector<16x1xi1>
    %32 = vector.broadcast %31 : vector<16x1xi1> to vector<16x1xi1>
    %33 = arith.xori %29, %32 : vector<16x1xi1>
    %34 = arith.andi %33, %27 : vector<16x1xi1>
    %35 = vector.broadcast %23 : i32 to vector<16x1xi32>
    %36 = arith.addi %25, %35 : vector<16x1xi32>
    %37 = arith.select %34, %36, %25 : vector<16x1xi1>, vector<16x1xi32>
    %c1_i32_9 = arith.constant 1 : i32
    %38 = vector.broadcast %c1_i32_9 : i32 to vector<16x1xi32>
    %39 = arith.cmpi sge, %37, %38 : vector<16x1xi32>
    %c2_i32 = arith.constant 2 : i32
    %40 = vector.broadcast %c2_i32 : i32 to vector<16x1xi32>
    %41 = arith.cmpi sle, %37, %40 : vector<16x1xi32>
    %c0 = arith.constant 0 : index
    %c0_10 = arith.constant 0 : index
    %c0_11 = arith.constant 0 : index
    %42 = vector.load %arg1[%c0, %c0_10, %c0_11] : memref<1x256x128xbf16, #tpu.memory_space<vmem>>, vector<1x64x128xbf16>
    %43 = vector.shape_cast %42 : vector<1x64x128xbf16> to vector<64x128xbf16>
    %c0_12 = arith.constant 0 : index
    %c64 = arith.constant 64 : index
    %c0_13 = arith.constant 0 : index
    %44 = vector.load %arg1[%c0_12, %c64, %c0_13] : memref<1x256x128xbf16, #tpu.memory_space<vmem>>, vector<1x64x128xbf16>
    %45 = vector.shape_cast %44 : vector<1x64x128xbf16> to vector<64x128xbf16>
    %c0_14 = arith.constant 0 : index
    %c128 = arith.constant 128 : index
    %c0_15 = arith.constant 0 : index
    %46 = vector.load %arg1[%c0_14, %c128, %c0_15] : memref<1x256x128xbf16, #tpu.memory_space<vmem>>, vector<1x64x128xbf16>
    %47 = vector.shape_cast %46 : vector<1x64x128xbf16> to vector<64x128xbf16>
    %c0_16 = arith.constant 0 : index
    %c192 = arith.constant 192 : index
    %c0_17 = arith.constant 0 : index
    %48 = vector.load %arg1[%c0_16, %c192, %c0_17] : memref<1x256x128xbf16, #tpu.memory_space<vmem>>, vector<1x64x128xbf16>
    %49 = vector.shape_cast %48 : vector<1x64x128xbf16> to vector<64x128xbf16>
    %c0_18 = arith.constant 0 : index
    %c0_19 = arith.constant 0 : index
    %50 = vector.load %arg2[%c0_18, %c0_19] : memref<9x128xf32, #tpu.memory_space<vmem>>, vector<9x128xf32>
    %51 = vector.extract_strided_slice %50 {offsets = [4, 0], sizes = [1, 128], strides = [1, 1]} : vector<9x128xf32> to vector<1x128xf32>
    %52 = arith.extf %43 : vector<64x128xbf16> to vector<64x128xf32>
    %53 = vector.broadcast %51 : vector<1x128xf32> to vector<64x128xf32>
    %54 = arith.mulf %52, %53 : vector<64x128xf32>
    %55 = vector.extract_strided_slice %50 {offsets = [5, 0], sizes = [1, 128], strides = [1, 1]} : vector<9x128xf32> to vector<1x128xf32>
    %56 = arith.extf %45 : vector<64x128xbf16> to vector<64x128xf32>
    %57 = vector.broadcast %55 : vector<1x128xf32> to vector<64x128xf32>
    %58 = arith.mulf %56, %57 : vector<64x128xf32>
    %59 = arith.addf %54, %58 : vector<64x128xf32>
    %60 = vector.extract_strided_slice %50 {offsets = [7, 0], sizes = [1, 128], strides = [1, 1]} : vector<9x128xf32> to vector<1x128xf32>
    %61 = arith.extf %47 : vector<64x128xbf16> to vector<64x128xf32>
    %62 = vector.broadcast %60 : vector<1x128xf32> to vector<64x128xf32>
    %63 = arith.mulf %61, %62 : vector<64x128xf32>
    %64 = arith.addf %59, %63 : vector<64x128xf32>
    %65 = vector.extract_strided_slice %50 {offsets = [8, 0], sizes = [1, 128], strides = [1, 1]} : vector<9x128xf32> to vector<1x128xf32>
    %66 = arith.extf %49 : vector<64x128xbf16> to vector<64x128xf32>
    %67 = vector.broadcast %65 : vector<1x128xf32> to vector<64x128xf32>
    %68 = arith.mulf %66, %67 : vector<64x128xf32>
    %69 = arith.addf %64, %68 : vector<64x128xf32>
    %cst = arith.constant 0.000000e+00 : bf16
    %70 = vector.broadcast %cst : bf16 to vector<8x128xbf16>
    %71 = vector.extract_strided_slice %47 {offsets = [0, 0], sizes = [56, 128], strides = [1, 1]} : vector<64x128xbf16> to vector<56x128xbf16>
    %72 = tpu.concatenate %70, %71 in 0 : vector<8x128xbf16>, vector<56x128xbf16> -> vector<64x128xbf16>
    %73 = vector.extract_strided_slice %50 {offsets = [1, 0], sizes = [1, 128], strides = [1, 1]} : vector<9x128xf32> to vector<1x128xf32>
    %74 = arith.extf %72 : vector<64x128xbf16> to vector<64x128xf32>
    %75 = vector.broadcast %73 : vector<1x128xf32> to vector<64x128xf32>
    %76 = arith.mulf %74, %75 : vector<64x128xf32>
    %77 = arith.addf %69, %76 : vector<64x128xf32>
    %cst_20 = arith.constant 0.000000e+00 : bf16
    %78 = vector.broadcast %cst_20 : bf16 to vector<8x128xbf16>
    %79 = vector.extract_strided_slice %49 {offsets = [0, 0], sizes = [56, 128], strides = [1, 1]} : vector<64x128xbf16> to vector<56x128xbf16>
    %80 = tpu.concatenate %78, %79 in 0 : vector<8x128xbf16>, vector<56x128xbf16> -> vector<64x128xbf16>
    %81 = vector.extract_strided_slice %50 {offsets = [2, 0], sizes = [1, 128], strides = [1, 1]} : vector<9x128xf32> to vector<1x128xf32>
    %82 = arith.extf %80 : vector<64x128xbf16> to vector<64x128xf32>
    %83 = vector.broadcast %81 : vector<1x128xf32> to vector<64x128xf32>
    %84 = arith.mulf %82, %83 : vector<64x128xf32>
    %85 = arith.addf %77, %84 : vector<64x128xf32>
    %cst_21 = arith.constant 0.000000e+00 : bf16
    %86 = vector.broadcast %cst_21 : bf16 to vector<1x128xbf16>
    %87 = vector.extract_strided_slice %45 {offsets = [0, 0], sizes = [63, 128], strides = [1, 1]} : vector<64x128xbf16> to vector<63x128xbf16>
    %88 = tpu.concatenate %86, %87 in 0 : vector<1x128xbf16>, vector<63x128xbf16> -> vector<64x128xbf16>
    %c0_i32_22 = arith.constant 0 : i32
    %89 = arith.sitofp %c0_i32_22 : i32 to bf16
    %90 = vector.shape_cast %18 : vector<64x1xi1> to vector<64x1xi1>
    %91 = vector.broadcast %90 : vector<64x1xi1> to vector<64x128xi1>
    %92 = vector.broadcast %89 : bf16 to vector<64x128xbf16>
    %93 = arith.select %91, %88, %92 : vector<64x128xi1>, vector<64x128xbf16>
    %94 = vector.extract_strided_slice %50 {offsets = [3, 0], sizes = [1, 128], strides = [1, 1]} : vector<9x128xf32> to vector<1x128xf32>
    %95 = arith.extf %93 : vector<64x128xbf16> to vector<64x128xf32>
    %96 = vector.broadcast %94 : vector<1x128xf32> to vector<64x128xf32>
    %97 = arith.mulf %95, %96 : vector<64x128xf32>
    %98 = arith.addf %85, %97 : vector<64x128xf32>
    %cst_23 = arith.constant 0.000000e+00 : bf16
    %99 = vector.broadcast %cst_23 : bf16 to vector<1x128xbf16>
    %100 = vector.extract_strided_slice %49 {offsets = [0, 0], sizes = [63, 128], strides = [1, 1]} : vector<64x128xbf16> to vector<63x128xbf16>
    %101 = tpu.concatenate %99, %100 in 0 : vector<1x128xbf16>, vector<63x128xbf16> -> vector<64x128xbf16>
    %c0_i32_24 = arith.constant 0 : i32
    %102 = arith.sitofp %c0_i32_24 : i32 to bf16
    %103 = vector.shape_cast %18 : vector<64x1xi1> to vector<64x1xi1>
    %104 = vector.broadcast %103 : vector<64x1xi1> to vector<64x128xi1>
    %105 = vector.broadcast %102 : bf16 to vector<64x128xbf16>
    %106 = arith.select %104, %101, %105 : vector<64x128xi1>, vector<64x128xbf16>
    %107 = vector.extract_strided_slice %50 {offsets = [6, 0], sizes = [1, 128], strides = [1, 1]} : vector<9x128xf32> to vector<1x128xf32>
    %108 = arith.extf %106 : vector<64x128xbf16> to vector<64x128xf32>
    %109 = vector.broadcast %107 : vector<1x128xf32> to vector<64x128xf32>
    %110 = arith.mulf %108, %109 : vector<64x128xf32>
    %111 = arith.addf %98, %110 : vector<64x128xf32>
    %cst_25 = arith.constant 0.000000e+00 : bf16
    %112 = vector.broadcast %cst_25 : bf16 to vector<9x128xbf16>
    %113 = vector.extract_strided_slice %49 {offsets = [0, 0], sizes = [55, 128], strides = [1, 1]} : vector<64x128xbf16> to vector<55x128xbf16>
    %114 = tpu.concatenate %112, %113 in 0 : vector<9x128xbf16>, vector<55x128xbf16> -> vector<64x128xbf16>
    %c0_i32_26 = arith.constant 0 : i32
    %115 = arith.sitofp %c0_i32_26 : i32 to bf16
    %116 = vector.shape_cast %18 : vector<64x1xi1> to vector<64x1xi1>
    %117 = vector.broadcast %116 : vector<64x1xi1> to vector<64x128xi1>
    %118 = vector.broadcast %115 : bf16 to vector<64x128xbf16>
    %119 = arith.select %117, %114, %118 : vector<64x128xi1>, vector<64x128xbf16>
    %120 = vector.extract_strided_slice %50 {offsets = [0, 0], sizes = [1, 128], strides = [1, 1]} : vector<9x128xf32> to vector<1x128xf32>
    %121 = arith.extf %119 : vector<64x128xbf16> to vector<64x128xf32>
    %122 = vector.broadcast %120 : vector<1x128xf32> to vector<64x128xf32>
    %123 = arith.mulf %121, %122 : vector<64x128xf32>
    %124 = arith.addf %111, %123 : vector<64x128xf32>
    %125 = arith.truncf %124 : vector<64x128xf32> to vector<64x128xbf16>
    %c0_27 = arith.constant 0 : index
    %c0_28 = arith.constant 0 : index
    %126 = vector.load %arg3[%c0_27, %c0_28] : memref<128x128xbf16, #tpu.memory_space<vmem>>, vector<128x128xbf16>
    %cst_29 = arith.constant dense<0.000000e+00> : vector<64x128xf32>
    %127 = tpu.matmul %125, %126, %cst_29 {dimension_numbers = #tpu.dot_dimension_numbers<[1], [0], [0], [1], [0, 0, 1, 1], [], []>} : vector<64x128xbf16>, vector<128x128xbf16>, vector<64x128xf32> -> vector<64x128xf32>
    %c0_30 = arith.constant 0 : index
    %c0_31 = arith.constant 0 : index
    %128 = vector.load %arg4[%c0_30, %c0_31] : memref<1x128xf32, #tpu.memory_space<vmem>>, vector<1x128xf32>
    %129 = vector.broadcast %128 : vector<1x128xf32> to vector<64x128xf32>
    %130 = arith.mulf %127, %129 : vector<64x128xf32>
    %c0_32 = arith.constant 0 : index
    %c0_33 = arith.constant 0 : index
    %131 = vector.load %arg5[%c0_32, %c0_33] : memref<1x128xf32, #tpu.memory_space<vmem>>, vector<1x128xf32>
    %132 = vector.broadcast %131 : vector<1x128xf32> to vector<64x128xf32>
    %133 = arith.addf %130, %132 : vector<64x128xf32>
    %cst_34 = arith.constant 0.000000e+00 : f32
    %134 = vector.broadcast %cst_34 : f32 to vector<64x128xf32>
    %135 = arith.maximumf %133, %134 : vector<64x128xf32>
    %c0_35 = arith.constant 0 : index
    %c0_36 = arith.constant 0 : index
    %136 = vector.load %arg6[%c0_35, %c0_36] : memref<9x128xf32, #tpu.memory_space<vmem>>, vector<9x128xf32>
    %137 = vector.extract_strided_slice %136 {offsets = [4, 0], sizes = [1, 128], strides = [1, 1]} : vector<9x128xf32> to vector<1x128xf32>
    %138 = vector.broadcast %137 : vector<1x128xf32> to vector<64x128xf32>
    %139 = arith.mulf %135, %138 : vector<64x128xf32>
    %cst_37 = arith.constant 0.000000e+00 : f32
    %140 = vector.broadcast %cst_37 : f32 to vector<1x128xf32>
    %141 = vector.extract_strided_slice %135 {offsets = [0, 0], sizes = [63, 128], strides = [1, 1]} : vector<64x128xf32> to vector<63x128xf32>
    %142 = tpu.concatenate %140, %141 in 0 : vector<1x128xf32>, vector<63x128xf32> -> vector<64x128xf32>
    %c0_i32_38 = arith.constant 0 : i32
    %143 = arith.sitofp %c0_i32_38 : i32 to f32
    %144 = vector.shape_cast %18 : vector<64x1xi1> to vector<64x1xi1>
    %145 = vector.broadcast %144 : vector<64x1xi1> to vector<64x128xi1>
    %146 = vector.broadcast %143 : f32 to vector<64x128xf32>
    %147 = arith.select %145, %142, %146 : vector<64x128xi1>, vector<64x128xf32>
    %148 = vector.extract_strided_slice %136 {offsets = [3, 0], sizes = [1, 128], strides = [1, 1]} : vector<9x128xf32> to vector<1x128xf32>
    %149 = vector.broadcast %148 : vector<1x128xf32> to vector<64x128xf32>
    %150 = arith.mulf %147, %149 : vector<64x128xf32>
    %151 = arith.addf %139, %150 : vector<64x128xf32>
    %152 = vector.extract_strided_slice %135 {offsets = [1, 0], sizes = [63, 128], strides = [1, 1]} : vector<64x128xf32> to vector<63x128xf32>
    %cst_39 = arith.constant 0.000000e+00 : f32
    %153 = vector.broadcast %cst_39 : f32 to vector<1x128xf32>
    %154 = tpu.concatenate %152, %153 in 0 : vector<63x128xf32>, vector<1x128xf32> -> vector<64x128xf32>
    %c0_i32_40 = arith.constant 0 : i32
    %155 = arith.sitofp %c0_i32_40 : i32 to f32
    %156 = vector.shape_cast %20 : vector<64x1xi1> to vector<64x1xi1>
    %157 = vector.broadcast %156 : vector<64x1xi1> to vector<64x128xi1>
    %158 = vector.broadcast %155 : f32 to vector<64x128xf32>
    %159 = arith.select %157, %154, %158 : vector<64x128xi1>, vector<64x128xf32>
    %160 = vector.extract_strided_slice %136 {offsets = [5, 0], sizes = [1, 128], strides = [1, 1]} : vector<9x128xf32> to vector<1x128xf32>
    %161 = vector.broadcast %160 : vector<1x128xf32> to vector<64x128xf32>
    %162 = arith.mulf %159, %161 : vector<64x128xf32>
    %163 = arith.addf %151, %162 : vector<64x128xf32>
    %cst_41 = arith.constant 0.000000e+00 : f32
    %164 = vector.broadcast %cst_41 : f32 to vector<8x128xf32>
    %165 = vector.extract_strided_slice %135 {offsets = [0, 0], sizes = [56, 128], strides = [1, 1]} : vector<64x128xf32> to vector<56x128xf32>
    %166 = tpu.concatenate %164, %165 in 0 : vector<8x128xf32>, vector<56x128xf32> -> vector<64x128xf32>
    %167 = vector.extract_strided_slice %136 {offsets = [1, 0], sizes = [1, 128], strides = [1, 1]} : vector<9x128xf32> to vector<1x128xf32>
    %168 = vector.broadcast %167 : vector<1x128xf32> to vector<64x128xf32>
    %169 = arith.mulf %166, %168 : vector<64x128xf32>
    %170 = arith.addf %163, %169 : vector<64x128xf32>
    %171 = vector.extract_strided_slice %135 {offsets = [8, 0], sizes = [56, 128], strides = [1, 1]} : vector<64x128xf32> to vector<56x128xf32>
    %cst_42 = arith.constant 0.000000e+00 : f32
    %172 = vector.broadcast %cst_42 : f32 to vector<8x128xf32>
    %173 = tpu.concatenate %171, %172 in 0 : vector<56x128xf32>, vector<8x128xf32> -> vector<64x128xf32>
    %174 = vector.extract_strided_slice %136 {offsets = [7, 0], sizes = [1, 128], strides = [1, 1]} : vector<9x128xf32> to vector<1x128xf32>
    %175 = vector.broadcast %174 : vector<1x128xf32> to vector<64x128xf32>
    %176 = arith.mulf %173, %175 : vector<64x128xf32>
    %177 = arith.addf %170, %176 : vector<64x128xf32>
    %cst_43 = arith.constant 0.000000e+00 : f32
    %178 = vector.broadcast %cst_43 : f32 to vector<9x128xf32>
    %179 = vector.extract_strided_slice %135 {offsets = [0, 0], sizes = [55, 128], strides = [1, 1]} : vector<64x128xf32> to vector<55x128xf32>
    %180 = tpu.concatenate %178, %179 in 0 : vector<9x128xf32>, vector<55x128xf32> -> vector<64x128xf32>
    %c0_i32_44 = arith.constant 0 : i32
    %181 = arith.sitofp %c0_i32_44 : i32 to f32
    %182 = vector.shape_cast %18 : vector<64x1xi1> to vector<64x1xi1>
    %183 = vector.broadcast %182 : vector<64x1xi1> to vector<64x128xi1>
    %184 = vector.broadcast %181 : f32 to vector<64x128xf32>
    %185 = arith.select %183, %180, %184 : vector<64x128xi1>, vector<64x128xf32>
    %186 = vector.extract_strided_slice %136 {offsets = [0, 0], sizes = [1, 128], strides = [1, 1]} : vector<9x128xf32> to vector<1x128xf32>
    %187 = vector.broadcast %186 : vector<1x128xf32> to vector<64x128xf32>
    %188 = arith.mulf %185, %187 : vector<64x128xf32>
    %189 = arith.addf %177, %188 : vector<64x128xf32>
    %cst_45 = arith.constant 0.000000e+00 : f32
    %190 = vector.broadcast %cst_45 : f32 to vector<7x128xf32>
    %191 = vector.extract_strided_slice %135 {offsets = [0, 0], sizes = [57, 128], strides = [1, 1]} : vector<64x128xf32> to vector<57x128xf32>
    %192 = tpu.concatenate %190, %191 in 0 : vector<7x128xf32>, vector<57x128xf32> -> vector<64x128xf32>
    %c0_i32_46 = arith.constant 0 : i32
    %193 = arith.sitofp %c0_i32_46 : i32 to f32
    %194 = vector.shape_cast %20 : vector<64x1xi1> to vector<64x1xi1>
    %195 = vector.broadcast %194 : vector<64x1xi1> to vector<64x128xi1>
    %196 = vector.broadcast %193 : f32 to vector<64x128xf32>
    %197 = arith.select %195, %192, %196 : vector<64x128xi1>, vector<64x128xf32>
    %198 = vector.extract_strided_slice %136 {offsets = [2, 0], sizes = [1, 128], strides = [1, 1]} : vector<9x128xf32> to vector<1x128xf32>
    %199 = vector.broadcast %198 : vector<1x128xf32> to vector<64x128xf32>
    %200 = arith.mulf %197, %199 : vector<64x128xf32>
    %201 = arith.addf %189, %200 : vector<64x128xf32>
    %202 = vector.extract_strided_slice %135 {offsets = [7, 0], sizes = [57, 128], strides = [1, 1]} : vector<64x128xf32> to vector<57x128xf32>
    %cst_47 = arith.constant 0.000000e+00 : f32
    %203 = vector.broadcast %cst_47 : f32 to vector<7x128xf32>
    %204 = tpu.concatenate %202, %203 in 0 : vector<57x128xf32>, vector<7x128xf32> -> vector<64x128xf32>
    %c0_i32_48 = arith.constant 0 : i32
    %205 = arith.sitofp %c0_i32_48 : i32 to f32
    %206 = vector.shape_cast %18 : vector<64x1xi1> to vector<64x1xi1>
    %207 = vector.broadcast %206 : vector<64x1xi1> to vector<64x128xi1>
    %208 = vector.broadcast %205 : f32 to vector<64x128xf32>
    %209 = arith.select %207, %204, %208 : vector<64x128xi1>, vector<64x128xf32>
    %210 = vector.extract_strided_slice %136 {offsets = [6, 0], sizes = [1, 128], strides = [1, 1]} : vector<9x128xf32> to vector<1x128xf32>
    %211 = vector.broadcast %210 : vector<1x128xf32> to vector<64x128xf32>
    %212 = arith.mulf %209, %211 : vector<64x128xf32>
    %213 = arith.addf %201, %212 : vector<64x128xf32>
    %214 = vector.extract_strided_slice %135 {offsets = [9, 0], sizes = [55, 128], strides = [1, 1]} : vector<64x128xf32> to vector<55x128xf32>
    %cst_49 = arith.constant 0.000000e+00 : f32
    %215 = vector.broadcast %cst_49 : f32 to vector<9x128xf32>
    %216 = tpu.concatenate %214, %215 in 0 : vector<55x128xf32>, vector<9x128xf32> -> vector<64x128xf32>
    %c0_i32_50 = arith.constant 0 : i32
    %217 = arith.sitofp %c0_i32_50 : i32 to f32
    %218 = vector.shape_cast %20 : vector<64x1xi1> to vector<64x1xi1>
    %219 = vector.broadcast %218 : vector<64x1xi1> to vector<64x128xi1>
    %220 = vector.broadcast %217 : f32 to vector<64x128xf32>
    %221 = arith.select %219, %216, %220 : vector<64x128xi1>, vector<64x128xf32>
    %222 = vector.extract_strided_slice %136 {offsets = [8, 0], sizes = [1, 128], strides = [1, 1]} : vector<9x128xf32> to vector<1x128xf32>
    %223 = vector.broadcast %222 : vector<1x128xf32> to vector<64x128xf32>
    %224 = arith.mulf %221, %223 : vector<64x128xf32>
    %225 = arith.addf %213, %224 : vector<64x128xf32>
    %226 = arith.truncf %225 : vector<64x128xf32> to vector<64x128xbf16>
    %c0_51 = arith.constant 0 : index
    %c0_52 = arith.constant 0 : index
    %227 = vector.load %arg7[%c0_51, %c0_52] : memref<128x128xbf16, #tpu.memory_space<vmem>>, vector<128x128xbf16>
    %cst_53 = arith.constant dense<0.000000e+00> : vector<64x128xf32>
    %228 = tpu.matmul %226, %227, %cst_53 {dimension_numbers = #tpu.dot_dimension_numbers<[1], [0], [0], [1], [0, 0, 1, 1], [], []>} : vector<64x128xbf16>, vector<128x128xbf16>, vector<64x128xf32> -> vector<64x128xf32>
    %c0_54 = arith.constant 0 : index
    %c0_55 = arith.constant 0 : index
    %229 = vector.load %arg8[%c0_54, %c0_55] : memref<1x128xf32, #tpu.memory_space<vmem>>, vector<1x128xf32>
    %230 = vector.broadcast %229 : vector<1x128xf32> to vector<64x128xf32>
    %231 = arith.mulf %228, %230 : vector<64x128xf32>
    %c0_56 = arith.constant 0 : index
    %c0_57 = arith.constant 0 : index
    %232 = vector.load %arg9[%c0_56, %c0_57] : memref<1x128xf32, #tpu.memory_space<vmem>>, vector<1x128xf32>
    %233 = vector.broadcast %232 : vector<1x128xf32> to vector<64x128xf32>
    %234 = arith.addf %231, %233 : vector<64x128xf32>
    %cst_58 = arith.constant 0.000000e+00 : f32
    %235 = vector.broadcast %cst_58 : f32 to vector<64x128xf32>
    %236 = arith.maximumf %234, %235 : vector<64x128xf32>
    %c0_59 = arith.constant 0 : index
    %c0_60 = arith.constant 0 : index
    %237 = vector.load %arg10[%c0_59, %c0_60] : memref<1x128xf32, #tpu.memory_space<vmem>>, vector<1x128xf32>
    %238 = vector.broadcast %237 : vector<1x128xf32> to vector<64x128xf32>
    %239 = arith.mulf %236, %238 : vector<64x128xf32>
    %c0_61 = arith.constant 0 : index
    %c0_62 = arith.constant 0 : index
    %240 = vector.load %arg11[%c0_61, %c0_62] : memref<1x128xf32, #tpu.memory_space<vmem>>, vector<1x128xf32>
    %241 = vector.broadcast %240 : vector<1x128xf32> to vector<64x128xf32>
    %242 = arith.addf %239, %241 : vector<64x128xf32>
    %cst_63 = arith.constant 0.000000e+00 : f32
    %243 = vector.broadcast %cst_63 : f32 to vector<64x128xf32>
    %244 = arith.maximumf %242, %243 : vector<64x128xf32>
    %245 = arith.truncf %244 : vector<64x128xf32> to vector<64x128xbf16>
    %c0_64 = arith.constant 0 : index
    %c0_65 = arith.constant 0 : index
    %246 = vector.load %arg12[%c0_64, %c0_65] : memref<256x64xbf16, #tpu.memory_space<vmem>>, vector<64x64xbf16>
    %cst_66 = arith.constant dense<0.000000e+00> : vector<64x128xf32>
    %247 = tpu.matmul %246, %245, %cst_66 {dimension_numbers = #tpu.dot_dimension_numbers<[1], [0], [0], [1], [0, 0, 1, 1], [], []>} : vector<64x64xbf16>, vector<64x128xbf16>, vector<64x128xf32> -> vector<64x128xf32>
    %cst_67 = arith.constant 0.000000e+00 : f32
    %248 = vector.broadcast %cst_67 : f32 to vector<64x128xf32>
    %249 = arith.subf %248, %247 : vector<64x128xf32>
    %250 = math.exp %249 : vector<64x128xf32>
    %cst_68 = arith.constant 1.000000e+00 : f32
    %251 = vector.broadcast %cst_68 : f32 to vector<64x128xf32>
    %252 = arith.addf %251, %250 : vector<64x128xf32>
    %253 = tpu.reciprocal %252 {approx = true} : vector<64x128xf32> -> vector<64x128xf32>
    %c0_69 = arith.constant 0 : index
    %c0_70 = arith.constant 0 : index
    %c0_71 = arith.constant 0 : index
    %254 = vector.load %arg1[%c0_69, %c0_70, %c0_71] : memref<1x256x128xbf16, #tpu.memory_space<vmem>>, vector<1x64x128xbf16>
    %255 = vector.shape_cast %254 : vector<1x64x128xbf16> to vector<64x128xbf16>
    %256 = arith.extf %255 : vector<64x128xbf16> to vector<64x128xf32>
    %257 = arith.mulf %256, %253 : vector<64x128xf32>
    %c0_72 = arith.constant 0 : index
    %c0_73 = arith.constant 0 : index
    %258 = vector.load %arg34[%c0_72, %c0_73] : memref<256x128xf32, #tpu.memory_space<vmem>>, vector<64x128xf32>
    tpu.vector_store %arg34[%c0_72, %c0_73], %257 {strides = array<i32>} : memref<256x128xf32, #tpu.memory_space<vmem>>, vector<64x128xf32>,
    %c64_74 = arith.constant 64 : index
    %c0_75 = arith.constant 0 : index
    %259 = vector.load %arg12[%c64_74, %c0_75] : memref<256x64xbf16, #tpu.memory_space<vmem>>, vector<64x64xbf16>
    %cst_76 = arith.constant dense<0.000000e+00> : vector<64x128xf32>
    %260 = tpu.matmul %259, %245, %cst_76 {dimension_numbers = #tpu.dot_dimension_numbers<[1], [0], [0], [1], [0, 0, 1, 1], [], []>} : vector<64x64xbf16>, vector<64x128xbf16>, vector<64x128xf32> -> vector<64x128xf32>
    %cst_77 = arith.constant 0.000000e+00 : f32
    %261 = vector.broadcast %cst_77 : f32 to vector<64x128xf32>
    %262 = arith.subf %261, %260 : vector<64x128xf32>
    %263 = math.exp %262 : vector<64x128xf32>
    %cst_78 = arith.constant 1.000000e+00 : f32
    %264 = vector.broadcast %cst_78 : f32 to vector<64x128xf32>
    %265 = arith.addf %264, %263 : vector<64x128xf32>
    %266 = tpu.reciprocal %265 {approx = true} : vector<64x128xf32> -> vector<64x128xf32>
    %c0_79 = arith.constant 0 : index
    %c64_80 = arith.constant 64 : index
    %c0_81 = arith.constant 0 : index
    %267 = vector.load %arg1[%c0_79, %c64_80, %c0_81] : memref<1x256x128xbf16, #tpu.memory_space<vmem>>, vector<1x64x128xbf16>
    %268 = vector.shape_cast %267 : vector<1x64x128xbf16> to vector<64x128xbf16>
    %269 = arith.extf %268 : vector<64x128xbf16> to vector<64x128xf32>
    %270 = arith.mulf %269, %266 : vector<64x128xf32>
    %c64_82 = arith.constant 64 : index
    %c0_83 = arith.constant 0 : index
    %271 = vector.load %arg34[%c64_82, %c0_83] : memref<256x128xf32, #tpu.memory_space<vmem>>, vector<64x128xf32>
    tpu.vector_store %arg34[%c64_82, %c0_83], %270 {strides = array<i32>} : memref<256x128xf32, #tpu.memory_space<vmem>>, vector<64x128xf32>,
    %c128_84 = arith.constant 128 : index
    %c0_85 = arith.constant 0 : index
    %272 = vector.load %arg12[%c128_84, %c0_85] : memref<256x64xbf16, #tpu.memory_space<vmem>>, vector<64x64xbf16>
    %cst_86 = arith.constant dense<0.000000e+00> : vector<64x128xf32>
    %273 = tpu.matmul %272, %245, %cst_86 {dimension_numbers = #tpu.dot_dimension_numbers<[1], [0], [0], [1], [0, 0, 1, 1], [], []>} : vector<64x64xbf16>, vector<64x128xbf16>, vector<64x128xf32> -> vector<64x128xf32>
    %cst_87 = arith.constant 0.000000e+00 : f32
    %274 = vector.broadcast %cst_87 : f32 to vector<64x128xf32>
    %275 = arith.subf %274, %273 : vector<64x128xf32>
    %276 = math.exp %275 : vector<64x128xf32>
    %cst_88 = arith.constant 1.000000e+00 : f32
    %277 = vector.broadcast %cst_88 : f32 to vector<64x128xf32>
    %278 = arith.addf %277, %276 : vector<64x128xf32>
    %279 = tpu.reciprocal %278 {approx = true} : vector<64x128xf32> -> vector<64x128xf32>
    %c0_89 = arith.constant 0 : index
    %c128_90 = arith.constant 128 : index
    %c0_91 = arith.constant 0 : index
    %280 = vector.load %arg1[%c0_89, %c128_90, %c0_91] : memref<1x256x128xbf16, #tpu.memory_space<vmem>>, vector<1x64x128xbf16>
    %281 = vector.shape_cast %280 : vector<1x64x128xbf16> to vector<64x128xbf16>
    %282 = arith.extf %281 : vector<64x128xbf16> to vector<64x128xf32>
    %283 = arith.mulf %282, %279 : vector<64x128xf32>
    %c128_92 = arith.constant 128 : index
    %c0_93 = arith.constant 0 : index
    %284 = vector.load %arg34[%c128_92, %c0_93] : memref<256x128xf32, #tpu.memory_space<vmem>>, vector<64x128xf32>
    tpu.vector_store %arg34[%c128_92, %c0_93], %283 {strides = array<i32>} : memref<256x128xf32, #tpu.memory_space<vmem>>, vector<64x128xf32>,
    %c192_94 = arith.constant 192 : index
    %c0_95 = arith.constant 0 : index
    %285 = vector.load %arg12[%c192_94, %c0_95] : memref<256x64xbf16, #tpu.memory_space<vmem>>, vector<64x64xbf16>
    %cst_96 = arith.constant dense<0.000000e+00> : vector<64x128xf32>
    %286 = tpu.matmul %285, %245, %cst_96 {dimension_numbers = #tpu.dot_dimension_numbers<[1], [0], [0], [1], [0, 0, 1, 1], [], []>} : vector<64x64xbf16>, vector<64x128xbf16>, vector<64x128xf32> -> vector<64x128xf32>
    %cst_97 = arith.constant 0.000000e+00 : f32
    %287 = vector.broadcast %cst_97 : f32 to vector<64x128xf32>
    %288 = arith.subf %287, %286 : vector<64x128xf32>
    %289 = math.exp %288 : vector<64x128xf32>
    %cst_98 = arith.constant 1.000000e+00 : f32
    %290 = vector.broadcast %cst_98 : f32 to vector<64x128xf32>
    %291 = arith.addf %290, %289 : vector<64x128xf32>
    %292 = tpu.reciprocal %291 {approx = true} : vector<64x128xf32> -> vector<64x128xf32>
    %c0_99 = arith.constant 0 : index
    %c192_100 = arith.constant 192 : index
    %c0_101 = arith.constant 0 : index
    %293 = vector.load %arg1[%c0_99, %c192_100, %c0_101] : memref<1x256x128xbf16, #tpu.memory_space<vmem>>, vector<1x64x128xbf16>
    %294 = vector.shape_cast %293 : vector<1x64x128xbf16> to vector<64x128xbf16>
    %295 = arith.extf %294 : vector<64x128xbf16> to vector<64x128xf32>
    %296 = arith.mulf %295, %292 : vector<64x128xf32>
    %c192_102 = arith.constant 192 : index
    %c0_103 = arith.constant 0 : index
    %297 = vector.load %arg34[%c192_102, %c0_103] : memref<256x128xf32, #tpu.memory_space<vmem>>, vector<64x128xf32>
    tpu.vector_store %arg34[%c192_102, %c0_103], %296 {strides = array<i32>} : memref<256x128xf32, #tpu.memory_space<vmem>>, vector<64x128xf32>,
    %c0_104 = arith.constant 0 : index
    %c0_105 = arith.constant 0 : index
    %298 = vector.load %arg34[%c0_104, %c0_105] : memref<256x128xf32, #tpu.memory_space<vmem>>, vector<64x128xf32>
    %c64_106 = arith.constant 64 : index
    %c0_107 = arith.constant 0 : index
    %299 = vector.load %arg34[%c64_106, %c0_107] : memref<256x128xf32, #tpu.memory_space<vmem>>, vector<64x128xf32>
    %c128_108 = arith.constant 128 : index
    %c0_109 = arith.constant 0 : index
    %300 = vector.load %arg34[%c128_108, %c0_109] : memref<256x128xf32, #tpu.memory_space<vmem>>, vector<64x128xf32>
    %c192_110 = arith.constant 192 : index
    %c0_111 = arith.constant 0 : index
    %301 = vector.load %arg34[%c192_110, %c0_111] : memref<256x128xf32, #tpu.memory_space<vmem>>, vector<64x128xf32>
    %c0_112 = arith.constant 0 : index
    %c0_113 = arith.constant 0 : index
    %302 = vector.load %arg13[%c0_112, %c0_113] : memref<9x128xf32, #tpu.memory_space<vmem>>, vector<9x128xf32>
    %303 = vector.extract_strided_slice %302 {offsets = [4, 0], sizes = [1, 128], strides = [1, 1]} : vector<9x128xf32> to vector<1x128xf32>
    %304 = vector.broadcast %303 : vector<1x128xf32> to vector<64x128xf32>
    %305 = arith.mulf %298, %304 : vector<64x128xf32>
    %306 = vector.extract_strided_slice %302 {offsets = [5, 0], sizes = [1, 128], strides = [1, 1]} : vector<9x128xf32> to vector<1x128xf32>
    %307 = vector.broadcast %306 : vector<1x128xf32> to vector<64x128xf32>
    %308 = arith.mulf %299, %307 : vector<64x128xf32>
    %309 = arith.addf %305, %308 : vector<64x128xf32>
    %310 = vector.extract_strided_slice %302 {offsets = [7, 0], sizes = [1, 128], strides = [1, 1]} : vector<9x128xf32> to vector<1x128xf32>
    %311 = vector.broadcast %310 : vector<1x128xf32> to vector<64x128xf32>
    %312 = arith.mulf %300, %311 : vector<64x128xf32>
    %313 = arith.addf %309, %312 : vector<64x128xf32>
    %314 = vector.extract_strided_slice %302 {offsets = [8, 0], sizes = [1, 128], strides = [1, 1]} : vector<9x128xf32> to vector<1x128xf32>
    %315 = vector.broadcast %314 : vector<1x128xf32> to vector<64x128xf32>
    %316 = arith.mulf %301, %315 : vector<64x128xf32>
    %317 = arith.addf %313, %316 : vector<64x128xf32>
    %cst_114 = arith.constant 0.000000e+00 : f32
    %318 = vector.broadcast %cst_114 : f32 to vector<8x128xf32>
    %319 = vector.extract_strided_slice %300 {offsets = [0, 0], sizes = [56, 128], strides = [1, 1]} : vector<64x128xf32> to vector<56x128xf32>
    %320 = tpu.concatenate %318, %319 in 0 : vector<8x128xf32>, vector<56x128xf32> -> vector<64x128xf32>
    %321 = vector.extract_strided_slice %302 {offsets = [1, 0], sizes = [1, 128], strides = [1, 1]} : vector<9x128xf32> to vector<1x128xf32>
    %322 = vector.broadcast %321 : vector<1x128xf32> to vector<64x128xf32>
    %323 = arith.mulf %320, %322 : vector<64x128xf32>
    %324 = arith.addf %317, %323 : vector<64x128xf32>
    %cst_115 = arith.constant 0.000000e+00 : f32
    %325 = vector.broadcast %cst_115 : f32 to vector<8x128xf32>
    %326 = vector.extract_strided_slice %301 {offsets = [0, 0], sizes = [56, 128], strides = [1, 1]} : vector<64x128xf32> to vector<56x128xf32>
    %327 = tpu.concatenate %325, %326 in 0 : vector<8x128xf32>, vector<56x128xf32> -> vector<64x128xf32>
    %328 = vector.extract_strided_slice %302 {offsets = [2, 0], sizes = [1, 128], strides = [1, 1]} : vector<9x128xf32> to vector<1x128xf32>
    %329 = vector.broadcast %328 : vector<1x128xf32> to vector<64x128xf32>
    %330 = arith.mulf %327, %329 : vector<64x128xf32>
    %331 = arith.addf %324, %330 : vector<64x128xf32>
    %cst_116 = arith.constant 0.000000e+00 : f32
    %332 = vector.broadcast %cst_116 : f32 to vector<1x128xf32>
    %333 = vector.extract_strided_slice %299 {offsets = [0, 0], sizes = [63, 128], strides = [1, 1]} : vector<64x128xf32> to vector<63x128xf32>
    %334 = tpu.concatenate %332, %333 in 0 : vector<1x128xf32>, vector<63x128xf32> -> vector<64x128xf32>
    %c0_i32_117 = arith.constant 0 : i32
    %335 = arith.sitofp %c0_i32_117 : i32 to f32
    %336 = vector.shape_cast %18 : vector<64x1xi1> to vector<64x1xi1>
    %337 = vector.broadcast %336 : vector<64x1xi1> to vector<64x128xi1>
    %338 = vector.broadcast %335 : f32 to vector<64x128xf32>
    %339 = arith.select %337, %334, %338 : vector<64x128xi1>, vector<64x128xf32>
    %340 = vector.extract_strided_slice %302 {offsets = [3, 0], sizes = [1, 128], strides = [1, 1]} : vector<9x128xf32> to vector<1x128xf32>
    %341 = vector.broadcast %340 : vector<1x128xf32> to vector<64x128xf32>
    %342 = arith.mulf %339, %341 : vector<64x128xf32>
    %343 = arith.addf %331, %342 : vector<64x128xf32>
    %cst_118 = arith.constant 0.000000e+00 : f32
    %344 = vector.broadcast %cst_118 : f32 to vector<1x128xf32>
    %345 = vector.extract_strided_slice %301 {offsets = [0, 0], sizes = [63, 128], strides = [1, 1]} : vector<64x128xf32> to vector<63x128xf32>
    %346 = tpu.concatenate %344, %345 in 0 : vector<1x128xf32>, vector<63x128xf32> -> vector<64x128xf32>
    %c0_i32_119 = arith.constant 0 : i32
    %347 = arith.sitofp %c0_i32_119 : i32 to f32
    %348 = vector.shape_cast %18 : vector<64x1xi1> to vector<64x1xi1>
    %349 = vector.broadcast %348 : vector<64x1xi1> to vector<64x128xi1>
    %350 = vector.broadcast %347 : f32 to vector<64x128xf32>
    %351 = arith.select %349, %346, %350 : vector<64x128xi1>, vector<64x128xf32>
    %352 = vector.extract_strided_slice %302 {offsets = [6, 0], sizes = [1, 128], strides = [1, 1]} : vector<9x128xf32> to vector<1x128xf32>
    %353 = vector.broadcast %352 : vector<1x128xf32> to vector<64x128xf32>
    %354 = arith.mulf %351, %353 : vector<64x128xf32>
    %355 = arith.addf %343, %354 : vector<64x128xf32>
    %cst_120 = arith.constant 0.000000e+00 : f32
    %356 = vector.broadcast %cst_120 : f32 to vector<9x128xf32>
    %357 = vector.extract_strided_slice %301 {offsets = [0, 0], sizes = [55, 128], strides = [1, 1]} : vector<64x128xf32> to vector<55x128xf32>
    %358 = tpu.concatenate %356, %357 in 0 : vector<9x128xf32>, vector<55x128xf32> -> vector<64x128xf32>
    %c0_i32_121 = arith.constant 0 : i32
    %359 = arith.sitofp %c0_i32_121 : i32 to f32
    %360 = vector.shape_cast %18 : vector<64x1xi1> to vector<64x1xi1>
    %361 = vector.broadcast %360 : vector<64x1xi1> to vector<64x128xi1>
    %362 = vector.broadcast %359 : f32 to vector<64x128xf32>
    %363 = arith.select %361, %358, %362 : vector<64x128xi1>, vector<64x128xf32>
    %364 = vector.extract_strided_slice %302 {offsets = [0, 0], sizes = [1, 128], strides = [1, 1]} : vector<9x128xf32> to vector<1x128xf32>
    %365 = vector.broadcast %364 : vector<1x128xf32> to vector<64x128xf32>
    %366 = arith.mulf %363, %365 : vector<64x128xf32>
    %367 = arith.addf %355, %366 : vector<64x128xf32>
    %368 = arith.truncf %367 : vector<64x128xf32> to vector<64x128xbf16>
    %c0_122 = arith.constant 0 : index
    %c0_123 = arith.constant 0 : index
    %369 = vector.load %arg14[%c0_122, %c0_123] : memref<128x128xbf16, #tpu.memory_space<vmem>>, vector<128x128xbf16>
    %cst_124 = arith.constant dense<0.000000e+00> : vector<64x128xf32>
    %370 = tpu.matmul %368, %369, %cst_124 {dimension_numbers = #tpu.dot_dimension_numbers<[1], [0], [0], [1], [0, 0, 1, 1], [], []>} : vector<64x128xbf16>, vector<128x128xbf16>, vector<64x128xf32> -> vector<64x128xf32>
    %c0_125 = arith.constant 0 : index
    %c0_126 = arith.constant 0 : index
    %371 = vector.load %arg15[%c0_125, %c0_126] : memref<1x128xf32, #tpu.memory_space<vmem>>, vector<1x128xf32>
    %372 = vector.broadcast %371 : vector<1x128xf32> to vector<64x128xf32>
    %373 = arith.mulf %370, %372 : vector<64x128xf32>
    %c0_127 = arith.constant 0 : index
    %c0_128 = arith.constant 0 : index
    %374 = vector.load %arg16[%c0_127, %c0_128] : memref<1x128xf32, #tpu.memory_space<vmem>>, vector<1x128xf32>
    %375 = vector.broadcast %374 : vector<1x128xf32> to vector<64x128xf32>
    %376 = arith.addf %373, %375 : vector<64x128xf32>
    %cst_129 = arith.constant 0.000000e+00 : f32
    %377 = vector.broadcast %cst_129 : f32 to vector<64x128xf32>
    %378 = arith.maximumf %376, %377 : vector<64x128xf32>
    %c0_130 = arith.constant 0 : index
    %c0_131 = arith.constant 0 : index
    %379 = vector.load %arg17[%c0_130, %c0_131] : memref<9x128xf32, #tpu.memory_space<vmem>>, vector<9x128xf32>
    %380 = vector.extract_strided_slice %379 {offsets = [4, 0], sizes = [1, 128], strides = [1, 1]} : vector<9x128xf32> to vector<1x128xf32>
    %381 = vector.broadcast %380 : vector<1x128xf32> to vector<64x128xf32>
    %382 = arith.mulf %378, %381 : vector<64x128xf32>
    %cst_132 = arith.constant 0.000000e+00 : f32
    %383 = vector.broadcast %cst_132 : f32 to vector<1x128xf32>
    %384 = vector.extract_strided_slice %378 {offsets = [0, 0], sizes = [63, 128], strides = [1, 1]} : vector<64x128xf32> to vector<63x128xf32>
    %385 = tpu.concatenate %383, %384 in 0 : vector<1x128xf32>, vector<63x128xf32> -> vector<64x128xf32>
    %c0_i32_133 = arith.constant 0 : i32
    %386 = arith.sitofp %c0_i32_133 : i32 to f32
    %387 = vector.shape_cast %18 : vector<64x1xi1> to vector<64x1xi1>
    %388 = vector.broadcast %387 : vector<64x1xi1> to vector<64x128xi1>
    %389 = vector.broadcast %386 : f32 to vector<64x128xf32>
    %390 = arith.select %388, %385, %389 : vector<64x128xi1>, vector<64x128xf32>
    %391 = vector.extract_strided_slice %379 {offsets = [3, 0], sizes = [1, 128], strides = [1, 1]} : vector<9x128xf32> to vector<1x128xf32>
    %392 = vector.broadcast %391 : vector<1x128xf32> to vector<64x128xf32>
    %393 = arith.mulf %390, %392 : vector<64x128xf32>
    %394 = arith.addf %382, %393 : vector<64x128xf32>
    %395 = vector.extract_strided_slice %378 {offsets = [1, 0], sizes = [63, 128], strides = [1, 1]} : vector<64x128xf32> to vector<63x128xf32>
    %cst_134 = arith.constant 0.000000e+00 : f32
    %396 = vector.broadcast %cst_134 : f32 to vector<1x128xf32>
    %397 = tpu.concatenate %395, %396 in 0 : vector<63x128xf32>, vector<1x128xf32> -> vector<64x128xf32>
    %c0_i32_135 = arith.constant 0 : i32
    %398 = arith.sitofp %c0_i32_135 : i32 to f32
    %399 = vector.shape_cast %20 : vector<64x1xi1> to vector<64x1xi1>
    %400 = vector.broadcast %399 : vector<64x1xi1> to vector<64x128xi1>
    %401 = vector.broadcast %398 : f32 to vector<64x128xf32>
    %402 = arith.select %400, %397, %401 : vector<64x128xi1>, vector<64x128xf32>
    %403 = vector.extract_strided_slice %379 {offsets = [5, 0], sizes = [1, 128], strides = [1, 1]} : vector<9x128xf32> to vector<1x128xf32>
    %404 = vector.broadcast %403 : vector<1x128xf32> to vector<64x128xf32>
    %405 = arith.mulf %402, %404 : vector<64x128xf32>
    %406 = arith.addf %394, %405 : vector<64x128xf32>
    %cst_136 = arith.constant 0.000000e+00 : f32
    %407 = vector.broadcast %cst_136 : f32 to vector<8x128xf32>
    %408 = vector.extract_strided_slice %378 {offsets = [0, 0], sizes = [56, 128], strides = [1, 1]} : vector<64x128xf32> to vector<56x128xf32>
    %409 = tpu.concatenate %407, %408 in 0 : vector<8x128xf32>, vector<56x128xf32> -> vector<64x128xf32>
    %410 = vector.extract_strided_slice %379 {offsets = [1, 0], sizes = [1, 128], strides = [1, 1]} : vector<9x128xf32> to vector<1x128xf32>
    %411 = vector.broadcast %410 : vector<1x128xf32> to vector<64x128xf32>
    %412 = arith.mulf %409, %411 : vector<64x128xf32>
    %413 = arith.addf %406, %412 : vector<64x128xf32>
    %414 = vector.extract_strided_slice %378 {offsets = [8, 0], sizes = [56, 128], strides = [1, 1]} : vector<64x128xf32> to vector<56x128xf32>
    %cst_137 = arith.constant 0.000000e+00 : f32
    %415 = vector.broadcast %cst_137 : f32 to vector<8x128xf32>
    %416 = tpu.concatenate %414, %415 in 0 : vector<56x128xf32>, vector<8x128xf32> -> vector<64x128xf32>
    %417 = vector.extract_strided_slice %379 {offsets = [7, 0], sizes = [1, 128], strides = [1, 1]} : vector<9x128xf32> to vector<1x128xf32>
    %418 = vector.broadcast %417 : vector<1x128xf32> to vector<64x128xf32>
    %419 = arith.mulf %416, %418 : vector<64x128xf32>
    %420 = arith.addf %413, %419 : vector<64x128xf32>
    %cst_138 = arith.constant 0.000000e+00 : f32
    %421 = vector.broadcast %cst_138 : f32 to vector<9x128xf32>
    %422 = vector.extract_strided_slice %378 {offsets = [0, 0], sizes = [55, 128], strides = [1, 1]} : vector<64x128xf32> to vector<55x128xf32>
    %423 = tpu.concatenate %421, %422 in 0 : vector<9x128xf32>, vector<55x128xf32> -> vector<64x128xf32>
    %c0_i32_139 = arith.constant 0 : i32
    %424 = arith.sitofp %c0_i32_139 : i32 to f32
    %425 = vector.shape_cast %18 : vector<64x1xi1> to vector<64x1xi1>
    %426 = vector.broadcast %425 : vector<64x1xi1> to vector<64x128xi1>
    %427 = vector.broadcast %424 : f32 to vector<64x128xf32>
    %428 = arith.select %426, %423, %427 : vector<64x128xi1>, vector<64x128xf32>
    %429 = vector.extract_strided_slice %379 {offsets = [0, 0], sizes = [1, 128], strides = [1, 1]} : vector<9x128xf32> to vector<1x128xf32>
    %430 = vector.broadcast %429 : vector<1x128xf32> to vector<64x128xf32>
    %431 = arith.mulf %428, %430 : vector<64x128xf32>
    %432 = arith.addf %420, %431 : vector<64x128xf32>
    %cst_140 = arith.constant 0.000000e+00 : f32
    %433 = vector.broadcast %cst_140 : f32 to vector<7x128xf32>
    %434 = vector.extract_strided_slice %378 {offsets = [0, 0], sizes = [57, 128], strides = [1, 1]} : vector<64x128xf32> to vector<57x128xf32>
    %435 = tpu.concatenate %433, %434 in 0 : vector<7x128xf32>, vector<57x128xf32> -> vector<64x128xf32>
    %c0_i32_141 = arith.constant 0 : i32
    %436 = arith.sitofp %c0_i32_141 : i32 to f32
    %437 = vector.shape_cast %20 : vector<64x1xi1> to vector<64x1xi1>
    %438 = vector.broadcast %437 : vector<64x1xi1> to vector<64x128xi1>
    %439 = vector.broadcast %436 : f32 to vector<64x128xf32>
    %440 = arith.select %438, %435, %439 : vector<64x128xi1>, vector<64x128xf32>
    %441 = vector.extract_strided_slice %379 {offsets = [2, 0], sizes = [1, 128], strides = [1, 1]} : vector<9x128xf32> to vector<1x128xf32>
    %442 = vector.broadcast %441 : vector<1x128xf32> to vector<64x128xf32>
    %443 = arith.mulf %440, %442 : vector<64x128xf32>
    %444 = arith.addf %432, %443 : vector<64x128xf32>
    %445 = vector.extract_strided_slice %378 {offsets = [7, 0], sizes = [57, 128], strides = [1, 1]} : vector<64x128xf32> to vector<57x128xf32>
    %cst_142 = arith.constant 0.000000e+00 : f32
    %446 = vector.broadcast %cst_142 : f32 to vector<7x128xf32>
    %447 = tpu.concatenate %445, %446 in 0 : vector<57x128xf32>, vector<7x128xf32> -> vector<64x128xf32>
    %c0_i32_143 = arith.constant 0 : i32
    %448 = arith.sitofp %c0_i32_143 : i32 to f32
    %449 = vector.shape_cast %18 : vector<64x1xi1> to vector<64x1xi1>
    %450 = vector.broadcast %449 : vector<64x1xi1> to vector<64x128xi1>
    %451 = vector.broadcast %448 : f32 to vector<64x128xf32>
    %452 = arith.select %450, %447, %451 : vector<64x128xi1>, vector<64x128xf32>
    %453 = vector.extract_strided_slice %379 {offsets = [6, 0], sizes = [1, 128], strides = [1, 1]} : vector<9x128xf32> to vector<1x128xf32>
    %454 = vector.broadcast %453 : vector<1x128xf32> to vector<64x128xf32>
    %455 = arith.mulf %452, %454 : vector<64x128xf32>
    %456 = arith.addf %444, %455 : vector<64x128xf32>
    %457 = vector.extract_strided_slice %378 {offsets = [9, 0], sizes = [55, 128], strides = [1, 1]} : vector<64x128xf32> to vector<55x128xf32>
    %cst_144 = arith.constant 0.000000e+00 : f32
    %458 = vector.broadcast %cst_144 : f32 to vector<9x128xf32>
    %459 = tpu.concatenate %457, %458 in 0 : vector<55x128xf32>, vector<9x128xf32> -> vector<64x128xf32>
    %c0_i32_145 = arith.constant 0 : i32
    %460 = arith.sitofp %c0_i32_145 : i32 to f32
    %461 = vector.shape_cast %20 : vector<64x1xi1> to vector<64x1xi1>
    %462 = vector.broadcast %461 : vector<64x1xi1> to vector<64x128xi1>
    %463 = vector.broadcast %460 : f32 to vector<64x128xf32>
    %464 = arith.select %462, %459, %463 : vector<64x128xi1>, vector<64x128xf32>
    %465 = vector.extract_strided_slice %379 {offsets = [8, 0], sizes = [1, 128], strides = [1, 1]} : vector<9x128xf32> to vector<1x128xf32>
    %466 = vector.broadcast %465 : vector<1x128xf32> to vector<64x128xf32>
    %467 = arith.mulf %464, %466 : vector<64x128xf32>
    %468 = arith.addf %456, %467 : vector<64x128xf32>
    %c0_146 = arith.constant 0 : index
    %c0_147 = arith.constant 0 : index
    %469 = vector.load %arg21[%c0_146, %c0_147] : memref<64x64xbf16, #tpu.memory_space<vmem>>, vector<64x64xbf16>
    %470 = arith.truncf %468 : vector<64x128xf32> to vector<64x128xbf16>
    %cst_148 = arith.constant dense<0.000000e+00> : vector<64x128xf32>
    %471 = tpu.matmul %469, %470, %cst_148 {dimension_numbers = #tpu.dot_dimension_numbers<[1], [0], [0], [1], [0, 0, 1, 1], [], []>} : vector<64x64xbf16>, vector<64x128xbf16>, vector<64x128xf32> -> vector<64x128xf32>
    %472 = arith.truncf %471 : vector<64x128xf32> to vector<64x128xbf16>
    %c0_149 = arith.constant 0 : index
    %c0_150 = arith.constant 0 : index
    %473 = vector.load %arg18[%c0_149, %c0_150] : memref<128x256xbf16, #tpu.memory_space<vmem>>, vector<128x256xbf16>
    %cst_151 = arith.constant dense<0.000000e+00> : vector<64x256xf32>
    %474 = tpu.matmul %472, %473, %cst_151 {dimension_numbers = #tpu.dot_dimension_numbers<[1], [0], [0], [1], [0, 0, 1, 1], [], []>} : vector<64x128xbf16>, vector<128x256xbf16>, vector<64x256xf32> -> vector<64x256xf32>
    %c0_152 = arith.constant 0 : index
    %c0_153 = arith.constant 0 : index
    %475 = vector.load %arg19[%c0_152, %c0_153] : memref<1x256xf32, #tpu.memory_space<vmem>>, vector<1x256xf32>
    %476 = vector.broadcast %475 : vector<1x256xf32> to vector<64x256xf32>
    %477 = arith.mulf %474, %476 : vector<64x256xf32>
    %c0_154 = arith.constant 0 : index
    %c0_155 = arith.constant 0 : index
    %478 = vector.load %arg20[%c0_154, %c0_155] : memref<1x256xf32, #tpu.memory_space<vmem>>, vector<1x256xf32>
    %479 = vector.broadcast %478 : vector<1x256xf32> to vector<64x256xf32>
    %480 = arith.addf %477, %479 : vector<64x256xf32>
    %cst_156 = arith.constant 0.000000e+00 : f32
    %481 = vector.broadcast %cst_156 : f32 to vector<64x256xf32>
    %482 = arith.maximumf %480, %481 : vector<64x256xf32>
    %483 = vector.extract_strided_slice %482 {offsets = [0, 0], sizes = [16, 256], strides = [1, 1]} : vector<64x256xf32> to vector<16x256xf32>
    %484 = vector.extract_strided_slice %482 {offsets = [16, 0], sizes = [16, 256], strides = [1, 1]} : vector<64x256xf32> to vector<16x256xf32>
    %485 = vector.extract_strided_slice %482 {offsets = [32, 0], sizes = [16, 256], strides = [1, 1]} : vector<64x256xf32> to vector<16x256xf32>
    %486 = vector.extract_strided_slice %482 {offsets = [48, 0], sizes = [16, 256], strides = [1, 1]} : vector<64x256xf32> to vector<16x256xf32>
    %c0_157 = arith.constant 0 : index
    %c0_158 = arith.constant 0 : index
    %487 = vector.load %arg22[%c0_157, %c0_158] : memref<9x256xf32, #tpu.memory_space<vmem>>, vector<9x256xf32>
    %488 = vector.extract_strided_slice %487 {offsets = [4, 0], sizes = [1, 256], strides = [1, 1]} : vector<9x256xf32> to vector<1x256xf32>
    %489 = vector.broadcast %488 : vector<1x256xf32> to vector<16x256xf32>
    %490 = arith.mulf %483, %489 : vector<16x256xf32>
    %491 = vector.extract_strided_slice %487 {offsets = [5, 0], sizes = [1, 256], strides = [1, 1]} : vector<9x256xf32> to vector<1x256xf32>
    %492 = vector.broadcast %491 : vector<1x256xf32> to vector<16x256xf32>
    %493 = arith.mulf %484, %492 : vector<16x256xf32>
    %494 = arith.addf %490, %493 : vector<16x256xf32>
    %495 = vector.extract_strided_slice %487 {offsets = [7, 0], sizes = [1, 256], strides = [1, 1]} : vector<9x256xf32> to vector<1x256xf32>
    %496 = vector.broadcast %495 : vector<1x256xf32> to vector<16x256xf32>
    %497 = arith.mulf %485, %496 : vector<16x256xf32>
    %498 = arith.addf %494, %497 : vector<16x256xf32>
    %499 = vector.extract_strided_slice %487 {offsets = [8, 0], sizes = [1, 256], strides = [1, 1]} : vector<9x256xf32> to vector<1x256xf32>
    %500 = vector.broadcast %499 : vector<1x256xf32> to vector<16x256xf32>
    %501 = arith.mulf %486, %500 : vector<16x256xf32>
    %502 = arith.addf %498, %501 : vector<16x256xf32>
    %cst_159 = arith.constant 0.000000e+00 : f32
    %503 = vector.broadcast %cst_159 : f32 to vector<4x256xf32>
    %504 = vector.extract_strided_slice %485 {offsets = [0, 0], sizes = [12, 256], strides = [1, 1]} : vector<16x256xf32> to vector<12x256xf32>
    %505 = tpu.concatenate %503, %504 in 0 : vector<4x256xf32>, vector<12x256xf32> -> vector<16x256xf32>
    %506 = vector.extract_strided_slice %487 {offsets = [1, 0], sizes = [1, 256], strides = [1, 1]} : vector<9x256xf32> to vector<1x256xf32>
    %507 = vector.broadcast %506 : vector<1x256xf32> to vector<16x256xf32>
    %508 = arith.mulf %505, %507 : vector<16x256xf32>
    %509 = arith.addf %502, %508 : vector<16x256xf32>
    %cst_160 = arith.constant 0.000000e+00 : f32
    %510 = vector.broadcast %cst_160 : f32 to vector<4x256xf32>
    %511 = vector.extract_strided_slice %486 {offsets = [0, 0], sizes = [12, 256], strides = [1, 1]} : vector<16x256xf32> to vector<12x256xf32>
    %512 = tpu.concatenate %510, %511 in 0 : vector<4x256xf32>, vector<12x256xf32> -> vector<16x256xf32>
    %513 = vector.extract_strided_slice %487 {offsets = [2, 0], sizes = [1, 256], strides = [1, 1]} : vector<9x256xf32> to vector<1x256xf32>
    %514 = vector.broadcast %513 : vector<1x256xf32> to vector<16x256xf32>
    %515 = arith.mulf %512, %514 : vector<16x256xf32>
    %516 = arith.addf %509, %515 : vector<16x256xf32>
    %cst_161 = arith.constant 0.000000e+00 : f32
    %517 = vector.broadcast %cst_161 : f32 to vector<1x256xf32>
    %518 = vector.extract_strided_slice %484 {offsets = [0, 0], sizes = [15, 256], strides = [1, 1]} : vector<16x256xf32> to vector<15x256xf32>
    %519 = tpu.concatenate %517, %518 in 0 : vector<1x256xf32>, vector<15x256xf32> -> vector<16x256xf32>
    %c0_i32_162 = arith.constant 0 : i32
    %520 = arith.sitofp %c0_i32_162 : i32 to f32
    %521 = vector.shape_cast %39 : vector<16x1xi1> to vector<16x1xi1>
    %522 = vector.broadcast %521 : vector<16x1xi1> to vector<16x256xi1>
    %523 = vector.broadcast %520 : f32 to vector<16x256xf32>
    %524 = arith.select %522, %519, %523 : vector<16x256xi1>, vector<16x256xf32>
    %525 = vector.extract_strided_slice %487 {offsets = [3, 0], sizes = [1, 256], strides = [1, 1]} : vector<9x256xf32> to vector<1x256xf32>
    %526 = vector.broadcast %525 : vector<1x256xf32> to vector<16x256xf32>
    %527 = arith.mulf %524, %526 : vector<16x256xf32>
    %528 = arith.addf %516, %527 : vector<16x256xf32>
    %cst_163 = arith.constant 0.000000e+00 : f32
    %529 = vector.broadcast %cst_163 : f32 to vector<1x256xf32>
    %530 = vector.extract_strided_slice %486 {offsets = [0, 0], sizes = [15, 256], strides = [1, 1]} : vector<16x256xf32> to vector<15x256xf32>
    %531 = tpu.concatenate %529, %530 in 0 : vector<1x256xf32>, vector<15x256xf32> -> vector<16x256xf32>
    %c0_i32_164 = arith.constant 0 : i32
    %532 = arith.sitofp %c0_i32_164 : i32 to f32
    %533 = vector.shape_cast %39 : vector<16x1xi1> to vector<16x1xi1>
    %534 = vector.broadcast %533 : vector<16x1xi1> to vector<16x256xi1>
    %535 = vector.broadcast %532 : f32 to vector<16x256xf32>
    %536 = arith.select %534, %531, %535 : vector<16x256xi1>, vector<16x256xf32>
    %537 = vector.extract_strided_slice %487 {offsets = [6, 0], sizes = [1, 256], strides = [1, 1]} : vector<9x256xf32> to vector<1x256xf32>
    %538 = vector.broadcast %537 : vector<1x256xf32> to vector<16x256xf32>
    %539 = arith.mulf %536, %538 : vector<16x256xf32>
    %540 = arith.addf %528, %539 : vector<16x256xf32>
    %cst_165 = arith.constant 0.000000e+00 : f32
    %541 = vector.broadcast %cst_165 : f32 to vector<5x256xf32>
    %542 = vector.extract_strided_slice %486 {offsets = [0, 0], sizes = [11, 256], strides = [1, 1]} : vector<16x256xf32> to vector<11x256xf32>
    %543 = tpu.concatenate %541, %542 in 0 : vector<5x256xf32>, vector<11x256xf32> -> vector<16x256xf32>
    %c0_i32_166 = arith.constant 0 : i32
    %544 = arith.sitofp %c0_i32_166 : i32 to f32
    %545 = vector.shape_cast %39 : vector<16x1xi1> to vector<16x1xi1>
    %546 = vector.broadcast %545 : vector<16x1xi1> to vector<16x256xi1>
    %547 = vector.broadcast %544 : f32 to vector<16x256xf32>
    %548 = arith.select %546, %543, %547 : vector<16x256xi1>, vector<16x256xf32>
    %549 = vector.extract_strided_slice %487 {offsets = [0, 0], sizes = [1, 256], strides = [1, 1]} : vector<9x256xf32> to vector<1x256xf32>
    %550 = vector.broadcast %549 : vector<1x256xf32> to vector<16x256xf32>
    %551 = arith.mulf %548, %550 : vector<16x256xf32>
    %552 = arith.addf %540, %551 : vector<16x256xf32>
    %553 = arith.truncf %552 : vector<16x256xf32> to vector<16x256xbf16>
    %c0_167 = arith.constant 0 : index
    %c0_168 = arith.constant 0 : index
    %554 = vector.load %arg23[%c0_167, %c0_168] : memref<256x256xbf16, #tpu.memory_space<vmem>>, vector<256x256xbf16>
    %cst_169 = arith.constant dense<0.000000e+00> : vector<16x256xf32>
    %555 = tpu.matmul %553, %554, %cst_169 {dimension_numbers = #tpu.dot_dimension_numbers<[1], [0], [0], [1], [0, 0, 1, 1], [], []>} : vector<16x256xbf16>, vector<256x256xbf16>, vector<16x256xf32> -> vector<16x256xf32>
    %c0_170 = arith.constant 0 : index
    %c0_171 = arith.constant 0 : index
    %556 = vector.load %arg24[%c0_170, %c0_171] : memref<1x256xf32, #tpu.memory_space<vmem>>, vector<1x256xf32>
    %557 = vector.broadcast %556 : vector<1x256xf32> to vector<16x256xf32>
    %558 = arith.mulf %555, %557 : vector<16x256xf32>
    %c0_172 = arith.constant 0 : index
    %c0_173 = arith.constant 0 : index
    %559 = vector.load %arg25[%c0_172, %c0_173] : memref<1x256xf32, #tpu.memory_space<vmem>>, vector<1x256xf32>
    %560 = vector.broadcast %559 : vector<1x256xf32> to vector<16x256xf32>
    %561 = arith.addf %558, %560 : vector<16x256xf32>
    %cst_174 = arith.constant 0.000000e+00 : f32
    %562 = vector.broadcast %cst_174 : f32 to vector<16x256xf32>
    %563 = arith.maximumf %561, %562 : vector<16x256xf32>
    %c0_175 = arith.constant 0 : index
    %c0_176 = arith.constant 0 : index
    %564 = vector.load %arg26[%c0_175, %c0_176] : memref<9x256xf32, #tpu.memory_space<vmem>>, vector<9x256xf32>
    %565 = vector.extract_strided_slice %564 {offsets = [4, 0], sizes = [1, 256], strides = [1, 1]} : vector<9x256xf32> to vector<1x256xf32>
    %566 = vector.broadcast %565 : vector<1x256xf32> to vector<16x256xf32>
    %567 = arith.mulf %563, %566 : vector<16x256xf32>
    %cst_177 = arith.constant 0.000000e+00 : f32
    %568 = vector.broadcast %cst_177 : f32 to vector<1x256xf32>
    %569 = vector.extract_strided_slice %563 {offsets = [0, 0], sizes = [15, 256], strides = [1, 1]} : vector<16x256xf32> to vector<15x256xf32>
    %570 = tpu.concatenate %568, %569 in 0 : vector<1x256xf32>, vector<15x256xf32> -> vector<16x256xf32>
    %c0_i32_178 = arith.constant 0 : i32
    %571 = arith.sitofp %c0_i32_178 : i32 to f32
    %572 = vector.shape_cast %39 : vector<16x1xi1> to vector<16x1xi1>
    %573 = vector.broadcast %572 : vector<16x1xi1> to vector<16x256xi1>
    %574 = vector.broadcast %571 : f32 to vector<16x256xf32>
    %575 = arith.select %573, %570, %574 : vector<16x256xi1>, vector<16x256xf32>
    %576 = vector.extract_strided_slice %564 {offsets = [3, 0], sizes = [1, 256], strides = [1, 1]} : vector<9x256xf32> to vector<1x256xf32>
    %577 = vector.broadcast %576 : vector<1x256xf32> to vector<16x256xf32>
    %578 = arith.mulf %575, %577 : vector<16x256xf32>
    %579 = arith.addf %567, %578 : vector<16x256xf32>
    %580 = vector.extract_strided_slice %563 {offsets = [1, 0], sizes = [15, 256], strides = [1, 1]} : vector<16x256xf32> to vector<15x256xf32>
    %cst_179 = arith.constant 0.000000e+00 : f32
    %581 = vector.broadcast %cst_179 : f32 to vector<1x256xf32>
    %582 = tpu.concatenate %580, %581 in 0 : vector<15x256xf32>, vector<1x256xf32> -> vector<16x256xf32>
    %c0_i32_180 = arith.constant 0 : i32
    %583 = arith.sitofp %c0_i32_180 : i32 to f32
    %584 = vector.shape_cast %41 : vector<16x1xi1> to vector<16x1xi1>
    %585 = vector.broadcast %584 : vector<16x1xi1> to vector<16x256xi1>
    %586 = vector.broadcast %583 : f32 to vector<16x256xf32>
    %587 = arith.select %585, %582, %586 : vector<16x256xi1>, vector<16x256xf32>
    %588 = vector.extract_strided_slice %564 {offsets = [5, 0], sizes = [1, 256], strides = [1, 1]} : vector<9x256xf32> to vector<1x256xf32>
    %589 = vector.broadcast %588 : vector<1x256xf32> to vector<16x256xf32>
    %590 = arith.mulf %587, %589 : vector<16x256xf32>
    %591 = arith.addf %579, %590 : vector<16x256xf32>
    %cst_181 = arith.constant 0.000000e+00 : f32
    %592 = vector.broadcast %cst_181 : f32 to vector<4x256xf32>
    %593 = vector.extract_strided_slice %563 {offsets = [0, 0], sizes = [12, 256], strides = [1, 1]} : vector<16x256xf32> to vector<12x256xf32>
    %594 = tpu.concatenate %592, %593 in 0 : vector<4x256xf32>, vector<12x256xf32> -> vector<16x256xf32>
    %595 = vector.extract_strided_slice %564 {offsets = [1, 0], sizes = [1, 256], strides = [1, 1]} : vector<9x256xf32> to vector<1x256xf32>
    %596 = vector.broadcast %595 : vector<1x256xf32> to vector<16x256xf32>
    %597 = arith.mulf %594, %596 : vector<16x256xf32>
    %598 = arith.addf %591, %597 : vector<16x256xf32>
    %599 = vector.extract_strided_slice %563 {offsets = [4, 0], sizes = [12, 256], strides = [1, 1]} : vector<16x256xf32> to vector<12x256xf32>
    %cst_182 = arith.constant 0.000000e+00 : f32
    %600 = vector.broadcast %cst_182 : f32 to vector<4x256xf32>
    %601 = tpu.concatenate %599, %600 in 0 : vector<12x256xf32>, vector<4x256xf32> -> vector<16x256xf32>
    %602 = vector.extract_strided_slice %564 {offsets = [7, 0], sizes = [1, 256], strides = [1, 1]} : vector<9x256xf32> to vector<1x256xf32>
    %603 = vector.broadcast %602 : vector<1x256xf32> to vector<16x256xf32>
    %604 = arith.mulf %601, %603 : vector<16x256xf32>
    %605 = arith.addf %598, %604 : vector<16x256xf32>
    %cst_183 = arith.constant 0.000000e+00 : f32
    %606 = vector.broadcast %cst_183 : f32 to vector<5x256xf32>
    %607 = vector.extract_strided_slice %563 {offsets = [0, 0], sizes = [11, 256], strides = [1, 1]} : vector<16x256xf32> to vector<11x256xf32>
    %608 = tpu.concatenate %606, %607 in 0 : vector<5x256xf32>, vector<11x256xf32> -> vector<16x256xf32>
    %c0_i32_184 = arith.constant 0 : i32
    %609 = arith.sitofp %c0_i32_184 : i32 to f32
    %610 = vector.shape_cast %39 : vector<16x1xi1> to vector<16x1xi1>
    %611 = vector.broadcast %610 : vector<16x1xi1> to vector<16x256xi1>
    %612 = vector.broadcast %609 : f32 to vector<16x256xf32>
    %613 = arith.select %611, %608, %612 : vector<16x256xi1>, vector<16x256xf32>
    %614 = vector.extract_strided_slice %564 {offsets = [0, 0], sizes = [1, 256], strides = [1, 1]} : vector<9x256xf32> to vector<1x256xf32>
    %615 = vector.broadcast %614 : vector<1x256xf32> to vector<16x256xf32>
    %616 = arith.mulf %613, %615 : vector<16x256xf32>
    %617 = arith.addf %605, %616 : vector<16x256xf32>
    %cst_185 = arith.constant 0.000000e+00 : f32
    %618 = vector.broadcast %cst_185 : f32 to vector<3x256xf32>
    %619 = vector.extract_strided_slice %563 {offsets = [0, 0], sizes = [13, 256], strides = [1, 1]} : vector<16x256xf32> to vector<13x256xf32>
    %620 = tpu.concatenate %618, %619 in 0 : vector<3x256xf32>, vector<13x256xf32> -> vector<16x256xf32>
    %c0_i32_186 = arith.constant 0 : i32
    %621 = arith.sitofp %c0_i32_186 : i32 to f32
    %622 = vector.shape_cast %41 : vector<16x1xi1> to vector<16x1xi1>
    %623 = vector.broadcast %622 : vector<16x1xi1> to vector<16x256xi1>
    %624 = vector.broadcast %621 : f32 to vector<16x256xf32>
    %625 = arith.select %623, %620, %624 : vector<16x256xi1>, vector<16x256xf32>
    %626 = vector.extract_strided_slice %564 {offsets = [2, 0], sizes = [1, 256], strides = [1, 1]} : vector<9x256xf32> to vector<1x256xf32>
    %627 = vector.broadcast %626 : vector<1x256xf32> to vector<16x256xf32>
    %628 = arith.mulf %625, %627 : vector<16x256xf32>
    %629 = arith.addf %617, %628 : vector<16x256xf32>
    %630 = vector.extract_strided_slice %563 {offsets = [3, 0], sizes = [13, 256], strides = [1, 1]} : vector<16x256xf32> to vector<13x256xf32>
    %cst_187 = arith.constant 0.000000e+00 : f32
    %631 = vector.broadcast %cst_187 : f32 to vector<3x256xf32>
    %632 = tpu.concatenate %630, %631 in 0 : vector<13x256xf32>, vector<3x256xf32> -> vector<16x256xf32>
    %c0_i32_188 = arith.constant 0 : i32
    %633 = arith.sitofp %c0_i32_188 : i32 to f32
    %634 = vector.shape_cast %39 : vector<16x1xi1> to vector<16x1xi1>
    %635 = vector.broadcast %634 : vector<16x1xi1> to vector<16x256xi1>
    %636 = vector.broadcast %633 : f32 to vector<16x256xf32>
    %637 = arith.select %635, %632, %636 : vector<16x256xi1>, vector<16x256xf32>
    %638 = vector.extract_strided_slice %564 {offsets = [6, 0], sizes = [1, 256], strides = [1, 1]} : vector<9x256xf32> to vector<1x256xf32>
    %639 = vector.broadcast %638 : vector<1x256xf32> to vector<16x256xf32>
    %640 = arith.mulf %637, %639 : vector<16x256xf32>
    %641 = arith.addf %629, %640 : vector<16x256xf32>
    %642 = vector.extract_strided_slice %563 {offsets = [5, 0], sizes = [11, 256], strides = [1, 1]} : vector<16x256xf32> to vector<11x256xf32>
    %cst_189 = arith.constant 0.000000e+00 : f32
    %643 = vector.broadcast %cst_189 : f32 to vector<5x256xf32>
    %644 = tpu.concatenate %642, %643 in 0 : vector<11x256xf32>, vector<5x256xf32> -> vector<16x256xf32>
    %c0_i32_190 = arith.constant 0 : i32
    %645 = arith.sitofp %c0_i32_190 : i32 to f32
    %646 = vector.shape_cast %41 : vector<16x1xi1> to vector<16x1xi1>
    %647 = vector.broadcast %646 : vector<16x1xi1> to vector<16x256xi1>
    %648 = vector.broadcast %645 : f32 to vector<16x256xf32>
    %649 = arith.select %647, %644, %648 : vector<16x256xi1>, vector<16x256xf32>
    %650 = vector.extract_strided_slice %564 {offsets = [8, 0], sizes = [1, 256], strides = [1, 1]} : vector<9x256xf32> to vector<1x256xf32>
    %651 = vector.broadcast %650 : vector<1x256xf32> to vector<16x256xf32>
    %652 = arith.mulf %649, %651 : vector<16x256xf32>
    %653 = arith.addf %641, %652 : vector<16x256xf32>
    %654 = arith.truncf %653 : vector<16x256xf32> to vector<16x256xbf16>
    %c0_191 = arith.constant 0 : index
    %c0_192 = arith.constant 0 : index
    %655 = vector.load %arg27[%c0_191, %c0_192] : memref<256x512xbf16, #tpu.memory_space<vmem>>, vector<256x512xbf16>
    %cst_193 = arith.constant dense<0.000000e+00> : vector<16x512xf32>
    %656 = tpu.matmul %654, %655, %cst_193 {dimension_numbers = #tpu.dot_dimension_numbers<[1], [0], [0], [1], [0, 0, 1, 1], [], []>} : vector<16x256xbf16>, vector<256x512xbf16>, vector<16x512xf32> -> vector<16x512xf32>
    %c0_194 = arith.constant 0 : index
    %c0_195 = arith.constant 0 : index
    %657 = vector.load %arg28[%c0_194, %c0_195] : memref<1x512xf32, #tpu.memory_space<vmem>>, vector<1x512xf32>
    %658 = vector.broadcast %657 : vector<1x512xf32> to vector<16x512xf32>
    %659 = arith.mulf %656, %658 : vector<16x512xf32>
    %c0_196 = arith.constant 0 : index
    %c0_197 = arith.constant 0 : index
    %660 = vector.load %arg29[%c0_196, %c0_197] : memref<1x512xf32, #tpu.memory_space<vmem>>, vector<1x512xf32>
    %661 = vector.broadcast %660 : vector<1x512xf32> to vector<16x512xf32>
    %662 = arith.addf %659, %661 : vector<16x512xf32>
    %cst_198 = arith.constant 0.000000e+00 : f32
    %663 = vector.broadcast %cst_198 : f32 to vector<16x512xf32>
    %664 = arith.maximumf %662, %663 : vector<16x512xf32>
    %cst_199 = arith.constant dense<0.000000e+00> : vector<512xf32>
    %665 = vector.multi_reduction <add>, %664, %cst_199 [0] : vector<16x512xf32> to vector<512xf32>
    %666 = vector.shape_cast %665 : vector<512xf32> to vector<1x512xf32>
    %cst_200 = arith.constant 1.600000e+01 : f32
    %667 = vector.broadcast %cst_200 : f32 to vector<1x512xf32>
    %668 = arith.divf %666, %667 : vector<1x512xf32>
    %c0_201 = arith.constant 0 : index
    %c0_202 = arith.constant 0 : index
    %c0_203 = arith.constant 0 : index
    %669 = vector.load %arg33[%c0_201, %c0_202, %c0_203] : memref<1x1x512xf32, #tpu.memory_space<vmem>>, vector<1x1x512xf32>
    %670 = vector.shape_cast %669 : vector<1x1x512xf32> to vector<1x512xf32>
    %671 = vector.shape_cast %668 : vector<1x512xf32> to vector<1x1x512xf32>
    tpu.vector_store %arg33[%c0_201, %c0_202, %c0_203], %671 {strides = array<i32>} : memref<1x1x512xf32, #tpu.memory_space<vmem>>, vector<1x1x512xf32>,
    %672 = arith.truncf %668 : vector<1x512xf32> to vector<1x512xbf16>
    %c0_204 = arith.constant 0 : index
    %c0_205 = arith.constant 0 : index
    %673 = vector.load %arg30[%c0_204, %c0_205] : memref<512x128xbf16, #tpu.memory_space<vmem>>, vector<512x128xbf16>
    %cst_206 = arith.constant dense<0.000000e+00> : vector<1x128xf32>
    %674 = tpu.matmul %672, %673, %cst_206 {dimension_numbers = #tpu.dot_dimension_numbers<[1], [0], [0], [1], [0, 0, 1, 1], [], []>} : vector<1x512xbf16>, vector<512x128xbf16>, vector<1x128xf32> -> vector<1x128xf32>
    %c0_207 = arith.constant 0 : index
    %c0_208 = arith.constant 0 : index
    %675 = vector.load %arg31[%c0_207, %c0_208] : memref<1x128xf32, #tpu.memory_space<vmem>>, vector<1x128xf32>
    %676 = arith.addf %674, %675 : vector<1x128xf32>
    %c0_209 = arith.constant 0 : index
    %c0_210 = arith.constant 0 : index
    %c0_211 = arith.constant 0 : index
    %677 = vector.load %arg32[%c0_209, %c0_210, %c0_211] : memref<1x1x128xf32, #tpu.memory_space<vmem>>, vector<1x1x128xf32>
    %678 = vector.shape_cast %677 : vector<1x1x128xf32> to vector<1x128xf32>
    %679 = vector.shape_cast %676 : vector<1x128xf32> to vector<1x1x128xf32>
    tpu.vector_store %arg32[%c0_209, %c0_210, %c0_211], %679 {strides = array<i32>} : memref<1x1x128xf32, #tpu.memory_space<vmem>>, vector<1x1x128xf32>,
    return
  }
  func.func @transform_0(%arg0: i32) -> (i32, i32, i32) {
    %c0_i32 = arith.constant 0 : i32
    %c0_i32_0 = arith.constant 0 : i32
    %c0_i32_1 = arith.constant 0 : i32
    return %arg0, %c0_i32, %c0_i32_0 : i32, i32, i32
  }
  func.func @transform_1(%arg0: i32) -> (i32, i32) {
    %c0_i32 = arith.constant 0 : i32
    %c0_i32_0 = arith.constant 0 : i32
    %c0_i32_1 = arith.constant 0 : i32
    return %c0_i32, %c0_i32_0 : i32, i32
  }
  func.func @transform_2(%arg0: i32) -> (i32, i32) {
    %c0_i32 = arith.constant 0 : i32
    %c0_i32_0 = arith.constant 0 : i32
    %c0_i32_1 = arith.constant 0 : i32
    return %c0_i32, %c0_i32_0 : i32, i32
  }
  func.func @transform_3(%arg0: i32) -> (i32, i32) {
    %c0_i32 = arith.constant 0 : i32
    %c0_i32_0 = arith.constant 0 : i32
    %c0_i32_1 = arith.constant 0 : i32
    return %c0_i32, %c0_i32_0 : i32, i32
  }
  func.func @transform_4(%arg0: i32) -> (i32, i32) {
    %c0_i32 = arith.constant 0 : i32
    %c0_i32_0 = arith.constant 0 : i32
    %c0_i32_1 = arith.constant 0 : i32
    return %c0_i32, %c0_i32_0 : i32, i32
  }
  func.func @transform_5(%arg0: i32) -> (i32, i32) {
    %c0_i32 = arith.constant 0 : i32
    %c0_i32_0 = arith.constant 0 : i32
    %c0_i32_1 = arith.constant 0 : i32
    return %c0_i32, %c0_i32_0 : i32, i32
  }
  func.func @transform_6(%arg0: i32) -> (i32, i32) {
    %c0_i32 = arith.constant 0 : i32
    %c0_i32_0 = arith.constant 0 : i32
    %c0_i32_1 = arith.constant 0 : i32
    return %c0_i32, %c0_i32_0 : i32, i32
  }
  func.func @transform_7(%arg0: i32) -> (i32, i32) {
    %c0_i32 = arith.constant 0 : i32
    %c0_i32_0 = arith.constant 0 : i32
    %c0_i32_1 = arith.constant 0 : i32
    return %c0_i32, %c0_i32_0 : i32, i32
  }
  func.func @transform_8(%arg0: i32) -> (i32, i32) {
    %c0_i32 = arith.constant 0 : i32
    %c0_i32_0 = arith.constant 0 : i32
    %c0_i32_1 = arith.constant 0 : i32
    return %c0_i32, %c0_i32_0 : i32, i32
  }
  func.func @transform_9(%arg0: i32) -> (i32, i32) {
    %c0_i32 = arith.constant 0 : i32
    %c0_i32_0 = arith.constant 0 : i32
    %c0_i32_1 = arith.constant 0 : i32
    return %c0_i32, %c0_i32_0 : i32, i32
  }
  func.func @transform_10(%arg0: i32) -> (i32, i32) {
    %c0_i32 = arith.constant 0 : i32
    %c0_i32_0 = arith.constant 0 : i32
    %c0_i32_1 = arith.constant 0 : i32
    return %c0_i32, %c0_i32_0 : i32, i32
  }
  func.func @transform_11(%arg0: i32) -> (i32, i32) {
    %c0_i32 = arith.constant 0 : i32
    %c0_i32_0 = arith.constant 0 : i32
    %c0_i32_1 = arith.constant 0 : i32
    return %c0_i32, %c0_i32_0 : i32, i32
  }
  func.func @transform_12(%arg0: i32) -> (i32, i32) {
    %c0_i32 = arith.constant 0 : i32
    %c0_i32_0 = arith.constant 0 : i32
    %c0_i32_1 = arith.constant 0 : i32
    return %c0_i32, %c0_i32_0 : i32, i32
  }
  func.func @transform_13(%arg0: i32) -> (i32, i32) {
    %c0_i32 = arith.constant 0 : i32
    %c0_i32_0 = arith.constant 0 : i32
    %c0_i32_1 = arith.constant 0 : i32
    return %c0_i32, %c0_i32_0 : i32, i32
  }
  func.func @transform_14(%arg0: i32) -> (i32, i32) {
    %c0_i32 = arith.constant 0 : i32
    %c0_i32_0 = arith.constant 0 : i32
    %c0_i32_1 = arith.constant 0 : i32
    return %c0_i32, %c0_i32_0 : i32, i32
  }
  func.func @transform_15(%arg0: i32) -> (i32, i32) {
    %c0_i32 = arith.constant 0 : i32
    %c0_i32_0 = arith.constant 0 : i32
    %c0_i32_1 = arith.constant 0 : i32
    return %c0_i32, %c0_i32_0 : i32, i32
  }
  func.func @transform_16(%arg0: i32) -> (i32, i32) {
    %c0_i32 = arith.constant 0 : i32
    %c0_i32_0 = arith.constant 0 : i32
    %c0_i32_1 = arith.constant 0 : i32
    return %c0_i32, %c0_i32_0 : i32, i32
  }
  func.func @transform_17(%arg0: i32) -> (i32, i32) {
    %c0_i32 = arith.constant 0 : i32
    %c0_i32_0 = arith.constant 0 : i32
    %c0_i32_1 = arith.constant 0 : i32
    return %c0_i32, %c0_i32_0 : i32, i32
  }
  func.func @transform_18(%arg0: i32) -> (i32, i32) {
    %c0_i32 = arith.constant 0 : i32
    %c0_i32_0 = arith.constant 0 : i32
    %c0_i32_1 = arith.constant 0 : i32
    return %c0_i32, %c0_i32_0 : i32, i32
  }
  func.func @transform_19(%arg0: i32) -> (i32, i32) {
    %c0_i32 = arith.constant 0 : i32
    %c0_i32_0 = arith.constant 0 : i32
    %c0_i32_1 = arith.constant 0 : i32
    return %c0_i32, %c0_i32_0 : i32, i32
  }
  func.func @transform_20(%arg0: i32) -> (i32, i32) {
    %c0_i32 = arith.constant 0 : i32
    %c0_i32_0 = arith.constant 0 : i32
    %c0_i32_1 = arith.constant 0 : i32
    return %c0_i32, %c0_i32_0 : i32, i32
  }
  func.func @transform_21(%arg0: i32) -> (i32, i32) {
    %c0_i32 = arith.constant 0 : i32
    %c0_i32_0 = arith.constant 0 : i32
    %c0_i32_1 = arith.constant 0 : i32
    return %c0_i32, %c0_i32_0 : i32, i32
  }
  func.func @transform_22(%arg0: i32) -> (i32, i32) {
    %c0_i32 = arith.constant 0 : i32
    %c0_i32_0 = arith.constant 0 : i32
    %c0_i32_1 = arith.constant 0 : i32
    return %c0_i32, %c0_i32_0 : i32, i32
  }
  func.func @transform_23(%arg0: i32) -> (i32, i32) {
    %c0_i32 = arith.constant 0 : i32
    %c0_i32_0 = arith.constant 0 : i32
    %c0_i32_1 = arith.constant 0 : i32
    return %c0_i32, %c0_i32_0 : i32, i32
  }
  func.func @transform_24(%arg0: i32) -> (i32, i32) {
    %c0_i32 = arith.constant 0 : i32
    %c0_i32_0 = arith.constant 0 : i32
    %c0_i32_1 = arith.constant 0 : i32
    return %c0_i32, %c0_i32_0 : i32, i32
  }
  func.func @transform_25(%arg0: i32) -> (i32, i32) {
    %c0_i32 = arith.constant 0 : i32
    %c0_i32_0 = arith.constant 0 : i32
    %c0_i32_1 = arith.constant 0 : i32
    return %c0_i32, %c0_i32_0 : i32, i32
  }
  func.func @transform_26(%arg0: i32) -> (i32, i32) {
    %c0_i32 = arith.constant 0 : i32
    %c0_i32_0 = arith.constant 0 : i32
    %c0_i32_1 = arith.constant 0 : i32
    return %c0_i32, %c0_i32_0 : i32, i32
  }
  func.func @transform_27(%arg0: i32) -> (i32, i32) {
    %c0_i32 = arith.constant 0 : i32
    %c0_i32_0 = arith.constant 0 : i32
    %c0_i32_1 = arith.constant 0 : i32
    return %c0_i32, %c0_i32_0 : i32, i32
  }
  func.func @transform_28(%arg0: i32) -> (i32, i32) {
    %c0_i32 = arith.constant 0 : i32
    %c0_i32_0 = arith.constant 0 : i32
    %c0_i32_1 = arith.constant 0 : i32
    return %c0_i32, %c0_i32_0 : i32, i32
  }
  func.func @transform_29(%arg0: i32) -> (i32, i32) {
    %c0_i32 = arith.constant 0 : i32
    %c0_i32_0 = arith.constant 0 : i32
    %c0_i32_1 = arith.constant 0 : i32
    return %c0_i32, %c0_i32_0 : i32, i32
  }
  func.func @transform_30(%arg0: i32) -> (i32, i32) {
    %c0_i32 = arith.constant 0 : i32
    %c0_i32_0 = arith.constant 0 : i32
    %c0_i32_1 = arith.constant 0 : i32
    return %c0_i32, %c0_i32_0 : i32, i32
  }
  func.func @transform_31(%arg0: i32) -> (i32, i32, i32) {
    %c0_i32 = arith.constant 0 : i32
    %c0_i32_0 = arith.constant 0 : i32
    %c0_i32_1 = arith.constant 0 : i32
    return %arg0, %c0_i32, %c0_i32_0 : i32, i32, i32
  }
  func.func @transform_32(%arg0: i32) -> (i32, i32, i32) {
    %c0_i32 = arith.constant 0 : i32
    %c0_i32_0 = arith.constant 0 : i32
    %c0_i32_1 = arith.constant 0 : i32
    return %arg0, %c0_i32, %c0_i32_0 : i32, i32, i32
  }
}

</mosaic_0001>

<bundles_post_ra>
// kernel: analog_resnet_attention2_forward.1
= control target key start
LH: loop header
LB: loop body
LE: loop exit
PB: predicated region body
PF: predicated region fallthrough
CT: control target
= control target key end

     0   :  { %s8632_s6 = smov 1   ;;  %s8633_s10 = smov 2   ;;  %s11583_s0 = inlined_call_operand.smem [shape: u32[33], index: -1, kind: input, shape index: {}] }
   0x1   :  { %s8705_s5 = sld [smem:[%s11583_s0]]   ;;  %s8634_s14 = smov 3  }
   0x2   :  { %s8710_s9 = sld [smem:[%s11583_s0 + %s8632_s6]]   ;;  %s8635_s18 = smov 4  }
   0x3   :  { %s8715_s13 = sld [smem:[%s11583_s0 + %s8633_s10]]   ;;  %s8636_s22 = smov 5  }
   0x4   :  { %s8720_s17 = sld [smem:[%s11583_s0 + %s8634_s14]]   ;;  %s8637_s26 = smov 6  }
   0x5   :  { %s8725_s21 = sld [smem:[%s11583_s0 + %s8635_s18]]   ;;  %s8638_s30 = smov 7  }
   0x6   :  { %s8730_s25 = sld [smem:[%s11583_s0 + %s8636_s22]]   ;;  %s8639_s4 = smov 8  }
   0x7   :  { %11727 = sst [smem:[#allocation56_spill]] %s8705_s5  ;;  %s8640_s10 = smov 9  }
   0x8   :  { %s8735_s29 = sld [smem:[%s11583_s0 + %s8637_s26]]   ;;  %s8641_s15 = smov 10  }
   0x9   :  { %11728 = sst [smem:[#allocation57_spill]] %s8715_s13  ;;  %s8642_s20 = smov 11  }
   0xa   :  { %s8740_s3 = sld [smem:[%s11583_s0 + %s8638_s30]]   ;;  %s8643_s26 = smov 12  }
   0xb   :  { %s8745_s8 = sld [smem:[%s11583_s0 + %s8639_s4]]   ;;  %s8644_s1 = smov 13  }
   0xc   :  { %s8750_s14 = sld [smem:[%s11583_s0 + %s8640_s10]]   ;;  %s8645_s7 = smov 14  }
   0xd   :  { %s8755_s19 = sld [smem:[%s11583_s0 + %s8641_s15]]   ;;  %s8646_s15 = smov 15  }
   0xe   :  { %s8760_s24 = sld [smem:[%s11583_s0 + %s8642_s20]]   ;;  %s8647_s22 = smov 16  }
   0xf   :  { %s8765_s30 = sld [smem:[%s11583_s0 + %s8643_s26]]   ;;  %s8648_s28 = smov 17  }
  0x10   :  { %11729 = sst [smem:[#allocation58_spill]] %s8740_s3 }
  0x11   :  { %s8770_s6 = sld [smem:[%s11583_s0 + %s8644_s1]]  }
  0x12   :  { %11730 = sst [smem:[#allocation59_spill]] %s8750_s14 }
  0x13   :  { %s8775_s12 = sld [smem:[%s11583_s0 + %s8645_s7]]   ;;  %s8649_s7 = smov 18  }
  0x14   :  { %11731 = sst [smem:[#allocation60_spill]] %s8760_s24 }
  0x15   :  { %11732 = sst [smem:[#allocation61_spill]] %s8765_s30 }
  0x16   :  { %s8780_s20 = sld [smem:[%s11583_s0 + %s8646_s15]]   ;;  %s8650_s15 = smov 19  }
  0x17   :  { %11733 = sst [smem:[#allocation62_spill]] %s8770_s6 }
  0x18   :  { %s8785_s27 = sld [smem:[%s11583_s0 + %s8647_s22]]   ;;  %s8651_s22 = smov 20  }
  0x19   :  { %11734 = sst [smem:[#allocation63_spill]] %s8775_s12 }
  0x1a   :  { %s8790_s4 = sld [smem:[%s11583_s0 + %s8648_s28]]   ;;  %s8652_s28 = smov 21  }
  0x1b   :  { %s8795_s24 = sld [smem:[%s11583_s0 + %s8649_s7]]   ;;  %s8653_s7 = smov 22  }
  0x1c   :  { %s8800_s5 = sld [smem:[%s11583_s0 + %s8650_s15]]   ;;  %s8654_s15 = smov 23  }
  0x1d   :  { %s8815_s12 = sld [smem:[%s11583_s0 + %s8653_s7]]   ;;  %s8657_s7 = smov 26  }
  0x1e   :  { %11735 = sst [smem:[#allocation64_spill]] %s8785_s27 }
  0x1f   :  { %s8805_s27 = sld [smem:[%s11583_s0 + %s8651_s22]]   ;;  %s8655_s22 = smov 24  }
  0x20   :  { %11736 = sst [smem:[#allocation65_spill]] %s8790_s4 }
  0x21   :  { %s8810_s4 = sld [smem:[%s11583_s0 + %s8652_s28]]   ;;  %s8656_s28 = smov 25  }
  0x22   :  { %11737 = sst [smem:[#allocation66_spill]] %s8800_s5 }
  0x23   :  { %11739 = sst [smem:[#allocation68_spill]] %s8815_s12 }
  0x24   :  { %s8820_s5 = sld [smem:[%s11583_s0 + %s8654_s15]]   ;;  %s8658_s15 = smov 27  }
  0x25   :  { %s8825_s30 = sld [smem:[%s11583_s0 + %s8655_s22]]   ;;  %s8659_s22 = smov 28  }
  0x26   :  { %s8835_s12 = sld [smem:[%s11583_s0 + %s8657_s7]]   ;;  %s8661_s7 = smov 30  }
  0x27   :  { %11738 = sst [smem:[#allocation67_spill]] %s8810_s4 }
  0x28   :  { %s8830_s4 = sld [smem:[%s11583_s0 + %s8656_s28]]   ;;  %s8660_s28 = smov 29  }
  0x29   :  { %s8845_s14 = sld [smem:[%s11583_s0 + %s8659_s22]]   ;;  %s8663_s22 = smov 32  }
  0x2a   :  { %11740 = sst [smem:[#allocation69_spill]] %s8820_s5 }
  0x2b   :  { %s8840_s5 = sld [smem:[%s11583_s0 + %s8658_s15]]   ;;  %s8662_s15 = smov 31  }
  0x2c   :  { %11742 = sst [smem:[#allocation71_spill]] %s8835_s12 }
  0x2d   :  { %s8855_s12 = sld [smem:[%s11583_s0 + %s8661_s7]]  }
  0x2e   :  { %11741 = sst [smem:[#allocation70_spill]] %s8830_s4 }
  0x2f   :  { %11744 = sst [smem:[#allocation73_spill]] %s8845_s14 }
  0x30   :  { %s8850_s4 = sld [smem:[%s11583_s0 + %s8660_s28]]  }
  0x31   :  { %11743 = sst [smem:[#allocation72_spill]] %s8840_s5 }
  0x32   :  { %s8860_s3 = sld [smem:[%s11583_s0 + %s8662_s15]]  }
  0x33   :  { %s8865_s14 = sld [smem:[%s11583_s0 + %s8663_s22]]  }
  0x36   :  { %11745 = sst [smem:[#allocation74_spill]] %s8850_s4 }
  0x37   :  { %71 = vsyncpa [#allocation4], 0 }
  0x38   :  { %72 = vsyncpa [#allocation7], 0 }
  0x39   :  { %73 = vsyncpa [#allocation10], 0 }
  0x3a   :  { %74 = vsyncpa [#allocation13], 0 }
  0x3b   :  { %75 = vsyncpa [#allocation16], 0 }
  0x3c   :  { %76 = vsyncpa [#allocation19], 0 }
  0x3d   :  { %77 = vsyncpa [#allocation22], 0 }
  0x3e   :  { %78 = vsyncpa [#allocation25], 0 }
  0x3f   :  { %79 = vsyncpa [#allocation28], 0 }
  0x40   :  { %80 = vsyncpa [#allocation31], 0 }
  0x41   :  { %81 = vsyncpa [#allocation34], 0 }
  0x42   :  { %82 = vsyncpa [#allocation37], 0 }
  0x43   :  { %83 = vsyncpa [#allocation40], 0 }
  0x44   :  { %84 = vsyncpa [#allocation5], 0 }
  0x45   :  { %86 = vsyncpa [#allocation5 + $0x1], 0  ;;  %s8867_s28 = smov 0   ;;  %s8869_s1 = smov 0  }
  0x46   :  { %s8871_s0 = smov 0   ;;  %s8873_s2 = smov 0  }
  0x47 LB: > { %s11746_s4 = sld [smem:[#allocation74_spill]]  ;;  %s8888_s7 = sadd.s32 4294967295, %s8630_s2   ;;  %s8618_s28 = sphi %s8867_s28, %s12124_s28   ;;  %s8630_s2 = sphi %s8873_s2, %s12121_s2   ;;  %s8626_s0 = sphi %s8871_s0, %s12123_s0   ;;  %s8622_s1 = sphi %s8869_s1, %s12125_s1  }
  0x48   : > { %11747 = sst [smem:[#allocation75_spill]] %s8618_s28  ;;  %s6523_s10 = sadd.s32 4294967294, %s8630_s2  }
  0x49   : > { %11748 = sst [smem:[#allocation76_spill]] %s8626_s0  ;;  %s8892_s11 = sadd.s32 1, %s8630_s2  }
  0x4a   : > { %11749 = sst [smem:[#allocation77_spill]] %s8630_s2  ;;  %s755_s15 = sadd.s32 1, %s8626_s0 }
  0x4b   : > { %11750 = sst [smem:[#allocation78_spill]] %s8892_s11  ;;  %s752_s16 = ssub.s32 %s8630_s2, %s8892_s11 }
  0x4c   : > { %p765_p0 = scmp.ne.s32.totalorder %s8626_s0, %s8622_s1  ;;  %p753_p1 = scmp.eq.s32.totalorder %s752_s16, 0 }
  0x4d   : > { %p766_p2 = scmp.eq.s32.totalorder %s8888_s7, 1  ;;  %p771_p3 = scmp.ne.s32.totalorder %s8622_s1, %s8618_s28 }
  0x4e   : > { %p772_p4 = scmp.eq.s32.totalorder %s6523_s10, 1  ;;  %p6524_p7 = scmp.ge.s32.totalorder %s8630_s2, 1 }
  0x4f   : > { %s8903_s18 = scalar_select %p753_p1, %s8626_s0, %s755_s15  }
  0x50   : > { %p8905_p5 = por %p766_p2, %p765_p0  ;;  %p8909_p6 = por %p772_p4, %p771_p3 }
  0x51   : > { %11751 = sst [smem:[#allocation79_spill]] %s8903_s18  ;;  %p805_p8 = scmp.lt.s32.totalorder %s8630_s2, 3 }
  0x52   : > { %s11752_s22 = scalar_select %p8905_p5, 1, 0 }
  0x53   : > { %s11754_s23 = scalar_select %p8909_p6, 1, 0 }
  0x54   : > { %11753 = sst [smem:[#allocation80_spill]] %s11752_s22  ;;  %p11597_p9 = scmp.eq.s32.totalorder %s8888_s7, 0 }
  0x55   : > { %11755 = sst [smem:[#allocation81_spill]] %s11754_s23  ;;  %p8916_p10 = pnand %p6524_p7, %p805_p8 }
  0x56   : > { %s8664_s16 = smov [#allocation6]   ;;  %s8665_s18 = smov [#allocation9]  }
  0x57   : > { %s11756_s26 = scalar_select %p8916_p10, 1, 0 }
  0x58   : > { %s830_s10 = sshll.u32 %s8664_s16, 4  ;;  %p7276_p11 = pneg %p8916_p10  ;;  %s831_s10 = int_to_ptr.vmem [resolvable:$true] %s830_s10 }
  0x59   : > { %s855_s0 = sshll.u32 %s8665_s18, 4  ;;  %s8666_s11 = smov [#allocation12]   ;;  %s856_s0 = int_to_ptr.vmem [resolvable:$true] %s855_s0 }
  0x5a   : > { %p8924_p12 = pnand %p11597_p9, %p7276_p11  ;;  %s878_s23 = sshll.u32 %s8666_s11, 4  ;;  %s879_s23 = int_to_ptr.vmem [resolvable:$true] %s878_s23 }
  0x5b   : > { %s7905_s16 = scalar_lea.vmem %s831_s10, 1024  ;;  %p7913_p3 = scmp.lt.s32.totalorder %s831_s10, %s831_s10 }
  0x5c   : > { %p8930_p13 = pneg %p8924_p12  ;;  %p7906_p0 = scmp.ne.s32.totalorder %s831_s10, %s7905_s16 }
  0x5d   : > { %p7914_p4 = scmp.lt.s32.totalorder %s7905_s16, %s7905_s16 }
  0x5e   : > { %p7908_p1 = pnand %p7906_p0, %p8930_p13 }
  0x5f   : > { %p7915_p7 = por %p7914_p4, %p7913_p3 }
  0x60   : > { %p7909_p2 = pneg %p7908_p1 }
  0x62   : > { %p7916_p8 = pnand %p7915_p7, %p7909_p2 }
  0x64   : > { %7919 = shalt.err (!%p7916_p8)
}
  0x65   : > { %s11600_s18 = smov 64   ;;  %s11759_s13 = sld [smem:[#allocation57_spill]] }
  0x66   : > { %s11602_s11 = smov 4   ;;  %s7931_s2 = scalar_lea.vmem %s856_s0, 16 }
  0x67   : > { %p7932_p11 = scmp.ne.s32.totalorder %s856_s0, %s7931_s2  ;;  %s7938_s22 = scalar_lea.vmem %s856_s0, 32 }
  0x68   : > { %p7939_p9 = scmp.lt.s32.totalorder %s856_s0, %s856_s0  ;;  %p7940_p3 = scmp.lt.s32.totalorder %s7938_s22, %s7931_s2 }
  0x69   : > { %p7934_p0 = pnand %p7932_p11, %p8930_p13 }
  0x6a   : > { %p7941_p2 = por %p7940_p3, %p7939_p9 }
  0x6b   : > { %7282 = dma.hbm_to_vmem [thread:$0]  (!%p8924_p12), %s11759_s13, 1024, %s831_s10, [#allocation7], %s11600_s18, %s11600_s18, %s11602_s11  }
  0x6c   : > { %p7935_p1 = pneg %p7934_p0 }
  0x6e   : > { %p7942_p4 = pnand %p7941_p2, %p7935_p1 }
  0x70   : > { %7945 = shalt.err (!%p7942_p4)
}
  0x71   : > { %7288 = dma.hbm_to_vmem [thread:$0]  (!%p8924_p12), %s8725_s21, 16, %s856_s0, [#allocation10]  }
  0x72   : > { %s7957_s16 = scalar_lea.vmem %s879_s23, 1024  ;;  %p7965_p5 = scmp.lt.s32.totalorder %s879_s23, %s879_s23 }
  0x73   : > { %p7958_p7 = scmp.ne.s32.totalorder %s879_s23, %s7957_s16  ;;  %p7966_p11 = scmp.lt.s32.totalorder %s7957_s16, %s7957_s16 }
  0x75   : > { %p7960_p8 = pnand %p7958_p7, %p8930_p13  ;;  %p7967_p0 = por %p7966_p11, %p7965_p5 }
  0x77   : > { %p7961_p6 = pneg %p7960_p8 }
  0x79   : > { %p7968_p10 = pnand %p7967_p0, %p7961_p6 }
  0x7b   : > { %7971 = shalt.err (!%p7968_p10)
}
  0x7c   : > { %7294 = dma.hbm_to_vmem [thread:$0]  (!%p8924_p12), %s8735_s29, 1024, %s879_s23, [#allocation13], %s11600_s18, %s11600_s18, %s11602_s11  }
  0x7d   : > { %s8669_s0 = smov [#allocation15]   ;;  %s8670_s22 = smov [#allocation18]  }
  0x7e   : > { %s903_s2 = sshll.u32 %s8669_s0, 4  ;;  %s925_s10 = sshll.u32 %s8670_s22, 4  ;;  %s904_s2 = int_to_ptr.vmem [resolvable:$true] %s903_s2  ;;  %s926_s10 = int_to_ptr.vmem [resolvable:$true] %s925_s10 }
  0x7f   : > { %s7983_s13 = scalar_lea.vmem %s904_s2, 16  ;;  %s7990_s16 = scalar_lea.vmem %s904_s2, 32 }
  0x80   : > { %p7984_p9 = scmp.ne.s32.totalorder %s904_s2, %s7983_s13  ;;  %p7991_p6 = scmp.lt.s32.totalorder %s904_s2, %s904_s2 }
  0x81   : > { %p7992_p10 = scmp.lt.s32.totalorder %s7990_s16, %s7983_s13 }
  0x82   : > { %p7986_p1 = pnand %p7984_p9, %p8930_p13 }
  0x83   : > { %p7993_p3 = por %p7992_p10, %p7991_p6 }
  0x84   : > { %p7987_p5 = pneg %p7986_p1 }
  0x86   : > { %p7994_p2 = pnand %p7993_p3, %p7987_p5 }
  0x88   : > { %7997 = shalt.err (!%p7994_p2)
}
  0x89   : > { %7300 = dma.hbm_to_vmem [thread:$0]  (!%p8924_p12), %s8745_s8, 16, %s904_s2, [#allocation16]  }
  0x8a   : > { %s8009_s23 = scalar_lea.vmem %s926_s10, 16  ;;  %s8016_s0 = scalar_lea.vmem %s926_s10, 32 }
  0x8b   : > { %p8010_p4 = scmp.ne.s32.totalorder %s926_s10, %s8009_s23  ;;  %p8017_p11 = scmp.lt.s32.totalorder %s926_s10, %s926_s10 }
  0x8c   : > { %p8018_p0 = scmp.lt.s32.totalorder %s8016_s0, %s8009_s23 }
  0x8d   : > { %p8012_p7 = pnand %p8010_p4, %p8930_p13 }
  0x8e   : > { %p8019_p9 = por %p8018_p0, %p8017_p11 }
  0x8f   : > { %p8013_p8 = pneg %p8012_p7 }
  0x91   : > { %p8020_p1 = pnand %p8019_p9, %p8013_p8 }
  0x93   : > { %8023 = shalt.err (!%p8020_p1)
}
  0x94   : > { %7306 = dma.hbm_to_vmem [thread:$0]  (!%p8924_p12), %s8755_s19, 16, %s926_s10, [#allocation19]  }
  0x95   : > { %s8671_s13 = smov [#allocation21]   ;;  %s8672_s2 = smov [#allocation24]  }
  0x96   : > { %s951_s22 = sshll.u32 %s8671_s13, 4  ;;  %s976_s16 = sshll.u32 %s8672_s2, 4  ;;  %s952_s22 = int_to_ptr.vmem [resolvable:$true] %s951_s22  ;;  %s977_s16 = int_to_ptr.vmem [resolvable:$true] %s976_s16 }
  0x97   : > { %s8035_s18 = scalar_lea.vmem %s952_s22, 1024  ;;  %p8043_p3 = scmp.lt.s32.totalorder %s952_s22, %s952_s22 }
  0x98   : > { %p8036_p5 = scmp.ne.s32.totalorder %s952_s22, %s8035_s18  ;;  %p8044_p2 = scmp.lt.s32.totalorder %s8035_s18, %s8035_s18 }
  0x9a   : > { %p8038_p6 = pnand %p8036_p5, %p8930_p13  ;;  %p8045_p4 = por %p8044_p2, %p8043_p3 }
  0x9c   : > { %p8039_p10 = pneg %p8038_p6 }
  0x9e   : > { %p8046_p7 = pnand %p8045_p4, %p8039_p10 }
  0xa0   : > { %8049 = shalt.err (!%p8046_p7)
}
  0xa1   : > { %s11760_s23 = smov 64   ;;  %s11761_s6 = sld [smem:[#allocation62_spill]] }
  0xa2   : > { %s8061_s10 = scalar_lea.vmem %s977_s16, 16  ;;  %s8068_s0 = scalar_lea.vmem %s977_s16, 32 }
  0xa3   : > { %p8062_p8 = scmp.ne.s32.totalorder %s977_s16, %s8061_s10  ;;  %p8069_p9 = scmp.lt.s32.totalorder %s977_s16, %s977_s16 }
  0xa4   : > { %p8070_p1 = scmp.lt.s32.totalorder %s8068_s0, %s8061_s10 }
  0xa5   : > { %p8064_p11 = pnand %p8062_p8, %p8930_p13 }
  0xa6   : > { %p8071_p5 = por %p8070_p1, %p8069_p9 }
  0xa7   : > { %7312 = dma.hbm_to_vmem [thread:$0]  (!%p8924_p12), %s11761_s6, 1024, %s952_s22, [#allocation22], %s11760_s23, %s11760_s23, %s11602_s11  }
  0xa8   : > { %p8065_p0 = pneg %p8064_p11 }
  0xaa   : > { %p8072_p6 = pnand %p8071_p5, %p8065_p0 }
  0xac   : > { %8075 = shalt.err (!%p8072_p6)
}
  0xad   : > { %7318 = dma.hbm_to_vmem [thread:$0]  (!%p8924_p12), %s8780_s20, 16, %s977_s16, [#allocation25]  }
  0xae   : > { %s8673_s18 = smov [#allocation27]   ;;  %s8674_s22 = smov [#allocation30]  }
  0xaf   : > { %s1003_s13 = sshll.u32 %s8673_s18, 4  ;;  %s1024_s2 = sshll.u32 %s8674_s22, 4  ;;  %s1004_s13 = int_to_ptr.vmem [resolvable:$true] %s1003_s13  ;;  %s1025_s2 = int_to_ptr.vmem [resolvable:$true] %s1024_s2 }
  0xb0   : > { %s8087_s11 = scalar_lea.vmem %s1004_s13, 32  ;;  %p8095_p4 = scmp.lt.s32.totalorder %s1004_s13, %s1004_s13 }
  0xb1   : > { %p8088_p10 = scmp.ne.s32.totalorder %s1004_s13, %s8087_s11  ;;  %p8096_p7 = scmp.lt.s32.totalorder %s8087_s11, %s8087_s11 }
  0xb3   : > { %p8090_p3 = pnand %p8088_p10, %p8930_p13  ;;  %p8097_p8 = por %p8096_p7, %p8095_p4 }
  0xb5   : > { %p8091_p2 = pneg %p8090_p3 }
  0xb7   : > { %p8098_p11 = pnand %p8097_p8, %p8091_p2 }
  0xb9   : > { %8101 = shalt.err (!%p8098_p11)
}
  0xba   : > { %7324 = dma.hbm_to_vmem [thread:$0]  (!%p8924_p12), %s8795_s24, 32, %s1004_s13, [#allocation28]  }
  0xbb   : > { %s8113_s16 = scalar_lea.vmem %s1025_s2, 512  ;;  %p8121_p5 = scmp.lt.s32.totalorder %s1025_s2, %s1025_s2 }
  0xbc   : > { %p8114_p0 = scmp.ne.s32.totalorder %s1025_s2, %s8113_s16  ;;  %p8122_p6 = scmp.lt.s32.totalorder %s8113_s16, %s8113_s16 }
  0xbe   : > { %p8116_p9 = pnand %p8114_p0, %p8930_p13  ;;  %p8123_p10 = por %p8122_p6, %p8121_p5 }
  0xc0   : > { %p8117_p1 = pneg %p8116_p9 }
  0xc2   : > { %p8124_p3 = pnand %p8123_p10, %p8117_p1 }
  0xc4   : > { %8127 = shalt.err (!%p8124_p3)
}
  0xc5   : > { %s11762_s11 = smov 4   ;;  %s8675_s10 = smov [#allocation33]  }
  0xc6   : > { %7330 = dma.hbm_to_vmem [thread:$0]  (!%p8924_p12), %s8805_s27, 512, %s1025_s2, [#allocation31], %s11760_s23, %s11760_s23, %s11762_s11  }
  0xc7   : > { %s1055_s0 = sshll.u32 %s8675_s10, 4  ;;  %s8676_s18 = smov [#allocation36]   ;;  %s1056_s0 = int_to_ptr.vmem [resolvable:$true] %s1055_s0 }
  0xc8   : > { %s1082_s13 = sshll.u32 %s8676_s18, 4  ;;  %s8139_s22 = scalar_lea.vmem %s1056_s0, 32  ;;  %s1083_s13 = int_to_ptr.vmem [resolvable:$true] %s1082_s13 }
  0xc9   : > { %p8140_p2 = scmp.ne.s32.totalorder %s1056_s0, %s8139_s22  ;;  %p8147_p8 = scmp.lt.s32.totalorder %s1056_s0, %s1056_s0 }
  0xca   : > { %p8148_p11 = scmp.lt.s32.totalorder %s8139_s22, %s8139_s22 }
  0xcb   : > { %p8142_p4 = pnand %p8140_p2, %p8930_p13 }
  0xcc   : > { %p8149_p0 = por %p8148_p11, %p8147_p8 }
  0xcd   : > { %p8143_p7 = pneg %p8142_p4 }
  0xcf   : > { %p8150_p9 = pnand %p8149_p0, %p8143_p7 }
  0xd1   : > { %8153 = shalt.err (!%p8150_p9)
}
  0xd2   : > { %7336 = dma.hbm_to_vmem [thread:$0]  (!%p8924_p12), %s8825_s30, 32, %s1056_s0, [#allocation34]  }
  0xd3   : > { %s8165_s23 = scalar_lea.vmem %s1083_s13, 64  ;;  %p8173_p10 = scmp.lt.s32.totalorder %s1083_s13, %s1083_s13 }
  0xd4   : > { %p8166_p1 = scmp.ne.s32.totalorder %s1083_s13, %s8165_s23  ;;  %p8174_p3 = scmp.lt.s32.totalorder %s8165_s23, %s8165_s23 }
  0xd6   : > { %p8168_p5 = pnand %p8166_p1, %p8930_p13  ;;  %p8175_p2 = por %p8174_p3, %p8173_p10 }
  0xd8   : > { %p8169_p6 = pneg %p8168_p5 }
  0xda   : > { %p8176_p4 = pnand %p8175_p2, %p8169_p6 }
  0xdc   : > { %8179 = shalt.err (!%p8176_p4)
}
  0xdd   : > { %s11763_s5 = sld [smem:[#allocation72_spill]]  ;;  %s8677_s2 = smov [#allocation3]  }
  0xde   : > { %s817_s16 = sshll.u32 %s8677_s2, 4  ;;  %s818_s16 = int_to_ptr.vmem [resolvable:$true] %s817_s16 }
  0xdf   : > { %s8191_s11 = scalar_lea.vmem %s818_s16, 256  ;;  %p8199_p0 = scmp.lt.s32.totalorder %s818_s16, %s818_s16 }
  0xe0   : > { %p8192_p7 = scmp.ne.s32.totalorder %s818_s16, %s8191_s11  ;;  %p8200_p9 = scmp.lt.s32.totalorder %s8191_s11, %s8191_s11 }
  0xe2   : > { %p8194_p8 = pnand %p8192_p7, %p8930_p13  ;;  %p8201_p1 = por %p8200_p9, %p8199_p0 }
  0xe3   : > { %7342 = dma.hbm_to_vmem [thread:$0]  (!%p8924_p12), %s11763_s5, 64, %s1083_s13, [#allocation37]  }
  0xe4   : > { %p8195_p11 = pneg %p8194_p8 }
  0xe6   : > { %p8202_p5 = pnand %p8201_p1, %p8195_p11 }
  0xe8   : > { %8205 = shalt.err (!%p8202_p5)
}
  0xe9   : > { %s11603_s10 = smov 128   ;;  %s11605_s0 = smov 8  }
  0xea   : > { %7279 = dma.hbm_to_vmem [thread:$0]  (!%p8924_p12), %s8710_s9, 256, %s818_s16, [#allocation4], %s11603_s10, %s11603_s10, %s11605_s0  }
  0xeb   : > { %s8680_s18 = smov [#allocation8]   ;;  %s8681_s22 = smov [#allocation11]  }
  0xec   : > { %s844_s13 = sshll.u32 %s8680_s18, 4  ;;  %s865_s23 = sshll.u32 %s8681_s22, 4  ;;  %s845_s13 = int_to_ptr.vmem [resolvable:$true] %s844_s13  ;;  %s866_s23 = int_to_ptr.vmem [resolvable:$true] %s865_s23 }
  0xed   : > { %s8217_s2 = scalar_lea.vmem %s845_s13, 16  ;;  %s8224_s11 = scalar_lea.vmem %s845_s13, 32 }
  0xee   : > { %p8218_p6 = scmp.ne.s32.totalorder %s845_s13, %s8217_s2  ;;  %p8225_p2 = scmp.lt.s32.totalorder %s845_s13, %s845_s13 }
  0xef   : > { %p8226_p4 = scmp.lt.s32.totalorder %s8224_s11, %s8217_s2 }
  0xf0   : > { %p8220_p10 = pnand %p8218_p6, %p8930_p13 }
  0xf1   : > { %p8227_p7 = por %p8226_p4, %p8225_p2 }
  0xf2   : > { %p8221_p3 = pneg %p8220_p10 }
  0xf4   : > { %p8228_p8 = pnand %p8227_p7, %p8221_p3 }
  0xf6   : > { %8231 = shalt.err (!%p8228_p8)
}
  0xf7   : > { %7285 = dma.hbm_to_vmem [thread:$0]  (!%p8924_p12), %s8720_s17, 16, %s845_s13, [#allocation7]  }
  0xf8   : > { %s8243_s16 = scalar_lea.vmem %s866_s23, 256  ;;  %p8251_p1 = scmp.lt.s32.totalorder %s866_s23, %s866_s23 }
  0xf9   : > { %p8244_p11 = scmp.ne.s32.totalorder %s866_s23, %s8243_s16  ;;  %p8252_p5 = scmp.lt.s32.totalorder %s8243_s16, %s8243_s16 }
  0xfb   : > { %p8246_p0 = pnand %p8244_p11, %p8930_p13  ;;  %p8253_p6 = por %p8252_p5, %p8251_p1 }
  0xfd   : > { %p8247_p9 = pneg %p8246_p0 }
  0xff   : > { %p8254_p10 = pnand %p8253_p6, %p8247_p9 }
 0x101   : > { %8257 = shalt.err (!%p8254_p10)
}
 0x102   : > { %7291 = dma.hbm_to_vmem [thread:$0]  (!%p8924_p12), %s8730_s25, 256, %s866_s23, [#allocation10], %s11603_s10, %s11603_s10, %s11605_s0  }
 0x103   : > { %s8682_s18 = smov [#allocation14]   ;;  %s8683_s22 = smov [#allocation17]  }
 0x104   : > { %s892_s13 = sshll.u32 %s8682_s18, 4  ;;  %s914_s2 = sshll.u32 %s8683_s22, 4  ;;  %s893_s13 = int_to_ptr.vmem [resolvable:$true] %s892_s13  ;;  %s915_s2 = int_to_ptr.vmem [resolvable:$true] %s914_s2 }
 0x105   : > { %s8269_s11 = scalar_lea.vmem %s893_s13, 16  ;;  %s8276_s16 = scalar_lea.vmem %s893_s13, 32 }
 0x106   : > { %p8270_p3 = scmp.ne.s32.totalorder %s893_s13, %s8269_s11  ;;  %p8277_p7 = scmp.lt.s32.totalorder %s893_s13, %s893_s13 }
 0x107   : > { %p8278_p8 = scmp.lt.s32.totalorder %s8276_s16, %s8269_s11 }
 0x108   : > { %p8272_p2 = pnand %p8270_p3, %p8930_p13 }
 0x109   : > { %p8279_p11 = por %p8278_p8, %p8277_p7 }
 0x10a   : > { %p8273_p4 = pneg %p8272_p2 }
 0x10c   : > { %p8280_p0 = pnand %p8279_p11, %p8273_p4 }
 0x10e   : > { %8283 = shalt.err (!%p8280_p0)
}
 0x10f   : > { %s11764_s23 = sld [smem:[#allocation58_spill]]  ;;  %s8295_s18 = scalar_lea.vmem %s915_s2, 16 }
 0x110   : > { %p8296_p9 = scmp.ne.s32.totalorder %s915_s2, %s8295_s18  ;;  %s8302_s22 = scalar_lea.vmem %s915_s2, 32 }
 0x111   : > { %p8303_p6 = scmp.lt.s32.totalorder %s915_s2, %s915_s2  ;;  %p8304_p10 = scmp.lt.s32.totalorder %s8302_s22, %s8295_s18 }
 0x112   : > { %p8298_p1 = pnand %p8296_p9, %p8930_p13 }
 0x113   : > { %p8305_p3 = por %p8304_p10, %p8303_p6 }
 0x114   : > { %p8299_p5 = pneg %p8298_p1 }
 0x115   : > { %7297 = dma.hbm_to_vmem [thread:$0]  (!%p8924_p12), %s11764_s23, 16, %s893_s13, [#allocation13]  }
 0x116   : > { %p8306_p2 = pnand %p8305_p3, %p8299_p5 }
 0x118   : > { %8309 = shalt.err (!%p8306_p2)
}
 0x119   : > { %s11765_s11 = sld [smem:[#allocation59_spill]]  ;;  %s8684_s16 = smov [#allocation20]  }
 0x11a   : > { %s938_s10 = sshll.u32 %s8684_s16, 4  ;;  %s8685_s0 = smov [#allocation23]   ;;  %s939_s10 = int_to_ptr.vmem [resolvable:$true] %s938_s10 }
 0x11b   : > { %s965_s13 = sshll.u32 %s8685_s0, 4  ;;  %s8321_s23 = scalar_lea.vmem %s939_s10, 256  ;;  %s966_s13 = int_to_ptr.vmem [resolvable:$true] %s965_s13 }
 0x11c   : > { %p8322_p4 = scmp.ne.s32.totalorder %s939_s10, %s8321_s23  ;;  %p8329_p11 = scmp.lt.s32.totalorder %s939_s10, %s939_s10 }
 0x11d   : > { %p8330_p0 = scmp.lt.s32.totalorder %s8321_s23, %s8321_s23 }
 0x11e   : > { %p8324_p7 = pnand %p8322_p4, %p8930_p13 }
 0x11f   : > { %7303 = dma.hbm_to_vmem [thread:$0]  (!%p8924_p12), %s11765_s11, 16, %s915_s2, [#allocation16]  }
 0x120   : > { %p8325_p8 = pneg %p8324_p7  ;;  %p8331_p9 = por %p8330_p0, %p8329_p11 }
 0x122   : > { %p8332_p1 = pnand %p8331_p9, %p8325_p8 }
 0x124   : > { %8335 = shalt.err (!%p8332_p1)
}
 0x125   : > { %s11766_s18 = smov 8   ;;  %s11767_s2 = smov 128  }
 0x126   : > { %s11768_s22 = sld [smem:[#allocation61_spill]]  ;;  %s8347_s0 = scalar_lea.vmem %s966_s13, 16 }
 0x127   : > { %p8348_p5 = scmp.ne.s32.totalorder %s966_s13, %s8347_s0  ;;  %s8354_s11 = scalar_lea.vmem %s966_s13, 32 }
 0x128   : > { %p8355_p3 = scmp.lt.s32.totalorder %s966_s13, %s966_s13  ;;  %p8356_p2 = scmp.lt.s32.totalorder %s8354_s11, %s8347_s0 }
 0x129   : > { %p8350_p6 = pnand %p8348_p5, %p8930_p13 }
 0x12a   : > { %p8357_p4 = por %p8356_p2, %p8355_p3 }
 0x12b   : > { %p8351_p10 = pneg %p8350_p6 }
 0x12c   : > { %7309 = dma.hbm_to_vmem [thread:$0]  (!%p8924_p12), %s11768_s22, 256, %s939_s10, [#allocation19], %s11767_s2, %s11767_s2, %s11766_s18  }
 0x12d   : > { %p8358_p7 = pnand %p8357_p4, %p8351_p10 }
 0x12f   : > { %8361 = shalt.err (!%p8358_p7)
}
 0x130   : > { %s11769_s16 = sld [smem:[#allocation63_spill]]  ;;  %s8686_s23 = smov [#allocation26]  }
 0x131   : > { %s986_s5 = sshll.u32 %s8686_s23, 4  ;;  %s8687_s6 = smov [#allocation29]   ;;  %s987_s5 = int_to_ptr.vmem [resolvable:$true] %s986_s5 }
 0x132   : > { %s1014_s10 = sshll.u32 %s8687_s6, 4  ;;  %s8373_s22 = scalar_lea.vmem %s987_s5, 256  ;;  %s1015_s10 = int_to_ptr.vmem [resolvable:$true] %s1014_s10 }
 0x133   : > { %p8374_p8 = scmp.ne.s32.totalorder %s987_s5, %s8373_s22  ;;  %p8381_p9 = scmp.lt.s32.totalorder %s987_s5, %s987_s5 }
 0x134   : > { %p8382_p1 = scmp.lt.s32.totalorder %s8373_s22, %s8373_s22 }
 0x135   : > { %p8376_p11 = pnand %p8374_p8, %p8930_p13 }
 0x136   : > { %7315 = dma.hbm_to_vmem [thread:$0]  (!%p8924_p12), %s11769_s16, 16, %s966_s13, [#allocation22]  }
 0x137   : > { %p8377_p0 = pneg %p8376_p11  ;;  %p8383_p5 = por %p8382_p1, %p8381_p9 }
 0x139   : > { %p8384_p6 = pnand %p8383_p5, %p8377_p0 }
 0x13b   : > { %8387 = shalt.err (!%p8384_p6)
}
 0x13c   : > { %s11770_s13 = sld [smem:[#allocation64_spill]]  ;;  %s8399_s6 = scalar_lea.vmem %s1015_s10, 32 }
 0x13d   : > { %p8400_p10 = scmp.ne.s32.totalorder %s1015_s10, %s8399_s6  ;;  %p8407_p4 = scmp.lt.s32.totalorder %s1015_s10, %s1015_s10 }
 0x13e   : > { %p8408_p7 = scmp.lt.s32.totalorder %s8399_s6, %s8399_s6 }
 0x13f   : > { %p8402_p3 = pnand %p8400_p10, %p8930_p13 }
 0x140   : > { %p8409_p8 = por %p8408_p7, %p8407_p4 }
 0x141   : > { %p8403_p2 = pneg %p8402_p3 }
 0x142   : > { %7321 = dma.hbm_to_vmem [thread:$0]  (!%p8924_p12), %s11770_s13, 256, %s987_s5, [#allocation25], %s11767_s2, %s11767_s2, %s11766_s18  }
 0x143   : > { %p8410_p11 = pnand %p8409_p8, %p8403_p2 }
 0x145   : > { %8413 = shalt.err (!%p8410_p11)
}
 0x146   : > { %s11771_s0 = sld [smem:[#allocation66_spill]]  ;;  %s8688_s11 = smov [#allocation32]  }
 0x147   : > { %s1044_s16 = sshll.u32 %s8688_s11, 4  ;;  %s8689_s23 = smov [#allocation35]   ;;  %s1045_s16 = int_to_ptr.vmem [resolvable:$true] %s1044_s16 }
 0x148   : > { %s1065_s22 = sshll.u32 %s8689_s23, 4  ;;  %s8425_s5 = scalar_lea.vmem %s1045_s16, 32  ;;  %s1066_s22 = int_to_ptr.vmem [resolvable:$true] %s1065_s22 }
 0x149   : > { %p8426_p0 = scmp.ne.s32.totalorder %s1045_s16, %s8425_s5  ;;  %p8433_p5 = scmp.lt.s32.totalorder %s1045_s16, %s1045_s16 }
 0x14a   : > { %p8434_p6 = scmp.lt.s32.totalorder %s8425_s5, %s8425_s5 }
 0x14b   : > { %p8428_p9 = pnand %p8426_p0, %p8930_p13 }
 0x14c   : > { %7327 = dma.hbm_to_vmem [thread:$0]  (!%p8924_p12), %s11771_s0, 32, %s1015_s10, [#allocation28]  }
 0x14d   : > { %p8429_p1 = pneg %p8428_p9  ;;  %p8435_p10 = por %p8434_p6, %p8433_p5 }
 0x14f   : > { %p8436_p3 = pnand %p8435_p10, %p8429_p1 }
 0x151   : > { %8439 = shalt.err (!%p8436_p3)
}
 0x152   : > { %s11772_s18 = sld [smem:[#allocation69_spill]]  ;;  %s8451_s2 = scalar_lea.vmem %s1066_s22, 512 }
 0x153   : > { %p8452_p2 = scmp.ne.s32.totalorder %s1066_s22, %s8451_s2  ;;  %p8459_p8 = scmp.lt.s32.totalorder %s1066_s22, %s1066_s22 }
 0x154   : > { %p8460_p11 = scmp.lt.s32.totalorder %s8451_s2, %s8451_s2 }
 0x155   : > { %p8454_p4 = pnand %p8452_p2, %p8930_p13 }
 0x156   : > { %p8461_p0 = por %p8460_p11, %p8459_p8 }
 0x157   : > { %p8455_p7 = pneg %p8454_p4 }
 0x158   : > { %7333 = dma.hbm_to_vmem [thread:$0]  (!%p8924_p12), %s11772_s18, 32, %s1045_s16, [#allocation31]  }
 0x159   : > { %p8462_p9 = pnand %p8461_p0, %p8455_p7 }
 0x15b   : > { %8465 = shalt.err (!%p8462_p9)
}
 0x15c   : > { %s8690_s10 = smov 256   ;;  %s11773_s13 = sld [smem:[#allocation70_spill]] }
 0x15d   : > { %s8691_s6 = smov 16   ;;  %s8692_s0 = smov [#allocation38]  }
 0x15e   : > { %s1093_s11 = sshll.u32 %s8692_s0, 4  ;;  %s8693_s16 = smov [#allocation39]   ;;  %s1094_s11 = int_to_ptr.vmem [resolvable:$true] %s1093_s11 }
 0x15f   : > { %s1107_s23 = sshll.u32 %s8693_s16, 4  ;;  %s8477_s5 = scalar_lea.vmem %s1094_s11, 64  ;;  %s1108_s23 = int_to_ptr.vmem [resolvable:$true] %s1107_s23 }
 0x160   : > { %p8478_p1 = scmp.ne.s32.totalorder %s1094_s11, %s8477_s5  ;;  %p8485_p10 = scmp.lt.s32.totalorder %s1094_s11, %s1094_s11 }
 0x161   : > { %p8486_p3 = scmp.lt.s32.totalorder %s8477_s5, %s8477_s5 }
 0x162   : > { %7339 = dma.hbm_to_vmem [thread:$0]  (!%p8924_p12), %s11773_s13, 512, %s1066_s22, [#allocation34], %s8690_s10, %s8690_s10, %s8691_s6  }
 0x163   : > { %p8480_p5 = pnand %p8478_p1, %p8930_p13  ;;  %p8487_p2 = por %p8486_p3, %p8485_p10 }
 0x165   : > { %p8481_p6 = pneg %p8480_p5 }
 0x167   : > { %p8488_p4 = pnand %p8487_p2, %p8481_p6 }
 0x169   : > { %8491 = shalt.err (!%p8488_p4)
}
 0x16a   : > { %s11774_s18 = sld [smem:[#allocation73_spill]]  ;;  %s8503_s22 = scalar_lea.vmem %s1108_s23, 16 }
 0x16b   : > { %p8504_p7 = scmp.ne.s32.totalorder %s1108_s23, %s8503_s22  ;;  %s8510_s2 = scalar_lea.vmem %s1108_s23, 32 }
 0x16c   : > { %p8511_p0 = scmp.lt.s32.totalorder %s1108_s23, %s1108_s23  ;;  %p8512_p9 = scmp.lt.s32.totalorder %s8510_s2, %s8503_s22 }
 0x16d   : > { %p8506_p8 = pnand %p8504_p7, %p8930_p13 }
 0x16e   : > { %p8513_p1 = por %p8512_p9, %p8511_p0 }
 0x16f   : > { %p8507_p11 = pneg %p8506_p8 }
 0x170   : > { %7345 = dma.hbm_to_vmem [thread:$0]  (!%p8924_p12), %s11774_s18, 64, %s1094_s11, [#allocation37]  }
 0x171   : > { %p8514_p5 = pnand %p8513_p1, %p8507_p11 }
 0x173   : > { %8517 = shalt.err (!%p8514_p5)
}
 0x174   : > { %7348 = dma.hbm_to_vmem [thread:$0]  (!%p8924_p12), %s8855_s12, 16, %s1108_s23, [#allocation40]  }
 0x175   : > { %p11775_p6 = scmp.ne.s32.totalorder %s11756_s26, 0 }
 0x177   : > { %1128 = sbr.rel (%p11775_p6) target bundleno = 2719 (0xa9f), region = 144 }
 0x17c   : > { %p11776_p10 = scmp.eq.s32.totalorder %s8888_s7, 0 }
 0x17e   : > { %8561 = dma.done.wait (%p11776_p10), [#allocation4], 256   ;;  %p11777_p3 = pmov %p11776_p10 }
 0x180   : > { %8563 = vsyncadd (%p11777_p3), [#allocation4], 4294967040  ;;  %p11778_p13 = pmov %p11777_p3 }
 0x181   : > { %p11779_p2 = pmov %p11777_p3 }
 0x182   : > { %8565 = dma.done.wait (%p11778_p13), [#allocation7], 1040  }
 0x183   : > { %8567 = vsyncadd (%p11779_p2), [#allocation7], 4294966256  ;;  %p11780_p4 = pmov %p11779_p2 }
 0x184   : > { %p11781_p12 = pmov %p11779_p2 }
 0x185   : > { %8569 = dma.done.wait (%p11780_p4), [#allocation10], 272  }
 0x186   : > { %8571 = vsyncadd (%p11781_p12), [#allocation10], 4294967024  ;;  %p11782_p7 = pmov %p11779_p2 }
 0x187   : > { %p11783_p8 = pmov %p11779_p2 }
 0x188   : > { %8573 = dma.done.wait (%p11782_p7), [#allocation13], 1040  }
 0x189   : > { %8575 = vsyncadd (%p11783_p8), [#allocation13], 4294966256  ;;  %p11784_p11 = pmov %p11779_p2 }
 0x18a   : > { %p11785_p0 = pmov %p11779_p2 }
 0x18b   : > { %8577 = dma.done.wait (%p11784_p11), [#allocation16], 32  }
 0x18c   : > { %8579 = vsyncadd (%p11785_p0), [#allocation16], 4294967264  ;;  %p11786_p9 = pmov %p11785_p0 }
 0x18d   : > { %p11787_p1 = pmov %p11785_p0 }
 0x18e   : > { %8581 = dma.done.wait (%p11786_p9), [#allocation19], 272  }
 0x18f   : > { %8583 = vsyncadd (%p11787_p1), [#allocation19], 4294967024  ;;  %p11788_p5 = pmov %p11785_p0 }
 0x190   : > { %p11789_p6 = pmov %p11785_p0 }
 0x191   : > { %8585 = dma.done.wait (%p11788_p5), [#allocation22], 1040  }
 0x192   : > { %8587 = vsyncadd (%p11789_p6), [#allocation22], 4294966256  ;;  %p11790_p10 = pmov %p11785_p0 }
 0x193   : > { %p11791_p3 = pmov %p11785_p0 }
 0x194   : > { %8589 = dma.done.wait (%p11790_p10), [#allocation25], 272  }
 0x195   : > { %8591 = vsyncadd (%p11791_p3), [#allocation25], 4294967024  ;;  %p11792_p13 = pmov %p11785_p0 }
 0x196   : > { %p11793_p2 = pmov %p11785_p0 }
 0x197   : > { %8593 = dma.done.wait (%p11792_p13), [#allocation28], 64  }
 0x198   : > { %8595 = vsyncadd (%p11793_p2), [#allocation28], 4294967232  ;;  %p11794_p4 = pmov %p11785_p0 }
 0x199   : > { %p11795_p12 = pmov %p11785_p0 }
 0x19a   : > { %8597 = dma.done.wait (%p11794_p4), [#allocation31], 544  }
 0x19b   : > { %8599 = vsyncadd (%p11795_p12), [#allocation31], 4294966752  ;;  %p11796_p7 = pmov %p11785_p0 }
 0x19c   : > { %p11797_p8 = pmov %p11785_p0 }
 0x19d   : > { %8601 = dma.done.wait (%p11796_p7), [#allocation34], 544  }
 0x19e   : > { %8603 = vsyncadd (%p11797_p8), [#allocation34], 4294966752  ;;  %p11798_p11 = pmov %p11785_p0 }
 0x1a0   : > { %8605 = dma.done.wait (%p11798_p11), [#allocation37], 128  }
 0x1a1   : > { %8607 = vsyncadd (%p11785_p0), [#allocation37], 4294967168  ;;  %p11799_p9 = pmov %p11785_p0 }
 0x1a2   : > { %p11800_p1 = pmov %p11785_p0 }
 0x1a3   : > { %8609 = dma.done.wait (%p11799_p9), [#allocation40], 16  }
 0x1a4   : > { %8611 = vsyncadd (%p11800_p1), [#allocation40], 4294967280  ;;  %p1305_p5 = scmp.lt.s32.totalorder %s8888_s7, 1  ;;  %v11607_v0 = vlaneseq  ;;  %s11804_s15 = sld [smem:[#allocation56_spill]]  ;;  %v7498_v6 = vld [vmem:[#allocation6 + $0x38] sm:$0xff]   ;;  %v7499_v8 = vld [vmem:[#allocation6 + $0x30] sm:$0xff]  }
 0x1a5   : > { %7026 = vmatprep.subr.bf16.mxu0 %v7498_v6  ;;  %vm11644_vm0 = vcmask 1043456   ;;  %v7500_v14 = vld [vmem:[#allocation6 + $0x28] sm:$0xff]   ;;  %v11810_v16 = vmov 0  ;;  %v11814_v18 = vmov 0  ;;  %v7501_v20 = vld [vmem:[#allocation6 + $0x20] sm:$0xff]   ;;  %vm11664_vm4 = vcmask 1040384  }
 0x1a6   : > { %s9134_s28 = scalar_select %p1305_p5, %s8888_s7, 1  ;;  %v9137_v1 = vshrl.u32 %v11607_v0, 7  ;;  %7027 = vmatpush3.bf16.msra.mxu0 %v7498_v6  ;;  %vm1730_vm3 = vsmask.f32 256  ;;  %v9215_v34 = vld [vmem:[#allocation3] sm:$0xff]  ;;  %v7502_v44 = vld [vmem:[#allocation6 + $0x18] sm:$0xff]  }
 0x1a7   : > { %7028 = vmatprep.subr.bf16.mxu0 %v7499_v8  ;;  %v9217_v35 = vld [vmem:[#allocation3 + $0x8] ss:$0 sm:$0xff]  ;;  %vm1924_vm5 = vsmask.f32 4352  ;;  %vm11643_vm6 = vcmask 1044480   ;;  %v7503_v61 = vld [vmem:[#allocation6 + $0x10] sm:$0xff]   ;;  %vm9289_vm11 = vmand %vm11664_vm4, %vm1730_vm3 }
 0x1a8   : > { %11801 = vst [vmem:[#allocation82_spill] sm:$0xff] %v9137_v1  ;;  %v9140_v2 = vadd.s32 8, %v9137_v1  ;;  %s6826_s26 = sshll.u32 %s9134_s28, 7  ;;  %v11615_v3 = vand.u32 7, %v9137_v1  ;;  %v9145_v4 = vsub.s32 4, %v9137_v1  ;;  %v9148_v5 = vsub.s32 5, %v9137_v1  ;;  %vm9340_vm13 = vmand %vm11643_vm6, %vm1924_vm5 }
 0x1a9   : > { %v9151_v7 = vsub.s32 7, %v9137_v1  ;;  %v9154_v9 = vsub.s32 1, %v9137_v1  ;;  %v9158_v11 = vsub.s32 2, %v9137_v1  ;;  %v9161_v12 = vsub.s32 3, %v9137_v1  ;;  %s11901_s13 = sld [smem:[#allocation60_spill]]  ;;  %s6577_s5 = sshll.u32 %s9134_s28, 2 }
 0x1aa   : > { %11802 = vst [vmem:[#allocation83_spill] sm:$0xff] %v9140_v2  ;;  %11803 = vst [vmem:[#allocation84_spill] sm:$0xff] %v9145_v4  ;;  %v11614_v10 = vand.u32 7, %v9140_v2  ;;  %v9164_v13 = vadd.s32 16, %v9137_v1  ;;  %v9167_v15 = vadd.s32 24, %v9137_v1  ;;  %s9170_s10 = scalar_lea.vmem %s11804_s15, %s6826_s26  ;;  %vm9174_vm1 = vcmp.ge.s32.totalorder %v11615_v3, 1  ;;  %7029 = vmatpush3.bf16.msra.mxu0 %v7499_v8  ;;  %s1313_s18 = scalar_lea.vmem %s8865_s14, %s6577_s5 }
 0x1ab   : > { %11805 = vst [vmem:[#allocation85_spill] sm:$0xff] %v9148_v5  ;;  %11806 = vst [vmem:[#allocation86_spill] sm:$0xff] %v9151_v7  ;;  %v11811_v16 = vsel %vm9174_vm1, 4294967295, %v11810_v16  ;;  %v9179_v17 = vsub.s32 6, %v9137_v1  ;;  %v9188_v19 = vsub.s32 0, %v9137_v1  ;;  %7030 = vmatprep.subr.bf16.mxu0 %v7500_v14  ;;  %v9192_v22 = vld [vmem:[%s9170_s10] sm:$0xff]   ;;  %v9224_v40 = vrot.slane %v9215_v34, %v9145_v4 }
 0x1ac   : > { %11807 = vst [vmem:[#allocation87_spill] sm:$0xff] %v9154_v9  ;;  %11808 = vst [vmem:[#allocation88_spill] sm:$0xff] %v9158_v11  ;;  %vm9183_vm2 = vcmp.ge.s32.totalorder %v11614_v10, 1  ;;  %v11613_v21 = vand.u32 7, %v9164_v13  ;;  %v9195_v23 = vld [vmem:[%s9170_s10 + $0x20] sm:$0xff]   ;;  %v11612_v25 = vand.u32 7, %v9167_v15  ;;  %v11609_v27 = vunpack.c.l.bf16 %v9192_v22 }
 0x1ad   : > { %11809 = vst [vmem:[#allocation89_spill] sm:$0xff] %v9161_v12  ;;  %11812 = vst [vmem:[#allocation90_spill] sm:$0xff] %v11811_v16  ;;  %v11815_v18 = vsel %vm9183_vm2, 4294967295, %v11814_v18  ;;  %v1482_v24 = vld [vmem:[%s9170_s10 + $0x40] sm:$0xf]  ;;  %v9200_v26 = vadd.s32 32, %v9137_v1  ;;  %v11608_v28 = vunpack.c.h.bf16 %v9192_v22  ;;  %v1520_v32 = vunpack.c.l.bf16 %v9195_v23 }
 0x1ae   : > { %11813 = vst [vmem:[#allocation91_spill] sm:$0xff] %v9179_v17  ;;  %11816 = vst [vmem:[#allocation92_spill] sm:$0xff] %v11815_v18  ;;  %v9205_v29 = vld [vmem:[%s9170_s10 + $0x44] sm:$0xff]   ;;  %v9208_v30 = vld [vmem:[%s9170_s10 + $0x60] sm:$0xf]  ;;  %v1521_v33 = vunpack.c.h.bf16 %v9195_v23  ;;  %v1548_v36 = vunpack.c.l.bf16 %v1482_v24  ;;  %7031 = vmatpush3.bf16.msra.mxu0 %v7500_v14  ;;  %v9228_v41 = vrot.slane %v9215_v34, %v9148_v5  ;;  %v9232_v42 = vrot.slane %v9215_v34, %v9151_v7  ;;  %s12048_s6 = sld [smem:[#allocation65_spill]] }
 0x1af   : > { %11817 = vst [vmem:[#allocation93_spill] sm:$0xff] %v9188_v19  ;;  %11818 = vst [vmem:[#allocation94_spill] sm:$0xff] %v9192_v22  ;;  %v9211_v31 = vld [vmem:[%s9170_s10 + $0x64] sm:$0xf]  ;;  %v1549_v37 = vunpack.c.l.bf16 %v9205_v29  ;;  %v1576_v38 = vunpack.c.l.bf16 %v9208_v30  ;;  %v6579_v43 = vcombine.low %v1482_v24, %v1482_v24  ;;  %7032 = vmatprep.subr.bf16.mxu0 %v7501_v20  ;;  %v9238_v47 = vrot.slane %v9215_v34, %v9154_v9  ;;  %s12054_s0 = sld [smem:[#allocation68_spill]]  ;;  %s1297_s22 = sand.u32 1, %s8622_s1  }
 0x1b0   : > { %v1577_v39 = vunpack.c.l.bf16 %v9211_v31  ;;  %v6583_v48 = vcombine.low %v9208_v30, %v9208_v30  ;;  %v1512_v49 = vmul.f32 %v11609_v27, %v9224_v40  ;;  %v1513_v50 = vmul.f32 %v11608_v28, %v9224_v40  ;;  %vm1785_vm7 = vmpackc.low %vm9174_vm1, %vm9174_vm1  ;;  %s12056_s16 = sld [smem:[#allocation71_spill]]  ;;  %s6823_s28 = sshll.u32 %s8888_s7, 4 }
 0x1b1   : > { %v1588_v45 = vmul.f32 %v9217_v35, %v1576_v38  ;;  %v1532_v51 = vmul.f32 %v9228_v41, %v1520_v32  ;;  %v1533_v52 = vmul.f32 %v9228_v41, %v1521_v33  ;;  %v1560_v53 = vmul.f32 %v9232_v42, %v1548_v36  ;;  %vm1786_vm8 = vmpackc.low %vm9183_vm2, %vm9183_vm2  ;;  %v7504_v33 = vld [vmem:[#allocation6 + $0x8] sm:$0xff]   ;;  %s12057_s23 = sld [smem:[#allocation67_spill]]  ;;  %s1298_s26 = scalar_lea.vmem [#allocation41], %s1297_s22 }
 0x1b2   : > { %v1589_v46 = vmul.f32 %v9217_v35, %v1577_v39  ;;  %v1561_v54 = vmul.f32 %v9232_v42, %v1549_v37  ;;  %v1628_v55 = vsel %vm11644_vm0, 0, %v6579_v43  ;;  %v1680_v56 = vsel %vm11644_vm0, 0, %v6583_v48  ;;  %7033 = vmatpush3.bf16.msra.mxu0 %v7501_v20  ;;  %s12115_s2 = sld [smem:[#allocation80_spill]]  ;;  %s6178_s15 = sshll.u32 %s1298_s26, 4  ;;  %s6179_s15 = int_to_ptr.vmem [resolvable:$true] %s6178_s15 }
 0x1b3   : > { %v1540_v57 = vadd.f32 %v1532_v51, %v1512_v49  ;;  %v1541_v58 = vadd.f32 %v1533_v52, %v1513_v50  ;;  %v1630_v59 = vunpack.c.l.bf16 %v1628_v55  ;;  %v1631_v60 = vunpack.c.h.bf16 %v1628_v55  ;;  %7034 = vmatprep.subr.bf16.mxu0 %v7502_v44  ;;  %v9285_v49 = vld [vmem:[%s9170_s10 + $0x8] sm:$0xff]   ;;  %s8518_s5 = scalar_lea.vmem %s6179_s15, 16 }
 0x1b4   : > { %v1682_v62 = vunpack.c.l.bf16 %v1680_v56  ;;  %v1683_v63 = vunpack.c.h.bf16 %v1680_v56  ;;  %v9261_v6 = vrot.slane %v9215_v34, %v9158_v11  ;;  %vm9270_vm9 = vcmp.ge.s32.totalorder %v11613_v21, 1  ;;  %11825 = vst [vmem:[#allocation97_spill] sm:$0xff] %v9285_v49  ;;  %v9314_v56 = vld [vmem:[%s9170_s10 + $0x28] sm:$0xff]   ;;  %p8519_p6 = scmp.ne.s32.totalorder %s6179_s15, %s8518_s5 }
 0x1b5   : > { %v1568_v8 = vadd.f32 %v1560_v53, %v1540_v57  ;;  %v1569_v14 = vadd.f32 %v1561_v54, %v1541_v58  ;;  %v1642_v20 = vmul.f32 %v9238_v47, %v1630_v59  ;;  %v1643_v24 = vmul.f32 %v9238_v47, %v1631_v60  ;;  %vm1787_vm14 = vmpackc.low %vm9270_vm9, %vm9270_vm9  ;;  %s12055_s11 = smov %s12054_s0 }
 0x1b6   : > { %v11819_v32 = vmov 0  ;;  %v1694_v36 = vmul.f32 %v9261_v6, %v1682_v62  ;;  %v1695_v38 = vmul.f32 %v9261_v6, %v1683_v63  ;;  %v1732_v39 = vshrl.u32 %v9195_v23, 16  ;;  %7035 = vmatpush3.bf16.msra.mxu0 %v7502_v44  ;;  %v7505_v62 = vld [vmem:[#allocation6] sm:$0xff]  }
 0x1b7   : > { %v11820_v32 = vsel %vm9270_vm9, 4294967295, %v11819_v32  ;;  %v1735_v43 = vshll.u32 %v9195_v23, 16  ;;  %vm9280_vm10 = vcmp.ge.s32.totalorder %v11612_v25, 1  ;;  %v11822_v48 = vmov 0  ;;  %7036 = vmatprep.subr.bf16.mxu0 %v7503_v61  ;;  %v9380_v25 = vld [vmem:[%s9170_s10 + $0x6c] sm:$0xf] }
 0x1b8   : > { %11821 = vst [vmem:[#allocation95_spill] sm:$0xff] %v11820_v32  ;;  %v11823_v48 = vsel %vm9280_vm10, 4294967295, %v11822_v48  ;;  %v1596_v50 = vadd.f32 %v1588_v45, %v1568_v8  ;;  %v1597_v51 = vadd.f32 %v1589_v46, %v1569_v14  ;;  %v11621_v53 = vmov 0   ;;  %vm1788_vm15 = vmpackc.low %vm9280_vm10, %vm9280_vm10  ;;  %p12116_p10 = scmp.ne.s32.totalorder %s12115_s2, 0 }
 0x1b9   : > { %11824 = vst [vmem:[#allocation96_spill] sm:$0xff] %v11823_v48  ;;  %v1793_v23 = vsel %vm1785_vm7, 65537, %v11621_v53  ;;  %v1794_v44 = vsel %vm1786_vm8, 65537, %v11621_v53  ;;  %v9305_v45 = vrot.slane %v1732_v39, 7  ;;  %v9309_v54 = vrot.slane %v9215_v34, %v9161_v12  ;;  %v9330_v39 = vld [vmem:[%s9170_s10 + $0x4c] sm:$0xff]  }
 0x1ba   : > { %v6591_v46 = vcombine.low %v1793_v23, %v1794_v44  ;;  %v6595_v55 = vcombine.low %v9208_v30, %v9211_v31  ;;  %v1650_v57 = vadd.f32 %v1642_v20, %v1596_v50  ;;  %v1651_v58 = vadd.f32 %v1643_v24, %v1597_v51  ;;  %7037 = vmatpush3.bf16.msra.mxu0 %v7503_v61  ;;  %p8520_p3 = pnand %p8519_p6, %p12116_p10 }
 0x1bb   : > { %v9318_v59 = vrot.slane %v9215_v34, %v9179_v17  ;;  %v9322_v60 = vrot.slane %v9215_v34, %v9188_v19  ;;  %v1737_v63 = vor.u32 %v1735_v43, %v9305_v45  ;;  %v11611_v50 = vunpack.c.l.bf16 %v9285_v49  ;;  %7038 = vmatprep.subr.bf16.mxu0 %v7504_v33 }
 0x1bc   : > { %vm9325_vm12 = vcmp.ne.s16.totalorder %v6591_v46, 0  ;;  %v1856_v30 = vshrl.u32 %v6595_v55, 16  ;;  %v1859_v14 = vshll.u32 %v6595_v55, 16  ;;  %v1702_v20 = vadd.f32 %v1694_v36, %v1650_v57  ;;  %p8521_p13 = pneg %p8520_p3 }
 0x1bd   : > { %v1703_v24 = vadd.f32 %v1695_v38, %v1651_v58  ;;  %v11610_v51 = vunpack.c.h.bf16 %v9285_v49  ;;  %v1768_v34 = vsel %vm9289_vm11, 0, %v1737_v63  ;;  %v1514_v36 = vmul.f32 %v11611_v50, %v9224_v40 }
 0x1be   : > { %v9336_v43 = vrot.slane %v1856_v30, 7  ;;  %v1925_v23 = vrot.slane %v1856_v30, 3  ;;  %v1926_v44 = vrot.slane %v1859_v14, 4  ;;  %v1817_v61 = vsel %vm9325_vm12, %v1768_v34, 0  ;;  %7039 = vmatpush3.bf16.msra.mxu0 %v7504_v33 }
 0x1bf   : > { %v1515_v38 = vmul.f32 %v11610_v51, %v9224_v40  ;;  %v1522_v55 = vunpack.c.l.bf16 %v9314_v56  ;;  %v1821_v57 = vunpack.c.l.bf16 %v1817_v61  ;;  %v1822_v58 = vunpack.c.h.bf16 %v1817_v61  ;;  %7040 = vmatprep.subr.bf16.mxu0 %v7505_v62 }
 0x1c0   : > { %v1861_v63 = vor.u32 %v1859_v14, %v9336_v43  ;;  %v9354_v30 = vor.u32 %v1926_v44, %v1925_v23  ;;  %v1523_v34 = vunpack.c.h.bf16 %v9314_v56  ;;  %v1550_v28 = vunpack.c.h.bf16 %v9205_v29 }
 0x1c1   : > { %v1534_v0 = vmul.f32 %v9228_v41, %v1522_v55  ;;  %v11616_v27 = vunpack.c.l.bf16 %v9330_v39  ;;  %v1833_v51 = vmul.f32 %v9309_v54, %v1821_v57  ;;  %v1834_v61 = vmul.f32 %v9309_v54, %v1822_v58  ;;  %v1492_v55 = vld [vmem:[%s9170_s10 + $0x68] sm:$0xf] }
 0x1c2   : > { %v1890_v14 = vsel %vm9289_vm11, 0, %v1861_v63  ;;  %v1951_v33 = vsel %vm9340_vm13, 0, %v9354_v30  ;;  %v1535_v57 = vmul.f32 %v9228_v41, %v1523_v34  ;;  %7041 = vmatpush3.bf16.msra.mxu0 %v7505_v62  ;;  %v1562_v8 = vmul.f32 %v9232_v42, %v1550_v28 }
 0x1c3   : > { %v1891_v23 = vsel %vm9325_vm12, %v1890_v14, 0  ;;  %v1952_v44 = vsel %vm9325_vm12, %v1951_v33, 0  ;;  %v1542_v58 = vadd.f32 %v1534_v0, %v1514_v36  ;;  %v1841_v52 = vadd.f32 %v1833_v51, %v1702_v20 }
 0x1c4   : > { %v1842_v46 = vadd.f32 %v1834_v61, %v1703_v24  ;;  %v1895_v63 = vunpack.c.l.bf16 %v1891_v23  ;;  %v1896_v50 = vunpack.c.h.bf16 %v1891_v23  ;;  %v1956_v21 = vunpack.c.l.bf16 %v1952_v44 }
 0x1c5   : > { %v1957_v14 = vunpack.c.h.bf16 %v1952_v44  ;;  %v1543_v10 = vadd.f32 %v1535_v57, %v1515_v38  ;;  %v1563_v36 = vmul.f32 %v9232_v42, %v11616_v27  ;;  %v1578_v20 = vunpack.c.l.bf16 %v1492_v55 }
 0x1c6   : > { %v1907_v33 = vmul.f32 %v9318_v59, %v1895_v63  ;;  %v1908_v0 = vmul.f32 %v9318_v59, %v1896_v50  ;;  %v1968_v24 = vmul.f32 %v9322_v60, %v1956_v21  ;;  %v1570_v34 = vadd.f32 %v1562_v8, %v1542_v58 }
 0x1c7   : > { %v1969_v51 = vmul.f32 %v9322_v60, %v1957_v14  ;;  %v1579_v62 = vunpack.c.l.bf16 %v9380_v25  ;;  %v1571_v23 = vadd.f32 %v1563_v36, %v1543_v10  ;;  %v1590_v44 = vmul.f32 %v9217_v35, %v1578_v20  ;;  %v9418_v20 = vld [vmem:[%s9170_s10 + $0x10] sm:$0xff]  }
 0x1c8   : > { %v1915_v61 = vadd.f32 %v1907_v33, %v1841_v52  ;;  %v1916_v38 = vadd.f32 %v1908_v0, %v1842_v46  ;;  %v6584_v50 = vcombine.low %v9211_v31, %v1492_v55  ;;  %v1795_v21 = vsel %vm1787_vm14, 65537, %v11621_v53  ;;  %11832 = vst [vmem:[#allocation98_spill] sm:$0xff] %v9418_v20 }
 0x1c9   : > { %v1591_v57 = vmul.f32 %v9217_v35, %v1579_v62  ;;  %v1598_v27 = vadd.f32 %v1590_v44, %v1570_v34  ;;  %v1739_v14 = vshrl.u32 %v9314_v56, 16  ;;  %v1742_v8 = vshll.u32 %v9314_v56, 16  ;;  %v9430_v44 = vld [vmem:[%s9170_s10 + $0x30] sm:$0xff]  }
 0x1ca   : > { %v1976_v63 = vadd.f32 %v1968_v24, %v1915_v61  ;;  %v1977_v3 = vadd.f32 %v1969_v51, %v1916_v38  ;;  %v1684_v52 = vunpack.c.l.bf16 %v6584_v50  ;;  %v1685_v46 = vunpack.c.h.bf16 %v6584_v50 }
 0x1cb   : > { %v1599_v58 = vadd.f32 %v1591_v57, %v1571_v23  ;;  %v1644_v31 = vmul.f32 %v9238_v47, %v1549_v37  ;;  %v1645_v33 = vmul.f32 %v9238_v47, %v1550_v28  ;;  %v9414_v56 = vrot.slane %v1739_v14, 7 }
 0x1cc   : > { %v1984_v10 = vpack.c.bf16 %v1977_v3, %v1976_v63  ;;  %v1696_v0 = vmul.f32 %v9261_v6, %v1684_v52  ;;  %v1796_v3 = vsel %vm1788_vm15, 65537, %v11621_v53  ;;  %v1697_v36 = vmul.f32 %v9261_v6, %v1685_v46 }
 0x1cd   : > { %v6592_v29 = vcombine.low %v1795_v21, %v1796_v3  ;;  %v6596_v37 = vcombine.low %v1492_v55, %v9380_v25  ;;  %v1652_v28 = vadd.f32 %v1644_v31, %v1598_v27  ;;  %v1653_v24 = vadd.f32 %v1645_v33, %v1599_v58  ;;  %v9457_v3 = vld [vmem:[%s9170_s10 + $0x54] sm:$0xff]  }
 0x1ce   : > { %7042 = vmatprep.mubr.bf16.mxu0 %v1984_v10  ;;  %v9421_v51 = vadd.s32 40, %v9137_v1  ;;  %v11620_v34 = vand.u32 7, %v9200_v26  ;;  %v1744_v62 = vor.u32 %v1742_v8, %v9414_v56  ;;  %v11838_v46 = vmov 0 }
 0x1cf   : > { %vm9425_vm7 = vcmp.ne.s16.totalorder %v6592_v29, 0  ;;  %v1863_v38 = vshrl.u32 %v6596_v37, 16  ;;  %v1866_v23 = vshll.u32 %v6596_v37, 16  ;;  %v1704_v55 = vadd.f32 %v1696_v0, %v1652_v28 }
 0x1d0   : > { %11833 = vst [vmem:[#allocation99_spill] sm:$0xff] %v9421_v51  ;;  %v1705_v57 = vadd.f32 %v1697_v36, %v1653_v24  ;;  %v11619_v27 = vand.u32 7, %v9421_v51  ;;  %vm9435_vm8 = vcmp.ge.s32.totalorder %v11620_v34, 1  ;;  %v1745_v63 = vsel %vm1730_vm3, %v9305_v45, %v1744_v62 }
 0x1d1   : > { %v9441_v21 = vrot.slane %v1863_v38, 7  ;;  %v1928_v58 = vrot.slane %v1863_v38, 3  ;;  %v1929_v52 = vrot.slane %v1866_v23, 4  ;;  %v1818_v10 = vsel %vm9425_vm7, %v1745_v63, 0  ;;  %vm1789_vm12 = vmpackc.low %vm9435_vm8, %vm9435_vm8 }
 0x1d2   : > { %vm9447_vm11 = vcmp.ge.s32.totalorder %v11619_v27, 1  ;;  %v11618_v14 = vunpack.c.l.bf16 %v9418_v20  ;;  %v11617_v8 = vunpack.c.h.bf16 %v9418_v20  ;;  %v1823_v31 = vunpack.c.l.bf16 %v1818_v10 }
 0x1d3   : > { %v11839_v46 = vsel %vm9447_vm11, 4294967295, %v11838_v46  ;;  %v1824_v33 = vunpack.c.h.bf16 %v1818_v10  ;;  %v1868_v45 = vor.u32 %v1866_v23, %v9441_v21  ;;  %v9454_v0 = vor.u32 %v1929_v52, %v1928_v58  ;;  %vm1790_vm13 = vmpackc.low %vm9447_vm11, %vm9447_vm11 }
 0x1d4   : > { %11840 = vst [vmem:[#allocation100_spill] sm:$0xff] %v11839_v46  ;;  %v1516_v36 = vmul.f32 %v11618_v14, %v9224_v40  ;;  %v1517_v29 = vmul.f32 %v11617_v8, %v9224_v40  ;;  %v1524_v37 = vunpack.c.l.bf16 %v9430_v44  ;;  %v1525_v28 = vunpack.c.h.bf16 %v9430_v44 }
 0x1d5   : > { %v1835_v24 = vmul.f32 %v9309_v54, %v1823_v31  ;;  %v1836_v62 = vmul.f32 %v9309_v54, %v1824_v33  ;;  %v1869_v38 = vsel %vm1730_vm3, %v9336_v43, %v1868_v45  ;;  %v1931_v23 = vsel %vm1924_vm5, %v9354_v30, %v9454_v0  ;;  %v1494_v45 = vld [vmem:[%s9170_s10 + $0x70] sm:$0xf] }
 0x1d6   : > { %v1892_v63 = vsel %vm9425_vm7, %v1869_v38, 0  ;;  %v1953_v58 = vsel %vm9425_vm7, %v1931_v23, 0  ;;  %v1536_v52 = vmul.f32 %v9228_v41, %v1524_v37  ;;  %v1537_v10 = vmul.f32 %v9228_v41, %v1525_v28  ;;  %v9488_v38 = vld [vmem:[%s9170_s10 + $0x74] sm:$0xf] }
 0x1d7   : > { %v1843_v43 = vadd.f32 %v1835_v24, %v1704_v55  ;;  %v1844_v30 = vadd.f32 %v1836_v62, %v1705_v57  ;;  %v1897_v31 = vunpack.c.l.bf16 %v1892_v63  ;;  %v1898_v33 = vunpack.c.h.bf16 %v1892_v63 }
 0x1d8   : > { %v1958_v61 = vunpack.c.l.bf16 %v1953_v58  ;;  %v1959_v23 = vunpack.c.h.bf16 %v1953_v58  ;;  %v1544_v37 = vadd.f32 %v1536_v52, %v1516_v36  ;;  %v1545_v8 = vadd.f32 %v1537_v10, %v1517_v29 }
 0x1d9   : > { %v1909_v28 = vmul.f32 %v9318_v59, %v1897_v31  ;;  %v1910_v14 = vmul.f32 %v9318_v59, %v1898_v33  ;;  %v1552_v27 = vunpack.c.h.bf16 %v9330_v39  ;;  %v11629_v34 = vunpack.c.l.bf16 %v9457_v3 }
 0x1da   : > { %v1970_v55 = vmul.f32 %v9322_v60, %v1958_v61  ;;  %v1971_v57 = vmul.f32 %v9322_v60, %v1959_v23  ;;  %v1580_v24 = vunpack.c.l.bf16 %v1494_v45  ;;  %v1581_v62 = vunpack.c.l.bf16 %v9488_v38 }
 0x1db   : > { %v1917_v63 = vadd.f32 %v1909_v28, %v1843_v43  ;;  %v1918_v58 = vadd.f32 %v1910_v14, %v1844_v30  ;;  %v1564_v36 = vmul.f32 %v9232_v42, %v1552_v27  ;;  %v1565_v29 = vmul.f32 %v9232_v42, %v11629_v34  ;;  %v9505_v43 = vld [vmem:[%s9170_s10 + $0x18] sm:$0xff]  }
 0x1dc   : > { %v1592_v52 = vmul.f32 %v9217_v35, %v1580_v24  ;;  %v1593_v10 = vmul.f32 %v9217_v35, %v1581_v62  ;;  %v6585_v31 = vcombine.low %v9380_v25, %v1494_v45  ;;  %11841 = vst [vmem:[#allocation101_spill] sm:$0xff] %v9505_v43  ;;  %v11842_v49 = vunpack.c.l.bf16 %v9330_v39 }
 0x1dd   : > { %v1978_v33 = vadd.f32 %v1970_v55, %v1917_v63  ;;  %v1979_v61 = vadd.f32 %v1971_v57, %v1918_v58  ;;  %v1572_v23 = vadd.f32 %v1564_v36, %v1544_v37  ;;  %v1573_v53 = vadd.f32 %v1565_v29, %v1545_v8  ;;  %v9538_v36 = vld [vmem:[%s9170_s10 + $0x38] sm:$0xff]  }
 0x1de   : > { %v1686_v20 = vunpack.c.l.bf16 %v6585_v31  ;;  %v1687_v22 = vunpack.c.h.bf16 %v6585_v31  ;;  %v1646_v34 = vmul.f32 %v9238_v47, %v11842_v49  ;;  %v1647_v24 = vmul.f32 %v9238_v47, %v1552_v27 }
 0x1df   : > { %v1985_v14 = vpack.c.bf16 %v1979_v61, %v1978_v33  ;;  %v1600_v30 = vadd.f32 %v1592_v52, %v1572_v23  ;;  %v1601_v28 = vadd.f32 %v1593_v10, %v1573_v53  ;;  %v1747_v8 = vshrl.u32 %v9430_v44, 16  ;;  %v1489_v23 = vld [vmem:[%s9170_s10 + $0x5c] sm:$0xf] }
 0x1e0   : > { %v1698_v25 = vmul.f32 %v9261_v6, %v1686_v20  ;;  %v1699_v55 = vmul.f32 %v9261_v6, %v1687_v22  ;;  %v1750_v37 = vshll.u32 %v9430_v44, 16  ;;  %v11843_v57 = vmov 0  }
 0x1e1   : > { %7043 = vmatmul.mubr.bf16.vlgmr.msra.gmra.mxu0 %v1985_v14  ;;  %v1797_v53 = vsel %vm1789_vm12, 65537, %v11843_v57  ;;  %v1798_v49 = vsel %vm1790_vm13, 65537, %v11843_v57  ;;  %v1654_v22 = vadd.f32 %v1646_v34, %v1600_v30  ;;  %v1655_v39 = vadd.f32 %v1647_v24, %v1601_v28 }
 0x1e2   : > { %v6593_v20 = vcombine.low %v1797_v53, %v1798_v49  ;;  %v6597_v44 = vcombine.low %v1494_v45, %v9488_v38  ;;  %v9528_v27 = vrot.slane %v1747_v8, 7  ;;  %v9531_v62 = vadd.s32 48, %v9137_v1 }
 0x1e3   : > { %v9534_v63 = vadd.s32 56, %v9137_v1  ;;  %v11630_v58 = vunpack.c.l.bf16 %v9505_v43  ;;  %v1706_v29 = vadd.f32 %v1698_v25, %v1654_v22  ;;  %v1707_v52 = vadd.f32 %v1699_v55, %v1655_v39 }
 0x1e4   : > { %11844 = vst [vmem:[#allocation102_spill] sm:$0xff] %v9531_v62  ;;  %vm9540_vm14 = vcmp.ne.s16.totalorder %v6593_v20, 0  ;;  %v1871_v10 = vshrl.u32 %v6597_v44, 16  ;;  %v1752_v45 = vor.u32 %v1750_v37, %v9528_v27  ;;  %v1874_v31 = vshll.u32 %v6597_v44, 16 }
 0x1e5   : > { %11845 = vst [vmem:[#allocation103_spill] sm:$0xff] %v9534_v63  ;;  %v11633_v33 = vand.u32 7, %v9531_v62  ;;  %v11632_v61 = vand.u32 7, %v9534_v63  ;;  %v11631_v28 = vunpack.c.h.bf16 %v9505_v43  ;;  %v1518_v24 = vmul.f32 %v11630_v58, %v9224_v40 }
 0x1e6   : > { %v9548_v14 = vrot.slane %v1871_v10, 7  ;;  %v1932_v30 = vrot.slane %v1871_v10, 3  ;;  %v1753_v25 = vsel %vm1730_vm3, %v9414_v56, %v1752_v45  ;;  %v1933_v55 = vrot.slane %v1874_v31, 4 }
 0x1e7   : > { %vm9558_vm15 = vcmp.ge.s32.totalorder %v11633_v33, 1  ;;  %v11848_v8 = vmov 0  ;;  %vm9564_vm7 = vcmp.ge.s32.totalorder %v11632_v61, 1  ;;  %v11851_v37 = vmov 0  ;;  %v1497_v61 = vld [vmem:[%s9170_s10 + $0x7c] sm:$0xf] }
 0x1e8   : > { %v11849_v8 = vsel %vm9558_vm15, 4294967295, %v11848_v8  ;;  %v11852_v37 = vsel %vm9564_vm7, 4294967295, %v11851_v37  ;;  %v1819_v53 = vsel %vm9540_vm14, %v1753_v25, 0  ;;  %v1876_v49 = vor.u32 %v1874_v31, %v9548_v14  ;;  %vm1791_vm12 = vmpackc.low %vm9558_vm15, %vm9558_vm15 }
 0x1e9   : > { %11850 = vst [vmem:[#allocation104_spill] sm:$0xff] %v11849_v8  ;;  %11853 = vst [vmem:[#allocation105_spill] sm:$0xff] %v11852_v37  ;;  %v1519_v56 = vmul.f32 %v11631_v28, %v9224_v40  ;;  %v1526_v22 = vunpack.c.l.bf16 %v9538_v36  ;;  %v1825_v39 = vunpack.c.l.bf16 %v1819_v53  ;;  %v1826_v20 = vunpack.c.h.bf16 %v1819_v53 }
 0x1ea   : > { %v9575_v44 = vor.u32 %v1933_v55, %v1932_v30  ;;  %v1527_v10 = vunpack.c.h.bf16 %v9538_v36  ;;  %v1877_v45 = vsel %vm1730_vm3, %v9441_v21, %v1876_v49  ;;  %v1554_v25 = vunpack.c.h.bf16 %v9457_v3  ;;  %vm1792_vm13 = vmpackc.low %vm9564_vm7, %vm9564_vm7 }
 0x1eb   : > { %v1538_v58 = vmul.f32 %v9228_v41, %v1526_v22  ;;  %v1555_v31 = vunpack.c.l.bf16 %v1489_v23  ;;  %v1837_v40 = vmul.f32 %v9309_v54, %v1825_v39  ;;  %v1838_v28 = vmul.f32 %v9309_v54, %v1826_v20 }
 0x1ec   : > { %v1893_v30 = vsel %vm9540_vm14, %v1877_v45, 0  ;;  %v1935_v55 = vsel %vm1924_vm5, %v9454_v0, %v9575_v44  ;;  %v1539_v49 = vmul.f32 %v9228_v41, %v1527_v10  ;;  %v1496_v0 = vld [vmem:[%s9170_s10 + $0x78] sm:$0xf]  ;;  %v1566_v34 = vmul.f32 %v9232_v42, %v1554_v25 }
 0x1ed   : > { %v1899_v21 = vunpack.c.l.bf16 %v1893_v30  ;;  %v1900_v23 = vunpack.c.h.bf16 %v1893_v30  ;;  %v1954_v53 = vsel %vm9540_vm14, %v1935_v55, 0  ;;  %v1845_v22 = vadd.f32 %v1837_v40, %v1706_v29 }
 0x1ee   : > { %v1846_v39 = vadd.f32 %v1838_v28, %v1707_v52  ;;  %v1960_v20 = vunpack.c.l.bf16 %v1954_v53  ;;  %v1961_v45 = vunpack.c.h.bf16 %v1954_v53  ;;  %v1546_v63 = vadd.f32 %v1538_v58, %v1518_v24 }
 0x1ef   : > { %v1911_v33 = vmul.f32 %v9318_v59, %v1899_v21  ;;  %v1912_v43 = vmul.f32 %v9318_v59, %v1900_v23  ;;  %v1547_v46 = vadd.f32 %v1539_v49, %v1519_v56  ;;  %v1567_v41 = vmul.f32 %v9232_v42, %v1555_v31 }
 0x1f0   : > { %v1972_v51 = vmul.f32 %v9322_v60, %v1960_v20  ;;  %v1973_v30 = vmul.f32 %v9322_v60, %v1961_v45  ;;  %v1582_v28 = vunpack.c.l.bf16 %v1496_v0  ;;  %v1583_v10 = vunpack.c.l.bf16 %v1497_v61 }
 0x1f1   : > { %v1919_v29 = vadd.f32 %v1911_v33, %v1845_v22  ;;  %v1920_v52 = vadd.f32 %v1912_v43, %v1846_v39  ;;  %v1574_v40 = vadd.f32 %v1566_v34, %v1546_v63  ;;  %v1575_v55 = vadd.f32 %v1567_v41, %v1547_v46 }
 0x1f2   : > { %v6586_v21 = vcombine.low %v9488_v38, %v1496_v0  ;;  %v1594_v58 = vmul.f32 %v9217_v35, %v1582_v28  ;;  %v1595_v24 = vmul.f32 %v9217_v35, %v1583_v10  ;;  %v11854_v42 = vunpack.c.l.bf16 %v9457_v3 }
 0x1f3   : > { %v1980_v53 = vadd.f32 %v1972_v51, %v1919_v29  ;;  %v1981_v23 = vadd.f32 %v1973_v30, %v1920_v52  ;;  %v1649_v63 = vmul.f32 %v9238_v47, %v1554_v25  ;;  %v1755_v46 = vshrl.u32 %v9538_v36, 16  ;;  %v7527_v30 = vld [vmem:[#allocation12 + $0x18] sm:$0xff]  }
 0x1f4   : > { %v1688_v49 = vunpack.c.l.bf16 %v6586_v21  ;;  %v1689_v20 = vunpack.c.h.bf16 %v6586_v21  ;;  %v1602_v45 = vadd.f32 %v1594_v58, %v1574_v40  ;;  %v1603_v62 = vadd.f32 %v1595_v24, %v1575_v55 }
 0x1f5   : > { %v1986_v56 = vpack.c.bf16 %v1981_v23, %v1980_v53  ;;  %v1648_v43 = vmul.f32 %v9238_v47, %v11854_v42  ;;  %v1758_v51 = vshll.u32 %v9538_v36, 16  ;;  %v1799_v35 = vsel %vm1791_vm12, 65537, %v11843_v57 }
 0x1f6   : > { %v1800_v3 = vsel %vm1792_vm13, 65537, %v11843_v57  ;;  %v6598_v38 = vcombine.low %v1496_v0, %v1497_v61  ;;  %v1700_v33 = vmul.f32 %v9261_v6, %v1688_v49  ;;  %v1701_v36 = vmul.f32 %v9261_v6, %v1689_v20 }
 0x1f7   : > { %7046 = vmatprep.mubr.bf16.mxu0 %v1986_v56  ;;  %v6594_v47 = vcombine.low %v1799_v35, %v1800_v3  ;;  %v1757_v25 = vrot.slane %v1755_v46, 7  ;;  %v6599_v31 = vcombine.low %v1496_v0, %v1496_v0  ;;  %v1656_v22 = vadd.f32 %v1648_v43, %v1602_v45 }
 0x1f8   : > { %v1657_v39 = vadd.f32 %v1649_v63, %v1603_v62  ;;  %v1879_v34 = vshrl.u32 %v6598_v38, 16  ;;  %v1882_v29 = vshll.u32 %v6598_v38, 16  ;;  %vm11671_vm12 = vcmask 1046528  }
 0x1f9   : > { %vm9629_vm14 = vcmp.ne.s16.totalorder %v6594_v47, 0  ;;  %v1760_v41 = vor.u32 %v1758_v51, %v1757_v25  ;;  %v1937_v52 = vshrl.u32 %v6599_v31, 16  ;;  %v1940_v28 = vshll.u32 %v6599_v31, 16  ;;  %v7523_v31 = vld [vmem:[#allocation12 + $0x38] sm:$0xff]  }
 0x1fa   : > { %v1881_v10 = vrot.slane %v1879_v34, 7  ;;  %v1708_v6 = vadd.f32 %v1700_v33, %v1656_v22  ;;  %v1709_v21 = vadd.f32 %v1701_v36, %v1657_v39  ;;  %7050 = vmatprep.subr.bf16.mxu1 %v7523_v31  ;;  %v7524_v22 = vld [vmem:[#allocation12 + $0x30] sm:$0xff]   ;;  %v7525_v39 = vld [vmem:[#allocation12 + $0x28] sm:$0xff]   ;;  %v11893_v16 = vmov 0 }
 0x1fb   : > { %v1761_v61 = vsel %vm1730_vm3, %v9528_v27, %v1760_v41  ;;  %v1939_v40 = vrot.slane %v1937_v52, 3  ;;  %v1942_v55 = vrot.slane %v1940_v28, 4  ;;  %7051 = vmatpush3.bf16.msra.mxu1 %v7523_v31  ;;  %v7529_v34 = vld [vmem:[#allocation12 + $0x8] sm:$0xff]   ;;  %v7530_v41 = vld [vmem:[#allocation12] sm:$0xff]  }
 0x1fc   : > { %v1820_v0 = vsel %vm9629_vm14, %v1761_v61, 0  ;;  %v1884_v62 = vor.u32 %v1882_v29, %v1881_v10  ;;  %7052 = vmatprep.subr.bf16.mxu1 %v7524_v22  ;;  %v9651_v29 = vld [vmem:[#allocation8] ss:$0 sm:$0xff]  ;;  %v9654_v61 = vld [vmem:[#allocation9] ss:$0 sm:$0xff] }
 0x1fd   : > { %v1827_v53 = vunpack.c.l.bf16 %v1820_v0  ;;  %v1828_v23 = vunpack.c.h.bf16 %v1820_v0  ;;  %v1943_v58 = vor.u32 %v1942_v55, %v1939_v40 }
 0x1fe   : > { %v1885_v24 = vsel %vm1730_vm3, %v9548_v14, %v1884_v62 }
 0x1ff   : > { %v1839_v56 = vmul.f32 %v9309_v54, %v1827_v53  ;;  %v1840_v49 = vmul.f32 %v9309_v54, %v1828_v23  ;;  %v1894_v27 = vsel %vm9629_vm14, %v1885_v24, 0  ;;  %v1944_v20 = vsel %vm1924_vm5, %v9575_v44, %v1943_v58  ;;  %7053 = vmatpush3.bf16.msra.mxu1 %v7524_v22 }
 0x200   : > { %v1901_v45 = vunpack.c.l.bf16 %v1894_v27  ;;  %v1902_v42 = vunpack.c.h.bf16 %v1894_v27  ;;  %v1955_v43 = vsel %vm9629_vm14, %v1944_v20, 0  ;;  %7054 = vmatprep.subr.bf16.mxu1 %v7525_v39 }
 0x201   : > { %v1847_v63 = vadd.f32 %v1839_v56, %v1708_v6  ;;  %v1848_v46 = vadd.f32 %v1840_v49, %v1709_v21  ;;  %v1962_v51 = vunpack.c.l.bf16 %v1955_v43  ;;  %v1963_v35 = vunpack.c.h.bf16 %v1955_v43  ;;  %v2155_v56 = vld [vmem:[#allocation11] sm:$0xff] }
 0x202   : > { %v1913_v14 = vmul.f32 %v9318_v59, %v1901_v45  ;;  %v1914_v3 = vmul.f32 %v9318_v59, %v1902_v42  ;;  %v7526_v59 = vld [vmem:[#allocation12 + $0x20] sm:$0xff]   ;;  %v9666_v20 = vrot.slane %v2155_v56, %v9161_v12  ;;  %v9670_v42 = vrot.slane %v2155_v56, %v9145_v4 }
 0x203   : > { %v1974_v54 = vmul.f32 %v9322_v60, %v1962_v51  ;;  %v1975_v47 = vmul.f32 %v9322_v60, %v1963_v35  ;;  %7055 = vmatpush3.bf16.msra.mxu1 %v7525_v39  ;;  %v7528_v60 = vld [vmem:[#allocation12 + $0x10] sm:$0xff]   ;;  %v9673_v43 = vrot.slane %v2155_v56, %v9154_v9  ;;  %v11857_v51 = vand.u32 7, %v9137_v1 }
 0x204   : > { %v1921_v38 = vadd.f32 %v1913_v14, %v1847_v63  ;;  %v1922_v33 = vadd.f32 %v1914_v3, %v1848_v46  ;;  %7056 = vmatprep.subr.bf16.mxu1 %v7526_v59  ;;  %v11858_v35 = vmov 0  ;;  %v11861_v14 = vand.u32 7, %v9140_v2 }
 0x205   : > { %vm9681_vm3 = vcmp.le.s32.totalorder %v11857_v51, 6  ;;  %v11862_v3 = vmov 0  ;;  %v9699_v31 = vrot.slane %v2155_v56, %v9148_v5  ;;  %v2303_v22 = vmul.f32 0.0, %v9673_v43 }
 0x206   : > { %v1982_v44 = vadd.f32 %v1974_v54, %v1921_v38  ;;  %v1983_v36 = vadd.f32 %v1975_v47, %v1922_v33  ;;  %v11859_v35 = vsel %vm9681_vm3, 4294967295, %v11858_v35  ;;  %vm9687_vm5 = vcmp.le.s32.totalorder %v11861_v14, 6 }
 0x207   : > { %7057 = vmatpush3.bf16.msra.mxu1 %v7526_v59  ;;  %11860 = vst [vmem:[#allocation106_spill] sm:$0xff] %v11859_v35  ;;  %v11863_v3 = vsel %vm9687_vm5, 4294967295, %v11862_v3  ;;  %v9741_v14 = vrot.slane %v2155_v56, %v9158_v11 }
 0x208   : > { %v1987_v25 = vpack.c.bf16 %v1983_v36, %v1982_v44  ;;  %7058 = vmatprep.subr.bf16.mxu1 %v7527_v30  ;;  %11864 = vst [vmem:[#allocation107_spill] sm:$0xff] %v11863_v3 }
 0x20a   : > { %7047 = vmatmul.mubr.bf16.gmra.mxu0 %v1987_v25 }
 0x20b   : > { %7059 = vmatpush3.bf16.msra.mxu1 %v7527_v30 }
 0x20c   : > { %7060 = vmatprep.subr.bf16.mxu1 %v7528_v60 }
 0x20f   : > { %7061 = vmatpush3.bf16.msra.mxu1 %v7528_v60 }
 0x210   : > { %7062 = vmatprep.subr.bf16.mxu1 %v7529_v34 }
 0x213   : > { %7063 = vmatpush3.bf16.msra.mxu1 %v7529_v34 }
 0x214   : > { %7064 = vmatprep.subr.bf16.mxu1 %v7530_v41 }
 0x217   : > { %7065 = vmatpush3.bf16.msra.mxu1 %v7530_v41 }
 0x2a1   : > { %v7044_v52 = vpop.f32.mrf.mxu0 }
 0x2a2   : > { %v2126_v28 = vmul.f32 %v7044_v52, %v9651_v29 }
 0x2a3   : > { %v2086_v10 = vpop.f32.mrf.mxu0 }
 0x2a4   : > { %v2124_v40 = vmul.f32 %v9651_v29, %v2086_v10  ;;  %v2141_v0 = vadd.f32 %v9654_v61, %v2126_v28 }
 0x2a5   : > { %v7045_v55 = vpop.f32.mrf.mxu0 }
 0x2a6   : > { %v2139_v6 = vadd.f32 %v9654_v61, %v2124_v40  ;;  %v2127_v53 = vmul.f32 %v7045_v55, %v9651_v29  ;;  %v9661_v24 = vmax.f32 %v2141_v0, 0.0  ;;  %v9728_v0 = vrot.slane %v2155_v56, %v9151_v7 }
 0x2a7   : > { %v2089_v62 = vpop.f32.mrf.mxu0 }
 0x2a8   : > { %v2147_v21 = vmax.f32 %v2139_v6, 0.0  ;;  %v2125_v23 = vmul.f32 %v9651_v29, %v2089_v62  ;;  %v2142_v45 = vadd.f32 %v9654_v61, %v2127_v53  ;;  %v2234_v54 = vrot.slane %v9661_v24, 1 }
 0x2a9   : > { %v11642_v25 = vrot.slane %v9661_v24, 7  ;;  %v9732_v53 = vrot.slane %v2155_v56, %v9188_v19 }
 0x2aa   : > { %v2178_v58 = vrot.slane %v2147_v21, 7  ;;  %v2140_v49 = vadd.f32 %v9654_v61, %v2125_v23  ;;  %v2231_v47 = vrot.slane %v2147_v21, 1  ;;  %v9695_v36 = vmax.f32 %v2142_v45, 0.0 }
 0x2ab   : > { %v2161_v39 = vmul.f32 %v9670_v42, %v2147_v21  ;;  %v2350_v51 = vmul.f32 0.0, %v9732_v53 }
 0x2ac   : > { %v2201_v27 = vsel %vm11664_vm4, 0.0, %v2178_v58  ;;  %v9675_v63 = vmax.f32 %v2140_v49, 0.0  ;;  %v11641_v62 = vrot.slane %v9695_v36, 1  ;;  %v2367_v23 = vsel %vm11671_vm12, 0.0, %v2231_v47 }
 0x2ad   : > { %v2202_v46 = vsel %vm9174_vm1, %v2201_v27, 0.0 }
 0x2ae   : > { %v2179_v38 = vrot.slane %v9675_v63, 7  ;;  %v2214_v33 = vmul.f32 %v9666_v20, %v2202_v46  ;;  %v2232_v44 = vrot.slane %v9675_v63, 1  ;;  %v2162_v10 = vmul.f32 %v9670_v42, %v9675_v63 }
 0x2b0   : > { %v9704_v59 = vsel %vm11664_vm4, %v2178_v58, %v2179_v38  ;;  %v2233_v30 = vsel %vm11671_vm12, %v2231_v47, %v2232_v44  ;;  %v9708_v60 = vsel %vm11671_vm12, %v2232_v44, %v2234_v54  ;;  %v9713_v34 = vsel %vm11664_vm4, %v2179_v38, %v11642_v25 }
 0x2b1   : > { %v2203_v41 = vsel %vm9183_vm2, %v9704_v59, 0.0  ;;  %v2271_v52 = vsel %vm9681_vm3, %v2233_v30, 0.0  ;;  %v2272_v28 = vsel %vm9687_vm5, %v9708_v60, 0.0  ;;  %v2222_v55 = vadd.f32 %v2214_v33, %v2161_v39 }
 0x2b2   : > { %v2215_v40 = vmul.f32 %v9666_v20, %v2203_v41  ;;  %v2283_v6 = vmul.f32 %v9699_v31, %v2271_v52  ;;  %v2204_v58 = vsel %vm9270_vm9, %v9713_v34, 0.0  ;;  %v2284_v45 = vmul.f32 %v9699_v31, %v2272_v28 }
 0x2b3   : > { %v2304_v38 = vmul.f32 %v9673_v43, %v2147_v21  ;;  %v2323_v47 = vmul.f32 %v9728_v0, %v9675_v63  ;;  %v11865_v39 = vand.u32 7, %v9164_v13  ;;  %v11866_v41 = vmov 0 }
 0x2b4   : > { %v2223_v49 = vadd.f32 %v2215_v40, %v2162_v10  ;;  %v2291_v46 = vadd.f32 %v2283_v6, %v2222_v55  ;;  %v2216_v52 = vmul.f32 %v9666_v20, %v2204_v58  ;;  %v2339_v28 = vsel %vm9183_vm2, %v2201_v27, 0.0 }
 0x2b5   : > { %vm9748_vm13 = vcmp.le.s32.totalorder %v11865_v39, 6  ;;  %v2368_v10 = vsel %vm9681_vm3, %v2367_v23, 0.0  ;;  %v9760_v21 = vsel %vm11671_vm12, %v2234_v54, %v11641_v62  ;;  %v2324_v13 = vmul.f32 %v9728_v0, %v9661_v24  ;;  %v9784_v39 = vld [vmem:[#allocation11 + $0x8] ss:$0 sm:$0xff] }
 0x2b6   : > { %v2292_v33 = vadd.f32 %v2284_v45, %v2223_v49  ;;  %v2311_v44 = vadd.f32 %v2303_v22, %v2291_v46  ;;  %v11867_v41 = vsel %vm9748_vm13, 4294967295, %v11866_v41  ;;  %v2163_v55 = vmul.f32 %v9670_v42, %v9661_v24 }
 0x2b7   : > { %11868 = vst [vmem:[#allocation108_spill] sm:$0xff] %v11867_v41  ;;  %v2369_v6 = vsel %vm9687_vm5, %v2233_v30, 0.0  ;;  %v2398_v27 = vsel %vm9174_vm1, %v9704_v59, 0.0  ;;  %v9772_v23 = vrot.slane %v2155_v56, %v9179_v17  ;;  %v2351_v58 = vmul.f32 %v9732_v53, %v2339_v28 }
 0x2b8   : > { %v2312_v22 = vadd.f32 %v2304_v38, %v2292_v33  ;;  %v2331_v40 = vadd.f32 %v2323_v47, %v2311_v44  ;;  %v2380_v45 = vmul.f32 %v9741_v14, %v2368_v10  ;;  %v2224_v46 = vadd.f32 %v2216_v52, %v2163_v55 }
 0x2b9   : > { %v2273_v38 = vsel %vm9748_vm13, %v9760_v21, 0.0  ;;  %v2399_v30 = vsel %vm9183_vm2, %v9713_v34, 0.0  ;;  %v2381_v44 = vmul.f32 %v9741_v14, %v2369_v6  ;;  %v2410_v47 = vmul.f32 %v9772_v23, %v2398_v27 }
 0x2ba   : > { %v2332_v54 = vadd.f32 %v2324_v13, %v2312_v22  ;;  %v2358_v49 = vadd.f32 %v2350_v51, %v2331_v40  ;;  %v2426_v51 = vsel %vm9681_vm3, %v9708_v60, 0.0  ;;  %v2427_v52 = vsel %vm9687_vm5, %v9760_v21, 0.0 }
 0x2bb   : > { %v2285_v28 = vmul.f32 %v9699_v31, %v2273_v38  ;;  %v2411_v22 = vmul.f32 %v9772_v23, %v2399_v30  ;;  %v2437_v6 = vmul.f32 %v9784_v39, %v2426_v51  ;;  %v2438_v27 = vmul.f32 %v9784_v39, %v2427_v52 }
 0x2bc   : > { %v2359_v33 = vadd.f32 %v2351_v58, %v2332_v54  ;;  %v2388_v56 = vadd.f32 %v2380_v45, %v2358_v49  ;;  %v2305_v54 = vmul.f32 %v9673_v43, %v9675_v63  ;;  %v2183_v25 = vrot.slane %v9695_v36, 7 }
 0x2bd   : > { %v2293_v40 = vadd.f32 %v2285_v28, %v2224_v46  ;;  %v2325_v38 = vmul.f32 %v9728_v0, %v9695_v36  ;;  %v2340_v46 = vsel %vm9270_vm9, %v9704_v59, 0.0  ;;  %v11870_v52 = vand.u32 7, %v9167_v15 }
 0x2be   : > { %v2389_v10 = vadd.f32 %v2381_v44, %v2359_v33  ;;  %v2418_v13 = vadd.f32 %v2410_v47, %v2388_v56  ;;  %v11869_v44 = vrot.slane %v9661_v24, 7  ;;  %v2352_v47 = vmul.f32 %v9732_v53, %v2340_v46 }
 0x2bf   : > { %v2313_v45 = vadd.f32 %v2305_v54, %v2293_v40  ;;  %vm9811_vm14 = vcmp.le.s32.totalorder %v11870_v52, 6  ;;  %v11871_v28 = vmov 0  ;;  %v2370_v59 = vsel %vm9748_vm13, %v9708_v60, 0.0 }
 0x2c0   : > { %v2419_v55 = vadd.f32 %v2411_v22, %v2389_v10  ;;  %v2445_v58 = vadd.f32 %v2437_v6, %v2418_v13  ;;  %v2184_v63 = vsel %vm11664_vm4, %v11869_v44, %v2183_v25  ;;  %v11872_v28 = vsel %vm9811_vm14, 4294967295, %v11871_v28 }
 0x2c1   : > { %v2333_v30 = vadd.f32 %v2325_v38, %v2313_v45  ;;  %11873 = vst [vmem:[#allocation109_spill] sm:$0xff] %v11872_v28  ;;  %v2205_v22 = vsel %vm9280_vm10, %v2184_v63, 0.0  ;;  %v2382_v6 = vmul.f32 %v9741_v14, %v2370_v59  ;;  %v2341_v60 = vsel %vm9280_vm10, %v9713_v34, 0.0 }
 0x2c2   : > { %v2446_v49 = vadd.f32 %v2438_v27, %v2419_v55  ;;  %v2371_v54 = vsel %vm9811_vm14, %v9760_v21, 0.0  ;;  %v2306_v45 = vmul.f32 %v9673_v43, %v9661_v24  ;;  %v2164_v34 = vmul.f32 %v9670_v42, %v9695_v36 }
 0x2c3   : > { %v2360_v13 = vadd.f32 %v2352_v47, %v2333_v30  ;;  %v2342_v30 = vsel %vm9435_vm8, %v2184_v63, 0.0  ;;  %v2353_v24 = vmul.f32 %v9732_v53, %v2341_v60  ;;  %v9850_v47 = vmul.f32 %v9741_v14, %v2371_v54 }
 0x2c4   : > { %v2453_v62 = vpack.c.bf16 %v2446_v49, %v2445_v58  ;;  %v2217_v58 = vmul.f32 %v9666_v20, %v2205_v22  ;;  %v2400_v49 = vsel %vm9270_vm9, %v2184_v63, 0.0  ;;  %v11874_v59 = vand.u32 7, %v9200_v26 }
 0x2c5   : > { %v2390_v46 = vadd.f32 %v2382_v6, %v2360_v13  ;;  %v11880_v26 = vmov 0 }
 0x2c6   : > { %7066 = vmatprep.mubr.bf16.mxu1 %v2453_v62  ;;  %vm9855_vm6 = vcmp.le.s32.totalorder %v11874_v59, 6 }
 0x2ca   : > { %v7048_v33 = vpop.f32.mrf.mxu0 }
 0x2cb   : > { %v2130_v56 = vmul.f32 %v7048_v33, %v9651_v29 }
 0x2cc   : > { %v2102_v51 = vpop.f32.mrf.mxu0 }
 0x2cd   : > { %v2145_v62 = vadd.f32 %v9654_v61, %v2130_v56  ;;  %v2128_v10 = vmul.f32 %v9651_v29, %v2102_v51  ;;  %v9846_v56 = vmul.f32 %v9673_v43, %v9695_v36  ;;  %v2412_v51 = vmul.f32 %v9772_v23, %v2400_v49 }
 0x2ce   : > { %v7049_v40 = vpop.f32.mrf.mxu0 }
 0x2cf   : > { %v2143_v55 = vadd.f32 %v9654_v61, %v2128_v10  ;;  %v2131_v15 = vmul.f32 %v7049_v40, %v9651_v29  ;;  %v9836_v38 = vmax.f32 %v2145_v62, 0.0  ;;  %v11875_v62 = vmov 0 }
 0x2d0   : > { %v2105_v27 = vpop.f32.mrf.mxu0  ;;  %v11876_v62 = vsel %vm9855_vm6, 4294967295, %v11875_v62  ;;  %v9860_v10 = vmul.f32 %v9732_v53, %v2342_v30 }
 0x2d1   : > { %v2151_v33 = vmax.f32 %v2143_v55, 0.0  ;;  %v2146_v21 = vadd.f32 %v9654_v61, %v2131_v15  ;;  %v2129_v44 = vmul.f32 %v9651_v29, %v2105_v27  ;;  %11877 = vst [vmem:[#allocation110_spill] sm:$0xff] %v11876_v62  ;;  %v2225_v29 = vadd.f32 %v2217_v58, %v2164_v34  ;;  %v11878_v15 = vld [vmem:[#allocation102_spill] sm:$0xff] }
 0x2d2   : > { %v2167_v22 = vmul.f32 %v9670_v42, %v9836_v38  ;;  %v2420_v55 = vadd.f32 %v2412_v51, %v2390_v46  ;;  %v11879_v6 = vand.u32 7, %v11878_v15  ;;  %v2242_v60 = vrot.slane %v9836_v38, 1 }
 0x2d3   : > { %v2185_v63 = vrot.slane %v2151_v33, 7  ;;  %v2238_v52 = vrot.slane %v2151_v33, 1  ;;  %v9864_v13 = vmax.f32 %v2146_v21, 0.0  ;;  %v2144_v40 = vadd.f32 %v9654_v61, %v2129_v44  ;;  %v11884_v21 = vld [vmem:[#allocation99_spill] sm:$0xff] }
 0x2d4   : > { %vm9869_vm0 = vcmp.le.s32.totalorder %v11879_v6, 6  ;;  %v11883_v58 = vrot.slane %v9695_v36, 1  ;;  %v9885_v61 = vmul.f32 %v9728_v0, %v9836_v38  ;;  %v2165_v46 = vmul.f32 %v9670_v42, %v2151_v33 }
 0x2d5   : > { %v11881_v26 = vsel %vm9869_vm0, 4294967295, %v11880_v26  ;;  %v9876_v54 = vsel %vm11664_vm4, %v2183_v25, %v2185_v63  ;;  %v2308_v30 = vmul.f32 %v9673_v43, %v2151_v33  ;;  %v2326_v34 = vmul.f32 %v9728_v0, %v2151_v33 }
 0x2d6   : > { %11882 = vst [vmem:[#allocation102_spill] sm:$0xff] %v11881_v26  ;;  %v9881_v49 = vsel %vm11671_vm12, %v11883_v58, %v2238_v52  ;;  %v11885_v44 = vand.u32 7, %v11884_v21  ;;  %v11886_v25 = vmov 0  ;;  %v2152_v36 = vmax.f32 %v2144_v40, 0.0 }
 0x2d7   : > { %v2206_v51 = vsel %vm9435_vm8, %v9876_v54, 0.0  ;;  %v2274_v59 = vsel %vm9811_vm14, %v9881_v49, 0.0  ;;  %v2401_v15 = vsel %vm9280_vm10, %v9876_v54, 0.0  ;;  %v9907_v33 = vmul.f32 %v9670_v42, %v9864_v13 }
 0x2d8   : > { %vm9892_vm5 = vcmp.le.s32.totalorder %v11885_v44, 6  ;;  %v2244_v40 = vrot.slane %v9864_v13, 1  ;;  %v2286_v58 = vmul.f32 %v9699_v31, %v2274_v59  ;;  %v9914_v21 = vmul.f32 %v9728_v0, %v9864_v13 }
 0x2d9   : > { %v11887_v25 = vsel %vm9892_vm5, 4294967295, %v11886_v25  ;;  %v2187_v44 = vrot.slane %v2152_v36, 7  ;;  %v2240_v27 = vrot.slane %v2152_v36, 1  ;;  %v2218_v2 = vmul.f32 %v9666_v20, %v2206_v51 }
 0x2da   : > { %11888 = vst [vmem:[#allocation99_spill] sm:$0xff] %v11887_v25  ;;  %v2166_v1 = vmul.f32 %v9670_v42, %v2152_v36  ;;  %v2294_v57 = vadd.f32 %v2286_v58, %v2225_v29  ;;  %v2413_v3 = vmul.f32 %v9772_v23, %v2401_v15  ;;  %v2428_v6 = vsel %vm9748_vm13, %v9881_v49, 0.0 }
 0x2db   : > { %v2309_v35 = vmul.f32 %v9673_v43, %v2152_v36  ;;  %v2241_v59 = vsel %vm11671_vm12, %v2238_v52, %v2240_v27  ;;  %v9925_v48 = vsel %vm11664_vm4, %v2185_v63, %v2187_v44  ;;  %v11889_v32 = vrot.slane %v9836_v38, 7 }
 0x2dc   : > { %v2327_v42 = vmul.f32 %v9728_v0, %v2152_v36  ;;  %v2275_v29 = vsel %vm9855_vm6, %v2241_v59, 0.0  ;;  %v2314_v15 = vadd.f32 %v2306_v45, %v2294_v57  ;;  %v9936_v58 = vsel %vm11671_vm12, %v2240_v27, %v2242_v60 }
 0x2dd   : > { %v9930_v51 = vsel %vm11664_vm4, %v2187_v44, %v11889_v32  ;;  %v2226_v41 = vadd.f32 %v2218_v2, %v2165_v46  ;;  %v2287_v52 = vmul.f32 %v9699_v31, %v2275_v29  ;;  %v2207_v18 = vsel %vm9447_vm11, %v9925_v48, 0.0  ;;  %v11891_v44 = vld [vmem:[#allocation103_spill] sm:$0xff] }
 0x2de   : > { %v2208_v32 = vsel %vm9558_vm15, %v9930_v51, 0.0  ;;  %v11892_v36 = vand.u32 7, %v11891_v44  ;;  %v2334_v57 = vadd.f32 %v2326_v34, %v2314_v15  ;;  %v2219_v45 = vmul.f32 %v9666_v20, %v2207_v18 }
 0x2df   : > { %v2220_v2 = vmul.f32 %v9666_v20, %v2208_v32  ;;  %v9954_v27 = vsel %vm11671_vm12, %v2242_v60, %v2244_v40  ;;  %v2295_v46 = vadd.f32 %v2287_v52, %v2226_v41  ;;  %v2439_v29 = vmul.f32 %v9784_v39, %v2428_v6 }
 0x2e0   : > { %vm9947_vm4 = vcmp.le.s32.totalorder %v11892_v36, 6  ;;  %v2276_v19 = vsel %vm9892_vm5, %v9936_v58, 0.0  ;;  %v2277_v44 = vsel %vm9869_vm0, %v9954_v27, 0.0  ;;  %v2361_v36 = vadd.f32 %v2353_v24, %v2334_v57 }
 0x2e1   : > { %v11894_v16 = vsel %vm9947_vm4, 4294967295, %v11893_v16  ;;  %v2227_v34 = vadd.f32 %v2219_v45, %v2166_v1  ;;  %v2228_v15 = vadd.f32 %v2220_v2, %v2167_v22  ;;  %v2288_v18 = vmul.f32 %v9699_v31, %v2276_v19 }
 0x2e2   : > { %11895 = vst [vmem:[#allocation100_spill] sm:$0xff] %v11894_v16  ;;  %v2429_v60 = vsel %vm9811_vm14, %v2241_v59, 0.0  ;;  %v2289_v41 = vmul.f32 %v9699_v31, %v2277_v44  ;;  %v2315_v6 = vadd.f32 %v9846_v56, %v2295_v46  ;;  %v2343_v52 = vsel %vm9447_vm11, %v9876_v54, 0.0 }
 0x2e3   : > { %v2391_v32 = vadd.f32 %v9850_v47, %v2361_v36  ;;  %v2296_v17 = vadd.f32 %v2288_v18, %v2227_v34  ;;  %v2372_v1 = vsel %vm9855_vm6, %v9881_v49, 0.0  ;;  %v2373_v19 = vsel %vm9892_vm5, %v2241_v59, 0.0 }
 0x2e4   : > { %v2447_v24 = vadd.f32 %v2439_v29, %v2420_v55  ;;  %v2297_v22 = vadd.f32 %v2289_v41, %v2228_v15  ;;  %v2335_v57 = vadd.f32 %v2327_v42, %v2315_v6  ;;  %v2402_v56 = vsel %vm9435_vm8, %v9925_v48, 0.0 }
 0x2e5   : > { %v2421_v45 = vadd.f32 %v2413_v3, %v2391_v32  ;;  %v2440_v54 = vmul.f32 %v9784_v39, %v2429_v60  ;;  %v2316_v2 = vadd.f32 %v2308_v30, %v2296_v17  ;;  %v2403_v47 = vsel %vm9447_vm11, %v9930_v51, 0.0 }
 0x2e6   : > { %v2355_v49 = vmul.f32 %v9732_v53, %v2343_v52  ;;  %v2362_v46 = vadd.f32 %v9860_v10, %v2335_v57  ;;  %v2384_v55 = vmul.f32 %v9741_v14, %v2372_v1  ;;  %v2385_v59 = vmul.f32 %v9741_v14, %v2373_v19 }
 0x2e7   : > { %v2448_v42 = vadd.f32 %v2440_v54, %v2421_v45  ;;  %v2336_v29 = vadd.f32 %v9885_v61, %v2316_v2  ;;  %v2414_v3 = vmul.f32 %v9772_v23, %v2402_v56  ;;  %v2415_v44 = vmul.f32 %v9772_v23, %v2403_v47 }
 0x2e8   : > { %v2392_v17 = vadd.f32 %v2384_v55, %v2362_v46  ;;  %v11896_v30 = vrot.slane %v9864_v13, 7  ;;  %v11897_v36 = vrot.slane %v9836_v38, 7  ;;  %vm11898_vm12 = vcmask 1040384  }
 0x2e9   : > { %vm11899_vm14 = vcmask 1046528   ;;  %v2317_v15 = vadd.f32 %v2309_v35, %v2297_v22  ;;  %v2454_v18 = vpack.c.bf16 %v2448_v42, %v2447_v24  ;;  %v2363_v60 = vadd.f32 %v2355_v49, %v2336_v29 }
 0x2ea   : > { %v2192_v34 = vsel %vm11898_vm12, %v11897_v36, %v11896_v30  ;;  %v2254_v10 = vsel %vm11899_vm14, %v2244_v40, 0.0  ;;  %v2430_v6 = vsel %vm9855_vm6, %v9936_v58, 0.0  ;;  %v2431_v52 = vsel %vm9892_vm5, %v9954_v27, 0.0 }
 0x2eb   : > { %v2209_v41 = vsel %vm9564_vm7, %v2192_v34, 0.0  ;;  %v2278_v61 = vsel %vm9947_vm4, %v2254_v10, 0.0  ;;  %v2337_v35 = vadd.f32 %v9914_v21, %v2317_v15  ;;  %7067 = vmatmul.mubr.bf16.vlgmr.msra.gmra.mxu1 %v2454_v18  ;;  %v2393_v40 = vadd.f32 %v2385_v59, %v2363_v60 }
 0x2ec   : > { %v2221_v32 = vmul.f32 %v9666_v20, %v2209_v41  ;;  %v2422_v1 = vadd.f32 %v2414_v3, %v2392_v17  ;;  %v2344_v19 = vsel %vm9558_vm15, %v9925_v48, 0.0  ;;  %v2374_v24 = vsel %vm9869_vm0, %v9936_v58, 0.0 }
 0x2ed   : > { %v2290_v57 = vmul.f32 %v9699_v31, %v2278_v61  ;;  %v2356_v56 = vmul.f32 %v9732_v53, %v2344_v19  ;;  %v2423_v20 = vadd.f32 %v2415_v44, %v2393_v40  ;;  %v2441_v21 = vmul.f32 %v9784_v39, %v2430_v6  ;;  %v7531_v6 = vld [vmem:[%s11901_s13] sm:$0xff]  }
 0x2ee   : > { %v2229_v22 = vadd.f32 %v2221_v32, %v9907_v33  ;;  %v2442_v45 = vmul.f32 %v9784_v39, %v2431_v52  ;;  %v2330_v54 = vmul.f32 0.0, %v9728_v0  ;;  %v2310_v48 = vmul.f32 %v9673_v43, %v9836_v38  ;;  %v7532_v52 = vld [vmem:[%s11901_s13 + $0x20] sm:$0xff]  }
 0x2ef   : > { %v2364_v47 = vadd.f32 %v2356_v56, %v2337_v35  ;;  %v2386_v58 = vmul.f32 %v9741_v14, %v2374_v24  ;;  %v2449_v49 = vadd.f32 %v2441_v21, %v2422_v1  ;;  %v2345_v31 = vsel %vm9564_vm7, %v9930_v51, 0.0  ;;  %v6619_v35 = vld [vmem:[#allocation14] ss:$0 sm:$0xff]  ;;  %v6620_v19 = vld [vmem:[#allocation15] ss:$0 sm:$0xff] }
 0x2f0   : > { %v2298_v2 = vadd.f32 %v2290_v57, %v2229_v22  ;;  %v2450_v33 = vadd.f32 %v2442_v45, %v2423_v20  ;;  %v2404_v46 = vsel %vm9558_vm15, %v2192_v34, 0.0  ;;  %v11900_v0 = vmov %v11896_v30 }
 0x2f1   : > { %v2394_v59 = vadd.f32 %v2386_v58, %v2364_v47  ;;  %v2397_v42 = vsel %vm11898_vm12, %v11900_v0, 0.0  ;;  %v2375_v38 = vsel %vm9947_vm4, %v9954_v27, 0.0  ;;  %v2357_v3 = vmul.f32 %v9732_v53, %v2345_v31 }
 0x2f2   : > { %v2318_v55 = vadd.f32 %v2310_v48, %v2298_v2  ;;  %v2455_v43 = vpack.c.bf16 %v2450_v33, %v2449_v49  ;;  %v2416_v44 = vmul.f32 %v9772_v23, %v2404_v46  ;;  %v2405_v51 = vsel %vm9564_vm7, %v2397_v42, 0.0  ;;  %v6621_v49 = vld [vmem:[#allocation17] ss:$0 sm:$0xff] }
 0x2f3   : > { %v2432_v13 = vsel %vm9869_vm0, %v2254_v10, 0.0  ;;  %v2387_v30 = vmul.f32 %v9741_v14, %v2375_v38  ;;  %v2417_v27 = vmul.f32 %v9772_v23, %v2405_v51  ;;  %v2444_v15 = vmul.f32 0.0, %v9784_v39  ;;  %v6622_v51 = vld [vmem:[#allocation18] ss:$0 sm:$0xff] }
 0x2f4   : > { %v2338_v29 = vadd.f32 %v2330_v54, %v2318_v55  ;;  %7070 = vmatprep.mubr.bf16.mxu1 %v2455_v43  ;;  %v2424_v36 = vadd.f32 %v2416_v44, %v2394_v59  ;;  %v2443_v53 = vmul.f32 %v9784_v39, %v2432_v13  ;;  %vm11694_vm14 = vcmask 523264  }
 0x2f5   : > { %7082 = vmatprep.mubr.msk.bf16.mxu0 %vm11694_vm14, %v7531_v6 }
 0x2f6   : > { %v2365_v17 = vadd.f32 %v2357_v3, %v2338_v29  ;;  %v2451_v60 = vadd.f32 %v2443_v53, %v2424_v36 }
 0x2f8   : > { %v2395_v34 = vadd.f32 %v2387_v30, %v2365_v17 }
 0x2fa   : > { %v2425_v18 = vadd.f32 %v2417_v27, %v2395_v34 }
 0x2fc   : > { %v2452_v41 = vadd.f32 %v2444_v15, %v2425_v18 }
 0x2fe   : > { %v2456_v61 = vpack.c.bf16 %v2452_v41, %v2451_v60 }
 0x300   : > { %7071 = vmatmul.mubr.bf16.gmra.mxu1 %v2456_v61 }
 0x301   : > { %7098 = vmatprep.mubr.msk.bf16.mxu1 %vm11694_vm14, %v7532_v52 }
 0x3ab   : > { %v7068_v14 = vpop.f32.mrf.mxu1 }
 0x3ac   : > { %v2595_v1 = vmul.f32 %v7068_v14, %v6619_v35 }
 0x3ad   : > { %v2555_v10 = vpop.f32.mrf.mxu1 }
 0x3ae   : > { %v2610_v45 = vadd.f32 %v6620_v19, %v2595_v1  ;;  %v2593_v48 = vmul.f32 %v6619_v35, %v2555_v10 }
 0x3af   : > { %v7069_v32 = vpop.f32.mrf.mxu1 }
 0x3b0   : > { %v2596_v40 = vmul.f32 %v7069_v32, %v6619_v35  ;;  %v2618_v43 = vmax.f32 %v2610_v45, 0.0  ;;  %v2608_v38 = vadd.f32 %v6620_v19, %v2593_v48  ;;  %v7533_v45 = vld [vmem:[%s11901_s13 + $0x8] sm:$0xff]   ;;  %v7535_v48 = vld [vmem:[%s11901_s13 + $0x10] sm:$0xff]  }
 0x3b1   : > { %v2558_v23 = vpop.f32.mrf.mxu1 }
 0x3b2   : > { %v2611_v22 = vadd.f32 %v6620_v19, %v2596_v40  ;;  %v2594_v57 = vmul.f32 %v6619_v35, %v2558_v23  ;;  %v2633_v27 = vmul.f32 %v6621_v49, %v2618_v43  ;;  %v2616_v53 = vmax.f32 %v2608_v38, 0.0  ;;  %v7547_v43 = vld [vmem:[#allocation21 + $0x38] sm:$0xff]   ;;  %v7548_v38 = vld [vmem:[#allocation21 + $0x30] sm:$0xff]  }
 0x3b4   : > { %v2619_v33 = vmax.f32 %v2611_v22, 0.0  ;;  %v2609_v31 = vadd.f32 %v6620_v19, %v2594_v57  ;;  %v2648_v10 = vadd.f32 %v6622_v51, %v2633_v27  ;;  %v2631_v32 = vmul.f32 %v6621_v49, %v2616_v53  ;;  %v10077_v27 = vld [vmem:[#allocation20] sm:$0xff] }
 0x3b6   : > { %v2634_v13 = vmul.f32 %v6621_v49, %v2619_v33  ;;  %v2617_v17 = vmax.f32 %v2609_v31, 0.0  ;;  %v2646_v22 = vadd.f32 %v6622_v51, %v2631_v32  ;;  %v7540_v33 = vld [vmem:[%s11901_s13 + $0x60] sm:$0xff]   ;;  %v7541_v31 = vld [vmem:[%s11901_s13 + $0x48] sm:$0xff]  }
 0x3b8   : > { %v2649_v41 = vadd.f32 %v6622_v51, %v2634_v13  ;;  %v2632_v61 = vmul.f32 %v6621_v49, %v2617_v17  ;;  %v7553_v13 = vld [vmem:[#allocation21 + $0x8] sm:$0xff]   ;;  %v7554_v17 = vld [vmem:[#allocation21] sm:$0xff]  }
 0x3ba   : > { %v2657_v1 = vmax.f32 %v2649_v41, 0.0 }
 0x3c0   : > { %v7072_v39 = vpop.f32.mrf.mxu1 }
 0x3c1   : > { %v2599_v24 = vmul.f32 %v7072_v39, %v6619_v35  ;;  %v2647_v39 = vadd.f32 %v6622_v51, %v2632_v61 }
 0x3c2   : > { %v2571_v56 = vpop.f32.mrf.mxu1 }
 0x3c3   : > { %v2614_v20 = vadd.f32 %v6620_v19, %v2599_v24  ;;  %v2597_v21 = vmul.f32 %v6619_v35, %v2571_v56  ;;  %v2656_v24 = vmax.f32 %v2648_v10, 0.0  ;;  %v2655_v56 = vmax.f32 %v2647_v39, 0.0 }
 0x3c4   : > { %v7073_v54 = vpop.f32.mrf.mxu1  ;;  %v10089_v39 = vrot.slane %v10077_v27, %v9148_v5 }
 0x3c5   : > { %v2622_v2 = vmax.f32 %v2614_v20, 0.0  ;;  %v2612_v47 = vadd.f32 %v6620_v19, %v2597_v21  ;;  %v2600_v58 = vmul.f32 %v7073_v54, %v6619_v35  ;;  %v2663_v57 = vpack.c.bf16 %v2657_v1, %v2656_v24  ;;  %v7534_v54 = vld [vmem:[%s11901_s13 + $0x28] sm:$0xff]  }
 0x3c6   : > { %v2574_v46 = vpop.f32.mrf.mxu1  ;;  %v2654_v20 = vmax.f32 %v2646_v22, 0.0 }
 0x3c7   : > { %v2637_v55 = vmul.f32 %v6621_v49, %v2622_v2  ;;  %v2620_v59 = vmax.f32 %v2612_v47, 0.0  ;;  %v2615_v0 = vadd.f32 %v6620_v19, %v2600_v58  ;;  %v2598_v42 = vmul.f32 %v6619_v35, %v2574_v46  ;;  %v7536_v2 = vld [vmem:[%s11901_s13 + $0x30] sm:$0xff]   ;;  %v7537_v47 = vld [vmem:[%s11901_s13 + $0x18] sm:$0xff]   ;;  %v7542_v46 = vld [vmem:[%s11901_s13 + $0x68] sm:$0xff]  }
 0x3c8   : > { %v2662_v21 = vpack.c.bf16 %v2655_v56, %v2654_v20  ;;  %v7538_v58 = vld [vmem:[%s11901_s13 + $0x38] sm:$0xff]  }
 0x3c9   : > { %v2635_v29 = vmul.f32 %v6621_v49, %v2620_v59  ;;  %v2623_v3 = vmax.f32 %v2615_v0, 0.0  ;;  %v2613_v44 = vadd.f32 %v6620_v19, %v2598_v42  ;;  %v2652_v30 = vadd.f32 %v6622_v51, %v2637_v55  ;;  %v7543_v55 = vld [vmem:[%s11901_s13 + $0x50] sm:$0xff]   ;;  %v7545_v0 = vld [vmem:[%s11901_s13 + $0x58] sm:$0xff]  }
 0x3ca   : > { %v7544_v59 = vld [vmem:[%s11901_s13 + $0x70] sm:$0xff]   ;;  %v7546_v42 = vld [vmem:[%s11901_s13 + $0x78] sm:$0xff]  }
 0x3cb   : > { %v2638_v36 = vmul.f32 %v6621_v49, %v2623_v3  ;;  %v2621_v34 = vmax.f32 %v2613_v44, 0.0  ;;  %v2650_v15 = vadd.f32 %v6622_v51, %v2635_v29  ;;  %v2660_v6 = vmax.f32 %v2652_v30, 0.0  ;;  %v7549_v29 = vld [vmem:[#allocation21 + $0x28] sm:$0xff]   ;;  %v7550_v3 = vld [vmem:[#allocation21 + $0x20] sm:$0xff]   ;;  %v7551_v44 = vld [vmem:[#allocation21 + $0x18] sm:$0xff]  }
 0x3cd   : > { %v2653_v18 = vadd.f32 %v6622_v51, %v2638_v36  ;;  %v2636_v60 = vmul.f32 %v6621_v49, %v2621_v34  ;;  %v2658_v23 = vmax.f32 %v2650_v15, 0.0  ;;  %v7539_v49 = vld [vmem:[%s11901_s13 + $0x40] sm:$0xff]   ;;  %v10080_v15 = vld [vmem:[%s9170_s10 + $0x28] sm:$0xff]  }
 0x3cf   : > { %v2661_v52 = vmax.f32 %v2653_v18, 0.0  ;;  %v2651_v14 = vadd.f32 %v6622_v51, %v2636_v60  ;;  %v7552_v51 = vld [vmem:[#allocation21 + $0x10] sm:$0xff]  }
 0x3d1   : > { %v2665_v35 = vpack.c.bf16 %v2661_v52, %v2660_v6  ;;  %v2659_v40 = vmax.f32 %v2651_v14, 0.0  ;;  %v10084_v14 = vrot.slane %v10077_v27, %v9145_v4 }
 0x3d3   : > { %v2664_v19 = vpack.c.bf16 %v2659_v40, %v2658_v23  ;;  %7074 = vmatprep.subr.bf16.mxu0 %v2665_v35  ;;  %7090 = vmatprep.subr.bf16.mxu1 %v2665_v35 }
 0x3d4   : > { %7075 = vmatpush3.bf16.msra.mxu0 %v2665_v35  ;;  %7091 = vmatpush3.bf16.msra.mxu1 %v2665_v35 }
 0x3d5   : > { %7076 = vmatprep.subr.bf16.mxu0 %v2664_v19  ;;  %7092 = vmatprep.subr.bf16.mxu1 %v2664_v19 }
 0x3d8   : > { %7077 = vmatpush3.bf16.msra.mxu0 %v2664_v19  ;;  %7093 = vmatpush3.bf16.msra.mxu1 %v2664_v19 }
 0x3d9   : > { %7078 = vmatprep.subr.bf16.mxu0 %v2663_v57  ;;  %7094 = vmatprep.subr.bf16.mxu1 %v2663_v57 }
 0x3dc   : > { %7079 = vmatpush3.bf16.msra.mxu0 %v2663_v57  ;;  %7095 = vmatpush3.bf16.msra.mxu1 %v2663_v57 }
 0x3dd   : > { %7080 = vmatprep.subr.bf16.mxu0 %v2662_v21  ;;  %7096 = vmatprep.subr.bf16.mxu1 %v2662_v21 }
 0x3e0   : > { %7081 = vmatpush3.bf16.msra.mxu0 %v2662_v21  ;;  %7097 = vmatpush3.bf16.msra.mxu1 %v2662_v21 }
 0x3e1   : > { %7106 = vmatprep.subr.bf16.mxu0 %v2665_v35  ;;  %7122 = vmatprep.subr.bf16.mxu1 %v2665_v35 }
 0x3e3   : > { %7083 = vmatmul.mubr.msk.bf16.vlgmr.msra.gmra.mxu0 %vm11694_vm14, %v7533_v45  ;;  %7099 = vmatmul.mubr.msk.bf16.vlgmr.msra.gmra.mxu1 %vm11694_vm14, %v7534_v54  ;;  %v10095_v45 = vld [vmem:[%s9170_s10 + $0x38] sm:$0xff]   ;;  %v10098_v54 = vld [vmem:[%s9170_s10 + $0x30] sm:$0xff]  }
 0x3e4   : > { %7107 = vmatpush3.bf16.msra.mxu0 %v2665_v35  ;;  %7123 = vmatpush3.bf16.msra.mxu1 %v2665_v35 }
 0x3e5   : > { %7108 = vmatprep.subr.bf16.mxu0 %v2664_v19  ;;  %7124 = vmatprep.subr.bf16.mxu1 %v2664_v19 }
 0x3e6   : > { %7086 = vmatprep.mubr.msk.bf16.mxu0 %vm11694_vm14, %v7535_v48  ;;  %7102 = vmatprep.mubr.msk.bf16.mxu1 %vm11694_vm14, %v7536_v2 }
 0x3e8   : > { %7109 = vmatpush3.bf16.msra.mxu0 %v2664_v19  ;;  %7125 = vmatpush3.bf16.msra.mxu1 %v2664_v19 }
 0x3e9   : > { %7110 = vmatprep.subr.bf16.mxu0 %v2663_v57  ;;  %7126 = vmatprep.subr.bf16.mxu1 %v2663_v57 }
 0x3eb   : > { %7087 = vmatmul.mubr.msk.bf16.gmra.mxu0 %vm11694_vm14, %v7537_v47  ;;  %7103 = vmatmul.mubr.msk.bf16.gmra.mxu1 %vm11694_vm14, %v7538_v58 }
 0x3ec   : > { %7111 = vmatpush3.bf16.msra.mxu0 %v2663_v57  ;;  %7127 = vmatpush3.bf16.msra.mxu1 %v2663_v57  ;;  %v10092_v57 = vld [vmem:[%s9170_s10 + $0x20] sm:$0xff]  }
 0x3ed   : > { %7112 = vmatprep.subr.bf16.mxu0 %v2662_v21  ;;  %7128 = vmatprep.subr.bf16.mxu1 %v2662_v21 }
 0x3ee   : > { %7114 = vmatprep.mubr.msk.bf16.mxu0 %vm11694_vm14, %v7539_v49  ;;  %7130 = vmatprep.mubr.msk.bf16.mxu1 %vm11694_vm14, %v7540_v33 }
 0x3f0   : > { %7113 = vmatpush3.bf16.msra.mxu0 %v2662_v21  ;;  %7129 = vmatpush3.bf16.msra.mxu1 %v2662_v21 }
 0x3f1   : > { %7138 = vmatprep.subr.bf16.mxu0 %v7547_v43 }
 0x3f3   : > { %7115 = vmatmul.mubr.msk.bf16.vlgmr.msra.gmra.mxu0 %vm11694_vm14, %v7541_v31  ;;  %7131 = vmatmul.mubr.msk.bf16.vlgmr.msra.gmra.mxu1 %vm11694_vm14, %v7542_v46 }
 0x3f4   : > { %7118 = vmatprep.mubr.msk.bf16.mxu0 %vm11694_vm14, %v7543_v55  ;;  %7134 = vmatprep.mubr.msk.bf16.mxu1 %vm11694_vm14, %v7544_v59  ;;  %v10192_v59 = vld [vmem:[%s9170_s10 + $0x78] sm:$0xff]  }
 0x3f5   : > { %7139 = vmatpush3.bf16.msra.mxu0 %v7547_v43 }
 0x3f6   : > { %7140 = vmatprep.subr.bf16.mxu0 %v7548_v38 }
 0x3f9   : > { %7141 = vmatpush3.bf16.msra.mxu0 %v7548_v38 }
 0x3fa   : > { %7142 = vmatprep.subr.bf16.mxu0 %v7549_v29 }
 0x3fb   : > { %7119 = vmatmul.mubr.msk.bf16.gmra.mxu0 %vm11694_vm14, %v7545_v0  ;;  %7135 = vmatmul.mubr.msk.bf16.gmra.mxu1 %vm11694_vm14, %v7546_v42  ;;  %vm11923_vm14 = vmmov %vm11898_vm12 }
 0x3fd   : > { %7143 = vmatpush3.bf16.msra.mxu0 %v7549_v29 }
 0x3fe   : > { %7144 = vmatprep.subr.bf16.mxu0 %v7550_v3 }
 0x401   : > { %7145 = vmatpush3.bf16.msra.mxu0 %v7550_v3 }
 0x402   : > { %7146 = vmatprep.subr.bf16.mxu0 %v7551_v44 }
 0x405   : > { %7147 = vmatpush3.bf16.msra.mxu0 %v7551_v44  ;;  %v10105_v44 = vld [vmem:[%s9170_s10 + $0x48] sm:$0xff]  }
 0x406   : > { %7148 = vmatprep.subr.bf16.mxu0 %v7552_v51 }
 0x409   : > { %7149 = vmatpush3.bf16.msra.mxu0 %v7552_v51 }
 0x40a   : > { %7150 = vmatprep.subr.bf16.mxu0 %v7553_v13 }
 0x40d   : > { %7151 = vmatpush3.bf16.msra.mxu0 %v7553_v13 }
 0x40e   : > { %7152 = vmatprep.subr.bf16.mxu0 %v7554_v17 }
 0x411   : > { %7153 = vmatpush3.bf16.msra.mxu0 %v7554_v17 }
 0x4a3   : > { %v7084_v30 = vpop.f32.mrf.mxu0  ;;  %v7100_v36 = vpop.f32.mrf.mxu1 }
 0x4a4   : > { %v2774_v34 = vsub.f32 0.0, %v7084_v30  ;;  %v2935_v53 = vsub.f32 0.0, %v7100_v36 }
 0x4a5   : > { %v2741_v18 = vpop.f32.mrf.mxu0  ;;  %v2902_v60 = vpop.f32.mrf.mxu1 }
 0x4a6   : > { %v2784_v41 = vmul.f32 1.442695, %v2774_v34  ;;  %v2945_v61 = vmul.f32 1.442695, %v2935_v53  ;;  %v2772_v6 = vsub.f32 0.0, %v2741_v18  ;;  %v2933_v52 = vsub.f32 0.0, %v2902_v60 }
 0x4a7   : > { %v7085_v10 = vpop.f32.mrf.mxu0  ;;  %v7101_v32 = vpop.f32.mrf.mxu1 }
 0x4a8   : > { %7766 = vpow2.f32 %v2784_v41  ;;  %v2780_v23 = vmul.f32 1.442695, %v2772_v6  ;;  %v2941_v35 = vmul.f32 1.442695, %v2933_v52  ;;  %v2775_v40 = vsub.f32 0.0, %v7085_v10  ;;  %v10111_v52 = vld [vmem:[%s9170_s10 + $0x68] sm:$0xff]  }
 0x4a9   : > { %7768 = vpow2.f32 %v2945_v61  ;;  %v2936_v19 = vsub.f32 0.0, %v7101_v32  ;;  %v2744_v24 = vpop.f32.mrf.mxu0  ;;  %v2905_v22 = vpop.f32.mrf.mxu1 }
 0x4aa   : > { %7770 = vpow2.f32 %v2780_v23  ;;  %v2786_v56 = vmul.f32 1.442695, %v2775_v40  ;;  %v2773_v20 = vsub.f32 0.0, %v2744_v24  ;;  %v2934_v21 = vsub.f32 0.0, %v2905_v22  ;;  %v10115_v40 = vld [vmem:[%s9170_s10 + $0x40] sm:$0xff]  }
 0x4ab   : > { %7772 = vpow2.f32 %v2941_v35  ;;  %v2947_v48 = vmul.f32 1.442695, %v2936_v19  ;;  %v7088_v58 = vpop.f32.mrf.mxu0  ;;  %v7104_v49 = vpop.f32.mrf.mxu1  ;;  %v10118_v19 = vld [vmem:[%s9170_s10 + $0x60] sm:$0xff]  }
 0x4ac   : > { %7774 = vpow2.f32 %v2786_v56  ;;  %v2782_v33 = vmul.f32 1.442695, %v2773_v20  ;;  %v2943_v31 = vmul.f32 1.442695, %v2934_v21  ;;  %v2778_v46 = vsub.f32 0.0, %v7088_v58 }
 0x4ad   : > { %7776 = vpow2.f32 %v2947_v48  ;;  %v2939_v55 = vsub.f32 0.0, %v7104_v49  ;;  %v2757_v0 = vpop.f32.mrf.mxu0  ;;  %v2918_v42 = vpop.f32.mrf.mxu1  ;;  %v10124_v56 = vrot.slane %v10077_v27, %v9151_v7  ;;  %v10130_v21 = vrot.slane %v10077_v27, %v9161_v12 }
 0x4ae   : > { %7778 = vpow2.f32 %v2782_v33  ;;  %v2792_v38 = vmul.f32 1.442695, %v2778_v46  ;;  %v2776_v29 = vsub.f32 0.0, %v2757_v0  ;;  %v2937_v3 = vsub.f32 0.0, %v2918_v42 }
 0x4af   : > { %7780 = vpow2.f32 %v2943_v31  ;;  %v2953_v51 = vmul.f32 1.442695, %v2939_v55  ;;  %v7089_v13 = vpop.f32.mrf.mxu0  ;;  %v7105_v17 = vpop.f32.mrf.mxu1  ;;  %11902 = vst [vmem:[#allocation103_spill] sm:$0xff] %v10130_v21  ;;  %v10134_v49 = vrot.slane %v10077_v27, %v9154_v9  ;;  %v11910_v9 = vunpack.c.l.bf16 %v10092_v57 }
 0x4b0   : > { %7782 = vpow2.f32 %v2792_v38  ;;  %v2788_v34 = vmul.f32 1.442695, %v2776_v29  ;;  %v2949_v53 = vmul.f32 1.442695, %v2937_v3  ;;  %v2779_v18 = vsub.f32 0.0, %v7089_v13  ;;  %v11904_v3 = vld [vmem:[#allocation93_spill] sm:$0xff] }
 0x4b1   : > { %7784 = vpow2.f32 %v2953_v51  ;;  %v2940_v60 = vsub.f32 0.0, %v7105_v17  ;;  %v2760_v41 = vpop.f32.mrf.mxu0  ;;  %v2921_v61 = vpop.f32.mrf.mxu1 }
 0x4b2   : > { %7786 = vpow2.f32 %v2788_v34  ;;  %v2794_v32 = vmul.f32 1.442695, %v2779_v18  ;;  %v2777_v23 = vsub.f32 0.0, %v2760_v41  ;;  %v2938_v35 = vsub.f32 0.0, %v2921_v61  ;;  %v11903_v18 = vld [vmem:[#allocation91_spill] sm:$0xff] }
 0x4b3   : > { %7788 = vpow2.f32 %v2949_v53  ;;  %v2955_v24 = vmul.f32 1.442695, %v2940_v60  ;;  %v10120_v22 = vpop.f32.mrf.mxu0  ;;  %v10126_v20 = vpop.f32.mrf.mxu1  ;;  %v10151_v60 = vld [vmem:[%s9170_s10 + $0x58] sm:$0xff]   ;;  %v10155_v41 = vrot.slane %v10077_v27, %v9158_v11  ;;  %v10168_v51 = vrot.slane %v10077_v27, %v11903_v18 }
 0x4b4   : > { %7790 = vpow2.f32 %v2794_v32  ;;  %v2790_v48 = vmul.f32 1.442695, %v2777_v23  ;;  %v2951_v58 = vmul.f32 1.442695, %v2938_v35  ;;  %v3112_v36 = vsub.f32 0.0, %v10120_v22 }
 0x4b5   : > { %v7767_v33 = vpop.eup %7766  ;;  %7792 = vpow2.f32 %v2955_v24  ;;  %v10137_v46 = vpop.f32.mrf.mxu0  ;;  %v10181_v23 = vmul.f32 0.0, %v10155_v41 }
 0x4b6   : > { %v10139_v55 = vpop.f32.mrf.mxu1  ;;  %v7769_v38 = vpop.eup %7768  ;;  %v2798_v29 = vadd.f32 1.0, %v7767_v33  ;;  %7794 = vpow2.f32 %v2790_v48 }
 0x4b7   : > { %v7771_v13 = vpop.eup %7770  ;;  %v2959_v17 = vadd.f32 1.0, %v7769_v38  ;;  %7796 = vpow2.f32 %v2951_v58  ;;  %v10145_v34 = vpop.f32.mrf.mxu0  ;;  %v10164_v38 = vld [vmem:[%s9170_s10 + $0x50] sm:$0xff]   ;;  %v3287_v22 = vsub.f32 0.0, %v10139_v55 }
 0x4b8   : > { %v10147_v53 = vpop.f32.mrf.mxu1  ;;  %v7773_v61 = vpop.eup %7772  ;;  %7798 = vrcp.f32 %v2798_v29  ;;  %v2796_v32 = vadd.f32 1.0, %v7771_v13  ;;  %v10172_v29 = vrot.slane %v10077_v27, %v11904_v3  ;;  %v3122_v27 = vmul.f32 1.442695, %v3112_v36 }
 0x4b9   : > { %v7775_v24 = vpop.eup %7774  ;;  %7800 = vrcp.f32 %v2959_v17  ;;  %v2957_v48 = vadd.f32 1.0, %v7773_v61  ;;  %v10159_v58 = vpop.f32.mrf.mxu0  ;;  %v10175_v17 = vld [vmem:[%s9170_s10 + $0x70] sm:$0xff]   ;;  %v10178_v61 = vmul.f32 0.0, %v10134_v49  ;;  %v3113_v1 = vsub.f32 0.0, %v10145_v34  ;;  %s11552_s10 = scalar_lea.hbm %s8860_s3, %s6823_s28 }
 0x4ba   : > { %v10161_v33 = vpop.f32.mrf.mxu1  ;;  %v7777_v13 = vpop.eup %7776  ;;  %7802 = vrcp.f32 %v2796_v32  ;;  %v2799_v35 = vadd.f32 1.0, %v7775_v24  ;;  %v3111_v36 = vsub.f32 0.0, %v10159_v58  ;;  %v3295_v28 = vmul.f32 1.442695, %v3287_v22 }
 0x4bb   : > { %v7779_v42 = vpop.eup %7778  ;;  %7804 = vrcp.f32 %v2957_v48  ;;  %v2960_v0 = vadd.f32 1.0, %v7777_v13  ;;  %v10183_v31 = vpop.f32.mrf.mxu0  ;;  %v3289_v13 = vsub.f32 0.0, %v10126_v20 }
 0x4bc   : > { %v7781_v32 = vpop.eup %7780  ;;  %7806 = vrcp.f32 %v2799_v35  ;;  %v2797_v24 = vadd.f32 1.0, %v7779_v42  ;;  %v10188_v30 = vpop.f32.mrf.mxu1  ;;  %v10197_v42 = vmul.f32 0.0, %v10172_v29  ;;  %v3116_v55 = vsub.f32 0.0, %v10183_v31 }
 0x4bd   : > { %v7783_v47 = vpop.eup %7782  ;;  %7808 = vrcp.f32 %v2960_v0  ;;  %v2958_v48 = vadd.f32 1.0, %v7781_v32  ;;  %v3095_v10 = vpop.f32.mrf.mxu0  ;;  %v3299_v26 = vmul.f32 1.442695, %v3289_v13  ;;  %v3290_v0 = vsub.f32 0.0, %v10147_v53 }
 0x4be   : > { %v7785_v2 = vpop.eup %7784  ;;  %7810 = vrcp.f32 %v2797_v24  ;;  %v2802_v6 = vadd.f32 1.0, %v7783_v47  ;;  %v3110_v24 = vsub.f32 0.0, %v10137_v46  ;;  %v3272_v47 = vpop.f32.mrf.mxu1  ;;  %v3288_v46 = vsub.f32 0.0, %v10161_v33 }
 0x4bf   : > { %v7787_v35 = vpop.eup %7786  ;;  %7812 = vrcp.f32 %v2958_v48  ;;  %v2963_v43 = vadd.f32 1.0, %v7785_v2  ;;  %v3114_v58 = vsub.f32 0.0, %v3095_v10  ;;  %v3291_v18 = vsub.f32 0.0, %v3272_v47 }
 0x4c0   : > { %v7789_v32 = vpop.eup %7788  ;;  %7814 = vrcp.f32 %v2802_v6  ;;  %v2800_v20 = vadd.f32 1.0, %v7787_v35  ;;  %v7121_v35 = vpop.f32.mrf.mxu0  ;;  %v3118_v53 = vmul.f32 1.442695, %v3110_v24  ;;  %v3301_v11 = vmul.f32 1.442695, %v3290_v0  ;;  %v11905_v24 = vld [vmem:[#allocation97_spill] sm:$0xff] }
 0x4c1   : > { %v7791_v62 = vpop.eup %7790  ;;  %7816 = vrcp.f32 %v2963_v43  ;;  %v2961_v25 = vadd.f32 1.0, %v7789_v32  ;;  %v3293_v32 = vsub.f32 0.0, %v10188_v30  ;;  %v3130_v30 = vmul.f32 1.442695, %v3116_v55  ;;  %v11908_v55 = vld [vmem:[#allocation94_spill] sm:$0xff] }
 0x4c2   : > { %v7793_v48 = vpop.eup %7792  ;;  %7818 = vrcp.f32 %v2800_v20  ;;  %v2803_v2 = vadd.f32 1.0, %v7791_v62  ;;  %v7137_v62 = vpop.f32.mrf.mxu1  ;;  %v3117_v12 = vsub.f32 0.0, %v7121_v35  ;;  %v11906_v22 = vunpack.c.l.bf16 %v11905_v24 }
 0x4c3   : > { %v7795_v16 = vpop.eup %7794  ;;  %7820 = vrcp.f32 %v2961_v25  ;;  %v2964_v6 = vadd.f32 1.0, %v7793_v48  ;;  %v3124_v48 = vmul.f32 1.442695, %v3113_v1  ;;  %v3098_v3 = vpop.f32.mrf.mxu0  ;;  %v3307_v5 = vmul.f32 1.442695, %v3293_v32 }
 0x4c4   : > { %v7797_v43 = vpop.eup %7796  ;;  %7822 = vrcp.f32 %v2803_v2  ;;  %v2801_v13 = vadd.f32 1.0, %v7795_v16  ;;  %v3120_v2 = vmul.f32 1.442695, %v3111_v36  ;;  %v3297_v16 = vmul.f32 1.442695, %v3288_v46 }
 0x4c5   : > { %v7799_v20 = vpop.eup %7798  ;;  %7824 = vrcp.f32 %v2964_v6  ;;  %v2962_v34 = vadd.f32 1.0, %v7797_v43  ;;  %v3275_v6 = vpop.f32.mrf.mxu1  ;;  %v11907_v1 = vunpack.c.l.bf16 %v10080_v15  ;;  %v3294_v47 = vsub.f32 0.0, %v7137_v62 }
 0x4c6   : > { %v7801_v25 = vpop.eup %7800  ;;  %7826 = vrcp.f32 %v2801_v13  ;;  %v2814_v7 = vmul.f32 %v7799_v20, %v11906_v22  ;;  %v3126_v36 = vmul.f32 1.442695, %v3114_v58  ;;  %v3303_v46 = vmul.f32 1.442695, %v3291_v18 }
 0x4c7   : > { %v7803_v33 = vpop.eup %7802  ;;  %7828 = vrcp.f32 %v2962_v34  ;;  %v10214_v10 = vmul.f32 %v7801_v25, %v11907_v1  ;;  %v3115_v13 = vsub.f32 0.0, %v3098_v3  ;;  %v11909_v32 = vunpack.c.l.bf16 %v11908_v55 }
 0x4c8   : > { %v7805_v31 = vpop.eup %7804  ;;  %7830 = vpow2.f32 %v3122_v27  ;;  %v3292_v34 = vsub.f32 0.0, %v3275_v6  ;;  %v11911_v25 = vunpack.c.h.bf16 %v11905_v24  ;;  %v11912_v62 = vunpack.c.h.bf16 %v10080_v15 }
 0x4c9   : > { %v7807_v43 = vpop.eup %7806  ;;  %7832 = vpow2.f32 %v3299_v26  ;;  %v2812_v35 = vmul.f32 %v7803_v33, %v11909_v32  ;;  %v10220_v20 = vmul.f32 %v7805_v31, %v11910_v9  ;;  %v3132_v3 = vmul.f32 1.442695, %v3117_v12 }
 0x4ca   : > { %v7809_v0 = vpop.eup %7808  ;;  %7834 = vpow2.f32 %v3118_v53  ;;  %v2815_v26 = vmul.f32 %v7807_v43, %v11911_v25  ;;  %v3399_v58 = vmul.f32 %v10084_v14, %v2814_v7  ;;  %v3309_v33 = vmul.f32 1.442695, %v3294_v47 }
 0x4cb   : > { %v7811_v27 = vpop.eup %7810  ;;  %7836 = vpow2.f32 %v3295_v28  ;;  %v10226_v53 = vmul.f32 %v7809_v0, %v11912_v62  ;;  %v3411_v28 = vmul.f32 %v10089_v39, %v10214_v10  ;;  %v11913_v31 = vunpack.c.h.bf16 %v11908_v55 }
 0x4cc   : > { %v7813_v22 = vpop.eup %7812  ;;  %7838 = vpow2.f32 %v3124_v48  ;;  %v11914_v43 = vunpack.c.h.bf16 %v10092_v57  ;;  %v3128_v15 = vmul.f32 1.442695, %v3115_v13  ;;  %v3397_v12 = vmul.f32 %v10084_v14, %v2812_v35  ;;  %v11915_v13 = vld [vmem:[#allocation101_spill] sm:$0xff] }
 0x4cd   : > { %v7815_v18 = vpop.eup %7814  ;;  %7840 = vpow2.f32 %v3301_v11  ;;  %v2813_v6 = vmul.f32 %v7811_v27, %v11913_v31  ;;  %v3305_v7 = vmul.f32 1.442695, %v3292_v34  ;;  %v3409_v1 = vmul.f32 %v10089_v39, %v10220_v20 }
 0x4ce   : > { %v7817_v9 = vpop.eup %7816  ;;  %v10235_v24 = vmul.f32 %v7813_v22, %v11914_v43  ;;  %7842 = vpow2.f32 %v3120_v2  ;;  %v3516_v47 = vrot.slane %v10214_v10, 7  ;;  %v3400_v0 = vmul.f32 %v10084_v14, %v2815_v26  ;;  %v11918_v26 = vld [vmem:[#allocation98_spill] sm:$0xff] }
 0x4cf   : > { %v7819_v48 = vpop.eup %7818  ;;  %7844 = vpow2.f32 %v3297_v16  ;;  %v3412_v57 = vmul.f32 %v10089_v39, %v10226_v53  ;;  %v10244_v2 = vadd.f32 %v3411_v28, %v3399_v58  ;;  %v11916_v55 = vunpack.c.l.bf16 %v11915_v13 }
 0x4d0   : > { %v7821_v11 = vpop.eup %7820  ;;  %7846 = vpow2.f32 %v3130_v30  ;;  %v11917_v16 = vunpack.c.l.bf16 %v10095_v45  ;;  %v3398_v22 = vmul.f32 %v10084_v14, %v2813_v6  ;;  %v3410_v25 = vmul.f32 %v10089_v39, %v10235_v24 }
 0x4d1   : > { %v7823_v27 = vpop.eup %7822  ;;  %v2818_v32 = vmul.f32 %v7815_v18, %v11916_v55  ;;  %7848 = vpow2.f32 %v3307_v5  ;;  %v11919_v62 = vunpack.c.l.bf16 %v11918_v26  ;;  %v3518_v28 = vrot.slane %v10226_v53, 7 }
 0x4d2   : > { %v10250_v35 = vmul.f32 %v7817_v9, %v11917_v16  ;;  %v7825_v34 = vpop.eup %7824  ;;  %7850 = vpow2.f32 %v3126_v36  ;;  %v10258_v18 = vadd.f32 %v3409_v1, %v3397_v12  ;;  %v3513_v9 = vrot.slane %v10220_v20, 7 }
 0x4d3   : > { %v2816_v30 = vmul.f32 %v7819_v48, %v11919_v62  ;;  %v7827_v58 = vpop.eup %7826  ;;  %7852 = vpow2.f32 %v3303_v46  ;;  %v10261_v5 = vadd.f32 %v3412_v57, %v3400_v0  ;;  %v11920_v6 = vunpack.c.l.bf16 %v10098_v54 }
 0x4d4   : > { %v7829_v31 = vpop.eup %7828  ;;  %7854 = vpow2.f32 %v3132_v3  ;;  %v3514_v55 = vrot.slane %v10235_v24, 7  ;;  %v10269_v36 = vmul.f32 %v10084_v14, %v2818_v32  ;;  %v10273_v46 = vmul.f32 %v10089_v39, %v10250_v35 }
 0x4d5   : > { %v10265_v43 = vmul.f32 %v7821_v11, %v11920_v6  ;;  %v7831_v48 = vpop.eup %7830  ;;  %v11921_v20 = vunpack.c.h.bf16 %v11915_v13  ;;  %7856 = vpow2.f32 %v3309_v33  ;;  %v10278_v0 = vmul.f32 %v10084_v14, %v2816_v30 }
 0x4d6   : > { %v7833_v1 = vpop.eup %7832  ;;  %v3136_v11 = vadd.f32 1.0, %v7831_v48  ;;  %7858 = vpow2.f32 %v3128_v15  ;;  %v10280_v3 = vadd.f32 %v3410_v25, %v3398_v22  ;;  %v11922_v57 = vunpack.c.h.bf16 %v10095_v45 }
 0x4d7   : > { %v2819_v12 = vmul.f32 %v7823_v27, %v11921_v20  ;;  %v7835_v24 = vpop.eup %7834  ;;  %v3313_v16 = vadd.f32 1.0, %v7833_v1  ;;  %7860 = vpow2.f32 %v3305_v7  ;;  %v3536_v62 = vsel %vm11898_vm12, 0.0, %v3513_v9 }
 0x4d8   : > { %v10284_v32 = vmul.f32 %v7825_v34, %v11922_v57  ;;  %v7837_v13 = vpop.eup %7836  ;;  %v3413_v33 = vmul.f32 %v10089_v39, %v10265_v43  ;;  %7862 = vrcp.f32 %v3136_v11  ;;  %v3134_v27 = vadd.f32 1.0, %v7835_v24 }
 0x4d9   : > { %v3515_v30 = vsel %vm11923_vm14, %v3513_v9, %v3514_v55  ;;  %v7839_v15 = vpop.eup %7838  ;;  %v10291_v22 = vmul.f32 %v10084_v14, %v2819_v12  ;;  %v11924_v45 = vunpack.c.h.bf16 %v10098_v54  ;;  %7864 = vrcp.f32 %v3313_v16  ;;  %vm11927_vm14 = vmmov %vm11898_vm12 }
 0x4da   : > { %v3311_v7 = vadd.f32 1.0, %v7837_v13  ;;  %v7841_v25 = vpop.eup %7840  ;;  %v11925_v6 = vunpack.c.h.bf16 %v11918_v26  ;;  %7866 = vrcp.f32 %v3134_v27  ;;  %v3137_v20 = vadd.f32 1.0, %v7839_v15 }
 0x4db   : > { %v10295_v34 = vmul.f32 %v7829_v31, %v11924_v45  ;;  %v3537_v11 = vsel %vm9174_vm1, %v3536_v62, 0.0  ;;  %v7843_v9 = vpop.eup %7842  ;;  %v3416_v12 = vmul.f32 %v10089_v39, %v10284_v32  ;;  %v3314_v24 = vadd.f32 1.0, %v7841_v25 }
 0x4dc   : > { %v2817_v48 = vmul.f32 %v7827_v58, %v11925_v6  ;;  %7868 = vrcp.f32 %v3311_v7  ;;  %v3517_v54 = vsel %vm11927_vm14, %v3514_v55, %v3516_v47  ;;  %v7845_v31 = vpop.eup %7844  ;;  %v3135_v57 = vadd.f32 1.0, %v7843_v9  ;;  %vm11931_vm14 = vmmov %vm11898_vm12 }
 0x4dd   : > { %7870 = vrcp.f32 %v3137_v20  ;;  %v3519_v26 = vsel %vm11898_vm12, %v3516_v47, %v3518_v28  ;;  %v3520_v58 = vrot.slane %v10265_v43, 7  ;;  %v7847_v16 = vpop.eup %7846  ;;  %v3312_v62 = vadd.f32 1.0, %v7845_v31 }
 0x4de   : > { %7872 = vrcp.f32 %v3314_v24  ;;  %v3538_v27 = vsel %vm9183_vm2, %v3515_v30, 0.0  ;;  %v3522_v15 = vrot.slane %v10295_v34, 7  ;;  %v7849_v55 = vpop.eup %7848  ;;  %v3402_v45 = vmul.f32 %v10084_v14, %v2817_v48 }
 0x4df   : > { %7874 = vrcp.f32 %v3135_v57  ;;  %v3140_v7 = vadd.f32 1.0, %v7847_v16  ;;  %v3539_v10 = vsel %vm9270_vm9, %v3517_v54, 0.0  ;;  %v7851_v6 = vpop.eup %7850  ;;  %v3414_v47 = vmul.f32 %v10089_v39, %v10295_v34 }
 0x4e0   : > { %7876 = vrcp.f32 %v3312_v62  ;;  %v3317_v43 = vadd.f32 1.0, %v7849_v55  ;;  %v3540_v9 = vsel %vm9280_vm10, %v3519_v26, 0.0  ;;  %v7853_v30 = vpop.eup %7852  ;;  %v3138_v24 = vadd.f32 1.0, %v7851_v6 }
 0x4e1   : > { %v10323_v31 = vmul.f32 %v10130_v21, %v3537_v11  ;;  %v10326_v14 = vmul.f32 %v10130_v21, %v3538_v27  ;;  %v3521_v48 = vsel %vm11931_vm14, %v3518_v28, %v3520_v58  ;;  %v7855_v54 = vpop.eup %7854  ;;  %7878 = vrcp.f32 %v3140_v7  ;;  %vm11932_vm14 = vmmov %vm11898_vm12 }
 0x4e2   : > { %v3315_v39 = vadd.f32 1.0, %v7853_v30  ;;  %v10332_v34 = vmul.f32 %v10130_v21, %v3539_v10  ;;  %v3523_v57 = vsel %vm11898_vm12, %v3520_v58, %v3522_v15  ;;  %v7857_v26 = vpop.eup %7856  ;;  %7880 = vrcp.f32 %v3317_v43 }
 0x4e3   : > { %v3141_v16 = vadd.f32 1.0, %v7855_v54  ;;  %v10336_v11 = vmul.f32 %v10130_v21, %v3540_v9  ;;  %v10339_v62 = vadd.f32 %v3413_v33, %v10278_v0  ;;  %v7859_v53 = vpop.eup %7858  ;;  %7882 = vrcp.f32 %v3138_v24 }
 0x4e4   : > { %v10341_v28 = vadd.f32 %v3414_v47, %v3402_v45  ;;  %v3541_v27 = vsel %vm9435_vm8, %v3521_v48, 0.0  ;;  %v3524_v55 = vrot.slane %v10250_v35, 7  ;;  %v7861_v7 = vpop.eup %7860  ;;  %v3139_v58 = vadd.f32 1.0, %v7859_v53  ;;  %v10354_v35 = vld [vmem:[#allocation20 + $0x8] ss:$0 sm:$0xff] }
 0x4e5   : > { %7884 = vrcp.f32 %v3141_v16  ;;  %v3542_v10 = vsel %vm9447_vm11, %v3523_v57, 0.0  ;;  %v3526_v6 = vrot.slane %v10284_v32, 7  ;;  %v7863_v43 = vpop.eup %7862  ;;  %v3318_v0 = vadd.f32 1.0, %v7857_v26 }
 0x4e6   : > { %7886 = vrcp.f32 %v3315_v39  ;;  %v3316_v33 = vadd.f32 1.0, %v7861_v7  ;;  %v10350_v45 = vsel %vm11932_vm14, %v3522_v15, %v3524_v55  ;;  %v7865_v47 = vpop.eup %7864  ;;  %v11934_v9 = vunpack.c.l.bf16 %v10105_v44  ;;  %vm11943_vm14 = vmmov %vm11898_vm12 }
 0x4e7   : > { %11933 = vst [vmem:[#allocation97_spill] sm:$0xff] %v10350_v45  ;;  %7888 = vrcp.f32 %v3139_v58  ;;  %v10358_v24 = vadd.f32 %v10273_v46, %v10269_v36  ;;  %v10361_v32 = vadd.f32 %v3416_v12, %v10291_v22  ;;  %v7867_v48 = vpop.eup %7866  ;;  %v11935_v54 = vunpack.c.l.bf16 %v10111_v52 }
 0x4e8   : > { %v3168_v30 = vmul.f32 %v7863_v43, %v11934_v9  ;;  %7890 = vrcp.f32 %v3316_v33  ;;  %v10368_v15 = vmul.f32 %v10130_v21, %v3541_v27  ;;  %v10371_v57 = vmul.f32 %v10130_v21, %v3542_v10 }
 0x4e9   : > { %v10365_v39 = vmul.f32 %v7865_v47, %v11935_v54  ;;  %v7869_v26 = vpop.eup %7868  ;;  %v11936_v36 = vunpack.c.l.bf16 %v10115_v40  ;;  %v10377_v22 = vsel %vm11898_vm12, %v3524_v55, %v3526_v6  ;;  %7892 = vrcp.f32 %v3318_v0 }
 0x4ea   : > { %v3431_v16 = vmul.f32 %v10124_v56, %v3168_v30  ;;  %11937 = vst [vmem:[#allocation94_spill] sm:$0xff] %v10377_v22  ;;  %v7871_v53 = vpop.eup %7870  ;;  %v3472_v27 = vmul.f32 %v10134_v49, %v3168_v30  ;;  %v11938_v58 = vunpack.c.l.bf16 %v10118_v19  ;;  %v11939_v55 = vunpack.c.h.bf16 %v10105_v44 }
 0x4eb   : > { %v3166_v46 = vmul.f32 %v7867_v48, %v11936_v36  ;;  %v3451_v7 = vmul.f32 %v10354_v35, %v10365_v39  ;;  %v7873_v43 = vpop.eup %7872  ;;  %v3492_v9 = vmul.f32 %v10155_v41, %v10365_v39  ;;  %v11940_v48 = vunpack.c.h.bf16 %v10111_v52 }
 0x4ec   : > { %v3343_v10 = vmul.f32 %v7869_v26, %v11938_v58  ;;  %v3439_v33 = vadd.f32 %v3431_v16, %v10244_v2  ;;  %v10390_v6 = vmul.f32 %v7871_v53, %v11939_v55  ;;  %v7875_v30 = vpop.eup %7874  ;;  %v3576_v36 = vrot.slane %v10365_v39, 7 }
 0x4ed   : > { %v3429_v47 = vmul.f32 %v10124_v56, %v3166_v46  ;;  %v10397_v54 = vmul.f32 %v7873_v43, %v11940_v48  ;;  %v3470_v0 = vmul.f32 %v10134_v49, %v3166_v46  ;;  %v7877_v2 = vpop.eup %7876  ;;  %v11941_v16 = vunpack.c.h.bf16 %v10115_v40 }
 0x4ee   : > { %v3573_v26 = vrot.slane %v3343_v10, 7  ;;  %v3432_v44 = vmul.f32 %v10124_v56, %v10390_v6  ;;  %v3449_v55 = vmul.f32 %v10354_v35, %v3343_v10  ;;  %v11942_v52 = vunpack.c.h.bf16 %v10118_v19  ;;  %v10411_v39 = vpop.eup %7878 }
 0x4ef   : > { %v3167_v53 = vmul.f32 %v7875_v30, %v11941_v16  ;;  %v3437_v58 = vadd.f32 %v3429_v47, %v10258_v18  ;;  %v3490_v48 = vmul.f32 %v10155_v41, %v3343_v10  ;;  %v3459_v12 = vadd.f32 %v3451_v7, %v3439_v33  ;;  %v10416_v18 = vpop.eup %7880 }
 0x4f0   : > { %v3344_v43 = vmul.f32 %v7877_v2, %v11942_v52  ;;  %v3596_v46 = vsel %vm11943_vm14, 0.0, %v3573_v26  ;;  %v3440_v4 = vadd.f32 %v3432_v44, %v10261_v5  ;;  %v3452_v19 = vmul.f32 %v10354_v35, %v10397_v54  ;;  %v7883_v33 = vpop.eup %7882  ;;  %vm11947_vm14 = vmmov %vm11898_vm12 }
 0x4f1   : > { %v3471_v21 = vmul.f32 %v10134_v49, %v3167_v53  ;;  %v3430_v40 = vmul.f32 %v10124_v56, %v3167_v53  ;;  %v3457_v30 = vadd.f32 %v3449_v55, %v3437_v58  ;;  %v3597_v10 = vsel %vm9174_vm1, %v3596_v46, 0.0 }
 0x4f2   : > { %v3574_v47 = vrot.slane %v3344_v43, 7  ;;  %v3625_v7 = vsel %vm9183_vm2, %v3596_v46, 0.0  ;;  %v3450_v44 = vmul.f32 %v10354_v35, %v3344_v43  ;;  %v7885_v53 = vpop.eup %7884  ;;  %v3460_v55 = vadd.f32 %v3452_v19, %v3440_v4 }
 0x4f3   : > { %v3438_v2 = vadd.f32 %v3430_v40, %v10280_v3  ;;  %v3477_v16 = vadd.f32 %v10178_v61, %v3457_v30  ;;  %v3479_v52 = vadd.f32 %v3471_v21, %v3459_v12  ;;  %v3491_v1 = vmul.f32 %v10155_v41, %v3344_v43  ;;  %v7887_v45 = vpop.eup %7886 }
 0x4f4   : > { %v3575_v58 = vsel %vm11898_vm12, %v3573_v26, %v3574_v47  ;;  %v3609_v37 = vmul.f32 %v10168_v51, %v3597_v10  ;;  %v3637_v5 = vmul.f32 %v10172_v29, %v3625_v7  ;;  %v7889_v3 = vpop.eup %7888  ;;  %v11944_v40 = vunpack.c.h.bf16 %v10151_v60 }
 0x4f5   : > { %v3458_v8 = vadd.f32 %v3450_v44, %v3438_v2  ;;  %v3497_v46 = vadd.f32 %v10181_v23, %v3477_v16  ;;  %v3598_v61 = vsel %vm9183_vm2, %v3575_v58, 0.0  ;;  %v3480_v4 = vadd.f32 %v3472_v27, %v3460_v55  ;;  %v7891_v12 = vpop.eup %7890 }
 0x4f6   : > { %v10435_v22 = vmul.f32 %v7885_v53, %v11944_v40  ;;  %v3499_v21 = vadd.f32 %v3491_v1, %v3479_v52  ;;  %v11945_v26 = vunpack.c.h.bf16 %v10164_v38  ;;  %v3626_v19 = vsel %vm9270_vm9, %v3575_v58, 0.0  ;;  %v7893_v27 = vpop.eup %7892 }
 0x4f7   : > { %v3478_v23 = vadd.f32 %v3470_v0, %v3458_v8  ;;  %v3557_v30 = vadd.f32 %v10323_v31, %v3497_v46  ;;  %v11946_v10 = vunpack.c.h.bf16 %v10175_v17  ;;  %v3500_v2 = vadd.f32 %v3492_v9, %v3480_v4 }
 0x4f8   : > { %v10441_v43 = vmul.f32 %v7889_v3, %v11945_v26  ;;  %v3559_v44 = vadd.f32 %v10332_v34, %v3499_v21  ;;  %v3577_v1 = vsel %vm11947_vm14, %v3574_v47, %v3576_v36  ;;  %v11948_v55 = vrot.slane %v10397_v54, 7  ;;  %vm11952_vm14 = vmmov %vm11898_vm12 }
 0x4f9   : > { %v10448_v7 = vmul.f32 %v7891_v12, %v11946_v10  ;;  %v3498_v16 = vadd.f32 %v3490_v48, %v3478_v23  ;;  %v3617_v53 = vadd.f32 %v3609_v37, %v3557_v30  ;;  %v3599_v31 = vsel %vm9270_vm9, %v3577_v1, 0.0 }
 0x4fa   : > { %v10455_v8 = vsel %vm11898_vm12, %v3576_v36, %v11948_v55  ;;  %v3560_v0 = vadd.f32 %v10336_v11, %v3500_v2  ;;  %v3611_v34 = vmul.f32 %v10168_v51, %v3599_v31  ;;  %v3627_v48 = vsel %vm9280_vm10, %v3577_v1, 0.0 }
 0x4fb   : > { %v3600_v9 = vsel %vm9280_vm10, %v10455_v8, 0.0  ;;  %v3558_v37 = vadd.f32 %v10326_v14, %v3498_v16  ;;  %v3610_v47 = vmul.f32 %v10168_v51, %v3598_v61  ;;  %v3638_v36 = vmul.f32 %v10172_v29, %v3626_v19 }
 0x4fc   : > { %v3612_v58 = vmul.f32 %v10168_v51, %v3600_v9  ;;  %v3619_v52 = vadd.f32 %v3611_v34, %v3559_v44  ;;  %v11949_v11 = vunpack.c.l.bf16 %v10164_v38  ;;  %v11950_v3 = vunpack.c.l.bf16 %v10175_v17 }
 0x4fd   : > { %v3434_v4 = vmul.f32 %v10124_v56, %v10441_v43  ;;  %v3618_v21 = vadd.f32 %v3610_v47, %v3558_v37  ;;  %v3644_v12 = vadd.f32 %v10197_v42, %v3617_v53  ;;  %v3639_v61 = vmul.f32 %v10172_v29, %v3627_v48 }
 0x4fe   : > { %v3170_v46 = vmul.f32 %v7883_v33, %v11949_v11  ;;  %v3347_v40 = vmul.f32 %v7887_v45, %v11950_v3  ;;  %v3620_v14 = vadd.f32 %v3612_v58, %v3560_v0  ;;  %v3454_v38 = vmul.f32 %v10354_v35, %v10448_v7 }
 0x4ff   : > { %v3442_v23 = vadd.f32 %v3434_v4, %v10341_v28  ;;  %v3473_v17 = vmul.f32 %v10134_v49, %v10390_v6  ;;  %v3645_v45 = vadd.f32 %v3637_v5, %v3618_v21  ;;  %v3646_v33 = vadd.f32 %v3638_v36, %v3619_v52 }
 0x500   : > { %v3433_v26 = vmul.f32 %v10124_v56, %v3170_v46  ;;  %v3647_v30 = vadd.f32 %v3639_v61, %v3620_v14  ;;  %v3453_v19 = vmul.f32 %v10354_v35, %v3347_v40  ;;  %v3474_v2 = vmul.f32 %v10134_v49, %v3170_v46 }
 0x501   : > { %v3462_v10 = vadd.f32 %v3454_v38, %v3442_v23  ;;  %v3580_v44 = vrot.slane %v3347_v40, 7  ;;  %v3652_v1 = vpack.c.bf16 %v3645_v45, %v3644_v12  ;;  %v3493_v28 = vmul.f32 %v10155_v41, %v10397_v54 }
 0x502   : > { %v3441_v42 = vadd.f32 %v3433_v26, %v10339_v62  ;;  %v3494_v16 = vmul.f32 %v10155_v41, %v3347_v40  ;;  %v3582_v53 = vrot.slane %v10448_v7, 7  ;;  %v3653_v6 = vpack.c.bf16 %v3647_v30, %v3646_v33  ;;  %v11956_v30 = vld [vmem:[#allocation94_spill] sm:$0xff] }
 0x503   : > { %v3482_v55 = vadd.f32 %v3474_v2, %v3462_v10  ;;  %v11951_v31 = vrot.slane %v10397_v54, 7  ;;  %7154 = vmatprep.mubr.bf16.mxu0 %v3652_v1  ;;  %v3628_v34 = vsel %vm9435_vm8, %v10455_v8, 0.0  ;;  %v11953_v48 = vunpack.c.l.bf16 %v10151_v60  ;;  %v11960_v1 = vld [vmem:[#allocation97_spill] sm:$0xff] }
 0x504   : > { %v3461_v5 = vadd.f32 %v3453_v19, %v3441_v42  ;;  %v3583_v62 = vsel %vm11898_vm12, %v3580_v44, %v3582_v53  ;;  %7155 = vmatmul.mubr.bf16.vlgmr.msra.gmra.mxu0 %v3653_v6  ;;  %v11954_v46 = vunpack.c.l.bf16 %v10192_v59  ;;  %v11955_v60 = vunpack.c.h.bf16 %v10192_v59 }
 0x505   : > { %v3581_v0 = vsel %vm11952_vm14, %v11951_v31, %v3580_v44  ;;  %v3172_v37 = vmul.f32 %v10411_v39, %v11953_v48  ;;  %v3502_v36 = vadd.f32 %v3494_v16, %v3482_v55  ;;  %v3602_v54 = vsel %vm9447_vm11, %v3583_v62, 0.0  ;;  %vm11958_vm14 = vmmov %vm11898_vm12  ;;  %v11962_v16 = vld [vmem:[#allocation103_spill] sm:$0xff] }
 0x506   : > { %v3601_v9 = vsel %vm9435_vm8, %v3581_v0, 0.0  ;;  %v3481_v47 = vadd.f32 %v3473_v17, %v3461_v5  ;;  %v3629_v58 = vsel %vm9447_vm11, %v3581_v0, 0.0  ;;  %v3614_v11 = vmul.f32 %v10168_v51, %v3602_v54 }
 0x507   : > { %v3613_v52 = vmul.f32 %v10168_v51, %v3601_v9  ;;  %v3349_v8 = vmul.f32 %v10416_v18, %v11954_v46  ;;  %v3350_v39 = vmul.f32 %v7893_v27, %v11955_v60  ;;  %v3562_v40 = vadd.f32 %v10371_v57, %v3502_v36  ;;  %v10555_v60 = vld [vmem:[#allocation23] ss:$0 sm:$0xff] }
 0x508   : > { %v3501_v3 = vadd.f32 %v3493_v28, %v3481_v47  ;;  %v3435_v4 = vmul.f32 %v10124_v56, %v3172_v37  ;;  %v3436_v21 = vmul.f32 %v10124_v56, %v10435_v22  ;;  %v3641_v12 = vmul.f32 %v10172_v29, %v3629_v58 }
 0x509   : > { %v3455_v14 = vmul.f32 %v10354_v35, %v3349_v8  ;;  %v3456_v61 = vmul.f32 %v10354_v35, %v3350_v39  ;;  %v3475_v18 = vmul.f32 %v10134_v49, %v10441_v43  ;;  %v3622_v27 = vadd.f32 %v3614_v11, %v3562_v40  ;;  %v10558_v40 = vld [vmem:[#allocation24] ss:$0 sm:$0xff] }
 0x50a   : > { %v3561_v59 = vadd.f32 %v10368_v15, %v3501_v3  ;;  %v3443_v26 = vadd.f32 %v3435_v4, %v10358_v24  ;;  %v3444_v57 = vadd.f32 %v3436_v21, %v10361_v32  ;;  %v3640_v23 = vmul.f32 %v10172_v29, %v3628_v34 }
 0x50b   : > { %v3476_v56 = vmul.f32 %v10134_v49, %v3172_v37  ;;  %v3584_v22 = vrot.slane %v3349_v8, 7  ;;  %v3586_v38 = vrot.slane %v3350_v39, 7  ;;  %v3649_v45 = vadd.f32 %v3641_v12, %v3622_v27 }
 0x50c   : > { %v3621_v17 = vadd.f32 %v3613_v52, %v3561_v59  ;;  %v3463_v33 = vadd.f32 %v3455_v14, %v3443_v26  ;;  %v3464_v35 = vadd.f32 %v3456_v61, %v3444_v57  ;;  %v3495_v43 = vmul.f32 %v10155_v41, %v10448_v7  ;;  %v11964_v59 = vld [vmem:[#allocation84_spill] sm:$0xff]  ;;  %v11965_v26 = vld [vmem:[#allocation87_spill] sm:$0xff] }
 0x50d   : > { %v3544_v19 = vsel %vm9564_vm7, %v11956_v30, 0.0  ;;  %v3585_v24 = vsel %vm11958_vm14, %v3582_v53, %v3584_v22  ;;  %v3587_v32 = vsel %vm11898_vm12, %v3584_v22, %v3586_v38  ;;  %v3496_v2 = vmul.f32 %v10155_v41, %v3349_v8  ;;  %v11967_v22 = vld [vmem:[#allocation89_spill] sm:$0xff] }
 0x50e   : > { %v3648_v42 = vadd.f32 %v3640_v23, %v3621_v17  ;;  %v3483_v10 = vadd.f32 %v3475_v18, %v3463_v33  ;;  %v3484_v49 = vadd.f32 %v3476_v56, %v3464_v35  ;;  %v11961_v28 = vsel %vm9558_vm15, %v11960_v1, 0.0  ;;  %v11966_v23 = vld [vmem:[#allocation86_spill] sm:$0xff]  ;;  %v11968_v30 = vld [vmem:[#allocation85_spill] sm:$0xff] }
 0x50f   : > { %v3555_v6 = vmul.f32 %v11962_v16, %v11961_v28  ;;  %v3603_v7 = vsel %vm9558_vm15, %v3585_v24, 0.0  ;;  %v3604_v5 = vsel %vm9564_vm7, %v3587_v32, 0.0  ;;  %v3556_v0 = vmul.f32 %v11962_v16, %v3544_v19 }
 0x510   : > { %v3654_v53 = vpack.c.bf16 %v3649_v45, %v3648_v42  ;;  %v3503_v55 = vadd.f32 %v3495_v43, %v3483_v10  ;;  %v3504_v31 = vadd.f32 %v3496_v2, %v3484_v49  ;;  %v3630_v41 = vsel %vm9558_vm15, %v3583_v62, 0.0  ;;  %v7555_v62 = vld [vmem:[#allocation30] sm:$0xff]   ;;  %v10580_v43 = vld [vmem:[#allocation26 + $0x8] ss:$0 sm:$0xff]  ;;  %v11971_v49 = vld [vmem:[#allocation91_spill] sm:$0xff] }
 0x511   : > { %v3631_v9 = vsel %vm9564_vm7, %v3585_v24, 0.0  ;;  %v3615_v37 = vmul.f32 %v10168_v51, %v3603_v7  ;;  %v3616_v47 = vmul.f32 %v10168_v51, %v3604_v5  ;;  %v3642_v58 = vmul.f32 %v10172_v29, %v3630_v41  ;;  %v11969_v24 = vld [vmem:[#allocation93_spill] sm:$0xff]  ;;  %v11970_v42 = vld [vmem:[#allocation88_spill] sm:$0xff] }
 0x512   : > { %7158 = vmatprep.mubr.bf16.mxu0 %v3654_v53  ;;  %v3563_v34 = vadd.f32 %v3555_v6, %v3503_v55  ;;  %v3564_v48 = vadd.f32 %v3556_v0, %v3504_v31  ;;  %v3643_v52 = vmul.f32 %v10172_v29, %v3631_v9  ;;  %vm11963_vm14 = vcmask 523264   ;;  %v3823_v29 = vld [vmem:[#allocation26] sm:$0xff] }
 0x513   : > { %7170 = vmatprep.mubr.msk.bf16.mxu1 %vm11963_vm14, %v7555_v62  ;;  %v10565_v27 = vrot.slane %v3823_v29, %v11964_v59  ;;  %v10568_v57 = vrot.slane %v3823_v29, %v11965_v26  ;;  %v10571_v56 = vrot.slane %v3823_v29, %v11966_v23  ;;  %v10574_v38 = vrot.slane %v3823_v29, %v11967_v22  ;;  %v11989_v23 = vld [vmem:[#allocation107_spill] sm:$0xff] }
 0x514   : > { %v3623_v36 = vadd.f32 %v3615_v37, %v3563_v34  ;;  %v3624_v54 = vadd.f32 %v3616_v47, %v3564_v48  ;;  %v10583_v19 = vrot.slane %v3823_v29, %v11968_v30  ;;  %v10586_v32 = vrot.slane %v3823_v29, %v11969_v24  ;;  %v11991_v24 = vld [vmem:[#allocation109_spill] sm:$0xff] }
 0x515   : > { %v10589_v10 = vrot.slane %v3823_v29, %v11970_v42  ;;  %v10592_v2 = vrot.slane %v3823_v29, %v11971_v49  ;;  %v10596_v28 = vmul.f32 0.0, %v10571_v56  ;;  %v10599_v16 = vmul.f32 0.0, %v10580_v43 }
 0x516   : > { %v3650_v11 = vadd.f32 %v3642_v58, %v3623_v36  ;;  %v3651_v46 = vadd.f32 %v3643_v52, %v3624_v54  ;;  %v10602_v6 = vmul.f32 0.0, %v10568_v57  ;;  %v10609_v55 = vmul.f32 0.0, %v10586_v32 }
 0x517   : > { %vm11976_vm14 = vcmask 1046528  }
 0x518   : > { %v3655_v8 = vpack.c.bf16 %v3651_v46, %v3650_v11  ;;  %11972 = vst [vmem:[#allocation101_spill] sm:$0xff] %v10602_v6  ;;  %11973 = vst [vmem:[#allocation98_spill] sm:$0xff] %v10609_v55 }
 0x51a   : > { %7159 = vmatmul.mubr.bf16.gmra.mxu0 %v3655_v8 }
 0x5c4   : > { %v7156_v39 = vpop.f32.mrf.mxu0 }
 0x5c5   : > { %v3794_v3 = vmul.f32 %v7156_v39, %v10555_v60 }
 0x5c6   : > { %v3754_v51 = vpop.f32.mrf.mxu0 }
 0x5c7   : > { %v3792_v4 = vmul.f32 %v10555_v60, %v3754_v51  ;;  %v3809_v21 = vadd.f32 %v10558_v40, %v3794_v3 }
 0x5c8   : > { %v7157_v12 = vpop.f32.mrf.mxu0 }
 0x5c9   : > { %v3807_v14 = vadd.f32 %v10558_v40, %v3792_v4  ;;  %v3795_v61 = vmul.f32 %v7157_v12, %v10555_v60  ;;  %v3817_v17 = vmax.f32 %v3809_v21, 0.0 }
 0x5ca   : > { %v3757_v18 = vpop.f32.mrf.mxu0 }
 0x5cb   : > { %v10576_v45 = vmax.f32 %v3807_v14, 0.0  ;;  %v3810_v33 = vadd.f32 %v10558_v40, %v3795_v61  ;;  %v3793_v35 = vmul.f32 %v10555_v60, %v3757_v18  ;;  %v3831_v31 = vmul.f32 %v10565_v27, %v3817_v17 }
 0x5cc   : > { %v3848_v0 = vrot.slane %v3817_v17, 7  ;;  %v3900_v41 = vrot.slane %v3817_v17, 1  ;;  %v10614_v34 = vmul.f32 %v10568_v57, %v3817_v17  ;;  %v10617_v48 = vmul.f32 %v10571_v56, %v3817_v17 }
 0x5cd   : > { %v3845_v1 = vrot.slane %v10576_v45, 7  ;;  %v11708_v7 = vrot.slane %v10576_v45, 1  ;;  %v10605_v5 = vmax.f32 %v3810_v33, 0.0  ;;  %v3808_v53 = vadd.f32 %v10558_v40, %v3793_v35 }
 0x5ce   : > { %11974 = vst [vmem:[#allocation95_spill] sm:$0xff] %v10617_v48  ;;  %v3829_v54 = vmul.f32 %v10565_v27, %v10576_v45  ;;  %v10630_v46 = vmul.f32 %v10568_v57, %v10576_v45 }
 0x5cf   : > { %v3868_v9 = vsel %vm11898_vm12, 0.0, %v3845_v1  ;;  %v11707_v36 = vrot.slane %v10605_v5, 7  ;;  %v11706_v11 = vrot.slane %v10605_v5, 1  ;;  %v10635_v8 = vsel %vm11976_vm14, 0.0, %v11708_v7 }
 0x5d0   : > { %v3869_v47 = vsel %vm9174_vm1, %v3868_v9, 0.0  ;;  %v3989_v52 = vsel %vm9183_vm2, %v3868_v9, 0.0  ;;  %11977 = vst [vmem:[#allocation94_spill] sm:$0xff] %v10635_v8  ;;  %v3816_v62 = vmax.f32 %v3808_v53, 0.0  ;;  %v3832_v3 = vmul.f32 %v10565_v27, %v10605_v5 }
 0x5d1   : > { %v3881_v58 = vmul.f32 %v10574_v38, %v3869_v47  ;;  %v3851_v39 = vsel %vm11898_vm12, %v3848_v0, %v11707_v36  ;;  %v10644_v51 = vmul.f32 %v10568_v57, %v10605_v5  ;;  %v10648_v4 = vmul.f32 %v10571_v56, %v10605_v5 }
 0x5d2   : > { %v10653_v21 = vsel %vm11976_vm14, %v3900_v41, %v11706_v11  ;;  %v3846_v29 = vrot.slane %v3816_v62, 7  ;;  %v3898_v12 = vrot.slane %v3816_v62, 1  ;;  %v3872_v14 = vsel %vm9280_vm10, %v3851_v39, 0.0  ;;  %vm11983_vm14 = vmmov %vm11898_vm12 }
 0x5d3   : > { %11978 = vst [vmem:[#allocation105_spill] sm:$0xff] %v10653_v21  ;;  %v10658_v61 = vmul.f32 %v10586_v32, %v3989_v52  ;;  %v10660_v18 = vadd.f32 %v3881_v58, %v3829_v54  ;;  %v3830_v17 = vmul.f32 %v10565_v27, %v3816_v62  ;;  %v3992_v33 = vsel %vm9435_vm8, %v3851_v39, 0.0 }
 0x5d4   : > { %v10669_v9 = vsel %vm11898_vm12, %v3845_v1, %v3846_v29  ;;  %v10672_v47 = vsel %vm11983_vm14, %v3846_v29, %v3848_v0  ;;  %vm11985_vm1 = vcmask 1046528   ;;  %v3923_v58 = vsel %vm9748_vm13, %v10653_v21, 0.0 }
 0x5d5   : > { %11979 = vst [vmem:[#allocation104_spill] sm:$0xff] %v10658_v61  ;;  %11980 = vst [vmem:[#allocation97_spill] sm:$0xff] %v10660_v18  ;;  %v10675_v52 = vsel %vm11985_vm1, %v3898_v12, %v3900_v41  ;;  %v3955_v11 = vmul.f32 %v10568_v57, %v3816_v62  ;;  %v3884_v7 = vmul.f32 %v10574_v38, %v3872_v14  ;;  %v3870_v1 = vsel %vm9183_vm2, %v10669_v9, 0.0 }
 0x5d6   : > { %11982 = vst [vmem:[#allocation103_spill] sm:$0xff] %v10669_v9  ;;  %11984 = vst [vmem:[#allocation111_spill] sm:$0xff] %v10672_v47  ;;  %v3871_v0 = vsel %vm9270_vm9, %v10672_v47, 0.0  ;;  %v10689_v41 = vmul.f32 %v10571_v56, %v3816_v62  ;;  %v10693_v53 = vmul.f32 %v10586_v32, %v3992_v33  ;;  %v3882_v14 = vmul.f32 %v10574_v38, %v3870_v1 }
 0x5d7   : > { %11986 = vst [vmem:[#allocation112_spill] sm:$0xff] %v10675_v52  ;;  %v3883_v49 = vmul.f32 %v10574_v38, %v3871_v0  ;;  %vm11990_vm1 = vnez %v11989_v23  ;;  %v3935_v30 = vmul.f32 %v10583_v19, %v3923_v58  ;;  %v3990_v62 = vsel %vm9270_vm9, %v10669_v9, 0.0 }
 0x5d8   : > { %11988 = vst [vmem:[#allocation113_spill] sm:$0xff] %v10689_v41  ;;  %v3922_v22 = vsel %vm11990_vm1, %v10675_v52, 0.0  ;;  %v3991_v0 = vsel %vm9280_vm10, %v10672_v47, 0.0  ;;  %v10709_v26 = vadd.f32 %v3884_v7, %v3832_v3  ;;  %v4020_v58 = vsel %vm9748_vm13, %v10675_v52, 0.0 }
 0x5d9   : > { %v3891_v59 = vadd.f32 %v3883_v49, %v3831_v31  ;;  %vm11992_vm12 = vnez %v11991_v24  ;;  %v3934_v7 = vmul.f32 %v10583_v19, %v3922_v22  ;;  %v10723_v3 = vmul.f32 %v10586_v32, %v3990_v62 }
 0x5da   : > { %v7160_v36 = vpop.f32.mrf.mxu0  ;;  %v4021_v8 = vsel %vm11992_vm12, %v10653_v21, 0.0  ;;  %v10726_v52 = vmul.f32 %v10586_v32, %v3991_v0  ;;  %v3890_v9 = vadd.f32 %v3882_v14, %v3830_v17  ;;  %v10729_v21 = vmul.f32 %v10589_v10, %v4020_v58 }
 0x5db   : > { %v3798_v29 = vmul.f32 %v7160_v36, %v10555_v60  ;;  %v3943_v55 = vadd.f32 %v3935_v30, %v3891_v59  ;;  %v10732_v25 = vmul.f32 %v10589_v10, %v4021_v8  ;;  %v11997_v59 = vrot.slane %v10576_v45, 1 }
 0x5dc   : > { %v3770_v42 = vpop.f32.mrf.mxu0  ;;  %11993 = vst [vmem:[#allocation114_spill] sm:$0xff] %v10726_v52  ;;  %11994 = vst [vmem:[#allocation115_spill] sm:$0xff] %v10729_v21  ;;  %v3942_v58 = vadd.f32 %v3934_v7, %v3890_v9  ;;  %vm12012_vm2 = vcmask 1046528  }
 0x5dd   : > { %v3813_v36 = vadd.f32 %v10558_v40, %v3798_v29  ;;  %v3796_v33 = vmul.f32 %v10555_v60, %v3770_v42  ;;  %v4050_v29 = vsel %vm9270_vm9, %v3851_v39, 0.0  ;;  %11995 = vst [vmem:[#allocation116_spill] sm:$0xff] %v10732_v25  ;;  %vm11998_vm9 = vcmask 1046528  }
 0x5de   : > { %v7161_v1 = vpop.f32.mrf.mxu0  ;;  %v10735_v39 = vmul.f32 %v10592_v2, %v4050_v29  ;;  %v10740_v22 = vsel %vm11998_vm9, %v11997_v59, %v3898_v12  ;;  %v3963_v0 = vadd.f32 %v3955_v11, %v3943_v55  ;;  %v12003_v59 = vrot.slane %v10605_v5, 1 }
 0x5df   : > { %v3821_v42 = vmax.f32 %v3813_v36, 0.0  ;;  %v3811_v49 = vadd.f32 %v10558_v40, %v3796_v33  ;;  %v3799_v31 = vmul.f32 %v7161_v1, %v10555_v60  ;;  %11999 = vst [vmem:[#allocation118_spill] sm:$0xff] %v10740_v22 }
 0x5e0   : > { %v3773_v37 = vpop.f32.mrf.mxu0  ;;  %11996 = vst [vmem:[#allocation117_spill] sm:$0xff] %v10735_v39 }
 0x5e1   : > { %v3835_v30 = vmul.f32 %v10565_v27, %v3821_v42  ;;  %v10743_v62 = vmax.f32 %v3811_v49, 0.0  ;;  %v3814_v17 = vadd.f32 %v10558_v40, %v3799_v31  ;;  %v3797_v14 = vmul.f32 %v10555_v60, %v3773_v37 }
 0x5e2   : > { %v3856_v36 = vrot.slane %v3821_v42, 7  ;;  %v3908_v33 = vrot.slane %v3821_v42, 1  ;;  %v3960_v8 = vmul.f32 %v10568_v57, %v3821_v42  ;;  %v10749_v1 = vmul.f32 %v10571_v56, %v3821_v42 }
 0x5e3   : > { %v3852_v45 = vrot.slane %v10743_v62, 7  ;;  %v11718_v12 = vrot.slane %v10743_v62, 1  ;;  %v3822_v29 = vmax.f32 %v3814_v17, 0.0  ;;  %v3812_v49 = vadd.f32 %v10558_v40, %v3797_v14 }
 0x5e4   : > { %v3921_v60 = vsel %vm9681_vm3, %v10740_v22, 0.0  ;;  %v3833_v55 = vmul.f32 %v10565_v27, %v10743_v62  ;;  %v10764_v11 = vmul.f32 %v10568_v57, %v10743_v62  ;;  %v10768_v9 = vmul.f32 %v10571_v56, %v10743_v62  ;;  %vm12006_vm3 = vmmov %vm11998_vm9 }
 0x5e5   : > { %v12001_v40 = vrot.slane %v10605_v5, 7  ;;  %v3858_v31 = vrot.slane %v3822_v29, 7  ;;  %v3910_v7 = vrot.slane %v3822_v29, 1  ;;  %v10780_v17 = vsel %vm11998_vm9, %v12003_v59, %v11718_v12  ;;  %vm12007_vm9 = vmmov %vm12006_vm3 }
 0x5e6   : > { %12000 = vst [vmem:[#allocation119_spill] sm:$0xff] %v10768_v9  ;;  %v10783_v14 = vadd.f32 %v10648_v4, %v3963_v0  ;;  %v3836_v37 = vmul.f32 %v10565_v27, %v3822_v29  ;;  %v3820_v35 = vmax.f32 %v3812_v49, 0.0  ;;  %v10787_v41 = vmul.f32 %v10583_v19, %v3921_v60 }
 0x5e7   : > { %v10773_v42 = vsel %vm11983_vm14, %v12001_v40, %v3852_v45  ;;  %v10790_v40 = vadd.f32 %v10630_v46, %v3942_v58  ;;  %v3979_v13 = vmul.f32 %v10571_v56, %v3822_v29  ;;  %v3859_v47 = vsel %vm11983_vm14, %v3856_v36, %v3858_v31 }
 0x5e8   : > { %12002 = vst [vmem:[#allocation120_spill] sm:$0xff] %v10773_v42  ;;  %12004 = vst [vmem:[#allocation121_spill] sm:$0xff] %v10787_v41  ;;  %v3920_v5 = vsel %vm12006_vm3, %v3910_v7, 0.0  ;;  %v3873_v4 = vsel %vm9435_vm8, %v10773_v42, 0.0  ;;  %v3854_v0 = vrot.slane %v3820_v35, 7  ;;  %v3906_v59 = vrot.slane %v3820_v35, 1 }
 0x5e9   : > { %12005 = vst [vmem:[#allocation122_spill] sm:$0xff] %v10790_v40  ;;  %v10799_v49 = vsel %vm12007_vm9, %v3908_v33, %v3910_v7  ;;  %v3924_v46 = vsel %vm11992_vm12, %v10780_v17, 0.0  ;;  %v3876_v58 = vsel %vm9564_vm7, %v3859_v47, 0.0  ;;  %v3928_v60 = vsel %vm9947_vm4, %v3920_v5, 0.0  ;;  %vm12009_vm3 = vmmov %vm11983_vm14 }
 0x5ea   : > { %v4047_v12 = vsel %vm12009_vm3, %v3858_v31, 0.0  ;;  %v3993_v22 = vsel %vm9447_vm11, %v10773_v42, 0.0  ;;  %vm12010_vm14 = vmmov %vm12009_vm3  ;;  %v3888_v61 = vmul.f32 %v10574_v38, %v3876_v58  ;;  %v10820_v6 = vsel %vm12012_vm2, %v3906_v59, %v3908_v33 }
 0x5eb   : > { %v10813_v23 = vsel %vm12010_vm14, %v3852_v45, %v3854_v0  ;;  %vm12011_vm9 = vmmov %vm12009_vm3  ;;  %v3834_v39 = vmul.f32 %v10565_v27, %v3820_v35  ;;  %v3926_v27 = vsel %vm9892_vm5, %v10820_v6, 0.0  ;;  %v3940_v40 = vmul.f32 %v10583_v19, %v3928_v60 }
 0x5ec   : > { %v10816_v7 = vsel %vm12011_vm9, %v3854_v0, %v3856_v36  ;;  %v3874_v31 = vsel %vm9447_vm11, %v10813_v23, 0.0  ;;  %v3927_v36 = vsel %vm9869_vm0, %v10799_v49, 0.0  ;;  %v3959_v0 = vmul.f32 %v10568_v57, %v3820_v35 }
 0x5ed   : > { %v3875_v25 = vsel %vm9558_vm15, %v10816_v7, 0.0  ;;  %v3896_v33 = vadd.f32 %v3888_v61, %v3836_v37  ;;  %v3994_v24 = vsel %vm9558_vm15, %v10813_v23, 0.0  ;;  %v3995_v41 = vsel %vm9564_vm7, %v10816_v7, 0.0 }
 0x5ee   : > { %v3887_v58 = vmul.f32 %v10574_v38, %v3875_v25  ;;  %v4024_v57 = vsel %vm9869_vm0, %v10820_v6, 0.0  ;;  %v3886_v61 = vmul.f32 %v10574_v38, %v3874_v31  ;;  %v3939_v37 = vmul.f32 %v10583_v19, %v3927_v36 }
 0x5ef   : > { %v4025_v60 = vsel %vm9947_vm4, %v10799_v49, 0.0  ;;  %v3977_v18 = vmul.f32 %v10571_v56, %v3820_v35  ;;  %v3938_v52 = vmul.f32 %v10583_v19, %v3926_v27  ;;  %v3948_v54 = vadd.f32 %v3940_v40, %v3896_v33 }
 0x5f0   : > { %v3895_v25 = vadd.f32 %v3887_v58, %v3835_v30  ;;  %v4006_v21 = vmul.f32 %v10586_v32, %v3994_v24  ;;  %v4007_v20 = vmul.f32 %v10586_v32, %v3995_v41  ;;  %v4036_v42 = vmul.f32 %v10589_v10, %v4024_v57 }
 0x5f1   : > { %v4054_v30 = vsel %vm9558_vm15, %v3859_v47, 0.0  ;;  %v3968_v31 = vadd.f32 %v3960_v8, %v3948_v54  ;;  %v4037_v36 = vmul.f32 %v10589_v10, %v4025_v60  ;;  %v4055_v29 = vsel %vm9564_vm7, %v4047_v12, 0.0 }
 0x5f2   : > { %v3947_v9 = vadd.f32 %v3939_v37, %v3895_v25  ;;  %v3885_v56 = vmul.f32 %v10574_v38, %v3873_v4  ;;  %v4082_v24 = vsel %vm9869_vm0, %v3920_v5, 0.0  ;;  %v3894_v40 = vadd.f32 %v3886_v61, %v3834_v39  ;;  %v12017_v37 = vld [vmem:[#allocation120_spill] sm:$0xff] }
 0x5f3   : > { %v12015_v41 = vrot.slane %v10743_v62, 1  ;;  %v3988_v44 = vadd.f32 %v10596_v28, %v3968_v31  ;;  %v4066_v47 = vmul.f32 %v10592_v2, %v4054_v30  ;;  %v4022_v39 = vsel %vm9855_vm6, %v10780_v17, 0.0  ;;  %v12020_v31 = vld [vmem:[#allocation115_spill] sm:$0xff] }
 0x5f4   : > { %v3967_v35 = vadd.f32 %v3959_v0, %v3947_v9  ;;  %v3893_v54 = vadd.f32 %v3885_v56, %v3833_v55  ;;  %v3946_v9 = vadd.f32 %v3938_v52, %v3894_v40  ;;  %v4067_v5 = vmul.f32 %v10592_v2, %v4055_v29 }
 0x5f5   : > { %v10868_v58 = vsel %vm12012_vm2, %v12015_v41, %v3906_v59  ;;  %v4015_v62 = vadd.f32 %v4007_v20, %v3988_v44  ;;  %v4093_v28 = vmul.f32 %v10580_v43, %v4082_v24  ;;  %v3936_v4 = vmul.f32 %v10583_v19, %v3924_v46  ;;  %v12023_v41 = vld [vmem:[#allocation97_spill] sm:$0xff] }
 0x5f6   : > { %v3925_v8 = vsel %vm9855_vm6, %v10868_v58, 0.0  ;;  %v3987_v38 = vadd.f32 %v3979_v13, %v3967_v35  ;;  %v3966_v45 = vadd.f32 %v10764_v11, %v3946_v9  ;;  %v4023_v13 = vsel %vm9892_vm5, %v10868_v58, 0.0  ;;  %v12022_v35 = vld [vmem:[#allocation114_spill] sm:$0xff]  ;;  %v12024_v44 = vld [vmem:[#allocation121_spill] sm:$0xff]  ;;  %v12027_v9 = vld [vmem:[#allocation95_spill] sm:$0xff] }
 0x5f7   : > { %v3937_v12 = vmul.f32 %v10583_v19, %v3925_v8  ;;  %v4045_v52 = vadd.f32 %v4037_v36, %v4015_v62  ;;  %v4005_v0 = vmul.f32 %v10586_v32, %v3993_v22  ;;  %v4034_v33 = vmul.f32 %v10589_v10, %v4022_v39  ;;  %v7568_v8 = vld [vmem:[%s12048_s6 + $0x40] ss:$8 sps:$4 sm:$0xff]  }
 0x5f8   : > { %v4014_v55 = vadd.f32 %v4006_v21, %v3987_v38  ;;  %v4052_v20 = vsel %vm9435_vm8, %v10813_v23, 0.0  ;;  %v3986_v21 = vadd.f32 %v10749_v1, %v3966_v45  ;;  %v4053_v11 = vsel %vm9447_vm11, %v10816_v7, 0.0 }
 0x5f9   : > { %v3945_v59 = vadd.f32 %v3937_v12, %v3893_v54  ;;  %v4075_v46 = vadd.f32 %v4067_v5, %v4045_v52  ;;  %v4035_v57 = vmul.f32 %v10589_v10, %v4023_v13  ;;  %v4080_v32 = vsel %vm9855_vm6, %v10820_v6, 0.0  ;;  %v12026_v12 = vld [vmem:[#allocation122_spill] sm:$0xff]  ;;  %v12029_v5 = vld [vmem:[#allocation117_spill] sm:$0xff]  ;;  %v12031_v13 = vld [vmem:[#allocation104_spill] sm:$0xff] }
 0x5fa   : > { %v4044_v27 = vadd.f32 %v4036_v42, %v4014_v55  ;;  %v3944_v22 = vadd.f32 %v3936_v4, %v10709_v26  ;;  %v4013_v42 = vadd.f32 %v4005_v0, %v3986_v21  ;;  %v4065_v63 = vmul.f32 %v10592_v2, %v4053_v11  ;;  %v12030_v55 = vld [vmem:[#allocation101_spill] sm:$0xff]  ;;  %v7589_v0 = vld [vmem:[%s12055_s11 + $0x50] ss:$8 sps:$4 sm:$0xff]  }
 0x5fb   : > { %v3965_v19 = vadd.f32 %v10644_v51, %v3945_v59  ;;  %v4081_v51 = vsel %vm9892_vm5, %v10799_v49, 0.0  ;;  %v4102_v1 = vadd.f32 %v10599_v16, %v4075_v46  ;;  %v4010_v61 = vadd.f32 %v10723_v3, %v10783_v14  ;;  %v12019_v16 = vld [vmem:[#allocation119_spill] sm:$0xff]  ;;  %vm12072_vm5 = vmmov %vm12009_vm3 }
 0x5fc   : > { %v4074_v50 = vadd.f32 %v4066_v47, %v4044_v27  ;;  %v3964_v7 = vadd.f32 %v10614_v34, %v3944_v22  ;;  %v4043_v26 = vadd.f32 %v4035_v57, %v4013_v42  ;;  %v4051_v60 = vsel %vm9280_vm10, %v12017_v37, 0.0  ;;  %v12035_v27 = vld [vmem:[#allocation111_spill] sm:$0xff]  ;;  %v12038_v57 = vld [vmem:[#allocation113_spill] sm:$0xff]  ;;  %v12044_v37 = vld [vmem:[#allocation106_spill] sm:$0xff] }
 0x5fd   : > { %v3985_v23 = vadd.f32 %v3977_v18, %v3965_v19  ;;  %v4064_v48 = vmul.f32 %v10592_v2, %v4052_v20  ;;  %v4092_v49 = vmul.f32 %v10580_v43, %v4081_v51  ;;  %v4040_v36 = vadd.f32 %v12020_v31, %v4010_v61  ;;  %v12036_v19 = vld [vmem:[#allocation92_spill] sm:$0xff]  ;;  %v12039_v22 = vld [vmem:[#allocation103_spill] sm:$0xff]  ;;  %v12046_v18 = vld [vmem:[#allocation94_spill] sm:$0xff] }
 0x5fe   : > { %v4101_v25 = vadd.f32 %v4093_v28, %v4074_v50  ;;  %v3984_v30 = vadd.f32 %v12019_v16, %v3964_v7  ;;  %v4073_v56 = vadd.f32 %v4065_v63, %v4043_v26  ;;  %v4091_v14 = vmul.f32 %v10580_v43, %v4080_v32  ;;  %v12040_v50 = vld [vmem:[#allocation90_spill] sm:$0xff]  ;;  %v12042_v63 = vld [vmem:[#allocation105_spill] sm:$0xff]  ;;  %v12049_v16 = vld [vmem:[#allocation112_spill] sm:$0xff] }
 0x5ff   : > { %v4012_v6 = vadd.f32 %v10693_v53, %v3985_v23  ;;  %v4078_v53 = vsel %vm9748_vm13, %v10780_v17, 0.0  ;;  %v4063_v40 = vmul.f32 %v10592_v2, %v4051_v60  ;;  %v3941_v47 = vadd.f32 %v12024_v44, %v12023_v41  ;;  %v12028_v17 = vld [vmem:[#allocation116_spill] sm:$0xff]  ;;  %v7564_v41 = vld [vmem:[%s12048_s6 + $0x64] ss:$8 sps:$4 sm:$0xff]   ;;  %vm12073_vm13 = vmmov %vm12009_vm3 }
 0x600   : > { %v4114_v34 = vpack.c.bf16 %v4102_v1, %v4101_v25  ;;  %v4011_v24 = vadd.f32 %v12022_v35, %v3984_v30  ;;  %v4100_v15 = vadd.f32 %v4092_v49, %v4073_v56  ;;  %v4079_v38 = vsel %vm11992_vm12, %v10868_v58, 0.0  ;;  %v7561_v35 = vld [vmem:[%s12048_s6 + $0x74] ss:$8 sps:$4 sm:$0xff]  }
 0x601   : > { %v4042_v29 = vadd.f32 %v4034_v33, %v4012_v6  ;;  %v3982_v39 = vadd.f32 %v12027_v9, %v12026_v12  ;;  %v4070_v28 = vadd.f32 %v12029_v5, %v4040_v36  ;;  %v4089_v4 = vmul.f32 %v10580_v43, %v4078_v53  ;;  %v12033_v33 = vld [vmem:[#allocation118_spill] sm:$0xff]  ;;  %v7567_v44 = vld [vmem:[%s12048_s6 + $0x54] ss:$8 sps:$4 sm:$0xff]   ;;  %v7571_v9 = vld [vmem:[%s12048_s6 + $0x30] ss:$8 sps:$4 sm:$0xff]  }
 0x602   : > { %7162 = vmatprep.subr.bf16.mxu1 %v4114_v34  ;;  %v4041_v62 = vadd.f32 %v12028_v17, %v4011_v24  ;;  %v3961_v59 = vadd.f32 %v12030_v55, %v3941_v47  ;;  %v12034_v20 = vsel %vm11990_vm1, %v12033_v33, 0.0  ;;  %vm12037_vm0 = vnez %v12036_v19  ;;  %v12043_v6 = vld [vmem:[#allocation98_spill] sm:$0xff]  ;;  %v7556_v24 = vld [vmem:[#allocation30 + $0x8] sm:$0xff]   ;;  %v7558_v47 = vld [vmem:[#allocation30 + $0x18] sm:$0xff]  }
 0x603   : > { %v4072_v54 = vadd.f32 %v4064_v48, %v4042_v29  ;;  %7163 = vmatpush3.bf16.msra.mxu1 %v4114_v34  ;;  %v4009_v52 = vadd.f32 %v12031_v13, %v3982_v39  ;;  %v4031_v58 = vmul.f32 %v10589_v10, %v12034_v20  ;;  %v4049_v21 = vsel %vm12037_vm0, %v12035_v27, 0.0  ;;  %v7573_v12 = vld [vmem:[%s12048_s6 + $0x34] ss:$8 sps:$4 sm:$0xff]   ;;  %v7576_v39 = vld [vmem:[%s12048_s6 + $0x24] ss:$8 sps:$4 sm:$0xff]  }
 0x604   : > { %v4071_v11 = vadd.f32 %v4063_v40, %v4041_v62  ;;  %v4090_v46 = vmul.f32 %v10580_v43, %v4079_v38  ;;  %v3981_v32 = vadd.f32 %v12038_v57, %v3961_v59  ;;  %vm12041_vm4 = vnez %v12040_v50  ;;  %v7559_v40 = vld [vmem:[%s12048_s6 + $0x70] ss:$8 sps:$4 sm:$0xff]   ;;  %v7574_v17 = vld [vmem:[%s12048_s6 + $0x20] ss:$8 sps:$4 sm:$0xff]   ;;  %v7579_v5 = vld [vmem:[%s12048_s6 + $0x14] ss:$8 sps:$4 sm:$0xff]  }
 0x605   : > { %v4099_v45 = vadd.f32 %v4091_v14, %v4072_v54  ;;  %v4048_v23 = vsel %vm12041_vm4, %v12039_v22, 0.0  ;;  %v4039_v51 = vadd.f32 %v4031_v58, %v4009_v52  ;;  %v4061_v1 = vmul.f32 %v10592_v2, %v4049_v21  ;;  %v7565_v54 = vld [vmem:[%s12048_s6 + $0x50] ss:$8 sps:$4 sm:$0xff]   ;;  %v7585_v59 = vld [vmem:[%s12055_s11 + $0x74] ss:$8 sps:$4 sm:$0xff]  }
 0x606   : > { %v4077_v7 = vsel %vm11990_vm1, %v12042_v63, 0.0  ;;  %v4097_v61 = vadd.f32 %v4089_v4, %v4070_v28  ;;  %v4098_v25 = vadd.f32 %v4090_v46, %v4071_v11  ;;  %v4008_v26 = vadd.f32 %v12043_v6, %v3981_v32  ;;  %v7577_v62 = vld [vmem:[%s12048_s6 + $0x10] ss:$8 sps:$4 sm:$0xff]   ;;  %v7580_v28 = vld [vmem:[%s12048_s6] ss:$8 sps:$4 sm:$0xff]   ;;  %4884 = vmatprep.subr.bf16.mxu0 %v7585_v59  ;;  %vm12074_vm1 = vmmov %vm12009_vm3 }
 0x607   : > { %v4113_v42 = vpack.c.bf16 %v4100_v15, %v4099_v45  ;;  %vm12045_vm6 = vnez %v12044_v37  ;;  %v4069_v49 = vadd.f32 %v4061_v1, %v4039_v51  ;;  %v4060_v34 = vmul.f32 %v10592_v2, %v4048_v23  ;;  %v7557_v2 = vld [vmem:[#allocation30 + $0x10] sm:$0xff]   ;;  %v7583_v55 = vld [vmem:[%s12054_s0 + $0x70] ss:$8 sps:$4 sm:$0xff]   ;;  %v7591_v52 = vld [vmem:[%s12055_s11 + $0x54] ss:$8 sps:$4 sm:$0xff]   ;;  %s6162_s0 = scalar_lea.sflag [#allocation5], %s1297_s22 }
 0x608   : > { %v12047_v60 = vsel %vm12045_vm6, %v12046_v18, 0.0  ;;  %v4076_v30 = vsel %vm12045_vm6, %v12049_v16, 0.0  ;;  %v4112_v31 = vpack.c.bf16 %v4098_v25, %v4097_v61  ;;  %v4088_v29 = vmul.f32 %v10580_v43, %v4077_v7  ;;  %v7570_v15 = vld [vmem:[%s12048_s6 + $0x44] ss:$8 sps:$4 sm:$0xff]   ;;  %4885 = vmatpush1.bf16.msra.mxu0 %v7583_v55  ;;  %v7586_v13 = vld [vmem:[%s12055_s11 + $0x60] ss:$8 sps:$4 sm:$0xff]   ;;  %vm12075_vm12 = vmmov %vm12074_vm1 }
 0x609   : > { %v4030_v48 = vmul.f32 %v10589_v10, %v12047_v60  ;;  %7164 = vmatprep.subr.bf16.mxu1 %v4113_v42  ;;  %v4087_v10 = vmul.f32 %v10580_v43, %v4076_v30  ;;  %vm12050_vm10 = vcmask 523264   ;;  %v7562_v43 = vld [vmem:[%s12048_s6 + $0x60] ss:$8 sps:$4 sm:$0xff]   ;;  %v12053_v38 = vmov 0   ;;  %v7582_v4 = vld [vmem:[%s12048_s6 + $0x4] ss:$8 sps:$4 sm:$0xff]   ;;  %vm12081_vm4 = vmmov %vm12074_vm1 }
 0x60a   : > { %7165 = vmatpush3.bf16.msra.mxu1 %v4113_v42  ;;  %v4096_v3 = vadd.f32 %v4088_v29, %v4069_v49  ;;  %vm12051_vm8 = vmmov %vm12050_vm10  ;;  %v7588_v45 = vld [vmem:[%s12055_s11 + $0x64] ss:$8 sps:$4 sm:$0xff]   ;;  %v7592_v23 = vld [vmem:[%s12055_s11 + $0x40] ss:$8 sps:$4 sm:$0xff]   ;;  %vm12076_vm3 = vcmask 1043456  }
 0x60b   : > { %v4038_v36 = vadd.f32 %v4030_v48, %v4008_v26  ;;  %7166 = vmatprep.subr.bf16.mxu1 %v4112_v31  ;;  %vm12052_vm11 = vmmov %vm12051_vm8  ;;  %4886 = vmatprep.subr.bf16.mxu0 %v7588_v45  ;;  %v7594_v42 = vld [vmem:[%s12055_s11 + $0x44] ss:$8 sps:$4 sm:$0xff]   ;;  %v7595_v51 = vld [vmem:[%s12055_s11 + $0x30] ss:$8 sps:$4 sm:$0xff]  }
 0x60c   : > { %4887 = vmatpush1.bf16.msra.mxu0 %v7586_v13  ;;  %v7597_v1 = vld [vmem:[%s12055_s11 + $0x34] ss:$8 sps:$4 sm:$0xff]   ;;  %v7598_v63 = vld [vmem:[%s12055_s11 + $0x20] ss:$8 sps:$4 sm:$0xff]   ;;  %v7600_v7 = vld [vmem:[%s12055_s11 + $0x24] ss:$8 sps:$4 sm:$0xff]  }
 0x60d   : > { %v4068_v56 = vadd.f32 %v4060_v34, %v4038_v36  ;;  %4888 = vmatprep.subr.bf16.mxu0 %v7591_v52  ;;  %v7601_v61 = vld [vmem:[%s12055_s11 + $0x10] ss:$8 sps:$4 sm:$0xff]   ;;  %v7603_v25 = vld [vmem:[%s12055_s11 + $0x14] ss:$8 sps:$4 sm:$0xff]   ;;  %v7604_v6 = vld [vmem:[%s12055_s11] ss:$8 sps:$4 sm:$0xff]  }
 0x60e   : > { %7167 = vmatpush3.bf16.msra.mxu1 %v4112_v31  ;;  %v7606_v26 = vld [vmem:[%s12055_s11 + $0x4] ss:$8 sps:$4 sm:$0xff]   ;;  %v7607_v37 = vld [vmem:[%s12055_s11 + $0xf0] ss:$8 sps:$4 sm:$0xff]   ;;  %v7609_v18 = vld [vmem:[%s12055_s11 + $0xf4] ss:$8 sps:$4 sm:$0xff]  }
 0x60f   : > { %v4095_v53 = vadd.f32 %v4087_v10, %v4068_v56  ;;  %v7610_v60 = vld [vmem:[%s12055_s11 + $0xe0] ss:$8 sps:$4 sm:$0xff]   ;;  %v7612_v48 = vld [vmem:[%s12055_s11 + $0xe4] ss:$8 sps:$4 sm:$0xff]   ;;  %v7613_v49 = vld [vmem:[%s12055_s11 + $0xd0] ss:$8 sps:$4 sm:$0xff]  }
 0x610   : > { %4889 = vmatpush1.bf16.msra.mxu0 %v7589_v0  ;;  %v7615_v16 = vld [vmem:[%s12055_s11 + $0xd4] ss:$8 sps:$4 sm:$0xff]   ;;  %v7618_v30 = vld [vmem:[%s12055_s11 + $0xc4] ss:$8 sps:$4 sm:$0xff]   ;;  %v7616_v31 = vld [vmem:[%s12055_s11 + $0xc0] ss:$8 sps:$4 sm:$0xff]  }
 0x611   : > { %v4111_v14 = vpack.c.bf16 %v4096_v3, %v4095_v53  ;;  %4890 = vmatprep.subr.bf16.mxu0 %v7594_v42  ;;  %v7621_v36 = vld [vmem:[%s12055_s11 + $0xb4] ss:$8 sps:$4 sm:$0xff]   ;;  %v7619_v34 = vld [vmem:[%s12055_s11 + $0xb0] ss:$8 sps:$4 sm:$0xff]   ;;  %v7624_v29 = vld [vmem:[%s12055_s11 + $0xa4] ss:$8 sps:$4 sm:$0xff]  }
 0x612   : > { %v7622_v56 = vld [vmem:[%s12055_s11 + $0xa0] ss:$8 sps:$4 sm:$0xff]   ;;  %v7627_v10 = vld [vmem:[%s12055_s11 + $0x94] ss:$8 sps:$4 sm:$0xff]   ;;  %v7625_v3 = vld [vmem:[%s12055_s11 + $0x90] ss:$8 sps:$4 sm:$0xff]  }
 0x613   : > { %7168 = vmatprep.subr.bf16.mxu1 %v4111_v14  ;;  %v7631_v53 = vld [vmem:[%s12056_s16 + $0xe0] ss:$16 sps:$4 sm:$0xff]   ;;  %vm12077_vm14 = vmmov %vm12076_vm3 }
 0x614   : > { %7169 = vmatpush3.bf16.msra.mxu1 %v4111_v14  ;;  %4891 = vmatpush1.bf16.msra.mxu0 %v7592_v23  ;;  %v7633_v14 = vld [vmem:[%s12056_s16 + $0xe4] ss:$16 sps:$4 sm:$0xff]   ;;  %v4413_v55 = vld [vmem:[#allocation29] sm:$0x3]  ;;  %vm12078_vm9 = vmmov %vm12076_vm3 }
 0x615   : > { %4312 = vmatprep.subr.bf16.mxu1 %v7561_v35  ;;  %4892 = vmatprep.subr.bf16.mxu0 %v7597_v1  ;;  %v7630_v35 = vld [vmem:[%s12055_s11 + $0x84] ss:$8 sps:$4 sm:$0xff]   ;;  %vm12079_vm2 = vmmov %vm12076_vm3 }
 0x616   : > { %v12059_v59 = vld [vmem:[#allocation87_spill] sm:$0xff]  ;;  %vm12080_vm0 = vmmov %vm12079_vm2 }
 0x617   : > { %7171 = vmatmul.mubr.msk.bf16.vlgmr.msra.gmra.mxu1 %vm12050_vm10, %v7556_v24  ;;  %v7639_v24 = vld [vmem:[%s12056_s16 + $0xc4] ss:$16 sps:$4 sm:$0xff]   ;;  %vm12082_vm6 = vmmov %vm12080_vm0 }
 0x618   : > { %7174 = vmatprep.mubr.msk.bf16.mxu1 %vm12051_vm8, %v7557_v2  ;;  %4313 = vmatpush1.bf16.msra.mxu1 %v7559_v40  ;;  %v7637_v2 = vld [vmem:[%s12056_s16 + $0xc0] ss:$16 sps:$4 sm:$0xff]   ;;  %vm12083_vm10 = vmmov %vm12080_vm0 }
 0x619   : > { %4314 = vmatprep.subr.bf16.mxu1 %v7564_v41  ;;  %4893 = vmatpush1.bf16.msra.mxu0 %v7595_v51  ;;  %v7628_v40 = vld [vmem:[%s12055_s11 + $0x80] ss:$8 sps:$4 sm:$0xff]   ;;  %v7636_v41 = vld [vmem:[%s12056_s16 + $0xec] ss:$16 sps:$4 sm:$0xff]   ;;  %vm12084_vm8 = vmmov %vm12074_vm1 }
 0x61a   : > { %4894 = vmatprep.subr.bf16.mxu0 %v7600_v7 }
 0x61c   : > { %4315 = vmatpush1.bf16.msra.mxu1 %v7562_v43  ;;  %v7645_v43 = vld [vmem:[%s12056_s16 + $0xa4] ss:$16 sps:$4 sm:$0xff]  }
 0x61d   : > { %4316 = vmatprep.subr.bf16.mxu1 %v7567_v44  ;;  %4895 = vmatpush1.bf16.msra.mxu0 %v7598_v63  ;;  %v7643_v44 = vld [vmem:[%s12056_s16 + $0xa0] ss:$16 sps:$4 sm:$0xff]  }
 0x61e   : > { %4896 = vmatprep.subr.bf16.mxu0 %v7603_v25  ;;  %v12063_v63 = vld [vmem:[#allocation85_spill] sm:$0xff] }
 0x61f   : > { %7175 = vmatmul.mubr.msk.bf16.gmra.mxu1 %vm12052_vm11, %v7558_v47  ;;  %v7651_v47 = vld [vmem:[%s12056_s16 + $0x84] ss:$16 sps:$4 sm:$0xff]   ;;  %vm12085_vm11 = vmmov %vm12074_vm1 }
 0x620   : > { %4317 = vmatpush1.bf16.msra.mxu1 %v7565_v54  ;;  %4344 = vmatprep.mubr.bf16.mxu1 %v12053_v38  ;;  %v7649_v54 = vld [vmem:[%s12056_s16 + $0x80] ss:$16 sps:$4 sm:$0xff]  }
 0x621   : > { %4318 = vmatprep.subr.bf16.mxu1 %v7570_v15  ;;  %4897 = vmatpush1.bf16.msra.mxu0 %v7601_v61  ;;  %v7657_v15 = vld [vmem:[%s12056_s16 + $0x64] ss:$16 sps:$4 sm:$0xff]   ;;  %v12064_v61 = vld [vmem:[#allocation89_spill] sm:$0xff] }
 0x622   : > { %4898 = vmatprep.subr.bf16.mxu0 %v7606_v26 }
 0x624   : > { %4319 = vmatpush1.bf16.msra.mxu1 %v7568_v8  ;;  %v7655_v8 = vld [vmem:[%s12056_s16 + $0x60] ss:$16 sps:$4 sm:$0xff]  }
 0x625   : > { %4320 = vmatprep.subr.bf16.mxu1 %v7573_v12  ;;  %4899 = vmatpush1.bf16.msra.mxu0 %v7604_v6  ;;  %v7661_v12 = vld [vmem:[%s12056_s16 + $0x40] ss:$16 sps:$4 sm:$0xff]  }
 0x626   : > { %4900 = vmatprep.subr.bf16.mxu0 %v7609_v18 }
 0x628   : > { %4321 = vmatpush1.bf16.msra.mxu1 %v7571_v9  ;;  %v7669_v9 = vld [vmem:[%s12056_s16 + $0x24] ss:$16 sps:$4 sm:$0xff]  }
 0x629   : > { %4322 = vmatprep.subr.bf16.mxu1 %v7576_v39  ;;  %4901 = vmatpush2.bf16.msra.mxu0 %v7607_v37  ;;  %v7667_v39 = vld [vmem:[%s12056_s16 + $0x20] ss:$16 sps:$4 sm:$0xff]  }
 0x62a   : > { %4902 = vmatprep.subr.bf16.mxu0 %v7612_v48 }
 0x62c   : > { %4323 = vmatpush1.bf16.msra.mxu1 %v7574_v17  ;;  %v4385_v17 = vld [vmem:[#allocation27] sm:$0x3] }
 0x62d   : > { %4324 = vmatprep.subr.bf16.mxu1 %v7579_v5  ;;  %4903 = vmatpush2.bf16.msra.mxu0 %v7610_v60  ;;  %v12058_v5 = vld [vmem:[#allocation93_spill] sm:$0xff]  ;;  %v11038_v45 = vrot.slane %v4385_v17, %v12059_v59 }
 0x62e   : > { %4904 = vmatprep.subr.bf16.mxu0 %v7615_v16  ;;  %v11042_v0 = vrot.slane %v4413_v55, %v12058_v5 }
 0x630   : > { %4325 = vmatpush1.bf16.msra.mxu1 %v7577_v62 }
 0x631   : > { %4326 = vmatprep.subr.bf16.mxu1 %v7582_v4  ;;  %4905 = vmatpush2.bf16.msra.mxu0 %v7613_v49 }
 0x632   : > { %4906 = vmatprep.subr.bf16.mxu0 %v7618_v30 }
 0x634   : > { %4327 = vmatpush1.bf16.msra.mxu1 %v7580_v28  ;;  %v11035_v28 = vrot.slane %v4385_v17, %v12058_v5 }
 0x635   : > { %4907 = vmatpush2.bf16.msra.mxu0 %v7616_v31  ;;  %5598 = vmatprep.subr.bf16.mxu1 %v7633_v14 }
 0x636   : > { %4908 = vmatprep.subr.bf16.mxu0 %v7621_v36  ;;  %v12067_v36 = vld [vmem:[#allocation86_spill] sm:$0xff] }
 0x639   : > { %4909 = vmatpush2.bf16.msra.mxu0 %v7619_v34 }
 0x63a   : > { %4910 = vmatprep.subr.bf16.mxu0 %v7624_v29 }
 0x63d   : > { %4911 = vmatpush2.bf16.msra.mxu0 %v7622_v56 }
 0x63e   : > { %4912 = vmatprep.subr.bf16.mxu0 %v7627_v10 }
 0x641   : > { %4913 = vmatpush2.bf16.msra.mxu0 %v7625_v3 }
 0x642   : > { %4914 = vmatprep.subr.bf16.mxu0 %v7630_v35 }
 0x645   : > { %4915 = vmatpush2.bf16.msra.mxu0 %v7628_v40  ;;  %v12070_v40 = vld [vmem:[#allocation88_spill] sm:$0xff] }
 0x646   : > { %5641 = vmatprep.subr.bf16.mxu0 %v7636_v41 }
 0x6d7   : > { %v7172_v33 = vpop.f32.mrf.mxu1 }
 0x6d9   : > { %v4181_v20 = vpop.f32.mrf.mxu1 }
 0x6db   : > { %v7173_v58 = vpop.f32.mrf.mxu1 }
 0x6dc   : > { %v4213_v46 = vpack.c.bf16 %v7173_v58, %v7172_v33  ;;  %v4457_v33 = vld [vmem:[%s12057_s23] sm:$0xff] }
 0x6dd   : > { %v4184_v27 = vpop.f32.mrf.mxu1  ;;  %v11058_v7 = vrot.slane %v4457_v33, %v12063_v63  ;;  %v11061_v25 = vrot.slane %v4457_v33, %v12064_v61  ;;  %v11079_v34 = vrot.slane %v4457_v33, %v12067_v36  ;;  %v11084_v3 = vrot.slane %v4457_v33, %v12059_v59 }
 0x6de   : > { %v4212_v19 = vpack.c.bf16 %v4184_v27, %v4181_v20  ;;  %v11047_v27 = vrot.slane %v4413_v55, %v12059_v59  ;;  %v11099_v41 = vrot.slane %v4457_v33, %v12070_v40  ;;  %v11108_v17 = vrot.slane %v4457_v33, %v12058_v5 }
 0x6df   : > { %v7176_v21 = vpop.f32.mrf.mxu1 }
 0x6e0   : > { %4345 = vmatmul.mubr.bf16.vlgmr.msra.gmra.mxu1 %v4212_v19  ;;  %v4458_v19 = vld [vmem:[%s12057_s23 + $0x8] sm:$0xff] }
 0x6e1   : > { %4354 = vmatprep.mubr.bf16.mxu1 %v12053_v38  ;;  %v4197_v11 = vpop.f32.mrf.mxu1  ;;  %5599 = vmatpush1.bf16.msra.mxu1 %v7631_v53  ;;  %v4480_v16 = vrot.slane %v4458_v19, %v12063_v63  ;;  %v11076_v30 = vrot.slane %v4458_v19, %v12064_v61  ;;  %v11117_v55 = vrot.slane %v4458_v19, %v12058_v5 }
 0x6e2   : > { %5600 = vmatprep.subr.bf16.mxu1 %v7639_v24  ;;  %v11093_v24 = vrot.slane %v4458_v19, %v12067_v36 }
 0x6e3   : > { %v7177_v57 = vpop.f32.mrf.mxu1 }
 0x6e4   : > { %v4215_v50 = vpack.c.bf16 %v7177_v57, %v7176_v21 }
 0x6e5   : > { %v4200_v32 = vpop.f32.mrf.mxu1  ;;  %5601 = vmatpush1.bf16.msra.mxu1 %v7637_v2  ;;  %v11096_v2 = vrot.slane %v4458_v19, %v12059_v59 }
 0x6e6   : > { %v4214_v22 = vpack.c.bf16 %v4200_v32, %v4197_v11  ;;  %5602 = vmatprep.subr.bf16.mxu1 %v7645_v43  ;;  %v12060_v11 = vld [vmem:[#allocation82_spill] sm:$0xff]  ;;  %v12061_v32 = vld [vmem:[#allocation83_spill] sm:$0xff] }
 0x6e8   : > { %4355 = vmatmul.mubr.bf16.gmra.mxu1 %v4213_v46  ;;  %v1442_v46 = vand.u32 3, %v12060_v11 }
 0x6e9   : > { %4364 = vmatprep.mubr.bf16.mxu1 %v12053_v38  ;;  %5603 = vmatpush1.bf16.msra.mxu1 %v7643_v44 }
 0x6ea   : > { %5604 = vmatprep.subr.bf16.mxu1 %v7651_v47  ;;  %vm11070_vm15 = vcmp.ge.s32.totalorder %v1442_v46, 1 }
 0x6ed   : > { %5605 = vmatpush1.bf16.msra.mxu1 %v7649_v54 }
 0x6ee   : > { %5606 = vmatprep.subr.bf16.mxu1 %v7657_v15 }
 0x6f0   : > { %4365 = vmatmul.mubr.bf16.gmra.mxu1 %v4214_v22  ;;  %v1449_v22 = vand.u32 3, %v12061_v32 }
 0x6f1   : > { %4374 = vmatprep.mubr.bf16.mxu1 %v12053_v38  ;;  %v7663_v38 = vld [vmem:[%s12056_s16 + $0x44] ss:$16 sps:$4 sm:$0xff]   ;;  %5607 = vmatpush1.bf16.msra.mxu1 %v7655_v8 }
 0x6f2   : > { %5608 = vmatprep.subr.bf16.mxu1 %v7663_v38  ;;  %vm11088_vm7 = vcmp.ge.s32.totalorder %v1449_v22, 1 }
 0x6f5   : > { %5609 = vmatpush1.bf16.msra.mxu1 %v7661_v12 }
 0x6f6   : > { %5610 = vmatprep.subr.bf16.mxu1 %v7669_v9  ;;  %v12071_v9 = vld [vmem:[#allocation91_spill] sm:$0xff] }
 0x6f8   : > { %4375 = vmatmul.mubr.bf16.gmra.mxu1 %v4215_v50  ;;  %v12062_v50 = vld [vmem:[#allocation84_spill] sm:$0xff] }
 0x6f9   : > { %5611 = vmatpush1.bf16.msra.mxu1 %v7667_v39  ;;  %v4464_v23 = vrot.slane %v4457_v33, %v12062_v50  ;;  %v4468_v1 = vrot.slane %v4458_v19, %v12062_v50  ;;  %v11105_v39 = vrot.slane %v4457_v33, %v12071_v9 }
 0x7a0   : > { %v4346_v62 = vpop.f32.mrf.mxu1 }
 0x7a1   : > { %v4397_v52 = vmul.f32 %v11035_v28, %v4346_v62  ;;  %v11111_v62 = vrot.slane %v4458_v19, %v12070_v40 }
 0x7a2   : > { %v4348_v4 = vpop.f32.mrf.mxu1 }
 0x7a3   : > { %v4398_v58 = vmul.f32 %v11038_v45, %v4348_v4  ;;  %v4425_v51 = vadd.f32 %v11042_v0, %v4397_v52  ;;  %v11114_v4 = vrot.slane %v4458_v19, %v12071_v9 }
 0x7a4   : > { %v4350_v13 = vpop.f32.mrf.mxu1 }
 0x7a5   : > { %v4399_v21 = vmul.f32 %v11035_v28, %v4350_v13  ;;  %v4426_v26 = vadd.f32 %v11047_v27, %v4398_v58  ;;  %v4441_v14 = vmax.f32 %v4425_v51, 0.0 }
 0x7a6   : > { %v4352_v20 = vpop.f32.mrf.mxu1 }
 0x7a7   : > { %v4400_v37 = vmul.f32 %v11038_v45, %v4352_v20  ;;  %v4427_v48 = vadd.f32 %v11042_v0, %v4399_v21  ;;  %v4442_v43 = vmax.f32 %v4426_v26, 0.0 }
 0x7a8   : > { %v4356_v57 = vpop.f32.mrf.mxu1 }
 0x7a9   : > { %v4401_v42 = vmul.f32 %v11035_v28, %v4356_v57  ;;  %v4428_v44 = vadd.f32 %v11047_v27, %v4400_v37  ;;  %v4443_v15 = vmax.f32 %v4427_v48, 0.0  ;;  %v4469_v57 = vmul.f32 %v4464_v23, %v4441_v14 }
 0x7aa   : > { %v4358_v6 = vpop.f32.mrf.mxu1 }
 0x7ab   : > { %v4429_v18 = vadd.f32 %v11042_v0, %v4401_v42  ;;  %v4402_v60 = vmul.f32 %v11038_v45, %v4358_v6  ;;  %v4470_v42 = vmul.f32 %v4468_v1, %v4442_v43  ;;  %v4444_v33 = vmax.f32 %v4428_v44, 0.0 }
 0x7ac   : > { %v4360_v31 = vpop.f32.mrf.mxu1  ;;  %v4471_v6 = vmul.f32 %v4464_v23, %v4443_v15 }
 0x7ad   : > { %v4445_v29 = vmax.f32 %v4429_v18, 0.0  ;;  %v4430_v56 = vadd.f32 %v11047_v27, %v4402_v60  ;;  %v4403_v10 = vmul.f32 %v11035_v28, %v4360_v31  ;;  %v4472_v44 = vmul.f32 %v4468_v1, %v4444_v33 }
 0x7ae   : > { %v4362_v35 = vpop.f32.mrf.mxu1 }
 0x7af   : > { %v4446_v47 = vmax.f32 %v4430_v56, 0.0  ;;  %v4431_v54 = vadd.f32 %v11042_v0, %v4403_v10  ;;  %v4589_v8 = vrot.slane %v4445_v29, 7  ;;  %v4404_v38 = vmul.f32 %v11038_v45, %v4362_v35 }
 0x7b0   : > { %v4366_v12 = vpop.f32.mrf.mxu1  ;;  %v4481_v19 = vmul.f32 %v11058_v7, %v4445_v29 }
 0x7b1   : > { %v4590_v13 = vrot.slane %v4446_v47, 7  ;;  %v4447_v52 = vmax.f32 %v4431_v54, 0.0  ;;  %v4432_v20 = vadd.f32 %v11047_v27, %v4404_v38  ;;  %v4405_v58 = vmul.f32 %v11035_v28, %v4366_v12 }
 0x7b2   : > { %v4368_v21 = vpop.f32.mrf.mxu1  ;;  %v4599_v26 = vsel %vm12072_vm5, 0.0, %v4589_v8  ;;  %v4482_v10 = vmul.f32 %v4480_v16, %v4446_v47  ;;  %vm12086_vm5 = vcmask 1044480  }
 0x7b3   : > { %v4406_v51 = vmul.f32 %v11038_v45, %v4368_v21  ;;  %v4591_v37 = vrot.slane %v4447_v52, 7  ;;  %v4448_v18 = vmax.f32 %v4432_v20, 0.0  ;;  %v4433_v48 = vadd.f32 %v11042_v0, %v4405_v58 }
 0x7b4   : > { %v4370_v60 = vpop.f32.mrf.mxu1  ;;  %v4600_v14 = vsel %vm12073_vm13, 0.0, %v4590_v13  ;;  %v4605_v54 = vsel %vm11070_vm15, %v4599_v26, 0.0  ;;  %v4483_v38 = vmul.f32 %v11058_v7, %v4447_v52  ;;  %v4485_v21 = vadd.f32 %v4481_v19, %v4469_v57  ;;  %vm12087_vm13 = vmmov %vm12080_vm0 }
 0x7b5   : > { %v4434_v31 = vadd.f32 %v11047_v27, %v4406_v51  ;;  %v4407_v56 = vmul.f32 %v11035_v28, %v4370_v60  ;;  %v4592_v35 = vsel %vm12074_vm1, %v4589_v8, %v4591_v37  ;;  %v4593_v43 = vrot.slane %v4448_v18, 7 }
 0x7b6   : > { %v4372_v23 = vpop.f32.mrf.mxu1  ;;  %v4449_v15 = vmax.f32 %v4433_v48, 0.0  ;;  %v4606_v8 = vsel %vm11070_vm15, %v4600_v14, 0.0  ;;  %v4607_v1 = vsel %vm11088_vm7, %v4592_v35, 0.0  ;;  %v4484_v33 = vmul.f32 %v4480_v16, %v4448_v18 }
 0x7b7   : > { %v4435_v29 = vadd.f32 %v11042_v0, %v4407_v56  ;;  %v4594_v12 = vsel %vm12075_vm12, %v4590_v13, %v4593_v43  ;;  %v4450_v20 = vmax.f32 %v4434_v31, 0.0  ;;  %v4408_v47 = vmul.f32 %v11038_v45, %v4372_v23  ;;  %vm12088_vm12 = vmmov %vm12086_vm5 }
 0x7b8   : > { %v4376_v58 = vpop.f32.mrf.mxu1  ;;  %v11140_v51 = vmul.f32 %v11061_v25, %v4605_v54  ;;  %v4486_v26 = vadd.f32 %v4482_v10, %v4470_v42  ;;  %v4608_v52 = vsel %vm11088_vm7, %v4594_v12, 0.0  ;;  %v4497_v57 = vmul.f32 %v11079_v34, %v4449_v15 }
 0x7b9   : > { %v4451_v37 = vmax.f32 %v4435_v29, 0.0  ;;  %v4436_v7 = vadd.f32 %v11047_v27, %v4408_v47  ;;  %v4525_v60 = vrot.slane %v4449_v15, 4  ;;  %v4409_v19 = vmul.f32 %v11035_v28, %v4376_v58  ;;  %v6691_v15 = vld [vmem:[%s12057_s23 + $0x10] ss:$0 sm:$0xff] }
 0x7ba   : > { %v4378_v13 = vpop.f32.mrf.mxu1  ;;  %v11148_v48 = vmul.f32 %v11076_v30, %v4606_v8  ;;  %v4487_v16 = vadd.f32 %v4483_v38, %v4471_v6  ;;  %v11151_v18 = vmul.f32 %v11061_v25, %v4607_v1  ;;  %v4526_v42 = vrot.slane %v4450_v20, 4 }
 0x7bb   : > { %v4488_v56 = vadd.f32 %v4484_v33, %v4472_v44  ;;  %v4452_v10 = vmax.f32 %v4436_v7, 0.0  ;;  %v4437_v14 = vadd.f32 %v11042_v0, %v4409_v19  ;;  %v4410_v35 = vmul.f32 %v11038_v45, %v4378_v13  ;;  %v6692_v33 = vld [vmem:[%s12057_s23 + $0x18] ss:$0 sm:$0xff] }
 0x7bc   : > { %v4380_v31 = vpop.f32.mrf.mxu1  ;;  %v11156_v43 = vmul.f32 %v11076_v30, %v4608_v52  ;;  %v4498_v23 = vmul.f32 %v11093_v24, %v4450_v20  ;;  %v4527_v54 = vrot.slane %v4451_v37, 4  ;;  %v4501_v29 = vadd.f32 %v4497_v57, %v4485_v21 }
 0x7bd   : > { %v4411_v6 = vmul.f32 %v11035_v28, %v4380_v31  ;;  %v4535_v38 = vsel %vm12076_vm3, 0.0, %v4525_v60  ;;  %v4529_v44 = vrot.slane %v4452_v10, 4  ;;  %v11162_v12 = vmax.f32 %v4437_v14, 0.0  ;;  %vm12089_vm3 = vmmov %vm12086_vm5 }
 0x7be   : > { %v4382_v25 = vpop.f32.mrf.mxu1  ;;  %v4536_v47 = vsel %vm12077_vm14, 0.0, %v4526_v42  ;;  %v4438_v58 = vadd.f32 %v11047_v27, %v4410_v35  ;;  %v4499_v8 = vmul.f32 %v11079_v34, %v4451_v37  ;;  %v4500_v1 = vmul.f32 %v11093_v24, %v4452_v10  ;;  %vm12090_vm14 = vmmov %vm12089_vm3 }
 0x7bf   : > { %v4439_v30 = vadd.f32 %v11042_v0, %v4411_v6  ;;  %v4412_v20 = vmul.f32 %v11038_v45, %v4382_v25  ;;  %v4513_v28 = vmul.f32 %v6691_v15, %v11162_v12  ;;  %v4557_v21 = vrot.slane %v11162_v12, 4 }
 0x7c0   : > { %v4502_v7 = vadd.f32 %v4498_v23, %v4486_v26  ;;  %v4528_v13 = vsel %vm12078_vm9, %v4525_v60, %v4527_v54  ;;  %v4530_v52 = vsel %vm12079_vm2, %v4526_v42, %v4529_v44  ;;  %v4454_v57 = vmax.f32 %v4438_v58, 0.0  ;;  %vm12093_vm2 = vmmov %vm12074_vm1 }
 0x7c1   : > { %v4517_v19 = vadd.f32 %v4513_v28, %v4501_v29  ;;  %v4567_v0 = vsel %vm12080_vm0, 0.0, %v4557_v21  ;;  %v4625_v45 = vrot.slane %v11162_v12, 7  ;;  %v4455_v31 = vmax.f32 %v4439_v30, 0.0 }
 0x7c2   : > { %v4545_v34 = vmul.f32 %v11084_v3, %v4535_v38  ;;  %v4546_v24 = vmul.f32 %v11096_v2, %v4536_v47  ;;  %v4514_v37 = vmul.f32 %v6692_v33, %v4454_v57  ;;  %v4440_v10 = vadd.f32 %v11047_v27, %v4412_v20 }
 0x7c3   : > { %v4503_v14 = vadd.f32 %v4499_v8, %v4487_v16  ;;  %v4547_v26 = vmul.f32 %v11084_v3, %v4528_v13  ;;  %v4504_v60 = vadd.f32 %v4500_v1, %v4488_v56  ;;  %v4558_v35 = vrot.slane %v4454_v57, 4 }
 0x7c4   : > { %v4548_v42 = vmul.f32 %v11096_v2, %v4530_v52  ;;  %v4549_v23 = vadd.f32 %v4545_v34, %v4517_v19  ;;  %v4577_v54 = vmul.f32 %v11099_v41, %v4567_v0  ;;  %v4518_v6 = vadd.f32 %v4514_v37, %v4502_v7 }
 0x7c5   : > { %v4635_v25 = vsel %vm12081_vm4, 0.0, %v4625_v45  ;;  %v4568_v29 = vsel %vm12082_vm6, 0.0, %v4558_v35  ;;  %v4626_v38 = vrot.slane %v4454_v57, 7  ;;  %v4515_v44 = vmul.f32 %v6691_v15, %v4455_v31  ;;  %vm12096_vm6 = vmmov %vm12089_vm3 }
 0x7c6   : > { %v4658_v47 = vrot.slane %v11162_v12, 3  ;;  %v4559_v27 = vrot.slane %v4455_v31, 4  ;;  %v4627_v16 = vrot.slane %v4455_v31, 7  ;;  %v4456_v58 = vmax.f32 %v4440_v10, 0.0 }
 0x7c7   : > { %v4519_v3 = vadd.f32 %v4515_v44, %v4503_v14  ;;  %v4660_v56 = vrot.slane %v4455_v31, 3  ;;  %v4550_v30 = vadd.f32 %v4546_v24, %v4518_v6  ;;  %v4578_v2 = vmul.f32 %v11111_v62, %v4568_v29 }
 0x7c8   : > { %v4581_v20 = vadd.f32 %v4577_v54, %v4549_v23  ;;  %v4637_v8 = vsel %vm11070_vm15, %v4635_v25, 0.0  ;;  %v4560_v1 = vsel %vm12083_vm10, %v4557_v21, %v4559_v27  ;;  %v4516_v28 = vmul.f32 %v6692_v33, %v4456_v58  ;;  %vm12097_vm10 = vmmov %vm12074_vm1 }
 0x7c9   : > { %v4659_v7 = vrot.slane %v4454_v57, 3  ;;  %v4551_v13 = vadd.f32 %v4547_v26, %v4519_v3  ;;  %v4579_v15 = vmul.f32 %v11099_v41, %v4560_v1  ;;  %v4636_v12 = vsel %vm12084_vm8, 0.0, %v4626_v38  ;;  %vm12098_vm8 = vmmov %vm12074_vm1 }
 0x7ca   : > { %v4628_v52 = vsel %vm12085_vm11, %v4625_v45, %v4627_v16  ;;  %v4520_v19 = vadd.f32 %v4516_v28, %v4504_v60  ;;  %v4561_v0 = vrot.slane %v4456_v58, 4  ;;  %v4629_v31 = vrot.slane %v4456_v58, 7  ;;  %vm12099_vm11 = vmmov %vm12080_vm0 }
 0x7cb   : > { %v4583_v34 = vadd.f32 %v4579_v15, %v4551_v13  ;;  %v4661_v24 = vsel %vm12086_vm5, %v4658_v47, %v4660_v56  ;;  %v4662_v37 = vrot.slane %v4456_v58, 3  ;;  %v4582_v10 = vadd.f32 %v4578_v2, %v4550_v30  ;;  %v7642_v15 = vld [vmem:[%s12056_s16 + $0xcc] ss:$16 sps:$4 sm:$0xff]   ;;  %vm12100_vm5 = vmmov %vm12089_vm3 }
 0x7cc   : > { %v4552_v14 = vadd.f32 %v4548_v42, %v4520_v19  ;;  %v4562_v21 = vsel %vm12087_vm13, %v4558_v35, %v4561_v0  ;;  %v4630_v33 = vsel %vm12074_vm1, %v4626_v38, %v4629_v31  ;;  %v4638_v41 = vsel %vm11070_vm15, %v4636_v12, 0.0  ;;  %v7646_v12 = vld [vmem:[%s12056_s16 + $0xa8] ss:$16 sps:$4 sm:$0xff]   ;;  %v7660_v0 = vld [vmem:[%s12056_s16 + $0x6c] ss:$16 sps:$4 sm:$0xff]  }
 0x7cd   : > { %v4639_v57 = vsel %vm11088_vm7, %v4628_v52, 0.0  ;;  %v4580_v45 = vmul.f32 %v11111_v62, %v4562_v21  ;;  %v4622_v26 = vadd.f32 %v11148_v48, %v4582_v10  ;;  %v4663_v60 = vsel %vm12088_vm12, %v4659_v7, %v4662_v37  ;;  %v7654_v52 = vld [vmem:[%s12056_s16 + $0x8c] ss:$16 sps:$4 sm:$0xff]   ;;  %v7652_v19 = vld [vmem:[%s12056_s16 + $0x88] ss:$16 sps:$4 sm:$0xff]  }
 0x7ce   : > { %v4668_v23 = vsel %vm12089_vm3, 0.0, %v4658_v47  ;;  %v4640_v42 = vsel %vm11088_vm7, %v4630_v33, 0.0  ;;  %v4669_v35 = vsel %vm12090_vm14, 0.0, %v4659_v7  ;;  %v4621_v54 = vadd.f32 %v11140_v51, %v4581_v20  ;;  %v7634_v7 = vld [vmem:[%s12056_s16 + $0xe8] ss:$16 sps:$4 sm:$0xff]   ;;  %vm12103_vm3 = vmmov %vm12080_vm0 }
 0x7cf   : > { %v4649_v6 = vmul.f32 %v11105_v39, %v4637_v8  ;;  %v4672_v25 = vsel %vm11088_vm7, %v4661_v24, 0.0  ;;  %v4584_v29 = vadd.f32 %v4580_v45, %v4552_v14  ;;  %v4650_v62 = vmul.f32 %v11114_v4, %v4638_v41  ;;  %v7658_v31 = vld [vmem:[%s12056_s16 + $0x68] ss:$16 sps:$4 sm:$0xff]   ;;  %v7672_v37 = vld [vmem:[%s12056_s16 + $0x2c] ss:$16 sps:$4 sm:$0xff]   ;;  %vm12104_vm14 = vmmov %vm12093_vm2 }
 0x7d0   : > { %v4651_v48 = vmul.f32 %v11105_v39, %v4639_v57  ;;  %v4671_v38 = vsel %vm11070_vm15, %v4669_v35, 0.0  ;;  %v4673_v44 = vsel %vm11088_vm7, %v4663_v60, 0.0  ;;  %v4623_v47 = vadd.f32 %v11151_v18, %v4583_v34  ;;  %v7666_v34 = vld [vmem:[%s12056_s16 + $0x4c] ss:$16 sps:$4 sm:$0xff]   ;;  %v7664_v24 = vld [vmem:[%s12056_s16 + $0x48] ss:$16 sps:$4 sm:$0xff]  }
 0x7d1   : > { %v4670_v51 = vsel %vm11070_vm15, %v4668_v23, 0.0  ;;  %v4624_v27 = vadd.f32 %v11156_v43, %v4584_v29  ;;  %v4652_v16 = vmul.f32 %v11114_v4, %v4640_v42  ;;  %v4654_v58 = vadd.f32 %v4650_v62, %v4622_v26  ;;  %v7670_v10 = vld [vmem:[%s12056_s16 + $0x28] ss:$16 sps:$4 sm:$0xff]   ;;  %v7673_v14 = vld [vmem:[%s12056_s16] ss:$16 sps:$4 sm:$0xff]  }
 0x7d2   : > { %v4653_v3 = vadd.f32 %v4649_v6, %v4621_v54  ;;  %v4655_v39 = vadd.f32 %v4651_v48, %v4623_v47  ;;  %v4684_v56 = vmul.f32 %v11108_v17, %v4672_v25  ;;  %v4683_v2 = vmul.f32 %v11117_v55, %v4671_v38  ;;  %v7675_v21 = vld [vmem:[%s12056_s16 + $0x4] ss:$16 sps:$4 sm:$0xff]   ;;  %v7676_v33 = vld [vmem:[%s12056_s16 + $0x8] ss:$16 sps:$4 sm:$0xff]   ;;  %v7678_v41 = vld [vmem:[%s12056_s16 + $0xc] ss:$16 sps:$4 sm:$0xff]  }
 0x7d3   : > { %v4656_v30 = vadd.f32 %v4652_v16, %v4624_v27  ;;  %v4685_v18 = vmul.f32 %v11117_v55, %v4673_v44  ;;  %v4682_v20 = vmul.f32 %v11108_v17, %v4670_v51  ;;  %v7640_v55 = vld [vmem:[%s12056_s16 + $0xc8] ss:$16 sps:$4 sm:$0xff]   ;;  %v7648_v17 = vld [vmem:[%s12056_s16 + $0xac] ss:$16 sps:$4 sm:$0xff]   ;;  %5612 = vmatprep.subr.bf16.mxu1 %v7675_v21  ;;  %v7679_v57 = vld [vmem:[%s12056_s16 + $0x1e0] ss:$16 sps:$4 sm:$0xff]  }
 0x7d4   : > { %v4688_v8 = vadd.f32 %v4684_v56, %v4655_v39  ;;  %v4687_v43 = vadd.f32 %v4683_v2, %v4654_v58  ;;  %5613 = vmatpush1.bf16.msra.mxu1 %v7673_v14  ;;  %v7681_v45 = vld [vmem:[%s12056_s16 + $0x1e4] ss:$16 sps:$4 sm:$0xff]   ;;  %v7682_v26 = vld [vmem:[%s12056_s16 + $0x1e8] ss:$16 sps:$4 sm:$0xff]   ;;  %v7684_v60 = vld [vmem:[%s12056_s16 + $0x1ec] ss:$16 sps:$4 sm:$0xff]  }
 0x7d5   : > { %v4689_v4 = vadd.f32 %v4685_v18, %v4656_v30  ;;  %v4686_v1 = vadd.f32 %v4682_v20, %v4653_v3  ;;  %v7687_v23 = vld [vmem:[%s12056_s16 + $0x1c4] ss:$16 sps:$4 sm:$0xff]   ;;  %5614 = vmatprep.subr.bf16.mxu1 %v7681_v45  ;;  %v7690_v42 = vld [vmem:[%s12056_s16 + $0x1cc] ss:$16 sps:$4 sm:$0xff]   ;;  %v7685_v35 = vld [vmem:[%s12056_s16 + $0x1c0] ss:$16 sps:$4 sm:$0xff]  }
 0x7d6   : > { %v7688_v54 = vld [vmem:[%s12056_s16 + $0x1c8] ss:$16 sps:$4 sm:$0xff]   ;;  %v7693_v6 = vld [vmem:[%s12056_s16 + $0x1a4] ss:$16 sps:$4 sm:$0xff]   ;;  %v7696_v25 = vld [vmem:[%s12056_s16 + $0x1ac] ss:$16 sps:$4 sm:$0xff]  }
 0x7d7   : > { %v4691_v28 = vpack.c.bf16 %v4689_v4, %v4687_v43  ;;  %v4690_v13 = vpack.c.bf16 %v4688_v8, %v4686_v1  ;;  %v7691_v29 = vld [vmem:[%s12056_s16 + $0x1a0] ss:$16 sps:$4 sm:$0xff]   ;;  %v7694_v62 = vld [vmem:[%s12056_s16 + $0x1a8] ss:$16 sps:$4 sm:$0xff]   ;;  %v7699_v48 = vld [vmem:[%s12056_s16 + $0x184] ss:$16 sps:$4 sm:$0xff]  }
 0x7d8   : > { %5615 = vmatpush2.bf16.msra.mxu1 %v7679_v57  ;;  %v7702_v38 = vld [vmem:[%s12056_s16 + $0x18c] ss:$16 sps:$4 sm:$0xff]   ;;  %v7697_v44 = vld [vmem:[%s12056_s16 + $0x180] ss:$16 sps:$4 sm:$0xff]   ;;  %v7700_v47 = vld [vmem:[%s12056_s16 + $0x188] ss:$16 sps:$4 sm:$0xff]  }
 0x7d9   : > { %4916 = vmatprep.mubr.bf16.mxu0 %v4691_v28  ;;  %5616 = vmatprep.subr.bf16.mxu1 %v7687_v23  ;;  %v7705_v51 = vld [vmem:[%s12056_s16 + $0x164] ss:$16 sps:$4 sm:$0xff]   ;;  %v7708_v27 = vld [vmem:[%s12056_s16 + $0x16c] ss:$16 sps:$4 sm:$0xff]   ;;  %v7703_v16 = vld [vmem:[%s12056_s16 + $0x160] ss:$16 sps:$4 sm:$0xff]  }
 0x7da   : > { %4917 = vmatmul.mubr.bf16.vlgmr.msra.gmra.mxu0 %v4690_v13  ;;  %v7706_v58 = vld [vmem:[%s12056_s16 + $0x168] ss:$16 sps:$4 sm:$0xff]   ;;  %v7711_v3 = vld [vmem:[%s12056_s16 + $0x144] ss:$16 sps:$4 sm:$0xff]   ;;  %v7714_v39 = vld [vmem:[%s12056_s16 + $0x14c] ss:$16 sps:$4 sm:$0xff]  }
 0x7db   : > { %5642 = vmatpush1.bf16.msra.mxu0 %v7634_v7  ;;  %v7709_v56 = vld [vmem:[%s12056_s16 + $0x140] ss:$16 sps:$4 sm:$0xff]   ;;  %v7712_v30 = vld [vmem:[%s12056_s16 + $0x148] ss:$16 sps:$4 sm:$0xff]   ;;  %v7717_v2 = vld [vmem:[%s12056_s16 + $0x124] ss:$16 sps:$4 sm:$0xff]  }
 0x7dc   : > { %5643 = vmatprep.subr.bf16.mxu0 %v7642_v15  ;;  %5617 = vmatpush2.bf16.msra.mxu1 %v7685_v35  ;;  %v7720_v18 = vld [vmem:[%s12056_s16 + $0x12c] ss:$16 sps:$4 sm:$0xff]   ;;  %v7715_v20 = vld [vmem:[%s12056_s16 + $0x120] ss:$16 sps:$4 sm:$0xff]   ;;  %v7718_v8 = vld [vmem:[%s12056_s16 + $0x128] ss:$16 sps:$4 sm:$0xff]  }
 0x7dd   : > { %5618 = vmatprep.subr.bf16.mxu1 %v7693_v6  ;;  %v7723_v43 = vld [vmem:[%s12056_s16 + $0x104] ss:$16 sps:$4 sm:$0xff]   ;;  %v7726_v4 = vld [vmem:[%s12056_s16 + $0x10c] ss:$16 sps:$4 sm:$0xff]   ;;  %v7721_v1 = vld [vmem:[%s12056_s16 + $0x100] ss:$16 sps:$4 sm:$0xff]  }
 0x7de   : > { %v7724_v28 = vld [vmem:[%s12056_s16 + $0x108] ss:$16 sps:$4 sm:$0xff]   ;;  %v4927_v13 = vld [vmem:[#allocation32] sm:$0x3]  ;;  %v4943_v15 = vld [vmem:[#allocation33] sm:$0x3] }
 0x7df   : > { %5644 = vmatpush1.bf16.msra.mxu0 %v7640_v55  ;;  %v7727_v7 = vld [vmem:[%s11746_s4 + $0x78] sm:$0xff]   ;;  %v4932_v55 = vrot.slane %v4927_v13, %v12058_v5  ;;  %vm11330_vm9 = vcmp.le.s32.totalorder %v1449_v22, 2  ;;  %vm11348_vm4 = vcmp.le.s32.totalorder %v1442_v46, 2  ;;  %vm5131_vm13 = vcmask 1042432  }
 0x7e0   : > { %5645 = vmatprep.subr.bf16.mxu0 %v7648_v17  ;;  %5619 = vmatpush2.bf16.msra.mxu1 %v7691_v29  ;;  %v4948_v17 = vrot.slane %v4943_v15, %v12058_v5  ;;  %vm12101_vm1 = vcmask 1046528  }
 0x7e1   : > { %5620 = vmatprep.subr.bf16.mxu1 %v7699_v48  ;;  %vm12102_vm12 = vmmov %vm12101_vm1 }
 0x7e3   : > { %5646 = vmatpush1.bf16.msra.mxu0 %v7646_v12  ;;  %v4963_v12 = vld [vmem:[#allocation35] sm:$0xff] }
 0x7e4   : > { %5647 = vmatprep.subr.bf16.mxu0 %v7654_v52  ;;  %5621 = vmatpush2.bf16.msra.mxu1 %v7697_v44  ;;  %v4936_v52 = vrot.slane %v4927_v13, %v12059_v59  ;;  %v11317_v48 = vrot.slane %v4963_v12, %v12067_v36  ;;  %v11323_v44 = vrot.slane %v4963_v12, %v12070_v40 }
 0x7e5   : > { %5622 = vmatprep.subr.bf16.mxu1 %v7705_v51 }
 0x7e7   : > { %5648 = vmatpush1.bf16.msra.mxu0 %v7652_v19  ;;  %v4964_v19 = vld [vmem:[#allocation35 + $0x8] sm:$0xff] }
 0x7e8   : > { %5649 = vmatprep.subr.bf16.mxu0 %v7660_v0  ;;  %5623 = vmatpush2.bf16.msra.mxu1 %v7703_v16  ;;  %v11288_v21 = vrot.slane %v4964_v19, %v12062_v50  ;;  %v11291_v57 = vrot.slane %v4964_v19, %v12064_v61  ;;  %v11294_v45 = vrot.slane %v4964_v19, %v12063_v63 }
 0x7e9   : > { %5624 = vmatprep.subr.bf16.mxu1 %v7711_v3  ;;  %v11300_v23 = vrot.slane %v4964_v19, %v12067_v36  ;;  %v11335_v36 = vrot.slane %v4963_v12, %v12071_v9 }
 0x7eb   : > { %5650 = vmatpush1.bf16.msra.mxu0 %v7658_v31 }
 0x7ec   : > { %5651 = vmatprep.subr.bf16.mxu0 %v7666_v34  ;;  %5625 = vmatpush2.bf16.msra.mxu1 %v7709_v56  ;;  %v4952_v34 = vrot.slane %v4943_v15, %v12059_v59 }
 0x7ed   : > { %5626 = vmatprep.subr.bf16.mxu1 %v7717_v2 }
 0x7ef   : > { %5652 = vmatpush1.bf16.msra.mxu0 %v7664_v24  ;;  %v4970_v24 = vrot.slane %v4963_v12, %v12062_v50  ;;  %v11306_v50 = vrot.slane %v4964_v19, %v12070_v40 }
 0x7f0   : > { %5653 = vmatprep.subr.bf16.mxu0 %v7672_v37  ;;  %5627 = vmatpush2.bf16.msra.mxu1 %v7715_v20  ;;  %v11282_v37 = vrot.slane %v4963_v12, %v12064_v61 }
 0x7f1   : > { %5628 = vmatprep.subr.bf16.mxu1 %v7723_v43 }
 0x7f3   : > { %5654 = vmatpush1.bf16.msra.mxu0 %v7670_v10  ;;  %v11285_v10 = vrot.slane %v4963_v12, %v12059_v59 }
 0x7f4   : > { %5655 = vmatprep.subr.bf16.mxu0 %v7678_v41  ;;  %5629 = vmatpush2.bf16.msra.mxu1 %v7721_v1 }
 0x7f5   : > { %6982 = vmatprep.subr.bf16.mxu1 %v7727_v7 }
 0x7f7   : > { %5656 = vmatpush1.bf16.msra.mxu0 %v7676_v33 }
 0x7f8   : > { %5657 = vmatprep.subr.bf16.mxu0 %v7684_v60  ;;  %v11297_v60 = vrot.slane %v4964_v19, %v12059_v59 }
 0x7fb   : > { %5658 = vmatpush2.bf16.msra.mxu0 %v7682_v26 }
 0x7fc   : > { %5659 = vmatprep.subr.bf16.mxu0 %v7690_v42  ;;  %v11303_v42 = vrot.slane %v4964_v19, %v12058_v5 }
 0x7ff   : > { %5660 = vmatpush2.bf16.msra.mxu0 %v7688_v54 }
 0x800   : > { %5661 = vmatprep.subr.bf16.mxu0 %v7696_v25  ;;  %v11311_v25 = vrot.slane %v4964_v19, %v12071_v9  ;;  %v7730_v9 = vld [vmem:[%s11746_s4 + $0x30] sm:$0xff]  }
 0x803   : > { %5662 = vmatpush2.bf16.msra.mxu0 %v7694_v62  ;;  %v11314_v62 = vrot.slane %v4963_v12, %v12063_v63  ;;  %v7729_v63 = vld [vmem:[%s11746_s4 + $0x70] sm:$0xff]  }
 0x804   : > { %5663 = vmatprep.subr.bf16.mxu0 %v7702_v38  ;;  %v11320_v38 = vrot.slane %v4963_v12, %v12058_v5 }
 0x807   : > { %5664 = vmatpush2.bf16.msra.mxu0 %v7700_v47 }
 0x808   : > { %5665 = vmatprep.subr.bf16.mxu0 %v7708_v27 }
 0x80b   : > { %5666 = vmatpush2.bf16.msra.mxu0 %v7706_v58 }
 0x80c   : > { %5667 = vmatprep.subr.bf16.mxu0 %v7714_v39 }
 0x80f   : > { %5668 = vmatpush2.bf16.msra.mxu0 %v7712_v30 }
 0x810   : > { %5669 = vmatprep.subr.bf16.mxu0 %v7720_v18 }
 0x813   : > { %5670 = vmatpush2.bf16.msra.mxu0 %v7718_v8 }
 0x814   : > { %5671 = vmatprep.subr.bf16.mxu0 %v7726_v4 }
 0x817   : > { %5672 = vmatpush2.bf16.msra.mxu0 %v7724_v28 }
 0x89a   : > { %v4918_v0 = vpop.f32.mrf.mxu0 }
 0x89b   : > { %v4939_v31 = vmul.f32 %v4932_v55, %v4918_v0 }
 0x89c   : > { %v4920_v14 = vpop.f32.mrf.mxu0 }
 0x89d   : > { %v4955_v33 = vadd.f32 %v4948_v17, %v4939_v31  ;;  %v4940_v41 = vmul.f32 %v4936_v52, %v4920_v14 }
 0x89e   : > { %v4922_v26 = vpop.f32.mrf.mxu0 }
 0x89f   : > { %v11308_v35 = vmax.f32 %v4955_v33, 0.0  ;;  %v4956_v54 = vadd.f32 %v4952_v34, %v4940_v41  ;;  %v4941_v6 = vmul.f32 %v4932_v55, %v4922_v26 }
 0x8a0   : > { %v4924_v29 = vpop.f32.mrf.mxu0 }
 0x8a1   : > { %v4975_v47 = vmul.f32 %v4970_v24, %v11308_v35  ;;  %v4983_v51 = vrot.slane %v11308_v35, 7  ;;  %v5051_v27 = vrot.slane %v11308_v35, 4  ;;  %v5015_v16 = vrot.slane %v11308_v35, 1 }
 0x8a2   : > { %v5099_v58 = vrot.slane %v11308_v35, 3  ;;  %v11339_v3 = vmax.f32 %v4956_v54, 0.0  ;;  %v4957_v39 = vadd.f32 %v4948_v17, %v4941_v6  ;;  %v5132_v22 = vrot.slane %v11308_v35, 5 }
 0x8a3   : > { %v4993_v56 = vsel %vm12093_vm2, 0.0, %v4983_v51  ;;  %v5061_v32 = vsel %vm12080_vm0, 0.0, %v5051_v27  ;;  %v4942_v30 = vmul.f32 %v4936_v52, %v4924_v29  ;;  %vm12105_vm2 = vmmov %vm12101_vm1 }
 0x8a4   : > { %v4995_v2 = vsel %vm11070_vm15, %v4993_v56, 0.0  ;;  %v11355_v18 = vmul.f32 %v11285_v10, %v5061_v32  ;;  %v11360_v20 = vsel %vm12096_vm6, 0.0, %v5099_v58  ;;  %v4976_v8 = vmul.f32 %v11288_v21, %v11339_v3  ;;  %vm12106_vm0 = vmmov %vm12101_vm1 }
 0x8a5   : > { %v5007_v43 = vmul.f32 %v11282_v37, %v4995_v2  ;;  %v4984_v46 = vrot.slane %v11339_v3, 7  ;;  %v5018_v4 = vrot.slane %v11339_v3, 1  ;;  %v11367_v1 = vmax.f32 %v4957_v39, 0.0  ;;  %vm12107_vm6 = vmmov %vm12103_vm3 }
 0x8a6   : > { %v4958_v28 = vadd.f32 %v4952_v34, %v4942_v30  ;;  %v5052_v7 = vrot.slane %v11339_v3, 4  ;;  %v5100_v13 = vrot.slane %v11339_v3, 3  ;;  %v5133_v15 = vrot.slane %v11339_v3, 5 }
 0x8a7   : > { %v11372_v55 = vadd.f32 %v5007_v43, %v4975_v47  ;;  %v4994_v17 = vsel %vm12097_vm10, 0.0, %v4984_v46  ;;  %v4977_v12 = vmul.f32 %v4970_v24, %v11367_v1  ;;  %v4985_v52 = vrot.slane %v11367_v1, 7  ;;  %vm12108_vm10 = vmmov %vm12103_vm3 }
 0x8a8   : > { %v5016_v19 = vrot.slane %v11367_v1, 1  ;;  %v5053_v0 = vrot.slane %v11367_v1, 4  ;;  %v5101_v31 = vrot.slane %v11367_v1, 3  ;;  %v11380_v34 = vmax.f32 %v4958_v28, 0.0 }
 0x8a9   : > { %v4986_v14 = vsel %vm12098_vm8, %v4983_v51, %v4985_v52  ;;  %v4996_v33 = vsel %vm11070_vm15, %v4994_v17, 0.0  ;;  %v5062_v41 = vsel %vm12099_vm11, 0.0, %v5052_v7  ;;  %v5110_v26 = vsel %vm12100_vm5, 0.0, %v5100_v13  ;;  %vm12109_vm8 = vmmov %vm12100_vm5 }
 0x8aa   : > { %v4997_v24 = vsel %vm11088_vm7, %v4986_v14, 0.0  ;;  %v5017_v54 = vsel %vm12101_vm1, %v5015_v16, %v5016_v19  ;;  %v5025_v6 = vsel %vm12102_vm12, %v5016_v19, 0.0  ;;  %v11394_v29 = vsel %vm12103_vm3, %v5053_v0, 0.0  ;;  %vm12110_vm11 = vmmov %vm12100_vm5 }
 0x8ab   : > { %v5009_v47 = vmul.f32 %v11282_v37, %v4997_v24  ;;  %v4978_v51 = vmul.f32 %v11288_v21, %v11380_v34  ;;  %v4987_v3 = vrot.slane %v11380_v34, 7  ;;  %v5019_v39 = vrot.slane %v11380_v34, 1  ;;  %vm12111_vm5 = vmmov %vm12103_vm3 }
 0x8ac   : > { %v5008_v56 = vmul.f32 %v11291_v57, %v4996_v33  ;;  %v5031_v16 = vsel %vm11348_vm4, %v5017_v54, 0.0  ;;  %v5033_v32 = vsel %vm11330_vm9, %v5025_v6, 0.0  ;;  %v5055_v30 = vrot.slane %v11380_v34, 4  ;;  %vm12112_vm1 = vmmov %vm12109_vm8 }
 0x8ad   : > { %v5013_v2 = vadd.f32 %v5009_v47, %v4977_v12  ;;  %v4988_v37 = vsel %vm12104_vm14, %v4984_v46, %v4987_v3  ;;  %v5020_v43 = vsel %vm12105_vm2, %v5018_v4, %v5019_v39  ;;  %v5026_v21 = vsel %vm12106_vm0, %v5019_v39, 0.0  ;;  %vm12113_vm12 = vmmov %vm12112_vm1 }
 0x8ae   : > { %v4998_v28 = vsel %vm11088_vm7, %v4988_v37, 0.0  ;;  %v5012_v17 = vadd.f32 %v5008_v56, %v4976_v8  ;;  %v5032_v52 = vsel %vm11348_vm4, %v5020_v43, 0.0  ;;  %v5034_v19 = vsel %vm11330_vm9, %v5026_v21, 0.0 }
 0x8af   : > { %v5010_v14 = vmul.f32 %v11291_v57, %v4998_v28  ;;  %v5044_v12 = vmul.f32 %v11294_v45, %v5032_v52  ;;  %v5046_v46 = vmul.f32 %v11294_v45, %v5034_v19  ;;  %v5056_v4 = vsel %vm12107_vm6, %v5052_v7, %v5055_v30 }
 0x8b0   : > { %v5072_v33 = vmul.f32 %v11297_v60, %v5062_v41  ;;  %v5074_v24 = vmul.f32 %v11297_v60, %v5056_v4  ;;  %v5082_v8 = vsel %vm12108_vm10, %v5055_v30, 0.0  ;;  %v5092_v54 = vmul.f32 %v11300_v23, %v5056_v4 }
 0x8b1   : > { %v5014_v6 = vadd.f32 %v5010_v14, %v4978_v51  ;;  %v5048_v47 = vadd.f32 %v5044_v12, %v5012_v17  ;;  %v5094_v3 = vmul.f32 %v11300_v23, %v5082_v8  ;;  %v5103_v57 = vrot.slane %v11380_v34, 3 }
 0x8b2   : > { %v5112_v39 = vsel %vm11070_vm15, %v5110_v26, 0.0  ;;  %v5136_v45 = vrot.slane %v11380_v34, 5  ;;  %v5143_v7 = vsel %vm5131_vm13, 0.0, %v5133_v15  ;;  %v5043_v41 = vmul.f32 %v11314_v62, %v5031_v16 }
 0x8b3   : > { %v5050_v60 = vadd.f32 %v5046_v46, %v5014_v6  ;;  %v5076_v56 = vadd.f32 %v5072_v33, %v5048_v47  ;;  %v5104_v30 = vsel %vm12109_vm8, %v5100_v13, %v5103_v57  ;;  %v5124_v51 = vmul.f32 %v11303_v42, %v5112_v39  ;;  %v6726_v13 = vld [vmem:[#allocation35 + $0x18] ss:$0 sm:$0xff] }
 0x8b4   : > { %v5114_v23 = vsel %vm11088_vm7, %v5104_v30, 0.0  ;;  %v5137_v37 = vsel %vm5131_vm13, %v5133_v15, %v5136_v45  ;;  %v5145_v26 = vsel %vm11348_vm4, %v5143_v7, 0.0  ;;  %v5167_v34 = vsel %vm12110_vm11, %v5103_v57, 0.0 }
 0x8b5   : > { %v5078_v43 = vadd.f32 %v5074_v24, %v5050_v60  ;;  %v5096_v21 = vadd.f32 %v5092_v54, %v5076_v56  ;;  %v5126_v16 = vmul.f32 %v11303_v42, %v5114_v23  ;;  %v5147_v28 = vsel %vm11330_vm9, %v5137_v37, 0.0 }
 0x8b6   : > { %v5157_v17 = vmul.f32 %v11306_v50, %v5145_v26  ;;  %v5159_v52 = vmul.f32 %v11306_v50, %v5147_v28  ;;  %v5169_v15 = vsel %vm11070_vm15, %v5104_v30, 0.0  ;;  %v5171_v19 = vsel %vm11088_vm7, %v5167_v34, 0.0 }
 0x8b7   : > { %v5098_v14 = vadd.f32 %v5094_v3, %v5078_v43  ;;  %v5128_v12 = vadd.f32 %v5124_v51, %v5096_v21  ;;  %v5181_v46 = vmul.f32 %v11311_v25, %v5169_v15  ;;  %v5183_v42 = vmul.f32 %v11311_v25, %v5171_v19 }
 0x8b8   : > { %v5191_v4 = vsel %vm5131_vm13, %v5136_v45, 0.0  ;;  %v5193_v33 = vsel %vm11348_vm4, %v5137_v37, 0.0  ;;  %v5045_v24 = vmul.f32 %v11314_v62, %v5033_v32  ;;  %v5047_v50 = vadd.f32 %v5043_v41, %v11372_v55 }
 0x8b9   : > { %v5130_v8 = vadd.f32 %v5126_v16, %v5098_v14  ;;  %v5161_v54 = vadd.f32 %v5157_v17, %v5128_v12  ;;  %v5195_v6 = vsel %vm11330_vm9, %v5191_v4, 0.0  ;;  %v5205_v47 = vmul.f32 %v6726_v13, %v5193_v33  ;;  %v6725_v16 = vld [vmem:[#allocation35 + $0x10] ss:$0 sm:$0xff] }
 0x8ba   : > { %v5207_v3 = vmul.f32 %v6726_v13, %v5195_v6  ;;  %v5049_v57 = vadd.f32 %v5045_v24, %v5013_v2  ;;  %v5054_v25 = vsel %vm12111_vm5, %v5051_v27, %v5053_v0  ;;  %v5075_v39 = vadd.f32 %v11355_v18, %v5047_v50  ;;  %v7731_v4 = vld [vmem:[%s11746_s4 + $0x68] sm:$0xff]   ;;  %v7733_v24 = vld [vmem:[%s11746_s4 + $0x60] sm:$0xff]   ;;  %v7737_v6 = vld [vmem:[%s11746_s4 + $0x50] sm:$0xff]  }
 0x8bb   : > { %v5163_v45 = vadd.f32 %v5159_v52, %v5130_v8  ;;  %v5185_v62 = vadd.f32 %v5181_v46, %v5161_v54  ;;  %v5073_v55 = vmul.f32 %v11285_v10, %v5054_v25  ;;  %v5091_v32 = vmul.f32 %v11317_v48, %v5054_v25  ;;  %v7732_v33 = vld [vmem:[%s11746_s4 + $0x28] sm:$0xff]   ;;  %v7734_v50 = vld [vmem:[%s11746_s4 + $0x20] sm:$0xff]   ;;  %v7735_v8 = vld [vmem:[%s11746_s4 + $0x58] sm:$0xff]  }
 0x8bc   : > { %v5093_v7 = vmul.f32 %v11317_v48, %v11394_v29  ;;  %v5102_v2 = vsel %vm12112_vm1, %v5099_v58, %v5101_v31  ;;  %v5111_v27 = vsel %vm11070_vm15, %v11360_v20, 0.0  ;;  %v5134_v18 = vrot.slane %v11367_v1, 5  ;;  %v7736_v54 = vld [vmem:[%s11746_s4 + $0x18] sm:$0xff]   ;;  %v7741_v25 = vld [vmem:[%s11746_s4 + $0x40] sm:$0xff]  }
 0x8bd   : > { %v5187_v0 = vadd.f32 %v5183_v42, %v5163_v45  ;;  %v5209_v41 = vadd.f32 %v5205_v47, %v5185_v62  ;;  %v5077_v10 = vadd.f32 %v5073_v55, %v5049_v57  ;;  %v5095_v60 = vadd.f32 %v5091_v32, %v5075_v39  ;;  %v7738_v47 = vld [vmem:[%s11746_s4 + $0x10] sm:$0xff]   ;;  %v7740_v57 = vld [vmem:[%s11746_s4 + $0x8] sm:$0xff]   ;;  %v7742_v39 = vld [vmem:[%s11746_s4] sm:$0xff]  }
 0x8be   : > { %v5113_v56 = vsel %vm11088_vm7, %v5102_v2, 0.0  ;;  %v5123_v48 = vmul.f32 %v11320_v38, %v5111_v27  ;;  %v5135_v29 = vsel %vm5131_vm13, %v5132_v22, %v5134_v18  ;;  %v5142_v58 = vsel %vm5131_vm13, 0.0, %v5132_v22  ;;  %v7743_v45 = vld [vmem:[%s11746_s4 + $0xf8] sm:$0xff]  }
 0x8bf   : > { %v5211_v20 = vadd.f32 %v5207_v3, %v5187_v0  ;;  %v5097_v30 = vadd.f32 %v5093_v7, %v5077_v10  ;;  %v5125_v51 = vmul.f32 %v11320_v38, %v5113_v56  ;;  %v5144_v23 = vsel %vm11348_vm4, %v5142_v58, 0.0  ;;  %v7739_v3 = vld [vmem:[%s11746_s4 + $0x48] sm:$0xff]   ;;  %v5684_v62 = vld [vmem:[#allocation36] sm:$0xf]  ;;  %v5714_v7 = vld [vmem:[#allocation38] sm:$0xf] }
 0x8c0   : > { %v5127_v37 = vadd.f32 %v5123_v48, %v5095_v60  ;;  %v5146_v26 = vsel %vm11330_vm9, %v5135_v29, 0.0  ;;  %v5156_v34 = vmul.f32 %v11323_v44, %v5144_v23  ;;  %v5166_v43 = vsel %vm12113_vm12, %v5101_v31, 0.0 }
 0x8c1   : > { %v5213_v35 = vpack.c.bf16 %v5211_v20, %v5209_v41  ;;  %v5129_v21 = vadd.f32 %v5125_v51, %v5097_v30  ;;  %v5158_v22 = vmul.f32 %v11323_v44, %v5146_v26  ;;  %v5168_v38 = vsel %vm11070_vm15, %v5102_v2, 0.0 }
 0x8c2   : > { %v5160_v28 = vadd.f32 %v5156_v34, %v5127_v37  ;;  %v5170_v13 = vsel %vm11088_vm7, %v5166_v43, 0.0  ;;  %v5180_v17 = vmul.f32 %v11335_v36, %v5168_v38  ;;  %v5190_v52 = vsel %vm5131_vm13, %v5134_v18, 0.0 }
 0x8c3   : > { %5630 = vmatprep.mubr.bf16.mxu1 %v5213_v35  ;;  %5673 = vmatprep.mubr.bf16.mxu0 %v5213_v35  ;;  %v5162_v1 = vadd.f32 %v5158_v22, %v5129_v21  ;;  %v5182_v31 = vmul.f32 %v11335_v36, %v5170_v13  ;;  %v5192_v49 = vsel %vm11348_vm4, %v5135_v29, 0.0  ;;  %v5194_v44 = vsel %vm11330_vm9, %v5190_v52, 0.0  ;;  %v7728_v36 = vld [vmem:[%s11746_s4 + $0x38] sm:$0xff]  }
 0x8c4   : > { %v5184_v53 = vadd.f32 %v5180_v17, %v5160_v28  ;;  %v5204_v19 = vmul.f32 %v6725_v16, %v5192_v49  ;;  %v5206_v14 = vmul.f32 %v6725_v16, %v5194_v44  ;;  %v5689_v55 = vrot.slane %v5684_v62, %v12058_v5 }
 0x8c5   : > { %v5186_v15 = vadd.f32 %v5182_v31, %v5162_v1  ;;  %v5697_v32 = vrot.slane %v5684_v62, %v12070_v40  ;;  %v5693_v2 = vrot.slane %v5684_v62, %v12059_v59  ;;  %v5701_v27 = vrot.slane %v5684_v62, %v12064_v61 }
 0x8c6   : > { %v5208_v12 = vadd.f32 %v5204_v19, %v5184_v53  ;;  %v5719_v10 = vrot.slane %v5714_v7, %v12058_v5  ;;  %v5727_v56 = vrot.slane %v5714_v7, %v12070_v40  ;;  %v5723_v20 = vrot.slane %v5714_v7, %v12059_v59 }
 0x8c7   : > { %v5210_v46 = vadd.f32 %v5206_v14, %v5186_v15  ;;  %v5731_v51 = vrot.slane %v5714_v7, %v12064_v61 }
 0x8c9   : > { %v5212_v42 = vpack.c.bf16 %v5210_v46, %v5208_v12 }
 0x8cb   : > { %5631 = vmatmul.mubr.bf16.vlgmr.msra.gmra.mxu1 %v5212_v42  ;;  %5674 = vmatmul.mubr.bf16.vlgmr.msra.gmra.mxu0 %v5212_v42 }
 0x8cc   : > { %6983 = vmatpush3.bf16.msra.mxu1 %v7728_v36 }
 0x8cd   : > { %6984 = vmatprep.subr.bf16.mxu1 %v7729_v63 }
 0x8d0   : > { %6985 = vmatpush3.bf16.msra.mxu1 %v7730_v9 }
 0x8d1   : > { %6986 = vmatprep.subr.bf16.mxu1 %v7731_v4 }
 0x8d4   : > { %6987 = vmatpush3.bf16.msra.mxu1 %v7732_v33 }
 0x8d5   : > { %6988 = vmatprep.subr.bf16.mxu1 %v7733_v24 }
 0x8d8   : > { %6989 = vmatpush3.bf16.msra.mxu1 %v7734_v50 }
 0x8d9   : > { %6990 = vmatprep.subr.bf16.mxu1 %v7735_v8 }
 0x8dc   : > { %6991 = vmatpush3.bf16.msra.mxu1 %v7736_v54 }
 0x8dd   : > { %6992 = vmatprep.subr.bf16.mxu1 %v7737_v6 }
 0x8e0   : > { %6993 = vmatpush3.bf16.msra.mxu1 %v7738_v47 }
 0x8e1   : > { %6994 = vmatprep.subr.bf16.mxu1 %v7739_v3  ;;  %v8695_v3 = vmov 1966171168  }
 0x8e4   : > { %6995 = vmatpush3.bf16.msra.mxu1 %v7740_v57  ;;  %v5792_v57 = vunpack.c.l.s4 %v8695_v3 }
 0x8e5   : > { %6996 = vmatprep.subr.bf16.mxu1 %v7741_v25 }
 0x8e8   : > { %6997 = vmatpush3.bf16.msra.mxu1 %v7742_v39 }
 0x8e9   : > { %7004 = vmatprep.subr.bf16.mxu1 %v7743_v45 }
 0x98b   : > { %v5632_v18 = vpop.f32.mrf.mxu1  ;;  %v5675_v0 = vpop.f32.mrf.mxu0 }
 0x98c   : > { %v5706_v41 = vmul.f32 %v5689_v55, %v5632_v18  ;;  %v5708_v60 = vmul.f32 %v5697_v32, %v5675_v0 }
 0x98d   : > { %v5634_v48 = vpop.f32.mrf.mxu1  ;;  %v5677_v29 = vpop.f32.mrf.mxu0 }
 0x98e   : > { %v5707_v58 = vmul.f32 %v5693_v2, %v5634_v48  ;;  %v5709_v30 = vmul.f32 %v5701_v27, %v5677_v29  ;;  %v5736_v26 = vadd.f32 %v5719_v10, %v5706_v41  ;;  %v5738_v34 = vadd.f32 %v5727_v56, %v5708_v60 }
 0x98f   : > { %v5636_v23 = vpop.f32.mrf.mxu1  ;;  %v5679_v37 = vpop.f32.mrf.mxu0 }
 0x990   : > { %v5710_v43 = vmul.f32 %v5689_v55, %v5636_v23  ;;  %v5712_v35 = vmul.f32 %v5697_v32, %v5679_v37  ;;  %v5737_v5 = vadd.f32 %v5723_v20, %v5707_v58  ;;  %v5739_v38 = vadd.f32 %v5731_v51, %v5709_v30 }
 0x991   : > { %v5638_v21 = vpop.f32.mrf.mxu1  ;;  %v5681_v22 = vpop.f32.mrf.mxu0  ;;  %v5744_v59 = vmax.f32 %v5736_v26, 0.0  ;;  %v5746_v1 = vmax.f32 %v5738_v34, 0.0  ;;  %v7745_v26 = vld [vmem:[%s11746_s4 + $0xf0] sm:$0xff]  }
 0x992   : > { %v5711_v16 = vmul.f32 %v5693_v2, %v5638_v21  ;;  %v5713_v40 = vmul.f32 %v5701_v27, %v5681_v22  ;;  %v5740_v28 = vadd.f32 %v5719_v10, %v5710_v43  ;;  %v5742_v13 = vadd.f32 %v5727_v56, %v5712_v35  ;;  %v7746_v21 = vld [vmem:[%s11746_s4 + $0xb0] sm:$0xff]  }
 0x993   : > { %v5745_v49 = vmax.f32 %v5737_v5, 0.0  ;;  %v5747_v44 = vmax.f32 %v5739_v38, 0.0  ;;  %v5793_v2 = vunpack.c.0.s8 %v5792_v57  ;;  %v12114_v22 = vlaneseq  ;;  %v7747_v5 = vld [vmem:[%s11746_s4 + $0xe8] sm:$0xff]  }
 0x994   : > { %v5741_v17 = vadd.f32 %v5723_v20, %v5711_v16  ;;  %v5743_v52 = vadd.f32 %v5731_v51, %v5713_v40  ;;  %v5748_v31 = vmax.f32 %v5740_v28, 0.0  ;;  %v5750_v61 = vmax.f32 %v5742_v13, 0.0  ;;  %v7744_v51 = vld [vmem:[%s11746_s4 + $0xb8] sm:$0xff]   ;;  %v7748_v16 = vld [vmem:[%s11746_s4 + $0xa8] sm:$0xff]   ;;  %v7749_v40 = vld [vmem:[%s11746_s4 + $0xe0] sm:$0xff]  }
 0x995   : > { %v5796_v48 = vsub.s32 %v5793_v2, %v12060_v11  ;;  %vm5816_vm15 = vcmp.lt.s32.totalorder %v12114_v22, 512  ;;  %v7750_v28 = vld [vmem:[%s11746_s4 + $0xa0] sm:$0xff]   ;;  %v7751_v13 = vld [vmem:[%s11746_s4 + $0xd8] sm:$0xff]  }
 0x996   : > { %v5749_v53 = vmax.f32 %v5741_v17, 0.0  ;;  %v5751_v15 = vmax.f32 %v5743_v52, 0.0  ;;  %v5752_v19 = vadd.f32 %v5748_v31, %v5744_v59  ;;  %v5766_v14 = vadd.f32 %v5750_v61, %v5746_v1  ;;  %v7752_v17 = vld [vmem:[%s11746_s4 + $0x98] sm:$0xff]   ;;  %v7753_v52 = vld [vmem:[%s11746_s4 + $0xd0] sm:$0xff]   ;;  %v7755_v1 = vld [vmem:[%s11746_s4 + $0xc8] sm:$0xff]  }
 0x997   : > { %v7754_v59 = vld [vmem:[%s11746_s4 + $0x90] sm:$0xff]   ;;  %v7756_v31 = vld [vmem:[%s11746_s4 + $0x88] sm:$0xff]   ;;  %v7757_v61 = vld [vmem:[%s11746_s4 + $0xc0] sm:$0xff]  }
 0x998   : > { %v5759_v12 = vadd.f32 %v5749_v53, %v5745_v49  ;;  %v5773_v46 = vadd.f32 %v5751_v15, %v5747_v44  ;;  %v5753_v42 = vrot.slane %v5752_v19, 4  ;;  %v5767_v36 = vrot.slane %v5766_v14, 4  ;;  %v7758_v49 = vld [vmem:[%s11746_s4 + $0x80] sm:$0xff]  }
 0x99a   : > { %v5760_v63 = vrot.slane %v5759_v12, 4  ;;  %v5774_v9 = vrot.slane %v5773_v46, 4  ;;  %v5754_v4 = vadd.f32 %v5753_v42, %v5752_v19  ;;  %v5768_v33 = vadd.f32 %v5767_v36, %v5766_v14 }
 0x99c   : > { %v5761_v24 = vadd.f32 %v5760_v63, %v5759_v12  ;;  %v5775_v50 = vadd.f32 %v5774_v9, %v5773_v46  ;;  %v5755_v8 = vrot.slane %v5754_v4, 2  ;;  %v5769_v54 = vrot.slane %v5768_v33, 2  ;;  %v5887_v46 = vld [vmem:[#allocation39] sm:$0x1] }
 0x99e   : > { %v5762_v6 = vrot.slane %v5761_v24, 2  ;;  %v5776_v47 = vrot.slane %v5775_v50, 2  ;;  %v5756_v25 = vadd.f32 %v5755_v8, %v5754_v4  ;;  %v5770_v39 = vadd.f32 %v5769_v54, %v5768_v33 }
 0x9a0   : > { %v5763_v45 = vadd.f32 %v5762_v6, %v5761_v24  ;;  %v5777_v62 = vadd.f32 %v5776_v47, %v5775_v50  ;;  %v5757_v55 = vrot.slane %v5756_v25, 1  ;;  %v5771_v32 = vrot.slane %v5770_v39, 1 }
 0x9a2   : > { %v5764_v7 = vrot.slane %v5763_v45, 1  ;;  %v5778_v27 = vrot.slane %v5777_v62, 1  ;;  %v5758_v18 = vadd.f32 %v5757_v55, %v5756_v25  ;;  %v5772_v0 = vadd.f32 %v5771_v32, %v5770_v39 }
 0x9a4   : > { %v5765_v41 = vadd.f32 %v5764_v7, %v5763_v45  ;;  %v5779_v10 = vadd.f32 %v5778_v27, %v5777_v62  ;;  %v5781_v60 = vmul.f32 0.0625, %v5758_v18  ;;  %v5783_v29 = vmul.f32 0.0625, %v5772_v0 }
 0x9a6   : > { %v5782_v56 = vmul.f32 0.0625, %v5765_v41  ;;  %v5784_v58 = vmul.f32 0.0625, %v5779_v10  ;;  %v5819_v37 = vpack.c.bf16 %v5781_v60, %v5781_v60  ;;  %v5821_v44 = vpack.c.bf16 %v5783_v29, %v5783_v29 }
 0x9a8   : > { %v5789_v20 = vcombine.low %v5781_v60, %v5782_v56  ;;  %v5820_v30 = vpack.c.bf16 %v5782_v56, %v5782_v56  ;;  %v5790_v23 = vcombine.low %v5783_v29, %v5784_v58  ;;  %v5822_v35 = vpack.c.bf16 %v5784_v58, %v5784_v58 }
 0x9aa   : > { %v5797_v34 = vrot.slane %v5789_v20, %v5796_v48  ;;  %6112 = vmatprep.mubr.bf16.mxu1 %v5820_v30  ;;  %v5804_v43 = vrot.slane %v5790_v23, %v5796_v48 }
 0x9ab   : > { %6113 = vmatmul.mubr.bf16.vlgmr.msra.gmra.mxu1 %v5819_v37 }
 0x9ac   : > { %7005 = vmatpush3.bf16.msra.mxu1 %v7744_v51  ;;  %v5805_v11 = vcombine.low %v5797_v34, %v5804_v43  ;;  %6152 = vmatprep.mubr.bf16.mxu1 %v5822_v35 }
 0x9ad   : > { %7006 = vmatprep.subr.bf16.mxu1 %v7745_v26 }
 0x9ae   : > { %v5812_v38 = vrot.slane %v5805_v11, %v5796_v48 }
 0x9b0   : > { %5818 = vst.msk [vmem:[%s1313_s18] sm:$0xf] %vm5816_vm15, %v5812_v38  ;;  %7007 = vmatpush3.bf16.msra.mxu1 %v7746_v21  ;;  %s8696_s18 = smov [#allocation41]  }
 0x9b1   : > { %7008 = vmatprep.subr.bf16.mxu1 %v7747_v5  ;;  %s8522_s4 = sshll.u32 %s8696_s18, 4  ;;  %s8523_s4 = int_to_ptr.vmem [resolvable:$false] %s8522_s4 }
 0x9b2   : > { %s8524_s7 = scalar_lea.vmem %s8523_s4, 32  ;;  %p8525_p2 = scmp.lt.s32.totalorder %s6179_s15, %s8523_s4 }
 0x9b3   : > { %p8526_p4 = scmp.lt.s32.totalorder %s8524_s7, %s8518_s5 }
 0x9b4   : > { %7009 = vmatpush3.bf16.msra.mxu1 %v7748_v16 }
 0x9b5   : > { %7010 = vmatprep.subr.bf16.mxu1 %v7749_v40  ;;  %p8527_p12 = por %p8526_p4, %p8525_p2 }
 0x9b7   : > { %p8528_p7 = pnand %p8527_p12, %p8521_p13 }
 0x9b8   : > { %7011 = vmatpush3.bf16.msra.mxu1 %v7750_v28 }
 0x9b9   : > { %7012 = vmatprep.subr.bf16.mxu1 %v7751_v13 }
 0x9bc   : > { %7013 = vmatpush3.bf16.msra.mxu1 %v7752_v17 }
 0x9bd   : > { %7014 = vmatprep.subr.bf16.mxu1 %v7753_v52 }
 0x9c0   : > { %7015 = vmatpush3.bf16.msra.mxu1 %v7754_v59 }
 0x9c1   : > { %7016 = vmatprep.subr.bf16.mxu1 %v7755_v1 }
 0x9c4   : > { %7017 = vmatpush3.bf16.msra.mxu1 %v7756_v31 }
 0x9c5   : > { %7018 = vmatprep.subr.bf16.mxu1 %v7757_v61 }
 0x9c8   : > { %7019 = vmatpush3.bf16.msra.mxu1 %v7758_v49 }
 0x9cb   : > { %6153 = vmatmul.mubr.bf16.vlgmr.msra.gmra.mxu1 %v5821_v44 }
 0xa6b   : > { %v6998_v53 = vpop.f32.mrf.mxu1 }
 0xa6d   : > { %v6999_v15 = vpop.f32.mrf.mxu1 }
 0xa6e   : > { %v7000_v12 = vadd.f32 %v6999_v15, %v6998_v53 }
 0xa6f   : > { %v7001_v19 = vpop.f32.mrf.mxu1 }
 0xa70   : > { %v6115_v63 = vadd.f32 %v7000_v12, %v5887_v46 }
 0xa71   : > { %v7002_v14 = vpop.f32.mrf.mxu1 }
 0xa8b   : > { %v7020_v42 = vpop.f32.mrf.mxu1 }
 0xa8d   : > { %v7021_v36 = vpop.f32.mrf.mxu1 }
 0xa8e   : > { %v7022_v9 = vadd.f32 %v7021_v36, %v7020_v42 }
 0xa8f   : > { %v7023_v4 = vpop.f32.mrf.mxu1 }
 0xa90   : > { %v6155_v33 = vadd.f32 %v7022_v9, %v6115_v63 }
 0xa91   : > { %v7024_v24 = vpop.f32.mrf.mxu1 }
 0xa92   : > { %6160 = vst [vmem:[%s1298_s26] sm:$0x1] %v6155_v33 }
 0xa93   : > { %8531 = shalt.err (!%p8528_p7)
}
 0xa94   : > { %s8532_s22 = scalar_lea.hbm %s11552_s10, 16  ;;  %s8536_s28 = scalar_lea.hbm %s8860_s3, 32 }
 0xa95   : > { %p8533_p8 = scmp.ne.s32.totalorder %s11552_s10, %s8532_s22  ;;  %p8537_p9 = scmp.lt.s32.totalorder %s11552_s10, %s8860_s3 }
 0xa96   : > { %p8538_p1 = scmp.lt.s32.totalorder %s8536_s28, %s8532_s22 }
 0xa97   : > { %p8534_p11 = pnand %p8533_p8, %p12116_p10 }
 0xa98   : > { %p8539_p5 = por %p8538_p1, %p8537_p9 }
 0xa99   : > { %p8535_p0 = pneg %p8534_p11 }
 0xa9b   : > { %p8540_p6 = pnand %p8539_p5, %p8535_p0 }
 0xa9d   : > { %8543 = shalt.err (!%p8540_p6)
}
 0xa9e   : > { %7274 = dma.vmem_to_hbm [thread:$0]  (%p12116_p10), %s6179_s15, 16, %s11552_s10, %s6162_s0  }
 0xa9f PF: > { %s12117_s4 = sld [smem:[#allocation77_spill]] }
 0xaa0   : > { %s12118_s26 = sld [smem:[#allocation75_spill]] }
 0xaa1   : > { %s12119_s5 = sld [smem:[#allocation81_spill]] }
 0xaa5   : > { %p7401_p3 = scmp.ge.s32.totalorder %s12117_s4, 2 }
 0xaa6   : > { %s6193_s18 = sand.u32 1, %s12118_s26  }
 0xaa7   : > { %p12120_p13 = scmp.ne.s32.totalorder %s12119_s5, 0  ;;  %s6194_s7 = scalar_lea.sflag [#allocation5], %s6193_s18 }
 0xaa9   : > { %p7350_p2 = pnand %p7401_p3, %p12120_p13 }
 0xaab   : > { %p7351_p4 = pneg %p7350_p2 }
 0xaad   : > { %8613 = dma.done.wait (%p7351_p4), %s6194_s7, 16  }
 0xaae   : > { %8615 = vsyncadd (%p7351_p4), %s6194_s7, 4294967280  ;;  %s12121_s2 = sld [smem:[#allocation78_spill]]  ;;  %s12124_s28 = smov %s8622_s1 }
 0xaaf   : > { %s12122_s22 = sld [smem:[#allocation76_spill]] }
 0xab0   : > { %s12123_s0 = sld [smem:[#allocation79_spill]] }
 0xab4   : > { %p89_p12 = scmp.ge.s32.totalorder %s12121_s2, 4  }
 0xab5   : > { %s12125_s1 = smov %s12122_s22 }
 0xab6   :  { %91 = sbr.rel (!%p89_p12) target bundleno = 71 (0x47), region = 320 }
 0xabb   :  { %6205 = vsyncpa [#allocation4], 1 }
 0xabc   :  { %6207 = vsyncpa [#allocation4 + $0x1], 1 }
 0xabd   :  { %6208 = vsyncpa [#allocation7], 1 }
 0xabe   :  { %6209 = vsyncpa [#allocation10], 1 }
 0xabf   :  { %6210 = vsyncpa [#allocation13], 1 }
 0xac0   :  { %6211 = vsyncpa [#allocation16], 1 }
 0xac1   :  { %6212 = vsyncpa [#allocation19], 1 }
 0xac2   :  { %6213 = vsyncpa [#allocation22], 1 }
 0xac3   :  { %6214 = vsyncpa [#allocation25], 1 }
 0xac4   :  { %6215 = vsyncpa [#allocation28], 1 }
 0xac5   :  { %6216 = vsyncpa [#allocation31], 1 }
 0xac6   :  { %6217 = vsyncpa [#allocation34], 1 }
 0xac7   :  { %6218 = vsyncpa [#allocation37], 1 }
 0xac8   :  { %6219 = vsyncpa [#allocation40], 1 }
 0xac9   :  { %6220 = vsyncpa [#allocation5], 1 }
 0xaca   :  { %6222 = vsyncpa [#allocation5 + $0x1], 1 }

</bundles_post_ra>
